<compile_context>
chip_gen: v7x
topology: tpu7x:2x2x1
jax: 0.10.0
libtpu: 0.0.40
codegen_flags: <defaults>
</compile_context>

<pallas_src>
import functools

import numpy as np
import jax
import jax.numpy as jnp
from jax import lax
from jax.experimental import pallas as pl
from jax.experimental.pallas import tpu as pltpu


# ---------------------------------------------------------------------------
# fully fused forward kernel: one grid step = one block of `nb` lane-batched samples
# ---------------------------------------------------------------------------
def _fused_forward_kernel(*refs, nb, nconv, layers, npool):
    # refs = (x_ref, [wf_ref, b_ref, sel_ref] * nconv, w1_ref, b1_ref, w2_ref, b2_ref, o_ref)
    # Activation layout: channels on sublanes, flattened spatial on lanes, samples at a
    # fixed per-sample lane stride S (layers[l][4]).
    x_ref = refs[0]
    conv_refs = refs[1:1 + 3 * nconv]
    w1_ref, b1_ref, w2_ref, b2_ref, o_ref = refs[1 + 3 * nconv:]

    act = x_ref[...]                                       # (1, nb*S0)
    feat_t = None
    for l in range(nconv):
        w_in, ksz_h, ksz_w, p, s, lc, lm = layers[l]
        wf = conv_refs[3 * l][...]                         # (Cout, KH*KW*Cin), read once
        bias = conv_refs[3 * l + 1][...]                   # (Cout, 1), broadcast once
        sel = conv_refs[3 * l + 2][...]                    # constant 0/1 selection matrix

        # im2col: KH*KW shifted lane-slices of the batched slab stacked on sublanes,
        # then ONE MXU matmul with contraction depth KH*KW*Cin for all nb samples.
        lb = (nb - 1) * s + lc
        pieces = [act[:, kh * w_in + kw: kh * w_in + kw + lb]
                  for kh in range(ksz_h) for kw in range(ksz_w)]
        patches = jnp.concatenate(pieces, axis=0) if len(pieces) > 1 else pieces[0]
        y = jnp.dot(wf, patches, preferred_element_type=jnp.float32) + bias   # (Cout, lb)

        # P x P max-pool via shifted slices on the batched slab, then ReLU.
        lmb = (nb - 1) * s + lm
        m = y[:, 0:lmb]
        for dh in range(p):
            for dw in range(p):
                if dh or dw:
                    sh = dh * w_in + dw
                    m = jnp.maximum(m, y[:, sh:sh + lmb])
        m = jnp.maximum(m, 0.0)

        if l + 1 < nconv:
            # Subsample each sample's pooled positions into the next layer's
            # zero-padded slab (per-sample 0/1 matmul with a shared constant RHS).
            nxt = [jnp.dot(m[:, i * s:i * s + lm], sel,
                           preferred_element_type=jnp.float32) for i in range(nb)]
            act = jnp.concatenate(nxt, axis=1) if nb > 1 else nxt[0]
        else:
            # Last layer: gather the pooled positions of ALL samples with one constant
            # 0/1 matmul -> (Cout, npool*nb), columns (pooled-position major, sample
            # minor), then one tiny transpose.  NCHW flatten order is folded into fc1.
            msel = jnp.dot(m, sel, preferred_element_type=jnp.float32)
            feat_t = jnp.transpose(msel)                   # (npool*nb, Cout)

    # fc1 with the flatten folded in:
    #   h[i] = b1 + sum_q feat_t[q*nb + i, :] @ w1[q*Cout:(q+1)*Cout, :]
    w1 = w1_ref[...]                                       # (npool*Cout, D1), q-major rows
    cout = w1.shape[0] // npool
    d1 = w1.shape[1]
    h = jnp.broadcast_to(b1_ref[...], (nb, d1))
    for q in range(npool):
        h = h + jnp.dot(feat_t[q * nb:(q + 1) * nb, :],
                        w1[q * cout:(q + 1) * cout, :],
                        preferred_element_type=jnp.float32)
    h = jnp.maximum(h, 0.0)
    # TODO(synk): training-mode F.dropout / nn.Dropout2d not implemented; eval = identity.
    o_ref[...] = (jnp.dot(h, w2_ref[...], preferred_element_type=jnp.float32)
                  + b2_ref[...]).astype(o_ref.dtype)


# ---------------------------------------------------------------------------
# wrapper: pack weights, build selection matrices, call the fused kernel once
# ---------------------------------------------------------------------------
def _num_tensorcores():
    """Best-effort TensorCore count of the local device (megacore chips -> 2)."""
    try:
        dev = jax.devices()[0]
        nc = getattr(dev, "num_cores", None)
        if nc:
            return max(1, int(nc))
        kind = str(getattr(dev, "device_kind", "")).lower()
        if any(tag in kind for tag in ("v4", "v5p", "v7", "7x")):
            return 2
    except Exception:
        pass
    return 1


def convolution_layer_forward(x, params, *, kernel_size, pool_size):
    del kernel_size  # geometry is derived from the weights themselves
    nsamples, nframes, H, W = x.shape
    N = nsamples * nframes
    P = pool_size

    conv_w = [params["conv1_w"]] + [w for (w, _) in params["conv2"]]
    conv_b = [params["conv1_b"]] + [b for (_, b) in params["conv2"]]
    nconv = len(conv_w)

    # Grid: one "parallel" step per TensorCore (1 on v5e/v6e, 2 on megacore chips).
    g = max(1, min(_num_tensorcores(), N))
    nb = -(-N // g)
    n_pad = g * nb

    # ---- static per-layer geometry + packed weights / pooling selection matrices
    layers = []
    conv_inputs = []
    h_in, w_in = H, W
    cout = 1
    for l in range(nconv):
        w_hwio = jnp.asarray(conv_w[l], jnp.float32)       # (KH, KW, Cin, Cout)
        kh, kw, cin, cout = w_hwio.shape
        ho, wo = h_in - kh + 1, w_in - kw + 1
        hp, wp = ho // P, wo // P
        assert hp >= 1 and wp >= 1, "spatial dims collapse below the pool size"
        # pooled windows must only read valid conv columns (no wrap-around reads)
        assert hp * P <= ho and wp * P <= wo
        s = h_in * w_in + (kh - 1) * w_in + (kw - 1)       # per-sample lane stride (input slab)
        lc = ho * w_in                                     # conv output cols (flat, row width w_in)
        lm = lc - (P - 1) * (w_in + 1)                     # shifted-max output cols
        assert (hp - 1) * P * w_in + (wp - 1) * P < lm

        # (Cout, KH*KW*Cin) with contraction order (kh, kw, cin) — packed once, here.
        wf = w_hwio.reshape(kh * kw * cin, cout).T
        bb = jnp.asarray(conv_b[l], jnp.float32).reshape(cout, 1)

        if l + 1 < nconv:
            # intermediate layer: per-sample 0/1 subsample matrix producing the next
            # layer's zero-padded per-sample slab (stride s_next).
            kh2, kw2 = conv_w[l + 1].shape[0], conv_w[l + 1].shape[1]
            s_next = hp * wp + (kh2 - 1) * wp + (kw2 - 1)
            sel = np.zeros((lm, s_next), np.float32)
            for ph in range(hp):
                for pw in range(wp):
                    sel[ph * P * w_in + pw * P, ph * wp + pw] = 1.0
        else:
            # last layer: gather all samples' pooled positions in one matmul, columns
            # ordered (pooled-position major, sample minor) so fc1 consumes contiguous
            # sublane slices after one tiny transpose.
            npool = hp * wp
            lmb = (nb - 1) * s + lm
            sel = np.zeros((lmb, npool * nb), np.float32)
            for i in range(nb):
                for ph in range(hp):
                    for pw in range(wp):
                        sel[i * s + ph * P * w_in + pw * P, (ph * wp + pw) * nb + i] = 1.0
        conv_inputs += [wf, bb, jnp.asarray(sel)]
        layers.append((w_in, kh, kw, P, s, lc, lm))
        h_in, w_in = hp, wp

    npool = h_in * w_in
    din = cout * npool
    w1 = jnp.asarray(params["fc1_w"], jnp.float32)
    assert w1.shape[0] == din, "fc1 weight does not match flattened conv output"
    d1 = w1.shape[1]
    # fold the NCHW flatten into fc1: rows reordered to (pooled-position major, channel minor)
    w1p = w1.reshape(cout, npool, d1).transpose(1, 0, 2).reshape(npool * cout, d1)
    b1 = jnp.asarray(params["fc1_b"], jnp.float32).reshape(1, -1)
    w2 = jnp.asarray(params["fc2_w"], jnp.float32)
    b2 = jnp.asarray(params["fc2_b"], jnp.float32).reshape(1, -1)
    d2 = w2.shape[1]

    # ---- input layout: (g, 1, nb*S0); sample i of a block occupies lanes
    # [i*S0, i*S0 + H*W) of the single-sublane slab (remaining lanes are pad).
    s0 = layers[0][4]
    x2 = x.reshape(N, H * W).astype(jnp.float32)
    x2 = jnp.pad(x2, ((0, n_pad - N), (0, s0 - H * W)))
    x3 = x2.reshape(g, 1, nb * s0)

    kernel = functools.partial(_fused_forward_kernel, nb=nb, nconv=nconv,
                               layers=tuple(layers), npool=npool)

    in_specs = [pl.BlockSpec((None, 1, nb * s0), lambda gi: (gi, 0, 0))]
    operands = [x3]
    for a in conv_inputs + [w1p, b1, w2, b2]:
        in_specs.append(pl.BlockSpec(a.shape, lambda gi: (0, 0)))  # constant blocks: no re-DMA
        operands.append(a)

    out3 = pl.pallas_call(
        kernel,
        out_shape=jax.ShapeDtypeStruct((g, nb, d2), jnp.float32),
        grid=(g,),
        in_specs=in_specs,
        out_specs=pl.BlockSpec((None, nb, d2), lambda gi: (gi, 0, 0)),
        compiler_params=pltpu.CompilerParams(
            dimension_semantics=("parallel",),
            vmem_limit_bytes=16 * 1024 * 1024,
        ),
    )(*operands)

    out = out3.reshape(g * nb, d2)[:N]
    return out.reshape(nsamples, nframes, d2)


# ---------------------------------------------------------------------------
# helpers: shape math (mirrors the PyTorch staticmethods), params, reference
# ---------------------------------------------------------------------------
def calc_dim(input_dim, kernel_size, pool_size, nfilters):
    res = input_dim
    for _ in range(nfilters + 1):
        res -= kernel_size - 1
        res = res // pool_size
    return res


def calc_shape(input_x, input_y, kernel_size, pool_size, nfilters, nchannels):
    return nchannels * calc_dim(input_x, kernel_size, pool_size, nfilters) * \
        calc_dim(input_y, kernel_size, pool_size, nfilters)


def init_params(key, *, nchannels, nfilters, kernel_size, flat_dim, out_len):
    n_keys = 6 + 2 * nfilters
    ks = jax.random.split(key, n_keys)

    def u(k, shape, fan_in):
        bound = 1.0 / (fan_in ** 0.5)
        return jax.random.uniform(k, shape, jnp.float32, -bound, bound)

    params = {}
    params["conv1_w"] = u(ks[0], (kernel_size, kernel_size, 1, nchannels),
                          kernel_size * kernel_size)
    params["conv1_b"] = u(ks[1], (nchannels,), kernel_size * kernel_size)
    conv2 = []
    for i in range(nfilters):
        fan = nchannels * kernel_size * kernel_size
        cw = u(ks[2 + 2 * i], (kernel_size, kernel_size, nchannels, nchannels), fan)
        cb = u(ks[3 + 2 * i], (nchannels,), fan)
        conv2.append((cw, cb))
    params["conv2"] = conv2
    idx = 2 + 2 * nfilters
    params["fc1_w"] = u(ks[idx], (flat_dim, out_len * 2), flat_dim)
    params["fc1_b"] = u(ks[idx + 1], (out_len * 2,), flat_dim)
    params["fc2_w"] = u(ks[idx + 2], (out_len * 2, out_len), out_len * 2)
    params["fc2_b"] = u(ks[idx + 3], (out_len,), out_len * 2)
    return params


def reference_forward(x, params, *, pool_size):
    # pure-JAX reference (same eval semantics) for correctness checking
    nsamples, nframes, H, W = x.shape
    y = x.reshape(-1, H, W, 1).astype(jnp.float32)

    def conv_block(y, w, b):
        y = lax.conv_general_dilated(y, w, window_strides=(1, 1), padding="VALID",
                                     dimension_numbers=("NHWC", "HWIO", "NHWC"))
        y = y + b.reshape(1, 1, 1, -1)
        y = lax.reduce_window(y, -jnp.inf, lax.max,
                              (1, pool_size, pool_size, 1),
                              (1, pool_size, pool_size, 1), "VALID")
        return jnp.maximum(y, 0.0)

    y = conv_block(y, params["conv1_w"], params["conv1_b"])
    for (cw, cb) in params["conv2"]:
        y = conv_block(y, cw, cb)
    N, hh, ww, c = y.shape
    y = jnp.transpose(y, (0, 3, 1, 2)).reshape(N, c * hh * ww)
    y = jnp.maximum(y @ params["fc1_w"] + params["fc1_b"], 0.0)
    y = y @ params["fc2_w"] + params["fc2_b"]
    return y.reshape(nsamples, nframes, -1)


if __name__ == "__main__":
    # small config consistent with the module's constructor
    nsamples, nframes = 2, 3
    H = W = 20
    nchannels, nfilters, kernel_size, pool_size = 8, 1, 5, 2
    output_embedding_len = 128   # keeps the final store lane-dense (d2 = 128)
    flat_dim = calc_shape(H, W, kernel_size, pool_size, nfilters, nchannels)  # 32

    key = jax.random.PRNGKey(0)
    kx, kp = jax.random.split(key)
    x = jax.random.normal(kx, (nsamples, nframes, H, W), jnp.float32)
    params = init_params(kp, nchannels=nchannels, nfilters=nfilters,
                         kernel_size=kernel_size, flat_dim=flat_dim,
                         out_len=output_embedding_len)

    out = convolution_layer_forward(x, params, kernel_size=kernel_size,
                                    pool_size=pool_size)
    out = jax.block_until_ready(out)

    assert out.shape == (nsamples, nframes, output_embedding_len), out.shape
    ref = reference_forward(x, params, pool_size=pool_size)
    if not jnp.allclose(out, ref, atol=2e-3, rtol=2e-3):
        max_err = float(jnp.max(jnp.abs(out - ref)))
        raise AssertionError(
            f"Pallas kernel output mismatch vs pure-JAX reference (max abs err {max_err})")
    print("KERNEL_OK")
</pallas_src>

<mosaic_0001>
module attributes {stable_mosaic.version = 11 : i64} {
  func.func @_fused_forward_kernel(%arg0: i32, %arg1: memref<1x1x2904xf32, #tpu.memory_space<vmem>>, %arg2: memref<8x25xf32, #tpu.memory_space<vmem>>, %arg3: memref<8x1xf32, #tpu.memory_space<vmem>>, %arg4: memref<299x100xf32, #tpu.memory_space<vmem>>, %arg5: memref<8x200xf32, #tpu.memory_space<vmem>>, %arg6: memref<8x1xf32, #tpu.memory_space<vmem>>, %arg7: memref<523x24xf32, #tpu.memory_space<vmem>>, %arg8: memref<32x256xf32, #tpu.memory_space<vmem>>, %arg9: memref<1x256xf32, #tpu.memory_space<vmem>>, %arg10: memref<256x128xf32, #tpu.memory_space<vmem>>, %arg11: memref<1x128xf32, #tpu.memory_space<vmem>>, %arg12: memref<1x6x128xf32, #tpu.memory_space<vmem>>) attributes {dimension_semantics = [#tpu.dimension_semantics<parallel>], iteration_bounds = array<i64: 1>, scalar_prefetch = 0 : i64, scratch_operands = 0 : i64, tpu.core_type = #tpu.core_type<tc>, window_params = [{transform_indices = @transform_0, window_bounds = array<i64: 1, 1, 2904>}, {pipeline_mode = #tpu.pipeline_mode<synchronous>, transform_indices = @transform_1, window_bounds = array<i64: 8, 25>}, {pipeline_mode = #tpu.pipeline_mode<synchronous>, transform_indices = @transform_2, window_bounds = array<i64: 8, 1>}, {pipeline_mode = #tpu.pipeline_mode<synchronous>, transform_indices = @transform_3, window_bounds = array<i64: 299, 100>}, {pipeline_mode = #tpu.pipeline_mode<synchronous>, transform_indices = @transform_4, window_bounds = array<i64: 8, 200>}, {pipeline_mode = #tpu.pipeline_mode<synchronous>, transform_indices = @transform_5, window_bounds = array<i64: 8, 1>}, {pipeline_mode = #tpu.pipeline_mode<synchronous>, transform_indices = @transform_6, window_bounds = array<i64: 523, 24>}, {pipeline_mode = #tpu.pipeline_mode<synchronous>, transform_indices = @transform_7, window_bounds = array<i64: 32, 256>}, {pipeline_mode = #tpu.pipeline_mode<synchronous>, transform_indices = @transform_8, window_bounds = array<i64: 1, 256>}, {pipeline_mode = #tpu.pipeline_mode<synchronous>, transform_indices = @transform_9, window_bounds = array<i64: 256, 128>}, {pipeline_mode = #tpu.pipeline_mode<synchronous>, transform_indices = @transform_10, window_bounds = array<i64: 1, 128>}, {transform_indices = @transform_11, window_bounds = array<i64: 1, 6, 128>}]} {
    %c0 = arith.constant 0 : index
    %c0_0 = arith.constant 0 : index
    %c0_1 = arith.constant 0 : index
    %0 = vector.load %arg1[%c0, %c0_0, %c0_1] : memref<1x1x2904xf32, #tpu.memory_space<vmem>>, vector<1x1x2904xf32>
    %1 = vector.shape_cast %0 : vector<1x1x2904xf32> to vector<1x2904xf32>
    %c0_2 = arith.constant 0 : index
    %c0_3 = arith.constant 0 : index
    %2 = vector.load %arg2[%c0_2, %c0_3] : memref<8x25xf32, #tpu.memory_space<vmem>>, vector<8x25xf32>
    %c0_4 = arith.constant 0 : index
    %c0_5 = arith.constant 0 : index
    %3 = vector.load %arg3[%c0_4, %c0_5] : memref<8x1xf32, #tpu.memory_space<vmem>>, vector<8x1xf32>
    %c0_6 = arith.constant 0 : index
    %c0_7 = arith.constant 0 : index
    %4 = vector.load %arg4[%c0_6, %c0_7] : memref<299x100xf32, #tpu.memory_space<vmem>>, vector<299x100xf32>
    %5 = vector.extract_strided_slice %1 {offsets = [0, 0], sizes = [1, 2740], strides = [1, 1]} : vector<1x2904xf32> to vector<1x2740xf32>
    %6 = vector.extract_strided_slice %1 {offsets = [0, 1], sizes = [1, 2740], strides = [1, 1]} : vector<1x2904xf32> to vector<1x2740xf32>
    %7 = vector.extract_strided_slice %1 {offsets = [0, 2], sizes = [1, 2740], strides = [1, 1]} : vector<1x2904xf32> to vector<1x2740xf32>
    %8 = vector.extract_strided_slice %1 {offsets = [0, 3], sizes = [1, 2740], strides = [1, 1]} : vector<1x2904xf32> to vector<1x2740xf32>
    %9 = vector.extract_strided_slice %1 {offsets = [0, 4], sizes = [1, 2740], strides = [1, 1]} : vector<1x2904xf32> to vector<1x2740xf32>
    %10 = vector.extract_strided_slice %1 {offsets = [0, 20], sizes = [1, 2740], strides = [1, 1]} : vector<1x2904xf32> to vector<1x2740xf32>
    %11 = vector.extract_strided_slice %1 {offsets = [0, 21], sizes = [1, 2740], strides = [1, 1]} : vector<1x2904xf32> to vector<1x2740xf32>
    %12 = vector.extract_strided_slice %1 {offsets = [0, 22], sizes = [1, 2740], strides = [1, 1]} : vector<1x2904xf32> to vector<1x2740xf32>
    %13 = vector.extract_strided_slice %1 {offsets = [0, 23], sizes = [1, 2740], strides = [1, 1]} : vector<1x2904xf32> to vector<1x2740xf32>
    %14 = vector.extract_strided_slice %1 {offsets = [0, 24], sizes = [1, 2740], strides = [1, 1]} : vector<1x2904xf32> to vector<1x2740xf32>
    %15 = vector.extract_strided_slice %1 {offsets = [0, 40], sizes = [1, 2740], strides = [1, 1]} : vector<1x2904xf32> to vector<1x2740xf32>
    %16 = vector.extract_strided_slice %1 {offsets = [0, 41], sizes = [1, 2740], strides = [1, 1]} : vector<1x2904xf32> to vector<1x2740xf32>
    %17 = vector.extract_strided_slice %1 {offsets = [0, 42], sizes = [1, 2740], strides = [1, 1]} : vector<1x2904xf32> to vector<1x2740xf32>
    %18 = vector.extract_strided_slice %1 {offsets = [0, 43], sizes = [1, 2740], strides = [1, 1]} : vector<1x2904xf32> to vector<1x2740xf32>
    %19 = vector.extract_strided_slice %1 {offsets = [0, 44], sizes = [1, 2740], strides = [1, 1]} : vector<1x2904xf32> to vector<1x2740xf32>
    %20 = vector.extract_strided_slice %1 {offsets = [0, 60], sizes = [1, 2740], strides = [1, 1]} : vector<1x2904xf32> to vector<1x2740xf32>
    %21 = vector.extract_strided_slice %1 {offsets = [0, 61], sizes = [1, 2740], strides = [1, 1]} : vector<1x2904xf32> to vector<1x2740xf32>
    %22 = vector.extract_strided_slice %1 {offsets = [0, 62], sizes = [1, 2740], strides = [1, 1]} : vector<1x2904xf32> to vector<1x2740xf32>
    %23 = vector.extract_strided_slice %1 {offsets = [0, 63], sizes = [1, 2740], strides = [1, 1]} : vector<1x2904xf32> to vector<1x2740xf32>
    %24 = vector.extract_strided_slice %1 {offsets = [0, 64], sizes = [1, 2740], strides = [1, 1]} : vector<1x2904xf32> to vector<1x2740xf32>
    %25 = vector.extract_strided_slice %1 {offsets = [0, 80], sizes = [1, 2740], strides = [1, 1]} : vector<1x2904xf32> to vector<1x2740xf32>
    %26 = vector.extract_strided_slice %1 {offsets = [0, 81], sizes = [1, 2740], strides = [1, 1]} : vector<1x2904xf32> to vector<1x2740xf32>
    %27 = vector.extract_strided_slice %1 {offsets = [0, 82], sizes = [1, 2740], strides = [1, 1]} : vector<1x2904xf32> to vector<1x2740xf32>
    %28 = vector.extract_strided_slice %1 {offsets = [0, 83], sizes = [1, 2740], strides = [1, 1]} : vector<1x2904xf32> to vector<1x2740xf32>
    %29 = vector.extract_strided_slice %1 {offsets = [0, 84], sizes = [1, 2740], strides = [1, 1]} : vector<1x2904xf32> to vector<1x2740xf32>
    %30 = tpu.concatenate %5, %6, %7, %8, %9, %10, %11, %12, %13, %14, %15, %16, %17, %18, %19, %20 in 0 : vector<1x2740xf32>, vector<1x2740xf32>, vector<1x2740xf32>, vector<1x2740xf32>, vector<1x2740xf32>, vector<1x2740xf32>, vector<1x2740xf32>, vector<1x2740xf32>, vector<1x2740xf32>, vector<1x2740xf32>, vector<1x2740xf32>, vector<1x2740xf32>, vector<1x2740xf32>, vector<1x2740xf32>, vector<1x2740xf32>, vector<1x2740xf32> -> vector<16x2740xf32>
    %31 = tpu.concatenate %21, %22, %23, %24, %25, %26, %27, %28, %29 in 0 : vector<1x2740xf32>, vector<1x2740xf32>, vector<1x2740xf32>, vector<1x2740xf32>, vector<1x2740xf32>, vector<1x2740xf32>, vector<1x2740xf32>, vector<1x2740xf32>, vector<1x2740xf32> -> vector<9x2740xf32>
    %32 = tpu.concatenate %30, %31 in 0 : vector<16x2740xf32>, vector<9x2740xf32> -> vector<25x2740xf32>
    %cst = arith.constant dense<0.000000e+00> : vector<8x2740xf32>
    %33 = tpu.matmul %2, %32, %cst {dimension_numbers = #tpu.dot_dimension_numbers<[1], [0], [0], [1], [0, 0, 1, 1], [], []>} : vector<8x25xf32>, vector<25x2740xf32>, vector<8x2740xf32> -> vector<8x2740xf32>
    %34 = vector.broadcast %3 : vector<8x1xf32> to vector<8x2740xf32>
    %35 = arith.addf %33, %34 : vector<8x2740xf32>
    %36 = vector.extract_strided_slice %35 {offsets = [0, 0], sizes = [8, 2719], strides = [1, 1]} : vector<8x2740xf32> to vector<8x2719xf32>
    %37 = vector.extract_strided_slice %35 {offsets = [0, 1], sizes = [8, 2719], strides = [1, 1]} : vector<8x2740xf32> to vector<8x2719xf32>
    %38 = arith.maximumf %36, %37 : vector<8x2719xf32>
    %39 = vector.extract_strided_slice %35 {offsets = [0, 20], sizes = [8, 2719], strides = [1, 1]} : vector<8x2740xf32> to vector<8x2719xf32>
    %40 = arith.maximumf %38, %39 : vector<8x2719xf32>
    %41 = vector.extract_strided_slice %35 {offsets = [0, 21], sizes = [8, 2719], strides = [1, 1]} : vector<8x2740xf32> to vector<8x2719xf32>
    %42 = arith.maximumf %40, %41 : vector<8x2719xf32>
    %cst_8 = arith.constant 0.000000e+00 : f32
    %43 = vector.broadcast %cst_8 : f32 to vector<8x2719xf32>
    %44 = arith.maximumf %42, %43 : vector<8x2719xf32>
    %45 = vector.extract_strided_slice %44 {offsets = [0, 0], sizes = [8, 299], strides = [1, 1]} : vector<8x2719xf32> to vector<8x299xf32>
    %cst_9 = arith.constant dense<0.000000e+00> : vector<8x100xf32>
    %46 = tpu.matmul %45, %4, %cst_9 {dimension_numbers = #tpu.dot_dimension_numbers<[1], [0], [0], [1], [0, 0, 1, 1], [], []>} : vector<8x299xf32>, vector<299x100xf32>, vector<8x100xf32> -> vector<8x100xf32>
    %47 = vector.extract_strided_slice %44 {offsets = [0, 484], sizes = [8, 299], strides = [1, 1]} : vector<8x2719xf32> to vector<8x299xf32>
    %cst_10 = arith.constant dense<0.000000e+00> : vector<8x100xf32>
    %48 = tpu.matmul %47, %4, %cst_10 {dimension_numbers = #tpu.dot_dimension_numbers<[1], [0], [0], [1], [0, 0, 1, 1], [], []>} : vector<8x299xf32>, vector<299x100xf32>, vector<8x100xf32> -> vector<8x100xf32>
    %49 = vector.extract_strided_slice %44 {offsets = [0, 968], sizes = [8, 299], strides = [1, 1]} : vector<8x2719xf32> to vector<8x299xf32>
    %cst_11 = arith.constant dense<0.000000e+00> : vector<8x100xf32>
    %50 = tpu.matmul %49, %4, %cst_11 {dimension_numbers = #tpu.dot_dimension_numbers<[1], [0], [0], [1], [0, 0, 1, 1], [], []>} : vector<8x299xf32>, vector<299x100xf32>, vector<8x100xf32> -> vector<8x100xf32>
    %51 = vector.extract_strided_slice %44 {offsets = [0, 1452], sizes = [8, 299], strides = [1, 1]} : vector<8x2719xf32> to vector<8x299xf32>
    %cst_12 = arith.constant dense<0.000000e+00> : vector<8x100xf32>
    %52 = tpu.matmul %51, %4, %cst_12 {dimension_numbers = #tpu.dot_dimension_numbers<[1], [0], [0], [1], [0, 0, 1, 1], [], []>} : vector<8x299xf32>, vector<299x100xf32>, vector<8x100xf32> -> vector<8x100xf32>
    %53 = vector.extract_strided_slice %44 {offsets = [0, 1936], sizes = [8, 299], strides = [1, 1]} : vector<8x2719xf32> to vector<8x299xf32>
    %cst_13 = arith.constant dense<0.000000e+00> : vector<8x100xf32>
    %54 = tpu.matmul %53, %4, %cst_13 {dimension_numbers = #tpu.dot_dimension_numbers<[1], [0], [0], [1], [0, 0, 1, 1], [], []>} : vector<8x299xf32>, vector<299x100xf32>, vector<8x100xf32> -> vector<8x100xf32>
    %55 = vector.extract_strided_slice %44 {offsets = [0, 2420], sizes = [8, 299], strides = [1, 1]} : vector<8x2719xf32> to vector<8x299xf32>
    %cst_14 = arith.constant dense<0.000000e+00> : vector<8x100xf32>
    %56 = tpu.matmul %55, %4, %cst_14 {dimension_numbers = #tpu.dot_dimension_numbers<[1], [0], [0], [1], [0, 0, 1, 1], [], []>} : vector<8x299xf32>, vector<299x100xf32>, vector<8x100xf32> -> vector<8x100xf32>
    %57 = tpu.concatenate %46, %48, %50, %52, %54, %56 in 1 : vector<8x100xf32>, vector<8x100xf32>, vector<8x100xf32>, vector<8x100xf32>, vector<8x100xf32>, vector<8x100xf32> -> vector<8x600xf32>
    %c0_15 = arith.constant 0 : index
    %c0_16 = arith.constant 0 : index
    %58 = vector.load %arg5[%c0_15, %c0_16] : memref<8x200xf32, #tpu.memory_space<vmem>>, vector<8x200xf32>
    %c0_17 = arith.constant 0 : index
    %c0_18 = arith.constant 0 : index
    %59 = vector.load %arg6[%c0_17, %c0_18] : memref<8x1xf32, #tpu.memory_space<vmem>>, vector<8x1xf32>
    %c0_19 = arith.constant 0 : index
    %c0_20 = arith.constant 0 : index
    %60 = vector.load %arg7[%c0_19, %c0_20] : memref<523x24xf32, #tpu.memory_space<vmem>>, vector<523x24xf32>
    %61 = vector.extract_strided_slice %57 {offsets = [0, 0], sizes = [8, 532], strides = [1, 1]} : vector<8x600xf32> to vector<8x532xf32>
    %62 = vector.extract_strided_slice %57 {offsets = [0, 1], sizes = [8, 532], strides = [1, 1]} : vector<8x600xf32> to vector<8x532xf32>
    %63 = vector.extract_strided_slice %57 {offsets = [0, 2], sizes = [8, 532], strides = [1, 1]} : vector<8x600xf32> to vector<8x532xf32>
    %64 = vector.extract_strided_slice %57 {offsets = [0, 3], sizes = [8, 532], strides = [1, 1]} : vector<8x600xf32> to vector<8x532xf32>
    %65 = vector.extract_strided_slice %57 {offsets = [0, 4], sizes = [8, 532], strides = [1, 1]} : vector<8x600xf32> to vector<8x532xf32>
    %66 = vector.extract_strided_slice %57 {offsets = [0, 8], sizes = [8, 532], strides = [1, 1]} : vector<8x600xf32> to vector<8x532xf32>
    %67 = vector.extract_strided_slice %57 {offsets = [0, 9], sizes = [8, 532], strides = [1, 1]} : vector<8x600xf32> to vector<8x532xf32>
    %68 = vector.extract_strided_slice %57 {offsets = [0, 10], sizes = [8, 532], strides = [1, 1]} : vector<8x600xf32> to vector<8x532xf32>
    %69 = vector.extract_strided_slice %57 {offsets = [0, 11], sizes = [8, 532], strides = [1, 1]} : vector<8x600xf32> to vector<8x532xf32>
    %70 = vector.extract_strided_slice %57 {offsets = [0, 12], sizes = [8, 532], strides = [1, 1]} : vector<8x600xf32> to vector<8x532xf32>
    %71 = vector.extract_strided_slice %57 {offsets = [0, 16], sizes = [8, 532], strides = [1, 1]} : vector<8x600xf32> to vector<8x532xf32>
    %72 = vector.extract_strided_slice %57 {offsets = [0, 17], sizes = [8, 532], strides = [1, 1]} : vector<8x600xf32> to vector<8x532xf32>
    %73 = vector.extract_strided_slice %57 {offsets = [0, 18], sizes = [8, 532], strides = [1, 1]} : vector<8x600xf32> to vector<8x532xf32>
    %74 = vector.extract_strided_slice %57 {offsets = [0, 19], sizes = [8, 532], strides = [1, 1]} : vector<8x600xf32> to vector<8x532xf32>
    %75 = vector.extract_strided_slice %57 {offsets = [0, 20], sizes = [8, 532], strides = [1, 1]} : vector<8x600xf32> to vector<8x532xf32>
    %76 = vector.extract_strided_slice %57 {offsets = [0, 24], sizes = [8, 532], strides = [1, 1]} : vector<8x600xf32> to vector<8x532xf32>
    %77 = vector.extract_strided_slice %57 {offsets = [0, 25], sizes = [8, 532], strides = [1, 1]} : vector<8x600xf32> to vector<8x532xf32>
    %78 = vector.extract_strided_slice %57 {offsets = [0, 26], sizes = [8, 532], strides = [1, 1]} : vector<8x600xf32> to vector<8x532xf32>
    %79 = vector.extract_strided_slice %57 {offsets = [0, 27], sizes = [8, 532], strides = [1, 1]} : vector<8x600xf32> to vector<8x532xf32>
    %80 = vector.extract_strided_slice %57 {offsets = [0, 28], sizes = [8, 532], strides = [1, 1]} : vector<8x600xf32> to vector<8x532xf32>
    %81 = vector.extract_strided_slice %57 {offsets = [0, 32], sizes = [8, 532], strides = [1, 1]} : vector<8x600xf32> to vector<8x532xf32>
    %82 = vector.extract_strided_slice %57 {offsets = [0, 33], sizes = [8, 532], strides = [1, 1]} : vector<8x600xf32> to vector<8x532xf32>
    %83 = vector.extract_strided_slice %57 {offsets = [0, 34], sizes = [8, 532], strides = [1, 1]} : vector<8x600xf32> to vector<8x532xf32>
    %84 = vector.extract_strided_slice %57 {offsets = [0, 35], sizes = [8, 532], strides = [1, 1]} : vector<8x600xf32> to vector<8x532xf32>
    %85 = vector.extract_strided_slice %57 {offsets = [0, 36], sizes = [8, 532], strides = [1, 1]} : vector<8x600xf32> to vector<8x532xf32>
    %86 = tpu.concatenate %61, %62, %63, %64, %65, %66, %67, %68, %69, %70, %71, %72, %73, %74, %75, %76 in 0 : vector<8x532xf32>, vector<8x532xf32>, vector<8x532xf32>, vector<8x532xf32>, vector<8x532xf32>, vector<8x532xf32>, vector<8x532xf32>, vector<8x532xf32>, vector<8x532xf32>, vector<8x532xf32>, vector<8x532xf32>, vector<8x532xf32>, vector<8x532xf32>, vector<8x532xf32>, vector<8x532xf32>, vector<8x532xf32> -> vector<128x532xf32>
    %87 = tpu.concatenate %77, %78, %79, %80, %81, %82, %83, %84, %85 in 0 : vector<8x532xf32>, vector<8x532xf32>, vector<8x532xf32>, vector<8x532xf32>, vector<8x532xf32>, vector<8x532xf32>, vector<8x532xf32>, vector<8x532xf32>, vector<8x532xf32> -> vector<72x532xf32>
    %88 = tpu.concatenate %86, %87 in 0 : vector<128x532xf32>, vector<72x532xf32> -> vector<200x532xf32>
    %cst_21 = arith.constant dense<0.000000e+00> : vector<8x532xf32>
    %89 = tpu.matmul %58, %88, %cst_21 {dimension_numbers = #tpu.dot_dimension_numbers<[1], [0], [0], [1], [0, 0, 1, 1], [], []>} : vector<8x200xf32>, vector<200x532xf32>, vector<8x532xf32> -> vector<8x532xf32>
    %90 = vector.broadcast %59 : vector<8x1xf32> to vector<8x532xf32>
    %91 = arith.addf %89, %90 : vector<8x532xf32>
    %92 = vector.extract_strided_slice %91 {offsets = [0, 0], sizes = [8, 523], strides = [1, 1]} : vector<8x532xf32> to vector<8x523xf32>
    %93 = vector.extract_strided_slice %91 {offsets = [0, 1], sizes = [8, 523], strides = [1, 1]} : vector<8x532xf32> to vector<8x523xf32>
    %94 = arith.maximumf %92, %93 : vector<8x523xf32>
    %95 = vector.extract_strided_slice %91 {offsets = [0, 8], sizes = [8, 523], strides = [1, 1]} : vector<8x532xf32> to vector<8x523xf32>
    %96 = arith.maximumf %94, %95 : vector<8x523xf32>
    %97 = vector.extract_strided_slice %91 {offsets = [0, 9], sizes = [8, 523], strides = [1, 1]} : vector<8x532xf32> to vector<8x523xf32>
    %98 = arith.maximumf %96, %97 : vector<8x523xf32>
    %cst_22 = arith.constant 0.000000e+00 : f32
    %99 = vector.broadcast %cst_22 : f32 to vector<8x523xf32>
    %100 = arith.maximumf %98, %99 : vector<8x523xf32>
    %cst_23 = arith.constant dense<0.000000e+00> : vector<8x24xf32>
    %101 = tpu.matmul %100, %60, %cst_23 {dimension_numbers = #tpu.dot_dimension_numbers<[1], [0], [0], [1], [0, 0, 1, 1], [], []>} : vector<8x523xf32>, vector<523x24xf32>, vector<8x24xf32> -> vector<8x24xf32>
    %102 = tpu.transpose %101, [1, 0] : vector<8x24xf32> -> vector<24x8xf32>
    %c0_24 = arith.constant 0 : index
    %c0_25 = arith.constant 0 : index
    %103 = vector.load %arg8[%c0_24, %c0_25] : memref<32x256xf32, #tpu.memory_space<vmem>>, vector<32x256xf32>
    %c0_26 = arith.constant 0 : index
    %c0_27 = arith.constant 0 : index
    %104 = vector.load %arg9[%c0_26, %c0_27] : memref<1x256xf32, #tpu.memory_space<vmem>>, vector<1x256xf32>
    %105 = vector.shape_cast %104 : vector<1x256xf32> to vector<1x256xf32>
    %106 = vector.broadcast %105 : vector<1x256xf32> to vector<6x256xf32>
    %107 = vector.extract_strided_slice %102 {offsets = [0, 0], sizes = [6, 8], strides = [1, 1]} : vector<24x8xf32> to vector<6x8xf32>
    %108 = vector.extract_strided_slice %103 {offsets = [0, 0], sizes = [8, 256], strides = [1, 1]} : vector<32x256xf32> to vector<8x256xf32>
    %cst_28 = arith.constant dense<0.000000e+00> : vector<6x256xf32>
    %109 = tpu.matmul %107, %108, %cst_28 {dimension_numbers = #tpu.dot_dimension_numbers<[1], [0], [0], [1], [0, 0, 1, 1], [], []>} : vector<6x8xf32>, vector<8x256xf32>, vector<6x256xf32> -> vector<6x256xf32>
    %110 = arith.addf %106, %109 : vector<6x256xf32>
    %111 = vector.extract_strided_slice %102 {offsets = [6, 0], sizes = [6, 8], strides = [1, 1]} : vector<24x8xf32> to vector<6x8xf32>
    %112 = vector.extract_strided_slice %103 {offsets = [8, 0], sizes = [8, 256], strides = [1, 1]} : vector<32x256xf32> to vector<8x256xf32>
    %cst_29 = arith.constant dense<0.000000e+00> : vector<6x256xf32>
    %113 = tpu.matmul %111, %112, %cst_29 {dimension_numbers = #tpu.dot_dimension_numbers<[1], [0], [0], [1], [0, 0, 1, 1], [], []>} : vector<6x8xf32>, vector<8x256xf32>, vector<6x256xf32> -> vector<6x256xf32>
    %114 = arith.addf %110, %113 : vector<6x256xf32>
    %115 = vector.extract_strided_slice %102 {offsets = [12, 0], sizes = [6, 8], strides = [1, 1]} : vector<24x8xf32> to vector<6x8xf32>
    %116 = vector.extract_strided_slice %103 {offsets = [16, 0], sizes = [8, 256], strides = [1, 1]} : vector<32x256xf32> to vector<8x256xf32>
    %cst_30 = arith.constant dense<0.000000e+00> : vector<6x256xf32>
    %117 = tpu.matmul %115, %116, %cst_30 {dimension_numbers = #tpu.dot_dimension_numbers<[1], [0], [0], [1], [0, 0, 1, 1], [], []>} : vector<6x8xf32>, vector<8x256xf32>, vector<6x256xf32> -> vector<6x256xf32>
    %118 = arith.addf %114, %117 : vector<6x256xf32>
    %119 = vector.extract_strided_slice %102 {offsets = [18, 0], sizes = [6, 8], strides = [1, 1]} : vector<24x8xf32> to vector<6x8xf32>
    %120 = vector.extract_strided_slice %103 {offsets = [24, 0], sizes = [8, 256], strides = [1, 1]} : vector<32x256xf32> to vector<8x256xf32>
    %cst_31 = arith.constant dense<0.000000e+00> : vector<6x256xf32>
    %121 = tpu.matmul %119, %120, %cst_31 {dimension_numbers = #tpu.dot_dimension_numbers<[1], [0], [0], [1], [0, 0, 1, 1], [], []>} : vector<6x8xf32>, vector<8x256xf32>, vector<6x256xf32> -> vector<6x256xf32>
    %122 = arith.addf %118, %121 : vector<6x256xf32>
    %cst_32 = arith.constant 0.000000e+00 : f32
    %123 = vector.broadcast %cst_32 : f32 to vector<6x256xf32>
    %124 = arith.maximumf %122, %123 : vector<6x256xf32>
    %c0_33 = arith.constant 0 : index
    %c0_34 = arith.constant 0 : index
    %125 = vector.load %arg10[%c0_33, %c0_34] : memref<256x128xf32, #tpu.memory_space<vmem>>, vector<256x128xf32>
    %cst_35 = arith.constant dense<0.000000e+00> : vector<6x128xf32>
    %126 = tpu.matmul %124, %125, %cst_35 {dimension_numbers = #tpu.dot_dimension_numbers<[1], [0], [0], [1], [0, 0, 1, 1], [], []>} : vector<6x256xf32>, vector<256x128xf32>, vector<6x128xf32> -> vector<6x128xf32>
    %c0_36 = arith.constant 0 : index
    %c0_37 = arith.constant 0 : index
    %127 = vector.load %arg11[%c0_36, %c0_37] : memref<1x128xf32, #tpu.memory_space<vmem>>, vector<1x128xf32>
    %128 = vector.broadcast %127 : vector<1x128xf32> to vector<6x128xf32>
    %129 = arith.addf %126, %128 : vector<6x128xf32>
    %c0_38 = arith.constant 0 : index
    %c0_39 = arith.constant 0 : index
    %c0_40 = arith.constant 0 : index
    %130 = vector.load %arg12[%c0_38, %c0_39, %c0_40] : memref<1x6x128xf32, #tpu.memory_space<vmem>>, vector<1x6x128xf32>
    %131 = vector.shape_cast %130 : vector<1x6x128xf32> to vector<6x128xf32>
    %132 = vector.shape_cast %129 : vector<6x128xf32> to vector<1x6x128xf32>
    tpu.vector_store %arg12[%c0_38, %c0_39, %c0_40], %132 {strides = array<i32>} : memref<1x6x128xf32, #tpu.memory_space<vmem>>, vector<1x6x128xf32>,
    return
  }
  func.func @transform_0(%arg0: i32) -> (i32, i32, i32) {
    %c0_i32 = arith.constant 0 : i32
    %c0_i32_0 = arith.constant 0 : i32
    %c0_i32_1 = arith.constant 0 : i32
    return %arg0, %c0_i32, %c0_i32_0 : i32, i32, i32
  }
  func.func @transform_1(%arg0: i32) -> (i32, i32) {
    %c0_i32 = arith.constant 0 : i32
    %c0_i32_0 = arith.constant 0 : i32
    %c0_i32_1 = arith.constant 0 : i32
    return %c0_i32, %c0_i32_0 : i32, i32
  }
  func.func @transform_2(%arg0: i32) -> (i32, i32) {
    %c0_i32 = arith.constant 0 : i32
    %c0_i32_0 = arith.constant 0 : i32
    %c0_i32_1 = arith.constant 0 : i32
    return %c0_i32, %c0_i32_0 : i32, i32
  }
  func.func @transform_3(%arg0: i32) -> (i32, i32) {
    %c0_i32 = arith.constant 0 : i32
    %c0_i32_0 = arith.constant 0 : i32
    %c0_i32_1 = arith.constant 0 : i32
    return %c0_i32, %c0_i32_0 : i32, i32
  }
  func.func @transform_4(%arg0: i32) -> (i32, i32) {
    %c0_i32 = arith.constant 0 : i32
    %c0_i32_0 = arith.constant 0 : i32
    %c0_i32_1 = arith.constant 0 : i32
    return %c0_i32, %c0_i32_0 : i32, i32
  }
  func.func @transform_5(%arg0: i32) -> (i32, i32) {
    %c0_i32 = arith.constant 0 : i32
    %c0_i32_0 = arith.constant 0 : i32
    %c0_i32_1 = arith.constant 0 : i32
    return %c0_i32, %c0_i32_0 : i32, i32
  }
  func.func @transform_6(%arg0: i32) -> (i32, i32) {
    %c0_i32 = arith.constant 0 : i32
    %c0_i32_0 = arith.constant 0 : i32
    %c0_i32_1 = arith.constant 0 : i32
    return %c0_i32, %c0_i32_0 : i32, i32
  }
  func.func @transform_7(%arg0: i32) -> (i32, i32) {
    %c0_i32 = arith.constant 0 : i32
    %c0_i32_0 = arith.constant 0 : i32
    %c0_i32_1 = arith.constant 0 : i32
    return %c0_i32, %c0_i32_0 : i32, i32
  }
  func.func @transform_8(%arg0: i32) -> (i32, i32) {
    %c0_i32 = arith.constant 0 : i32
    %c0_i32_0 = arith.constant 0 : i32
    %c0_i32_1 = arith.constant 0 : i32
    return %c0_i32, %c0_i32_0 : i32, i32
  }
  func.func @transform_9(%arg0: i32) -> (i32, i32) {
    %c0_i32 = arith.constant 0 : i32
    %c0_i32_0 = arith.constant 0 : i32
    %c0_i32_1 = arith.constant 0 : i32
    return %c0_i32, %c0_i32_0 : i32, i32
  }
  func.func @transform_10(%arg0: i32) -> (i32, i32) {
    %c0_i32 = arith.constant 0 : i32
    %c0_i32_0 = arith.constant 0 : i32
    %c0_i32_1 = arith.constant 0 : i32
    return %c0_i32, %c0_i32_0 : i32, i32
  }
  func.func @transform_11(%arg0: i32) -> (i32, i32, i32) {
    %c0_i32 = arith.constant 0 : i32
    %c0_i32_0 = arith.constant 0 : i32
    %c0_i32_1 = arith.constant 0 : i32
    return %arg0, %c0_i32, %c0_i32_0 : i32, i32, i32
  }
}

</mosaic_0001>

<bundles_post_ra>
// kernel: tpu_custom_call.1
= control target key start
LH: loop header
LB: loop body
LE: loop exit
PB: predicated region body
PF: predicated region fallthrough
CT: control target
= control target key end

     0   :  { %16 = vsyncpa [#allocation3], 0  ;;  %s8384_s17 = smov [#allocation2]   ;;  %s13333_s0 = inlined_call_operand.vmem [shape: f32[1,1,2904], index: 0, kind: input, shape index: {}]   ;;  %s13334_s1 = inlined_call_operand.hbm [shape: f32[8,25], index: 1, kind: input, shape index: {}]   ;;  %s13335_s2 = inlined_call_operand.vmem [shape: f32[8,1], index: 2, kind: input, shape index: {}]   ;;  %s13336_s3 = inlined_call_operand.vmem [shape: f32[299,100], index: 3, kind: input, shape index: {}]   ;;  %s13337_s4 = inlined_call_operand.vmem [shape: f32[8,200], index: 4, kind: input, shape index: {}]   ;;  %s13338_s5 = inlined_call_operand.vmem [shape: f32[8,1], index: 5, kind: input, shape index: {}]   ;;  %s13339_s6 = inlined_call_operand.vmem [shape: f32[523,24], index: 6, kind: input, shape index: {}]   ;;  %s13340_s7 = inlined_call_operand.vmem [shape: f32[32,256], index: 7, kind: input, shape index: {}]   ;;  %s13341_s8 = inlined_call_operand.vmem [shape: f32[1,256], index: 8, kind: input, shape index: {}]   ;;  %s13342_s9 = inlined_call_operand.vmem [shape: f32[256,128], index: 9, kind: input, shape index: {}]   ;;  %s13343_s10 = inlined_call_operand.vmem [shape: f32[1,128], index: 10, kind: input, shape index: {}]   ;;  %s13344_s11 = inlined_call_operand.vmem [shape: f32[1,6,128], index: 11, kind: output, shape index: {}]  }
   0x1   :  { %s25_s18 = sshll.u32 %s8384_s17, 4  ;;  %s8360_s21 = scalar_lea.hbm %s13334_s1, 128  ;;  %s26_s18 = int_to_ptr.vmem [resolvable:$true] %s25_s18 }
   0x2   :  { %p8361_p0 = scmp.ne.s32.totalorder %s13334_s1, %s8360_s21  ;;  %p8364_p1 = scmp.lt.u32.totalorder %s8360_s21, %s13334_s1 }
   0x4   :  { %p8366_p2 = pnand %p8364_p1, %p8361_p0 }
   0x6   :  { %8369 = shalt.err (!%p8366_p2)
}
   0x7   :  { %s8370_s26 = scalar_lea.vmem %s26_s18, 128  ;;  %p8375_p4 = scmp.lt.s32.totalorder %s26_s18, %s26_s18 }
   0x8   :  { %p8371_p3 = scmp.ne.s32.totalorder %s26_s18, %s8370_s26  ;;  %p8376_p5 = scmp.lt.s32.totalorder %s8370_s26, %s8370_s26 }
   0xa   :  { %p8377_p6 = por %p8376_p5, %p8375_p4 }
   0xc   :  { %p8378_p7 = pnand %p8377_p6, %p8371_p3 }
   0xe   :  { %8381 = shalt.err (!%p8378_p7)
}
   0xf   :  { %28 = dma.hbm_to_vmem [thread:$0]  %s13334_s1, 128, %s26_s18, [#allocation3]  }
  0x10   :  { %8382 = dma.done.wait [#allocation3], 128  }
  0x11   :  { %8383 = vsyncadd [#allocation3], 4294967168  ;;  %v96_v0 = vlaneseq  ;;  %v50_v8 = vld [vmem:[%s13333_s0] sm:$0xff]  ;;  %s8385_s1 = smov 127   ;;  %s8386_s12 = smov 126   ;;  %v8565_v19 = vld [vmem:[%s13333_s0 + $0x8] sm:$0xff] }
  0x12   :  { %s8387_s13 = smov 125   ;;  %s8388_s14 = smov 109   ;;  %v8772_v53 = vld [vmem:[%s13333_s0 + $0x10] sm:$0x7f]  ;;  %vm13433_vm0 = vcmask 1039360   ;;  %vm13424_vm1 = vcmask 1031168  }
  0x13   :  { %v97_v1 = vshrl.u32 %v96_v0, 7  ;;  %s8389_s15 = smov 108   ;;  %s8390_s18 = smov 107   ;;  %13554 = vst [vmem:[#allocation17_spill] sm:$0xff] %v8772_v53  ;;  %vm1526_vm2 = vcmask 1040384   ;;  %vm13538_vm3 = vcmask 1041408  }
  0x14   :  { %s8391_s19 = smov 106   ;;  %s8392_s20 = smov 105   ;;  %vm13432_vm4 = vcmask 1022976   ;;  %vm13450_vm5 = vcmask 891904   ;;  %vm1572_vm6 = vcmask 1042432   ;;  %vm13444_vm7 = vcmask 883712  }
  0x15   :  { %v8496_v2 = vsub.s32 4, %v97_v1  ;;  %v8498_v3 = vsub.s32 5, %v97_v1  ;;  %v8500_v4 = vsub.s32 1, %v97_v1  ;;  %v8502_v5 = vsub.s32 2, %v97_v1  ;;  %s8393_s21 = smov 104   ;;  %s8394_s22 = smov 88  }
  0x16   :  { %v8504_v6 = vsub.s32 0, %v97_v1  ;;  %v8506_v7 = vsub.s32 3, %v97_v1  ;;  %v126_v18 = vsub.s32 7, %v97_v1  ;;  %v8574_v21 = vsub.s32 6, %v97_v1  ;;  %s8395_s23 = smov 124   ;;  %s8396_s24 = smov 87  }
  0x17   :  { %13542 = vst [vmem:[#allocation5_spill] sm:$0xff] %v8500_v4  ;;  %v8512_v9 = vrot.slane %v50_v8, %v8496_v2  ;;  %v8515_v10 = vrot.slane %v50_v8, %v8498_v3  ;;  %v8518_v11 = vrot.slane %v50_v8, %v8500_v4  ;;  %v8521_v12 = vrot.slane %v50_v8, %v8502_v5  ;;  %s8397_s25 = smov 86   ;;  %s8398_s26 = smov 85  }
  0x18   :  { %13543 = vst [vmem:[#allocation6_spill] sm:$0xff] %v8504_v6  ;;  %v8524_v13 = vrot.slane %v50_v8, %v8504_v6  ;;  %v8527_v14 = vrot.slane %v50_v8, %v8506_v7  ;;  %v8572_v20 = vrot.slane %v8565_v19, %v126_v18  ;;  %13545 = vst [vmem:[#allocation8_spill] sm:$0xff] %v8574_v21  ;;  %s8399_s27 = smov 84   ;;  %s8400_s30 = smov 68   ;;  %vm13537_vm8 = vcmask 1043456  }
  0x19   :  { %v8531_v15 = vpack.i.bf16 %v8515_v10, %v8512_v9  ;;  %v8535_v16 = vpack.i.bf16 %v8521_v12, %v8518_v11  ;;  %v8580_v22 = vrot.slane %v50_v8, %v8574_v21  ;;  %v8582_v23 = vrot.slane %v50_v8, %v126_v18  ;;  %s8401_s0 = smov 67   ;;  %s8408_s16 = smov 56  }
  0x1a   :  { %v7072_v17 = vpack.i.bf16 %v8524_v13, %v8527_v14  ;;  %13544 = vst [vmem:[#allocation7_spill] sm:$0xff] %v8572_v20  ;;  %v8597_v25 = vrot.slane %v8565_v19, %v8504_v6  ;;  %v8601_v26 = vrot.slane %v8565_v19, %v8500_v4  ;;  %v8636_v28 = vrot.slane %v8565_v19, %v8496_v2  ;;  %s8411_s17 = smov 100   ;;  %s8419_s28 = smov 121  }
  0x1b   :  { %7078 = vrot.lane.b32.xlu1 %v8531_v15, %s8385_s1  ;;  %7068 = vrot.lane.b32.xlu0 %v8535_v16, %s8385_s1  ;;  %13546 = vst [vmem:[#allocation9_spill] sm:$0xff] %v8582_v23  ;;  %v8589_v24 = vpack.i.bf16 %v8582_v23, %v8580_v22  ;;  %v8644_v29 = vrot.slane %v8565_v19, %v8498_v3  ;;  %vm13418_vm9 = vcmask 875520   ;;  %vm13405_vm10 = vcmask 867328   ;;  %s8420_s29 = smov 119  }
  0x1c   :  { %13547 = vst [vmem:[#allocation10_spill] sm:$0xff] %v8597_v25  ;;  %v8608_v27 = vpack.i.bf16 %v8601_v26, %v8597_v25  ;;  %13548 = vst [vmem:[#allocation11_spill] sm:$0xff] %v8636_v28  ;;  %v8648_v30 = vrot.slane %v8565_v19, %v8502_v5  ;;  %v8652_v31 = vrot.slane %v8565_v19, %v8506_v7  ;;  %vm1618_vm11 = vcmask 1044480  }
  0x1d   :  { %13549 = vst [vmem:[#allocation12_spill] sm:$0xff] %v8644_v29  ;;  %v8660_v32 = vpack.i.bf16 %v8644_v29, %v8636_v28  ;;  %v7352_v34 = vpack.i.bf16 %v8527_v14, %v8524_v13  ;;  %v8780_v56 = vrot.slane %v8565_v19, %v8574_v21  ;;  %v8784_v57 = vrot.slane %v8772_v53, %v8504_v6 }
  0x1e   :  { %13550 = vst [vmem:[#allocation13_spill] sm:$0xff] %v8648_v30  ;;  %13551 = vst [vmem:[#allocation14_spill] sm:$0xff] %v8652_v31  ;;  %v8664_v33 = vpack.i.bf16 %v8652_v31, %v8648_v30  ;;  %v8788_v58 = vrot.slane %v8772_v53, %v8500_v4  ;;  %v8827_v19 = vrot.slane %v8772_v53, %v8502_v5  ;;  %vm1641_vm12 = vcmask 1045504  }
  0x1f   :  { %7083 = vrot.lane.b32.xlu1 %v8535_v16, %s8386_s12  ;;  %7073 = vrot.lane.b32.xlu0 %v7072_v17, %s8385_s1  ;;  %13552 = vst [vmem:[#allocation15_spill] sm:$0xff] %v8660_v32  ;;  %13555 = vst [vmem:[#allocation18_spill] sm:$0xff] %v8780_v56  ;;  %v8800_v61 = vpack.i.bf16 %v8572_v20, %v8780_v56  ;;  %vm1664_vm13 = vcmask 1046528   ;;  %vm13406_vm14 = vcmask 859136   ;;  %vm954_vm15 = vcmask 850944  }
  0x20   :  { %13553 = vst [vmem:[#allocation16_spill] sm:$0xff] %v8664_v33  ;;  %13556 = vst [vmem:[#allocation19_spill] sm:$0xff] %v8784_v57  ;;  %v8804_v62 = vpack.i.bf16 %v8788_v58, %v8784_v57 }
  0x21   :  { %13557 = vst [vmem:[#allocation20_spill] sm:$0xff] %v8788_v58  ;;  %13558 = vst [vmem:[#allocation21_spill] sm:$0xff] %v8800_v61  ;;  %v8865_v58 = vrot.slane %v8772_v53, %v8496_v2 }
  0x22   :  { %13559 = vst [vmem:[#allocation22_spill] sm:$0xff] %v8804_v62  ;;  %13560 = vst [vmem:[#allocation23_spill] sm:$0xff] %v8827_v19 }
  0x23   :  { %7093 = vrot.lane.b32.xlu1 %v8531_v15, %s8386_s12  ;;  %7088 = vrot.lane.b32.xlu0 %v7072_v17, %s8386_s12  ;;  %13567 = vst [vmem:[#allocation26_spill] sm:$0xff] %v8865_v58 }
  0x27   :  { %7103 = vrot.lane.b32.xlu1 %v7072_v17, %s8387_s13  ;;  %7098 = vrot.lane.b32.xlu0 %v8535_v16, %s8387_s13 }
  0x2b   :  { %7113 = vrot.lane.b32.xlu1 %v8535_v16, %s8388_s14  ;;  %7108 = vrot.lane.b32.xlu0 %v8531_v15, %s8387_s13 }
  0x2f   :  { %7123 = vrot.lane.b32.xlu1 %v8535_v16, %s8389_s15  ;;  %7118 = vrot.lane.b32.xlu0 %v7072_v17, %s8388_s14 }
  0x33   :  { %7133 = vrot.lane.b32.xlu1 %v8531_v15, %s8388_s14  ;;  %7128 = vrot.lane.b32.xlu0 %v7072_v17, %s8389_s15 }
  0x37   :  { %7143 = vrot.lane.b32.xlu1 %v8535_v16, %s8390_s18  ;;  %7138 = vrot.lane.b32.xlu0 %v8531_v15, %s8389_s15 }
  0x3b   :  { %7153 = vrot.lane.b32.xlu1 %v8531_v15, %s8390_s18  ;;  %7148 = vrot.lane.b32.xlu0 %v7072_v17, %s8390_s18 }
  0x3f   :  { %7163 = vrot.lane.b32.xlu1 %v7072_v17, %s8391_s19  ;;  %7158 = vrot.lane.b32.xlu0 %v8535_v16, %s8391_s19 }
  0x43   :  { %7173 = vrot.lane.b32.xlu1 %v8535_v16, %s8392_s20  ;;  %7168 = vrot.lane.b32.xlu0 %v8531_v15, %s8391_s19 }
  0x47   :  { %7183 = vrot.lane.b32.xlu1 %v8589_v24, %s8385_s1  ;;  %7178 = vrot.lane.b32.xlu0 %v7072_v17, %s8392_s20 }
  0x4b   :  { %7193 = vrot.lane.b32.xlu1 %v8608_v27, %s8385_s1  ;;  %7188 = vrot.lane.b32.xlu0 %v8531_v15, %s8392_s20 }
  0x4f   :  { %7203 = vrot.lane.b32.xlu1 %v8608_v27, %s8386_s12  ;;  %7198 = vrot.lane.b32.xlu0 %v8589_v24, %s8386_s12 }
  0x53   :  { %7213 = vrot.lane.b32.xlu1 %v8608_v27, %s8387_s13  ;;  %7208 = vrot.lane.b32.xlu0 %v8589_v24, %s8387_s13 }
  0x57   :  { %7223 = vrot.lane.b32.xlu1 %v8589_v24, %s8389_s15  ;;  %7218 = vrot.lane.b32.xlu0 %v8589_v24, %s8388_s14 }
  0x5b   :  { %7233 = vrot.lane.b32.xlu1 %v8608_v27, %s8389_s15  ;;  %7228 = vrot.lane.b32.xlu0 %v8608_v27, %s8388_s14 }
  0x5f   :  { %7243 = vrot.lane.b32.xlu1 %v8608_v27, %s8390_s18  ;;  %7238 = vrot.lane.b32.xlu0 %v8589_v24, %s8390_s18 }
  0x63   :  { %7253 = vrot.lane.b32.xlu1 %v8608_v27, %s8391_s19  ;;  %7248 = vrot.lane.b32.xlu0 %v8589_v24, %s8391_s19 }
  0x67   :  { %7263 = vrot.lane.b32.xlu1 %v8608_v27, %s8392_s20  ;;  %7258 = vrot.lane.b32.xlu0 %v8589_v24, %s8392_s20 }
  0x6b   :  { %7273 = vrot.lane.b32.xlu1 %v8660_v32, %s8385_s1  ;;  %7268 = vrot.lane.b32.xlu0 %v8664_v33, %s8385_s1 }
  0x6f   :  { %7283 = vrot.lane.b32.xlu1 %v8660_v32, %s8386_s12  ;;  %7278 = vrot.lane.b32.xlu0 %v8664_v33, %s8386_s12 }
  0x73   :  { %7293 = vrot.lane.b32.xlu1 %v8660_v32, %s8387_s13  ;;  %7288 = vrot.lane.b32.xlu0 %v8664_v33, %s8387_s13 }
  0x77   :  { %7303 = vrot.lane.b32.xlu1 %v8664_v33, %s8389_s15  ;;  %7298 = vrot.lane.b32.xlu0 %v8664_v33, %s8388_s14 }
  0x7b   :  { %7313 = vrot.lane.b32.xlu1 %v8660_v32, %s8389_s15  ;;  %7308 = vrot.lane.b32.xlu0 %v8660_v32, %s8388_s14 }
  0x7f   :  { %7323 = vrot.lane.b32.xlu1 %v8660_v32, %s8390_s18  ;;  %7318 = vrot.lane.b32.xlu0 %v8664_v33, %s8390_s18 }
  0x83   :  { %7333 = vrot.lane.b32.xlu1 %v8660_v32, %s8391_s19  ;;  %7328 = vrot.lane.b32.xlu0 %v8664_v33, %s8391_s19 }
  0x87   :  { %7343 = vrot.lane.b32.xlu1 %v8660_v32, %s8392_s20  ;;  %7338 = vrot.lane.b32.xlu0 %v8664_v33, %s8392_s20  ;;  %v8869_v32 = vrot.slane %v8772_v53, %v8498_v3 }
  0x89   :  { %13568 = vst [vmem:[#allocation27_spill] sm:$0xff] %v8869_v32 }
  0x8b   :  { %7353 = vrot.lane.b32.xlu1 %v7352_v34, %s8393_s21  ;;  %7348 = vrot.lane.b32.xlu0 %v8535_v16, %s8393_s21 }
  0x8d   :  { %v8703_v35 = vpop.permute.xlu1 %7078  ;;  %v8705_v36 = vpop.permute.xlu0 %7068 }
  0x8e   :  { %v7071_v1 = vunpack.i.h.bf16 %v8705_v36  ;;  %v13562_v5 = vunpack.i.l.bf16 %v8705_v36  ;;  %v13565_v4 = vunpack.i.h.bf16 %v8703_v35 }
  0x8f   :  { %7363 = vrot.lane.b32.xlu1 %v8535_v16, %s8394_s22  ;;  %7358 = vrot.lane.b32.xlu0 %v8531_v15, %s8393_s21 }
  0x91   :  { %v8711_v37 = vpop.permute.xlu1 %7083  ;;  %v8713_v38 = vpop.permute.xlu0 %7073 }
  0x92   :  { %v13563_v8 = vunpack.i.l.bf16 %v8711_v37  ;;  %v13569_v3 = vunpack.i.l.bf16 %v8713_v38 }
  0x93   :  { %7373 = vrot.lane.b32.xlu1 %v8531_v15, %s8394_s22  ;;  %7368 = vrot.lane.b32.xlu0 %v7352_v34, %s8394_s22 }
  0x95   :  { %v8718_v39 = vpop.permute.xlu1 %7093  ;;  %v8720_v40 = vpop.permute.xlu0 %7088 }
  0x97   :  { %7383 = vrot.lane.b32.xlu1 %v8535_v16, %s8395_s23  ;;  %7378 = vrot.lane.b32.xlu0 %v8535_v16, %s8396_s24 }
  0x99   :  { %v8726_v41 = vpop.permute.xlu1 %7103  ;;  %v8728_v42 = vpop.permute.xlu0 %7098 }
  0x9a   :  { %v7101_v57 = vunpack.i.h.bf16 %v8728_v42 }
  0x9b   :  { %7393 = vrot.lane.b32.xlu1 %v8531_v15, %s8396_s24  ;;  %7388 = vrot.lane.b32.xlu0 %v7352_v34, %s8396_s24 }
  0x9d   :  { %v8733_v43 = vpop.permute.xlu1 %7113  ;;  %v8735_v44 = vpop.permute.xlu0 %7108 }
  0x9e   :  { %v7116_v33 = vunpack.i.h.bf16 %v8733_v43 }
  0x9f   :  { %7403 = vrot.lane.b32.xlu1 %v7352_v34, %s8395_s23  ;;  %7398 = vrot.lane.b32.xlu0 %v8535_v16, %s8397_s25 }
  0xa1   :  { %v8740_v45 = vpop.permute.xlu1 %7123  ;;  %v8742_v46 = vpop.permute.xlu0 %7118 }
  0xa2   :  { %v13577_v25 = vunpack.i.l.bf16 %v8740_v45 }
  0xa3   :  { %7413 = vrot.lane.b32.xlu1 %v7352_v34, %s8397_s25  ;;  %7408 = vrot.lane.b32.xlu0 %v8531_v15, %s8395_s23 }
  0xa5   :  { %v8747_v47 = vpop.permute.xlu1 %7133  ;;  %v8749_v48 = vpop.permute.xlu0 %7128 }
  0xa7   :  { %7423 = vrot.lane.b32.xlu1 %v8535_v16, %s8398_s26  ;;  %7418 = vrot.lane.b32.xlu0 %v8531_v15, %s8397_s25 }
  0xa9   :  { %v8755_v49 = vpop.permute.xlu1 %7143  ;;  %v8757_v50 = vpop.permute.xlu0 %7138 }
  0xab   :  { %7433 = vrot.lane.b32.xlu1 %v8531_v15, %s8398_s26  ;;  %7428 = vrot.lane.b32.xlu0 %v7352_v34, %s8398_s26 }
  0xad   :  { %v8762_v51 = vpop.permute.xlu1 %7153  ;;  %v8764_v52 = vpop.permute.xlu0 %7148 }
  0xaf   :  { %7443 = vrot.lane.b32.xlu1 %v7352_v34, %s8399_s27  ;;  %7438 = vrot.lane.b32.xlu0 %v8535_v16, %s8399_s27 }
  0xb1   :  { %v8774_v54 = vpop.permute.xlu1 %7163  ;;  %v8776_v55 = vpop.permute.xlu0 %7158 }
  0xb3   :  { %7453 = vrot.lane.b32.xlu1 %v8535_v16, %s8400_s30  ;;  %7448 = vrot.lane.b32.xlu0 %v8531_v15, %s8399_s27  ;;  %v252_v16 = vsel %vm13433_vm0, %v13562_v5, %v7071_v1 }
  0xb5   :  { %v8794_v59 = vpop.permute.xlu1 %7173  ;;  %v8796_v60 = vpop.permute.xlu0 %7168 }
  0xb7   :  { %7463 = vrot.lane.b32.xlu1 %v8531_v15, %s8400_s30  ;;  %7458 = vrot.lane.b32.xlu0 %v7352_v34, %s8400_s30  ;;  %v7086_v15 = vunpack.i.h.bf16 %v8711_v37  ;;  %v8831_v34 = vrot.slane %v8772_v53, %v8506_v7  ;;  %v13566_v7 = vunpack.i.l.bf16 %v8703_v35  ;;  %v7161_v53 = vunpack.i.h.bf16 %v8776_v55 }
  0xb9   :  { %v8809_v63 = vpop.permute.xlu1 %7183  ;;  %v8811_v0 = vpop.permute.xlu0 %7178  ;;  %13561 = vst [vmem:[#allocation24_spill] sm:$0xff] %v8831_v34  ;;  %v340_v6 = vsel %vm13424_vm1, %v13563_v8, %v7086_v15  ;;  %v8855_v5 = vpack.i.bf16 %v8831_v34, %v8827_v19  ;;  %v255_v29 = vsel %vm13433_vm0, %v13566_v7, %v13565_v4  ;;  %v1528_v34 = vsel %vm1526_vm2, %v8518_v11, %v252_v16 }
  0xba   :  { %v7076_v19 = vunpack.i.h.bf16 %v8713_v38  ;;  %v1551_v2 = vsel %vm13538_vm3, %v1528_v34, %v340_v6  ;;  %v253_v7 = vsel %vm13433_vm0, %v7071_v1, %v13569_v3  ;;  %v13570_v11 = vunpack.i.l.bf16 %v8720_v40 }
  0xbb   :  { %7473 = vrot.lane.b32.xlu1 %v8800_v61, %s8385_s1  ;;  %7468 = vrot.lane.b32.xlu0 %v8589_v24, %s8393_s21  ;;  %13564 = vst [vmem:[#allocation25_spill] sm:$0xff] %v8855_v5  ;;  %v13571_v4 = vunpack.i.l.bf16 %v8726_v41  ;;  %v7126_v5 = vunpack.i.h.bf16 %v8740_v45  ;;  %v13573_v1 = vunpack.i.l.bf16 %v8728_v42  ;;  %v7146_v3 = vunpack.i.h.bf16 %v8755_v49 }
  0xbc   :  { %v341_v16 = vsel %vm13424_vm1, %v7086_v15, %v13570_v11  ;;  %v13574_v8 = vunpack.i.l.bf16 %v8733_v43 }
  0xbd   :  { %v8821_v17 = vpop.permute.xlu1 %7193  ;;  %v8823_v18 = vpop.permute.xlu0 %7188  ;;  %v429_v30 = vsel %vm13432_vm4, %v7101_v57, %v13571_v4  ;;  %v428_v15 = vsel %vm13432_vm4, %v13573_v1, %v7101_v57  ;;  %v1529_v57 = vsel %vm1526_vm2, %v8521_v12, %v253_v7  ;;  %v7095_v4 = vunpack.i.l.bf16 %v8718_v39 }
  0xbe   :  { %v1893_v31 = vsel %vm13450_vm5, %v13574_v8, %v7116_v33  ;;  %v13575_v8 = vunpack.i.l.bf16 %v8742_v46  ;;  %v1552_v11 = vsel %vm13538_vm3, %v1529_v57, %v341_v16  ;;  %v8923_v21 = vsel %vm1572_vm6, %v1551_v2, %v428_v15 }
  0xbf   :  { %7483 = vrot.lane.b32.xlu1 %v8589_v24, %s8394_s22  ;;  %7478 = vrot.lane.b32.xlu0 %v8608_v27, %s8393_s21  ;;  %13576 = vst [vmem:[#allocation29_spill] sm:$0xff] %v8923_v21  ;;  %v8928_v23 = vsel %vm13444_vm7, %v13577_v25, %v7126_v5  ;;  %v13578_v12 = vunpack.i.l.bf16 %v8749_v48  ;;  %v1952_v2 = vsel %vm13537_vm8, %v8923_v21, %v1893_v31  ;;  %v13581_v16 = vunpack.i.l.bf16 %v8755_v49 }
  0xc0   :  { %v1894_v6 = vsel %vm13450_vm5, %v7116_v33, %v13575_v8  ;;  %v8940_v33 = vsel %vm1572_vm6, %v1552_v11, %v429_v30  ;;  %v13582_v15 = vunpack.i.l.bf16 %v8764_v52  ;;  %v7091_v57 = vunpack.i.h.bf16 %v8720_v40 }
  0xc1   :  { %v8849_v20 = vpop.permute.xlu1 %7203  ;;  %v8851_v56 = vpop.permute.xlu0 %7198  ;;  %v8933_v7 = vsel %vm13444_vm7, %v7126_v5, %v13578_v12  ;;  %13580 = vst [vmem:[#allocation31_spill] sm:$0xff] %v8940_v33  ;;  %v8947_v25 = vsel %vm13418_vm9, %v13581_v16, %v7146_v3  ;;  %v1953_v8 = vsel %vm13537_vm8, %v8940_v33, %v1894_v6  ;;  %v13584_v30 = vunpack.i.l.bf16 %v8776_v55 }
  0xc2   :  { %13579 = vst [vmem:[#allocation30_spill] sm:$0xff] %v8933_v7  ;;  %v8952_v5 = vsel %vm13418_vm9, %v7146_v3, %v13582_v15  ;;  %v13586_v11 = vunpack.i.l.bf16 %v8774_v54  ;;  %v1531_v12 = vsel %vm1526_vm2, %v8512_v9, %v255_v29  ;;  %v1974_v6 = vsel %vm1618_vm11, %v1952_v2, %v8928_v23 }
  0xc3   :  { %7493 = vrot.lane.b32.xlu1 %v8800_v61, %s8386_s12  ;;  %7488 = vrot.lane.b32.xlu0 %v8804_v62, %s8385_s1  ;;  %13583 = vst [vmem:[#allocation32_spill] sm:$0xff] %v8952_v5  ;;  %v8964_v31 = vsel %vm13405_vm10, %v13584_v30, %v7161_v53  ;;  %v1975_v16 = vsel %vm1618_vm11, %v1953_v8, %v8933_v7  ;;  %v13588_v15 = vunpack.i.l.bf16 %v8705_v36  ;;  %v13589_v2 = vunpack.i.l.bf16 %v8703_v35 }
  0xc4   :  { %13585 = vst [vmem:[#allocation33_spill] sm:$0xff] %v8964_v31  ;;  %v8969_v3 = vsel %vm13405_vm10, %v7161_v53, %v13586_v11  ;;  %v1996_v53 = vsel %vm1641_vm12, %v1974_v6, %v8947_v25  ;;  %v1997_v9 = vsel %vm1641_vm12, %v1975_v16, %v8952_v5  ;;  %v8990_v29 = vpack.i.bf16 %v8869_v32, %v8865_v58 }
  0xc5   :  { %v8894_v34 = vpop.permute.xlu1 %7213  ;;  %v8896_v28 = vpop.permute.xlu0 %7208  ;;  %13587 = vst [vmem:[#allocation34_spill] sm:$0xff] %v8969_v3  ;;  %v251_v33 = vsel %vm13433_vm0, %v7076_v19, %v13588_v15  ;;  %v13590_v36 = vunpack.i.l.bf16 %v8713_v38  ;;  %v2018_v11 = vsel %vm1664_vm13, %v1996_v53, %v8964_v31  ;;  %v2019_v6 = vsel %vm1664_vm13, %v1997_v9, %v8969_v3 }
  0xc6   :  { %13572 = vst [vmem:[#allocation28_spill] sm:$0xff] %v8896_v28  ;;  %v13591_v16 = vunpack.i.h.bf16 %v8718_v39  ;;  %v13592_v32 = vunpack.i.l.bf16 %v8711_v37  ;;  %v7106_v38 = vunpack.i.h.bf16 %v8726_v41  ;;  %v1527_v53 = vsel %vm1526_vm2, %v8524_v13, %v251_v33 }
  0xc7   :  { %7503 = vrot.lane.b32.xlu1 %v8589_v24, %s8396_s24  ;;  %7498 = vrot.lane.b32.xlu0 %v8608_v27, %s8394_s22  ;;  %v254_v19 = vsel %vm13433_vm0, %v13590_v36, %v13589_v2  ;;  %v7110_v2 = vunpack.i.l.bf16 %v8735_v44  ;;  %v7176_v36 = vunpack.i.h.bf16 %v8794_v59  ;;  %v7532_v8 = vpack.i.bf16 %v2019_v6, %v2018_v11 }
  0xc8   :  { %v343_v15 = vsel %vm13424_vm1, %v7095_v4, %v13591_v16  ;;  %v339_v58 = vsel %vm13424_vm1, %v7091_v57, %v13592_v32  ;;  %v1530_v32 = vsel %vm1526_vm2, %v8527_v14, %v254_v19  ;;  %v13593_v5 = vunpack.i.l.bf16 %v8720_v40 }
  0xc9   :  { %v8935_v1 = vpop.permute.xlu1 %7223  ;;  %v8937_v28 = vpop.permute.xlu0 %7218  ;;  %v1554_v3 = vsel %vm13538_vm3, %v1531_v12, %v343_v15  ;;  %v1550_v33 = vsel %vm13538_vm3, %v1527_v53, %v339_v58  ;;  %v13594_v9 = vunpack.i.l.bf16 %v8811_v0  ;;  %v13595_v14 = vunpack.i.l.bf16 %v8728_v42 }
  0xca   :  { %v342_v13 = vsel %vm13424_vm1, %v13593_v5, %v7095_v4  ;;  %v13596_v7 = vunpack.i.l.bf16 %v8726_v41  ;;  %v7121_v12 = vunpack.i.h.bf16 %v8742_v46  ;;  %v7135_v40 = vunpack.i.l.bf16 %v8747_v47 }
  0xcb   :  { %7513 = vrot.lane.b32.xlu1 %v8800_v61, %s8387_s13  ;;  %7508 = vrot.lane.b32.xlu0 %v8804_v62, %s8386_s12  ;;  %v9033_v37 = vsel %vm13406_vm14, %v7176_v36, %v13594_v9  ;;  %v427_v19 = vsel %vm13432_vm4, %v7106_v38, %v13595_v14  ;;  %v13597_v58 = vunpack.i.h.bf16 %v8735_v44  ;;  %v7140_v41 = vunpack.i.l.bf16 %v8757_v50 }
  0xcc   :  { %v430_v11 = vsel %vm13432_vm4, %v13596_v7, %v7110_v2  ;;  %v13598_v7 = vunpack.i.l.bf16 %v8794_v59  ;;  %v1553_v6 = vsel %vm13538_vm3, %v1530_v32, %v342_v13  ;;  %v7131_v15 = vunpack.i.h.bf16 %v8749_v48 }
  0xcd   :  { %v8980_v30 = vpop.permute.xlu1 %7233  ;;  %v8982_v21 = vpop.permute.xlu0 %7228  ;;  %v431_v42 = vsel %vm13432_vm4, %v7110_v2, %v13597_v58  ;;  %v7155_v38 = vunpack.i.l.bf16 %v8762_v51  ;;  %v9066_v9 = vsel %vm1572_vm6, %v1550_v33, %v427_v19  ;;  %v9069_v14 = vsel %vm1572_vm6, %v1553_v6, %v430_v11 }
  0xce   :  { %v9054_v5 = vsel %vm13406_vm14, %v13598_v7, %v7176_v36  ;;  %v13377_v36 = vunpack.i.h.bf16 %v8757_v50  ;;  %v7170_v32 = vunpack.i.l.bf16 %v8796_v60  ;;  %v9074_v13 = vsel %vm1572_vm6, %v1554_v3, %v431_v42 }
  0xcf   :  { %7523 = vrot.lane.b32.xlu1 %v8608_v27, %s8396_s24  ;;  %7518 = vrot.lane.b32.xlu0 %v8589_v24, %s8395_s23  ;;  %v7537_v2 = vpack.i.bf16 %v9033_v37, %v9054_v5  ;;  %v13599_v58 = vunpack.i.l.bf16 %v8733_v43  ;;  %v13600_v4 = vunpack.i.l.bf16 %v8742_v46  ;;  %v13601_v33 = vunpack.i.h.bf16 %v8747_v47 }
  0xd0   :  { %v13602_v3 = vunpack.i.l.bf16 %v8749_v48  ;;  %v13379_v43 = vunpack.i.h.bf16 %v8762_v51  ;;  %v7151_v46 = vunpack.i.h.bf16 %v8764_v52  ;;  %v13378_v48 = vunpack.i.h.bf16 %v8796_v60 }
  0xd1   :  { %v9021_v57 = vpop.permute.xlu1 %7243  ;;  %v9023_v16 = vpop.permute.xlu0 %7238  ;;  %v1892_v7 = vsel %vm13450_vm5, %v7121_v12, %v13599_v58  ;;  %v1895_v31 = vsel %vm13450_vm5, %v13600_v4, %v7135_v40  ;;  %v1896_v19 = vsel %vm13450_vm5, %v7135_v40, %v13601_v33  ;;  %v13604_v12 = vunpack.i.l.bf16 %v8740_v45 }
  0xd2   :  { %v9091_v11 = vsel %vm13444_vm7, %v13602_v3, %v7140_v41  ;;  %v13605_v4 = vunpack.i.l.bf16 %v8764_v52  ;;  %v7166_v40 = vunpack.i.h.bf16 %v8774_v54  ;;  %v1954_v33 = vsel %vm13537_vm8, %v9069_v14, %v1895_v31 }
  0xd3   :  { %7528 = vrot.lane.b32.xlu0 %v8589_v24, %s8397_s25  ;;  %7533 = vrot.lane.b32.xlu1 %v7532_v8, %s8401_s0  ;;  %13603 = vst [vmem:[#allocation35_spill] sm:$0xff] %v9091_v11  ;;  %v9098_v42 = vsel %vm13444_vm7, %v7131_v15, %v13604_v12  ;;  %v9116_v45 = vsel %vm13444_vm7, %v7140_v41, %v13377_v36  ;;  %v13609_v52 = vunpack.i.l.bf16 %v8774_v54  ;;  %v7181_v3 = vunpack.i.h.bf16 %v8811_v0 }
  0xd4   :  { %v9103_v6 = vsel %vm13418_vm9, %v13605_v4, %v7155_v38  ;;  %13608 = vst [vmem:[#allocation38_spill] sm:$0xff] %v9116_v45  ;;  %v1951_v12 = vsel %vm13537_vm8, %v9066_v9, %v1892_v7  ;;  %v1955_v4 = vsel %vm13537_vm8, %v9074_v13, %v1896_v19  ;;  %v1976_v31 = vsel %vm1618_vm11, %v1954_v33, %v9091_v11 }
  0xd5   :  { %v9059_v8 = vpop.permute.xlu1 %7253  ;;  %v9061_v53 = vpop.permute.xlu0 %7248  ;;  %13606 = vst [vmem:[#allocation36_spill] sm:$0xff] %v9103_v6  ;;  %v9121_v15 = vsel %vm13405_vm10, %v13609_v52, %v7170_v32  ;;  %v1973_v54 = vsel %vm1618_vm11, %v1951_v12, %v9098_v42  ;;  %v9139_v41 = vsel %vm13418_vm9, %v7155_v38, %v13379_v43  ;;  %v13612_v7 = vunpack.i.l.bf16 %v8755_v49 }
  0xd6   :  { %13610 = vst [vmem:[#allocation39_spill] sm:$0xff] %v9121_v15  ;;  %13611 = vst [vmem:[#allocation40_spill] sm:$0xff] %v9139_v41  ;;  %v1998_v33 = vsel %vm1641_vm12, %v1976_v31, %v9103_v6  ;;  %v1977_v52 = vsel %vm1618_vm11, %v1955_v4, %v9116_v45  ;;  %v13614_v36 = vunpack.i.l.bf16 %v8776_v55  ;;  %v9158_v38 = vsel %vm13405_vm10, %v7170_v32, %v13378_v48 }
  0xd7   :  { %7538 = vrot.lane.b32.xlu0 %v7537_v2, %s8401_s0  ;;  %7543 = vrot.lane.b32.xlu1 %v8804_v62, %s8387_s13  ;;  %v9144_v19 = vsel %vm13418_vm9, %v7151_v46, %v13612_v7  ;;  %13616 = vst [vmem:[#allocation43_spill] sm:$0xff] %v9158_v38  ;;  %v2020_v31 = vsel %vm1664_vm13, %v1998_v33, %v9121_v15  ;;  %v13618_v7 = vunpack.i.l.bf16 %v8794_v59  ;;  %v7196_v43 = vunpack.i.h.bf16 %v8821_v17 }
  0xd8   :  { %13613 = vst [vmem:[#allocation41_spill] sm:$0xff] %v9144_v19  ;;  %v9153_v12 = vsel %vm13405_vm10, %v7166_v40, %v13614_v36  ;;  %v7190_v36 = vunpack.i.l.bf16 %v8823_v18  ;;  %v1999_v32 = vsel %vm1641_vm12, %v1977_v52, %v9139_v41  ;;  %v1995_v48 = vsel %vm1641_vm12, %v1973_v54, %v9144_v19 }
  0xd9   :  { %v9107_v2 = vpop.permute.xlu1 %7263  ;;  %v9109_v58 = vpop.permute.xlu0 %7258  ;;  %13615 = vst [vmem:[#allocation42_spill] sm:$0xff] %v9153_v12  ;;  %v9169_v4 = vsel %vm13406_vm14, %v7181_v3, %v13618_v7  ;;  %v2017_v59 = vsel %vm1664_vm13, %v1995_v48, %v9153_v12  ;;  %v2021_v3 = vsel %vm1664_vm13, %v1999_v32, %v9158_v38  ;;  %v13620_v41 = vunpack.i.l.bf16 %v8811_v0 }
  0xda   :  { %13607 = vst [vmem:[#allocation37_spill] sm:$0xff] %v9107_v2  ;;  %v7567_v7 = vpack.i.bf16 %v2020_v31, %v2017_v59  ;;  %v7572_v55 = vpack.i.bf16 %v9169_v4, %v2021_v3  ;;  %v13621_v48 = vunpack.i.h.bf16 %v8823_v18  ;;  %v7206_v38 = vunpack.i.h.bf16 %v8849_v20 }
  0xdb   :  { %7548 = vrot.lane.b32.xlu0 %v8608_v27, %s8395_s23  ;;  %7553 = vrot.lane.b32.xlu1 %v8608_v27, %s8397_s25  ;;  %v9198_v15 = vsel %vm13406_vm14, %v13620_v41, %v7190_v36  ;;  %v7185_v12 = vunpack.i.l.bf16 %v8809_v63  ;;  %v7186_v0 = vunpack.i.h.bf16 %v8809_v63  ;;  %v7216_v63 = vunpack.i.h.bf16 %v8894_v34 }
  0xdc   :  { %v9203_v32 = vsel %vm13406_vm14, %v7190_v36, %v13621_v48 }
  0xdd   :  { %v9160_v49 = vpop.permute.xlu1 %7273  ;;  %v9162_v46 = vpop.permute.xlu0 %7268 }
  0xde   :  { %13617 = vst [vmem:[#allocation44_spill] sm:$0xff] %v9160_v49  ;;  %v13383_v40 = vunpack.i.l.bf16 %v9162_v46 }
  0xdf   :  { %7558 = vrot.lane.b32.xlu0 %v8589_v24, %s8398_s26  ;;  %7563 = vrot.lane.b32.xlu1 %v8800_v61, %s8388_s14 }
  0xe0   :  { %v260_v33 = vsel %vm13433_vm0, %v7196_v43, %v13383_v40 }
  0xe1   :  { %v9190_v52 = vpop.permute.xlu1 %7283  ;;  %v9192_v54 = vpop.permute.xlu0 %7278  ;;  %v1536_v41 = vsel %vm1526_vm2, %v8601_v26, %v260_v33  ;;  %v13623_v26 = vunpack.i.h.bf16 %v8703_v35 }
  0xe2   :  { %13619 = vst [vmem:[#allocation45_spill] sm:$0xff] %v9190_v52  ;;  %v13385_v40 = vunpack.i.l.bf16 %v9192_v54 }
  0xe3   :  { %7568 = vrot.lane.b32.xlu0 %v7567_v7, %s8401_s0  ;;  %7573 = vrot.lane.b32.xlu1 %v7572_v55, %s8401_s0  ;;  %v7577_v7 = vpack.i.bf16 %v9203_v32, %v9198_v15  ;;  %v7195_v55 = vunpack.i.l.bf16 %v8821_v17  ;;  %v256_v33 = vsel %vm13433_vm0, %v13623_v26, %v7185_v12 }
  0xe4   :  { %v348_v31 = vsel %vm13424_vm1, %v7206_v38, %v13385_v40  ;;  %v7201_v40 = vunpack.i.h.bf16 %v8851_v56 }
  0xe5   :  { %v1559_v36 = vsel %vm13538_vm3, %v1536_v41, %v348_v31  ;;  %v9217_v59 = vpop.permute.xlu1 %7293  ;;  %v9219_v3 = vpop.permute.xlu0 %7288  ;;  %v257_v41 = vsel %vm13433_vm0, %v7185_v12, %v7186_v0  ;;  %v7205_v31 = vunpack.i.l.bf16 %v8849_v20  ;;  %v259_v45 = vsel %vm13433_vm0, %v7195_v55, %v7196_v43 }
  0xe6   :  { %13622 = vst [vmem:[#allocation46_spill] sm:$0xff] %v9217_v59  ;;  %v13389_v48 = vunpack.i.l.bf16 %v9219_v3  ;;  %v7200_v12 = vunpack.i.l.bf16 %v8851_v56  ;;  %v1532_v20 = vsel %vm1526_vm2, %v8515_v10, %v256_v33  ;;  %v1533_v19 = vsel %vm1526_vm2, %v8580_v22, %v257_v41  ;;  %v13628_v33 = vld [vmem:[#allocation10_spill] sm:$0xff] }
  0xe7   :  { %7578 = vrot.lane.b32.xlu0 %v7577_v7, %s8401_s0  ;;  %7583 = vrot.lane.b32.xlu1 %v8800_v61, %s8389_s15  ;;  %v258_v7 = vsel %vm13433_vm0, %v7186_v0, %v7195_v55  ;;  %v346_v0 = vsel %vm13424_vm1, %v7201_v40, %v7205_v31  ;;  %v7215_v43 = vunpack.i.l.bf16 %v8894_v34  ;;  %v13626_v55 = vld [vmem:[#allocation28_spill] sm:$0xff]  ;;  %v1535_v22 = vsel %vm1526_vm2, %v13628_v33, %v259_v45 }
  0xe8   :  { %v436_v17 = vsel %vm13432_vm4, %v7216_v63, %v13389_v48  ;;  %v7210_v56 = vunpack.i.l.bf16 %v13626_v55  ;;  %v7211_v34 = vunpack.i.h.bf16 %v13626_v55  ;;  %v7225_v55 = vunpack.i.l.bf16 %v8935_v1 }
  0xe9   :  { %v9239_v6 = vsel %vm1572_vm6, %v1559_v36, %v436_v17  ;;  %v9241_v35 = vpop.permute.xlu1 %7303  ;;  %v9243_v26 = vpop.permute.xlu0 %7298  ;;  %v347_v36 = vsel %vm13424_vm1, %v7205_v31, %v7206_v38  ;;  %v13627_v17 = vld [vmem:[#allocation9_spill] sm:$0xff]  ;;  %v345_v31 = vsel %vm13424_vm1, %v7200_v12, %v7201_v40  ;;  %v435_v45 = vsel %vm13432_vm4, %v7215_v43, %v7216_v63 }
  0xea   :  { %13624 = vst [vmem:[#allocation47_spill] sm:$0xff] %v9239_v6  ;;  %13625 = vst [vmem:[#allocation48_spill] sm:$0xff] %v9243_v26  ;;  %v1534_v10 = vsel %vm1526_vm2, %v13627_v17, %v258_v7  ;;  %v13629_v6 = vunpack.i.h.bf16 %v8718_v39  ;;  %v1558_v26 = vsel %vm13538_vm3, %v1535_v22, %v347_v36  ;;  %v13630_v39 = vunpack.i.h.bf16 %v8735_v44 }
  0xeb   :  { %7588 = vrot.lane.b32.xlu0 %v8608_v27, %s8398_s26  ;;  %7593 = vrot.lane.b32.xlu1 %v8589_v24, %s8399_s27  ;;  %v1557_v11 = vsel %vm13538_vm3, %v1534_v10, %v346_v0  ;;  %v7221_v40 = vunpack.i.h.bf16 %v8937_v28  ;;  %v7220_v7 = vunpack.i.l.bf16 %v8937_v28  ;;  %v1556_v36 = vsel %vm13538_vm3, %v1533_v19, %v345_v31 }
  0xec   :  { %v344_v38 = vsel %vm13424_vm1, %v13629_v6, %v7200_v12  ;;  %v432_v6 = vsel %vm13432_vm4, %v13630_v39, %v7210_v56  ;;  %v7226_v0 = vunpack.i.h.bf16 %v8935_v1  ;;  %v434_v44 = vsel %vm13432_vm4, %v7211_v34, %v7215_v43 }
  0xed   :  { %v9264_v41 = vpop.permute.xlu1 %7313  ;;  %v9266_v48 = vpop.permute.xlu0 %7308  ;;  %v1555_v12 = vsel %vm13538_vm3, %v1532_v20, %v344_v38  ;;  %v433_v63 = vsel %vm13432_vm4, %v7210_v56, %v7211_v34  ;;  %v13396_v33 = vunpack.i.h.bf16 %v8982_v21  ;;  %v7230_v28 = vunpack.i.l.bf16 %v8982_v21 }
  0xee   :  { %v9298_v20 = vsel %vm1572_vm6, %v1558_v26, %v435_v45  ;;  %v9301_v19 = vsel %vm1572_vm6, %v1555_v12, %v432_v6  ;;  %v13633_v1 = vunpack.i.h.bf16 %v8747_v47  ;;  %v1898_v56 = vsel %vm13450_vm5, %v7220_v7, %v7221_v40 }
  0xef   :  { %7598 = vrot.lane.b32.xlu0 %v8804_v62, %s8388_s14  ;;  %7603 = vrot.lane.b32.xlu1 %v8804_v62, %s8389_s15  ;;  %13631 = vst [vmem:[#allocation28_spill] sm:$0xff] %v9298_v20  ;;  %13632 = vst [vmem:[#allocation9_spill] sm:$0xff] %v9301_v19  ;;  %v13395_v22 = vunpack.i.h.bf16 %v8980_v30  ;;  %v7235_v26 = vunpack.i.l.bf16 %v8980_v30  ;;  %v13393_v38 = vmov 0.0   ;;  %v9316_v31 = vsel %vm1572_vm6, %v1556_v36, %v433_v63 }
  0xf0   :  { %v1897_v43 = vsel %vm13450_vm5, %v13633_v1, %v7220_v7  ;;  %2331 = vmatprep.mubr.f32.mxu0 %v13393_v38  ;;  %2402 = vmatprep.mubr.f32.mxu1 %v13393_v38  ;;  %13634 = vst [vmem:[#allocation10_spill] sm:$0xff] %v9316_v31  ;;  %v9319_v34 = vsel %vm1572_vm6, %v1557_v11, %v434_v44  ;;  %v13636_v47 = vunpack.i.h.bf16 %v8757_v50  ;;  %v7241_v11 = vunpack.i.h.bf16 %v9023_v16 }
  0xf1   :  { %v9289_v17 = vpop.permute.xlu1 %7323  ;;  %v9291_v10 = vpop.permute.xlu0 %7318  ;;  %13635 = vst [vmem:[#allocation49_spill] sm:$0xff] %v9319_v34  ;;  %v9327_v39 = vsel %vm13444_vm7, %v7225_v55, %v7226_v0  ;;  %v1899_v12 = vsel %vm13450_vm5, %v7221_v40, %v7230_v28  ;;  %v1900_v36 = vsel %vm13450_vm5, %v7230_v28, %v13396_v33  ;;  %v7240_v50 = vunpack.i.l.bf16 %v9023_v16 }
  0xf2   :  { %v9324_v45 = vsel %vm13444_vm7, %v13636_v47, %v7225_v55  ;;  %13638 = vst [vmem:[#allocation51_spill] sm:$0xff] %v9327_v39  ;;  %v1956_v44 = vsel %vm13537_vm8, %v9301_v19, %v1897_v43  ;;  %v1957_v55 = vsel %vm13537_vm8, %v9316_v31, %v1898_v56  ;;  %v7251_v63 = vunpack.i.h.bf16 %v9061_v53  ;;  %v13670_v19 = vld [vmem:[#allocation13_spill] sm:$0xff] }
  0xf3   :  { %7608 = vrot.lane.b32.xlu0 %v8800_v61, %s8390_s18  ;;  %7613 = vrot.lane.b32.xlu1 %v8608_v27, %s8399_s27  ;;  %13637 = vst [vmem:[#allocation50_spill] sm:$0xff] %v9324_v45  ;;  %v7250_v1 = vunpack.i.l.bf16 %v9061_v53  ;;  %v9350_v40 = vsel %vm13444_vm7, %v7226_v0, %v7235_v26  ;;  %v9355_v16 = vsel %vm13444_vm7, %v7235_v26, %v13395_v22  ;;  %v7245_v43 = vunpack.i.l.bf16 %v9021_v57 }
  0xf4   :  { %13639 = vst [vmem:[#allocation52_spill] sm:$0xff] %v9350_v40  ;;  %13640 = vst [vmem:[#allocation53_spill] sm:$0xff] %v9355_v16  ;;  %v1958_v53 = vsel %vm13537_vm8, %v9319_v34, %v1899_v12  ;;  %v7255_v0 = vunpack.i.l.bf16 %v9059_v8  ;;  %v13641_v26 = vunpack.i.h.bf16 %v8762_v51  ;;  %v9375_v33 = vsel %vm13418_vm9, %v7240_v50, %v7241_v11 }
  0xf5   :  { %v9329_v6 = vpop.permute.xlu1 %7333  ;;  %v9331_v7 = vpop.permute.xlu0 %7328  ;;  %13643 = vst [vmem:[#allocation55_spill] sm:$0xff] %v9375_v33  ;;  %v1978_v12 = vsel %vm1618_vm11, %v1956_v44, %v9324_v45  ;;  %v13644_v56 = vunpack.i.h.bf16 %v8796_v60  ;;  %v9387_v34 = vsel %vm13405_vm10, %v7250_v1, %v7251_v63  ;;  %v13647_v51 = vunpack.i.h.bf16 %v9021_v57  ;;  %v13664_v45 = vld [vmem:[#allocation14_spill] sm:$0xff] }
  0xf6   :  { %v9372_v22 = vsel %vm13418_vm9, %v13641_v26, %v7240_v50  ;;  %13646 = vst [vmem:[#allocation57_spill] sm:$0xff] %v9387_v34  ;;  %v9401_v44 = vsel %vm13418_vm9, %v7241_v11, %v7245_v43 }
  0xf7   :  { %7618 = vrot.lane.b32.xlu0 %v8589_v24, %s8400_s30  ;;  %7623 = vrot.lane.b32.xlu1 %v8804_v62, %s8390_s18  ;;  %v1959_v24 = vsel %vm13537_vm8, %v9298_v20, %v1900_v36  ;;  %13642 = vst [vmem:[#allocation54_spill] sm:$0xff] %v9372_v22  ;;  %v1979_v36 = vsel %vm1618_vm11, %v1957_v55, %v9327_v39  ;;  %13649 = vst [vmem:[#allocation59_spill] sm:$0xff] %v9401_v44 }
  0xf8   :  { %v9384_v28 = vsel %vm13405_vm10, %v13644_v56, %v7250_v1  ;;  %v9396_v50 = vsel %vm13418_vm9, %v7245_v43, %v13647_v51  ;;  %v1981_v60 = vsel %vm1618_vm11, %v1959_v24, %v9355_v16  ;;  %v1980_v55 = vsel %vm1618_vm11, %v1958_v53, %v9350_v40 }
  0xf9   :  { %v9365_v47 = vpop.permute.xlu1 %7343  ;;  %v9367_v38 = vpop.permute.xlu0 %7338  ;;  %13645 = vst [vmem:[#allocation56_spill] sm:$0xff] %v9384_v28  ;;  %13648 = vst [vmem:[#allocation58_spill] sm:$0xff] %v9396_v50  ;;  %v2000_v1 = vsel %vm1641_vm12, %v1978_v12, %v9372_v22  ;;  %v13650_v56 = vunpack.i.h.bf16 %v9059_v8  ;;  %v9415_v24 = vsel %vm13405_vm10, %v7251_v63, %v7255_v0  ;;  %v7261_v53 = vunpack.i.h.bf16 %v9109_v58 }
  0xfa   :  { %13652 = vst [vmem:[#allocation61_spill] sm:$0xff] %v9415_v24  ;;  %v7260_v51 = vunpack.i.l.bf16 %v9109_v58  ;;  %v2022_v12 = vsel %vm1664_vm13, %v2000_v1, %v9384_v28  ;;  %v7265_v40 = vunpack.i.l.bf16 %v9107_v2  ;;  %v2003_v58 = vsel %vm1641_vm12, %v1981_v60, %v9396_v50 }
  0xfb   :  { %7628 = vrot.lane.b32.xlu0 %v8800_v61, %s8391_s19  ;;  %7633 = vrot.lane.b32.xlu1 %v8608_v27, %s8400_s30  ;;  %v2001_v27 = vsel %vm1641_vm12, %v1979_v36, %v9375_v33  ;;  %v9412_v26 = vsel %vm13405_vm10, %v7255_v0, %v13650_v56  ;;  %v7275_v0 = vunpack.i.l.bf16 %v9160_v49  ;;  %v2002_v1 = vsel %vm1641_vm12, %v1980_v55, %v9401_v44  ;;  %v13661_v33 = vld [vmem:[#allocation17_spill] sm:$0xff] }
  0xfc   :  { %13651 = vst [vmem:[#allocation60_spill] sm:$0xff] %v9412_v26  ;;  %v2023_v36 = vsel %vm1664_vm13, %v2001_v27, %v9387_v34  ;;  %v7271_v27 = vunpack.i.h.bf16 %v9162_v46  ;;  %v2024_v28 = vsel %vm1664_vm13, %v2002_v1, %v9415_v24  ;;  %v2025_v16 = vsel %vm1664_vm13, %v2003_v58, %v9412_v26 }
  0xfd   :  { %v9417_v11 = vpop.permute.xlu1 %7353  ;;  %v9419_v43 = vpop.permute.xlu0 %7348  ;;  %v7652_v63 = vpack.i.bf16 %v2023_v36, %v2022_v12  ;;  %v13653_v22 = vunpack.i.h.bf16 %v8823_v18  ;;  %v9454_v55 = vsel %vm13406_vm14, %v7260_v51, %v7261_v53  ;;  %v13656_v12 = vunpack.i.h.bf16 %v9107_v2 }
  0xfe   :  { %13655 = vst [vmem:[#allocation63_spill] sm:$0xff] %v9454_v55  ;;  %v9464_v1 = vsel %vm13406_vm14, %v7261_v53, %v7265_v40  ;;  %v13658_v18 = vunpack.i.h.bf16 %v9160_v49  ;;  %vm13474_vm10 = vcmask 719872   ;;  %v7281_v50 = vunpack.i.h.bf16 %v9192_v54 }
  0xff   :  { %7638 = vrot.lane.b32.xlu0 %v8804_v62, %s8391_s19  ;;  %7643 = vrot.lane.b32.xlu1 %v8800_v61, %s8392_s20  ;;  %v9451_v60 = vsel %vm13406_vm14, %v13653_v22, %v7260_v51  ;;  %v9461_v36 = vsel %vm13406_vm14, %v7265_v40, %v13656_v12  ;;  %13657 = vst [vmem:[#allocation64_spill] sm:$0xff] %v9464_v1  ;;  %v7285_v12 = vunpack.i.l.bf16 %v9190_v52  ;;  %vm13489_vm14 = vcmask 1014784   ;;  %v13660_v61 = vld [vmem:[#allocation8_spill] sm:$0xff] }
 0x100   :  { %13654 = vst [vmem:[#allocation62_spill] sm:$0xff] %v9451_v60  ;;  %v263_v22 = vsel %vm13433_vm0, %v7275_v0, %v13658_v18  ;;  %v262_v51 = vsel %vm13433_vm0, %v7271_v27, %v7275_v0  ;;  %v7662_v0 = vpack.i.bf16 %v2025_v16, %v2024_v28  ;;  %v9493_v20 = vrot.slane %v13661_v33, %v13660_v61 }
 0x101   :  { %v9440_v56 = vpop.permute.xlu1 %7363  ;;  %v9442_v34 = vpop.permute.xlu0 %7358  ;;  %v9499_v39 = vsel %vm1526_vm2, %v13664_v45, %v262_v51  ;;  %v13665_v16 = vunpack.i.l.bf16 %v9162_v46  ;;  %vm13434_vm9 = vcmask 711680   ;;  %v13666_v26 = vunpack.i.h.bf16 %v9190_v52 }
 0x102   :  { %v13415_v44 = vunpack.i.h.bf16 %v9442_v34  ;;  %v13659_v40 = vunpack.i.l.bf16 %v9442_v34  ;;  %13662 = vst [vmem:[#allocation8_spill] sm:$0xff] %v9493_v20  ;;  %v13667_v33 = vunpack.i.l.bf16 %v9192_v54  ;;  %v9541_v31 = vsel %vm13424_vm1, %v7281_v50, %v7285_v12 }
 0x103   :  { %7648 = vrot.lane.b32.xlu0 %v8804_v62, %s8392_s20  ;;  %7653 = vrot.lane.b32.xlu1 %v7652_v63, %s8401_s0  ;;  %v7657_v63 = vpack.i.bf16 %v9454_v55, %v9451_v60  ;;  %v7667_v62 = vpack.i.bf16 %v9461_v36, %v9464_v1  ;;  %v261_v28 = vsel %vm13433_vm0, %v13665_v16, %v7271_v27  ;;  %v7351_v16 = vunpack.i.h.bf16 %v9419_v43 }
 0x104   :  { %v959_v53 = vsel %vm954_vm15, %v13659_v40, %v13415_v44  ;;  %v13663_v40 = vld [vmem:[#allocation11_spill] sm:$0xff]  ;;  %v351_v61 = vsel %vm13424_vm1, %v7285_v12, %v13666_v26  ;;  %v13671_v51 = vunpack.i.h.bf16 %v9217_v59  ;;  %v13675_v52 = vunpack.i.l.bf16 %v9219_v3 }
 0x105   :  { %v9481_v18 = vpop.permute.xlu1 %7373  ;;  %v9483_v24 = vpop.permute.xlu0 %7368  ;;  %v1539_v44 = vsel %vm1526_vm2, %v13663_v40, %v263_v22  ;;  %v349_v22 = vsel %vm13424_vm1, %v13667_v33, %v7281_v50  ;;  %v1691_v45 = vsel %vm1526_vm2, %v9203_v32, %v959_v53  ;;  %v7356_v32 = vunpack.i.h.bf16 %v9417_v11 }
 0x106   :  { %v13419_v58 = vunpack.i.h.bf16 %v9481_v18  ;;  %v13668_v46 = vunpack.i.l.bf16 %v9481_v18  ;;  %v7355_v53 = vunpack.i.l.bf16 %v9417_v11  ;;  %v7350_v33 = vunpack.i.l.bf16 %v9419_v43 }
 0x107   :  { %7658 = vrot.lane.b32.xlu0 %v7657_v63, %s8401_s0  ;;  %7663 = vrot.lane.b32.xlu1 %v7662_v0, %s8401_s0  ;;  %v7295_v63 = vunpack.i.l.bf16 %v9217_v59  ;;  %v7291_v0 = vunpack.i.h.bf16 %v9219_v3  ;;  %v1537_v11 = vsel %vm1526_vm2, %v13670_v19, %v261_v28  ;;  %v9544_v43 = vsel %vm13538_vm3, %v1539_v44, %v351_v61 }
 0x108   :  { %v1047_v27 = vsel %vm13474_vm10, %v13668_v46, %v13419_v58  ;;  %v7366_v46 = vunpack.i.h.bf16 %v9440_v56  ;;  %v7365_v58 = vunpack.i.l.bf16 %v9440_v56  ;;  %v9547_v56 = vsel %vm13538_vm3, %v1537_v11, %v349_v22 }
 0x109   :  { %v1713_v26 = vsel %vm13538_vm3, %v1691_v45, %v1047_v27  ;;  %v9523_v54 = vpop.permute.xlu1 %7383  ;;  %v9525_v40 = vpop.permute.xlu0 %7378  ;;  %v13669_v27 = vld [vmem:[#allocation25_spill] sm:$0xff]  ;;  %v9552_v20 = vsel %vm13432_vm4, %v7295_v63, %v13671_v51  ;;  %v957_v50 = vsel %vm954_vm15, %v7351_v16, %v7356_v32  ;;  %v955_v12 = vsel %vm954_vm15, %v7355_v53, %v7350_v33 }
 0x10a   :  { %v7385_v45 = vunpack.i.l.bf16 %v9523_v54  ;;  %vm13483_vm1 = vcmask 703488   ;;  %v956_v61 = vsel %vm954_vm15, %v7350_v33, %v7351_v16  ;;  %v1044_v22 = vsel %vm13474_vm10, %v7365_v58, %v7366_v46 }
 0x10b   :  { %7668 = vrot.lane.b32.xlu0 %v7667_v62, %s8401_s0  ;;  %7673 = vrot.lane.b32.xlu1 %v13669_v27, %s8385_s1  ;;  %v9555_v62 = vsel %vm13432_vm4, %v7291_v0, %v7295_v63  ;;  %v7370_v51 = vunpack.i.l.bf16 %v9483_v24  ;;  %v13673_v63 = vunpack.i.h.bf16 %v9523_v54  ;;  %v7371_v53 = vunpack.i.h.bf16 %v9483_v24 }
 0x10c   :  { %v7381_v44 = vunpack.i.h.bf16 %v9525_v40  ;;  %v7380_v16 = vunpack.i.l.bf16 %v9525_v40  ;;  %v1687_v55 = vsel %vm1526_vm2, %v9169_v4, %v955_v12  ;;  %v13676_v60 = vunpack.i.l.bf16 %v9442_v34 }
 0x10d   :  { %v9557_v1 = vpop.permute.xlu1 %7393  ;;  %v7389_v19 = vpop.permute.xlu0 %7388  ;;  %v516_v11 = vsel %vm13489_vm14, %v7385_v45, %v13673_v63  ;;  %v9582_v63 = vsel %vm13432_vm4, %v13675_v52, %v7291_v0  ;;  %v13677_v52 = vld [vmem:[#allocation29_spill] sm:$0xff]  ;;  %v1689_v4 = vsel %vm1526_vm2, %v9033_v37, %v957_v50  ;;  %vm13452_vm4 = vcmask 695296  }
 0x10e   :  { %13672 = vst [vmem:[#allocation17_spill] sm:$0xff] %v9557_v1  ;;  %v7395_v28 = vunpack.i.l.bf16 %v9557_v1  ;;  %v13674_v33 = vunpack.i.h.bf16 %v9557_v1  ;;  %v958_v24 = vsel %vm954_vm15, %v7356_v32, %v13676_v60  ;;  %v7390_v3 = vunpack.i.l.bf16 %v7389_v19 }
 0x10f   :  { %7678 = vrot.lane.b32.xlu0 %v8990_v29, %s8385_s1  ;;  %7683 = vrot.lane.b32.xlu1 %v13669_v27, %s8386_s12  ;;  %v1597_v0 = vsel %vm13537_vm8, %v13677_v52, %v516_v11  ;;  %v1043_v60 = vsel %vm13474_vm10, %v7370_v51, %v7365_v58  ;;  %v13678_v32 = vunpack.i.l.bf16 %v9481_v18  ;;  %v1132_v50 = vsel %vm13434_vm9, %v7380_v16, %v7381_v44 }
 0x110   :  { %v1135_v59 = vsel %vm13434_vm9, %v7395_v28, %v13674_v33  ;;  %v1688_v33 = vsel %vm1526_vm2, %v9054_v5, %v956_v61  ;;  %v1690_v5 = vsel %vm1526_vm2, %v9198_v15, %v958_v24  ;;  %v1620_v15 = vsel %vm1618_vm11, %v1597_v0, %v8928_v23 }
 0x111   :  { %v9590_v49 = vsel %vm1572_vm6, %v1713_v26, %v1135_v59  ;;  %v7404_v40 = vpop.permute.xlu1 %7403  ;;  %v9592_v2 = vpop.permute.xlu0 %7398  ;;  %v1710_v12 = vsel %vm13538_vm3, %v1688_v33, %v1044_v22  ;;  %v7391_v59 = vunpack.i.h.bf16 %v7389_v19  ;;  %v1045_v26 = vsel %vm13474_vm10, %v7366_v46, %v7371_v53 }
 0x112   :  { %v7405_v1 = vunpack.i.l.bf16 %v7404_v40  ;;  %v1046_v37 = vsel %vm13474_vm10, %v7371_v53, %v13678_v32  ;;  %v7406_v61 = vunpack.i.h.bf16 %v7404_v40  ;;  %v7401_v58 = vunpack.i.h.bf16 %v9592_v2 }
 0x113   :  { %7688 = vrot.lane.b32.xlu0 %v8990_v29, %s8386_s12  ;;  %7693 = vrot.lane.b32.xlu1 %v13669_v27, %s8387_s13  ;;  %v7400_v19 = vunpack.i.l.bf16 %v9592_v2  ;;  %v1709_v46 = vsel %vm13538_vm3, %v1687_v55, %v1043_v60  ;;  %v1131_v11 = vsel %vm13434_vm9, %v7390_v3, %v7380_v16  ;;  %v1711_v40 = vsel %vm13538_vm3, %v1689_v4, %v1045_v26 }
 0x114   :  { %v515_v53 = vsel %vm13489_vm14, %v7405_v1, %v7385_v45  ;;  %v1712_v33 = vsel %vm13538_vm3, %v1690_v5, %v1046_v37  ;;  %v1133_v2 = vsel %vm13434_vm9, %v7381_v44, %v7391_v59  ;;  %v1134_v23 = vsel %vm13434_vm9, %v7391_v59, %v7395_v28 }
 0x115   :  { %v9615_v22 = vpop.permute.xlu1 %7413  ;;  %v9617_v51 = vpop.permute.xlu0 %7408  ;;  %v1643_v1 = vsel %vm1641_vm12, %v1620_v15, %v8947_v25  ;;  %v1732_v45 = vsel %vm1572_vm6, %v1710_v12, %v1132_v50  ;;  %v1731_v16 = vsel %vm1572_vm6, %v1709_v46, %v1131_v11  ;;  %v13679_v44 = vunpack.i.h.bf16 %v9523_v54 }
 0x116   :  { %v7410_v24 = vunpack.i.l.bf16 %v9617_v51  ;;  %v13438_v55 = vunpack.i.h.bf16 %v9617_v51  ;;  %v1220_v52 = vsel %vm13483_vm1, %v7400_v19, %v7401_v58  ;;  %v1596_v28 = vsel %vm13537_vm8, %v9066_v9, %v515_v53  ;;  %v13680_v9 = vld [vmem:[#allocation33_spill] sm:$0xff] }
 0x117   :  { %7698 = vrot.lane.b32.xlu0 %v8990_v29, %s8387_s13  ;;  %7703 = vrot.lane.b32.xlu1 %v13669_v27, %s8388_s14  ;;  %v517_v3 = vsel %vm13489_vm14, %v13679_v44, %v7406_v61  ;;  %v1733_v60 = vsel %vm1572_vm6, %v1711_v40, %v1133_v2  ;;  %v7415_v25 = vunpack.i.l.bf16 %v9615_v22  ;;  %vm13441_vm0 = vcmask 687104  }
 0x118   :  { %v518_v12 = vsel %vm13489_vm14, %v7406_v61, %v7410_v24  ;;  %v7416_v54 = vunpack.i.h.bf16 %v9615_v22  ;;  %v9658_v26 = vsel %vm1664_vm13, %v1643_v1, %v13680_v9  ;;  %v1734_v32 = vsel %vm1572_vm6, %v1712_v33, %v1134_v23  ;;  %v13681_v22 = vld [vmem:[#allocation31_spill] sm:$0xff] }
 0x119   :  { %v7424_v0 = vpop.permute.xlu1 %7423  ;;  %v9642_v4 = vpop.permute.xlu0 %7418  ;;  %v519_v37 = vsel %vm13489_vm14, %v7410_v24, %v13438_v55  ;;  %v1754_v50 = vsel %vm13537_vm8, %v1732_v45, %v1220_v52  ;;  %v1619_v61 = vsel %vm1618_vm11, %v1596_v28, %v9098_v42  ;;  %v1598_v15 = vsel %vm13537_vm8, %v13681_v22, %v517_v3  ;;  %v13683_v28 = vld [vmem:[#allocation35_spill] sm:$0xff] }
 0x11a   :  { %v13436_v59 = vunpack.i.h.bf16 %v9642_v4  ;;  %v7420_v5 = vunpack.i.l.bf16 %v9642_v4  ;;  %v7426_v46 = vunpack.i.h.bf16 %v7424_v0  ;;  %v7425_v11 = vunpack.i.l.bf16 %v7424_v0 }
 0x11b   :  { %7708 = vrot.lane.b32.xlu0 %v13669_v27, %s8389_s15  ;;  %7713 = vrot.lane.b32.xlu1 %v8990_v29, %s8388_s14  ;;  %vm13439_vm9 = vcmask 556032   ;;  %v1599_v24 = vsel %vm13537_vm8, %v9069_v14, %v518_v12  ;;  %v1219_v2 = vsel %vm13483_vm1, %v7415_v25, %v7400_v19  ;;  %v7305_v45 = vunpack.i.l.bf16 %v9241_v35  ;;  %v13682_v14 = vld [vmem:[#allocation30_spill] sm:$0xff] }
 0x11c   :  { %v1223_v53 = vsel %vm13483_vm1, %v7420_v5, %v13436_v59  ;;  %v1221_v44 = vsel %vm13483_vm1, %v7401_v58, %v7416_v54  ;;  %v1600_v3 = vsel %vm13537_vm8, %v9074_v13, %v519_v37  ;;  %v1622_v58 = vsel %vm1618_vm11, %v1599_v24, %v13683_v28  ;;  %v13684_v37 = vld [vmem:[#allocation41_spill] sm:$0xff]  ;;  %v13685_v59 = vld [vmem:[#allocation38_spill] sm:$0xff] }
 0x11d   :  { %v9672_v40 = vpop.permute.xlu1 %7433  ;;  %v7429_v33 = vpop.permute.xlu0 %7428  ;;  %v1757_v42 = vsel %vm13537_vm8, %v9590_v49, %v1223_v53  ;;  %v1621_v49 = vsel %vm1618_vm11, %v1598_v15, %v13682_v14  ;;  %v1308_v9 = vsel %vm13452_vm4, %v7425_v11, %v7426_v46  ;;  %v9700_v22 = vsel %vm1641_vm12, %v1619_v61, %v13684_v37 }
 0x11e   :  { %v13435_v23 = vunpack.i.h.bf16 %v9672_v40  ;;  %v7435_v1 = vunpack.i.l.bf16 %v9672_v40  ;;  %v7431_v52 = vunpack.i.h.bf16 %v7429_v33  ;;  %v7430_v0 = vunpack.i.l.bf16 %v7429_v33 }
 0x11f   :  { %7718 = vrot.lane.b32.xlu0 %v8990_v29, %s8389_s15  ;;  %7723 = vrot.lane.b32.xlu1 %v13669_v27, %s8390_s18  ;;  %v1753_v15 = vsel %vm13537_vm8, %v1731_v16, %v1219_v2  ;;  %v1222_v53 = vsel %vm13483_vm1, %v7416_v54, %v7420_v5  ;;  %v1623_v24 = vsel %vm1618_vm11, %v1600_v3, %v13685_v59 }
 0x120   :  { %v1311_v19 = vsel %vm13452_vm4, %v7435_v1, %v13435_v23  ;;  %v1307_v54 = vsel %vm13452_vm4, %v7430_v0, %v7425_v11  ;;  %v1776_v5 = vsel %vm1618_vm11, %v1754_v50, %v1308_v9  ;;  %v1310_v2 = vsel %vm13452_vm4, %v7431_v52, %v7435_v1  ;;  %v13688_v1 = vld [vmem:[#allocation48_spill] sm:$0xff] }
 0x121   :  { %v1779_v13 = vsel %vm1618_vm11, %v1757_v42, %v1311_v19  ;;  %v7444_v25 = vpop.permute.xlu1 %7443  ;;  %v7439_v12 = vpop.permute.xlu0 %7438  ;;  %v13686_v42 = vld [vmem:[#allocation36_spill] sm:$0xff]  ;;  %v1755_v59 = vsel %vm13537_vm8, %v1733_v60, %v1221_v44  ;;  %v1309_v3 = vsel %vm13452_vm4, %v7426_v46, %v7431_v52  ;;  %v7301_v0 = vunpack.i.h.bf16 %v13688_v1 }
 0x122   :  { %v7445_v14 = vunpack.i.l.bf16 %v7444_v25  ;;  %v7441_v23 = vunpack.i.h.bf16 %v7439_v12  ;;  %v7440_v33 = vunpack.i.l.bf16 %v7439_v12  ;;  %v7446_v28 = vunpack.i.h.bf16 %v7444_v25  ;;  %v13687_v19 = vld [vmem:[#allocation32_spill] sm:$0xff] }
 0x123   :  { %7728 = vrot.lane.b32.xlu0 %v8990_v29, %s8390_s18  ;;  %7733 = vrot.lane.b32.xlu1 %v13669_v27, %s8391_s19  ;;  %v1645_v61 = vsel %vm1641_vm12, %v1622_v58, %v13686_v42  ;;  %v1644_v16 = vsel %vm1641_vm12, %v1621_v49, %v13687_v19  ;;  %v1756_v42 = vsel %vm13537_vm8, %v1734_v32, %v1222_v53 }
 0x124   :  { %v1396_v37 = vsel %vm13441_vm0, %v7440_v33, %v7441_v23  ;;  %v1395_v58 = vsel %vm13441_vm0, %v7445_v14, %v7440_v33  ;;  %v1775_v60 = vsel %vm1618_vm11, %v1753_v15, %v1307_v54  ;;  %v1778_v46 = vsel %vm1618_vm11, %v1756_v42, %v1310_v2 }
 0x125   :  { %v7454_v25 = vpop.permute.xlu1 %7453  ;;  %v9719_v12 = vpop.permute.xlu0 %7448  ;;  %v1397_v32 = vsel %vm13441_vm0, %v7441_v23, %v7446_v28  ;;  %v1798_v9 = vsel %vm1641_vm12, %v1776_v5, %v1396_v37  ;;  %v1797_v54 = vsel %vm1641_vm12, %v1775_v60, %v1395_v58  ;;  %v1777_v23 = vsel %vm1618_vm11, %v1755_v59, %v1309_v3 }
 0x126   :  { %v7456_v49 = vunpack.i.h.bf16 %v7454_v25  ;;  %v7455_v19 = vunpack.i.l.bf16 %v7454_v25  ;;  %v13437_v11 = vunpack.i.h.bf16 %v9719_v12  ;;  %v7450_v50 = vunpack.i.l.bf16 %v9719_v12 }
 0x127   :  { %7738 = vrot.lane.b32.xlu0 %v8990_v29, %s8391_s19  ;;  %7743 = vrot.lane.b32.xlu1 %v13669_v27, %s8392_s20  ;;  %v7300_v5 = vunpack.i.l.bf16 %v13688_v1  ;;  %v1799_v59 = vsel %vm1641_vm12, %v1777_v23, %v1397_v32  ;;  %v13694_v23 = vld [vmem:[#allocation15_spill] sm:$0xff] }
 0x128   :  { %v1399_v44 = vsel %vm13441_vm0, %v7450_v50, %v13437_v11  ;;  %v1484_v52 = vsel %vm13439_vm9, %v7455_v19, %v7456_v49  ;;  %v1398_v53 = vsel %vm13441_vm0, %v7446_v28, %v7450_v50 }
 0x129   :  { %v1801_v14 = vsel %vm1641_vm12, %v1779_v13, %v1399_v44  ;;  %v9741_v33 = vpop.permute.xlu1 %7463  ;;  %v7459_v25 = vpop.permute.xlu0 %7458  ;;  %v1820_v15 = vsel %vm1664_vm13, %v1798_v9, %v1484_v52  ;;  %v13689_v13 = vld [vmem:[#allocation16_spill] sm:$0xff]  ;;  %v1800_v37 = vsel %vm1641_vm12, %v1778_v46, %v1398_v53  ;;  %v13690_v9 = vld [vmem:[#allocation42_spill] sm:$0xff] }
 0x12a   :  { %v13446_v2 = vunpack.i.h.bf16 %v9741_v33  ;;  %v7465_v42 = vunpack.i.l.bf16 %v9741_v33  ;;  %v7461_v11 = vunpack.i.h.bf16 %v7459_v25  ;;  %v7460_v55 = vunpack.i.l.bf16 %v7459_v25  ;;  %v13693_v25 = vld [vmem:[#allocation40_spill] sm:$0xff] }
 0x12b   :  { %7748 = vrot.lane.b32.xlu0 %v8990_v29, %s8392_s20  ;;  %7753 = vrot.lane.b32.xlu1 %v13689_v13, %s8393_s21  ;;  %v6425_v28 = vpack.c.bf16 %v1820_v15, %v9658_v26  ;;  %v1646_v15 = vsel %vm1641_vm12, %v1623_v24, %v13693_v25  ;;  %v13448_v24 = vunpack.i.h.bf16 %v9266_v48 }
 0x12c   :  { %v1487_v3 = vsel %vm13439_vm9, %v7465_v42, %v13446_v2  ;;  %v1483_v58 = vsel %vm13439_vm9, %v7460_v55, %v7455_v19  ;;  %v1486_v50 = vsel %vm13439_vm9, %v7461_v11, %v7465_v42  ;;  %v1485_v60 = vsel %vm13439_vm9, %v7456_v49, %v7461_v11  ;;  %v13691_v19 = vld [vmem:[#allocation39_spill] sm:$0xff]  ;;  %v13692_v11 = vld [vmem:[#allocation34_spill] sm:$0xff] }
 0x12d   :  { %6426 = vmatprep.subr.bf16.mxu0 %v6425_v28  ;;  %v9762_v29 = vpop.permute.xlu1 %7473  ;;  %v9764_v44 = vpop.permute.xlu0 %7468  ;;  %v1819_v26 = vsel %vm1664_vm13, %v1797_v54, %v1483_v58  ;;  %v1822_v46 = vsel %vm1664_vm13, %v1800_v37, %v1486_v50  ;;  %v1821_v32 = vsel %vm1664_vm13, %v1799_v59, %v1485_v60  ;;  %v9770_v52 = vsel %vm1664_vm13, %v1801_v14, %v1487_v3 }
 0x12e   :  { %v1665_v55 = vsel %vm1664_vm13, %v9700_v22, %v13690_v9  ;;  %v1668_v49 = vsel %vm1664_vm13, %v1645_v61, %v13691_v19  ;;  %v1667_v53 = vsel %vm1664_vm13, %v1644_v16, %v13692_v11  ;;  %v7306_v54 = vunpack.i.h.bf16 %v9241_v35 }
 0x12f   :  { %7758 = vrot.lane.b32.xlu0 %v13694_v23, %s8393_s21  ;;  %7763 = vrot.lane.b32.xlu1 %v13689_v13, %s8394_s22  ;;  %v6427_v14 = vpack.c.bf16 %v1819_v26, %v1665_v55  ;;  %v6435_v42 = vpack.c.bf16 %v1822_v46, %v1668_v49  ;;  %v6437_v22 = vpack.c.bf16 %v1821_v32, %v1667_v53  ;;  %v13695_v16 = vunpack.i.h.bf16 %v8982_v21 }
 0x130   :  { %v1561_v61 = vsel %vm13538_vm3, %v9499_v39, %v9541_v31  ;;  %v7310_v37 = vunpack.i.l.bf16 %v9266_v48  ;;  %v9797_v59 = vsel %vm1572_vm6, %v9544_v43, %v9552_v20  ;;  %v1902_v3 = vsel %vm13450_vm5, %v7300_v5, %v7301_v0 }
 0x131   :  { %v1901_v28 = vsel %vm13450_vm5, %v13695_v16, %v7300_v5  ;;  %13696 = vst [vmem:[#allocation11_spill] sm:$0xff] %v9797_v59  ;;  %6428 = vmatpush1.bf16.msra.mxu0 %v6427_v14  ;;  %v9802_v58 = vpop.permute.xlu1 %7483  ;;  %v9804_v31 = vpop.permute.xlu0 %7478  ;;  %v9809_v21 = vsel %vm1572_vm6, %v9547_v56, %v9582_v63  ;;  %v9813_v39 = vsel %vm1572_vm6, %v1561_v61, %v9555_v62  ;;  %v13699_v20 = vunpack.i.h.bf16 %v8980_v30  ;;  %v13701_v5 = vld [vmem:[#allocation43_spill] sm:$0xff] }
 0x132   :  { %13697 = vst [vmem:[#allocation14_spill] sm:$0xff] %v9809_v21  ;;  %13698 = vst [vmem:[#allocation25_spill] sm:$0xff] %v9813_v39  ;;  %6436 = vmatprep.subr.bf16.mxu1 %v6435_v42  ;;  %v9824_v50 = vsel %vm1664_vm13, %v1646_v15, %v13701_v5  ;;  %v9829_v56 = vsel %vm13444_vm7, %v7305_v45, %v7306_v54  ;;  %v13703_v63 = vld [vmem:[#allocation47_spill] sm:$0xff]  ;;  %v7315_v60 = vunpack.i.l.bf16 %v9264_v41  ;;  %v13447_v35 = vunpack.i.h.bf16 %v9264_v41 }
 0x133   :  { %v9820_v43 = vsel %vm13444_vm7, %v13699_v20, %v7305_v45  ;;  %13702 = vst [vmem:[#allocation29_spill] sm:$0xff] %v9829_v56  ;;  %v1960_v62 = vsel %vm13537_vm8, %v13703_v63, %v1901_v28  ;;  %6438 = vmatpush1.bf16.msra.mxu1 %v6437_v22  ;;  %7768 = vrot.lane.b32.xlu0 %v13694_v23, %s8394_s22  ;;  %v13442_v32 = vunpack.i.h.bf16 %v9289_v17  ;;  %v7325_v9 = vunpack.i.l.bf16 %v9289_v17 }
 0x134   :  { %13700 = vst [vmem:[#allocation13_spill] sm:$0xff] %v9820_v43  ;;  %v1961_v26 = vsel %vm13537_vm8, %v9809_v21, %v1902_v3  ;;  %v1903_v45 = vsel %vm13450_vm5, %v7301_v0, %v7310_v37  ;;  %v1904_v46 = vsel %vm13450_vm5, %v7310_v37, %v13448_v24  ;;  %7773 = vrot.lane.b32.xlu1 %v13689_v13, %s8396_s24  ;;  %v13440_v55 = vunpack.i.h.bf16 %v9804_v31  ;;  %v13797_v21 = vld [vmem:[#allocation49_spill] sm:$0xff] }
 0x135   :  { %v13451_v19 = vunpack.i.l.bf16 %v9804_v31  ;;  %v9853_v49 = vpop.permute.xlu1 %7493  ;;  %v9855_v1 = vpop.permute.xlu0 %7488  ;;  %v9858_v0 = vsel %vm13444_vm7, %v7306_v54, %v7315_v60  ;;  %v7321_v11 = vunpack.i.h.bf16 %v9291_v10  ;;  %v1982_v53 = vsel %vm1618_vm11, %v1960_v62, %v9820_v43 }
 0x136   :  { %13704 = vst [vmem:[#allocation33_spill] sm:$0xff] %v9858_v0  ;;  %v1983_v25 = vsel %vm1618_vm11, %v1961_v26, %v9829_v56  ;;  %v9870_v15 = vsel %vm13444_vm7, %v7315_v60, %v13447_v35  ;;  %v1962_v54 = vsel %vm13537_vm8, %v9813_v39, %v1903_v45  ;;  %v1963_v14 = vsel %vm13537_vm8, %v9797_v59, %v1904_v46 }
 0x137   :  { %7778 = vrot.lane.b32.xlu0 %v13689_v13, %s8395_s23  ;;  %13705 = vst [vmem:[#allocation31_spill] sm:$0xff] %v9870_v15  ;;  %v7320_v42 = vunpack.i.l.bf16 %v9291_v10  ;;  %vm13706_vm9 = vcmask 875520   ;;  %v13445_v61 = vunpack.i.h.bf16 %v9329_v6  ;;  %v7335_v16 = vunpack.i.l.bf16 %v9329_v6 }
 0x138   :  { %7783 = vrot.lane.b32.xlu1 %v13694_v23, %s8396_s24  ;;  %v9882_v22 = vsel %vm13706_vm9, %v7325_v9, %v13442_v32  ;;  %v963_v28 = vsel %vm954_vm15, %v13451_v19, %v13440_v55  ;;  %v7331_v3 = vunpack.i.h.bf16 %v9331_v7  ;;  %v7330_v20 = vunpack.i.l.bf16 %v9331_v7  ;;  %vm13711_vm0 = vmmov %vm13706_vm9 }
 0x139   :  { %13707 = vst [vmem:[#allocation30_spill] sm:$0xff] %v9882_v22  ;;  %v9891_v37 = vpop.permute.xlu1 %7503  ;;  %v9893_v10 = vpop.permute.xlu0 %7498  ;;  %v1985_v60 = vsel %vm1618_vm11, %v1963_v14, %v9870_v15  ;;  %v9902_v26 = vsel %vm13706_vm9, %v7321_v11, %v7325_v9  ;;  %v1984_v45 = vsel %vm1618_vm11, %v1962_v54, %v9858_v0  ;;  %v1695_v46 = vsel %vm1526_vm2, %v9461_v36, %v963_v28 }
 0x13a   :  { %v13443_v5 = vunpack.i.h.bf16 %v9893_v10  ;;  %v13449_v62 = vunpack.i.l.bf16 %v9893_v10  ;;  %13708 = vst [vmem:[#allocation35_spill] sm:$0xff] %v9902_v26  ;;  %v2007_v9 = vsel %vm1641_vm12, %v1985_v60, %v9882_v22  ;;  %v13709_v14 = vunpack.i.h.bf16 %v9021_v57 }
 0x13b   :  { %7788 = vrot.lane.b32.xlu0 %v13689_v13, %s8397_s25  ;;  %v9925_v54 = vsel %vm13711_vm0, %v7320_v42, %v7321_v11  ;;  %vm13713_vm7 = vcmask 867328   ;;  %v13715_v57 = vunpack.i.h.bf16 %v9059_v8  ;;  %v13734_v59 = vunpack.i.h.bf16 %v9762_v29 }
 0x13c   :  { %v1051_v7 = vsel %vm13474_vm10, %v13449_v62, %v13443_v5  ;;  %7793 = vrot.lane.b32.xlu1 %v13694_v23, %s8395_s23  ;;  %v9922_v55 = vsel %vm13706_vm9, %v13709_v14, %v7320_v42  ;;  %13712 = vst [vmem:[#allocation38_spill] sm:$0xff] %v9925_v54  ;;  %v2006_v5 = vsel %vm1641_vm12, %v1984_v45, %v9902_v26  ;;  %vm13716_vm9 = vmmov %vm13713_vm7  ;;  %v13453_v42 = vunpack.i.h.bf16 %v9365_v47 }
 0x13d   :  { %13710 = vst [vmem:[#allocation41_spill] sm:$0xff] %v9922_v55  ;;  %v1717_v36 = vsel %vm13538_vm3, %v1695_v46, %v1051_v7  ;;  %v9928_v28 = vpop.permute.xlu1 %7513  ;;  %v9930_v32 = vpop.permute.xlu0 %7508  ;;  %v9937_v60 = vsel %vm13713_vm7, %v7335_v16, %v13445_v61  ;;  %v9942_v14 = vsel %vm13716_vm9, %v13715_v57, %v7330_v20  ;;  %vm13718_vm0 = vmmov %vm13713_vm7  ;;  %v7345_v46 = vunpack.i.l.bf16 %v9365_v47 }
 0x13e   :  { %13714 = vst [vmem:[#allocation36_spill] sm:$0xff] %v9937_v60  ;;  %13717 = vst [vmem:[#allocation32_spill] sm:$0xff] %v9942_v14  ;;  %v9945_v11 = vsel %vm13718_vm0, %v7330_v20, %v7331_v3  ;;  %v7341_v7 = vunpack.i.h.bf16 %v9367_v38  ;;  %v7340_v45 = vunpack.i.l.bf16 %v9367_v38  ;;  %v2004_v8 = vsel %vm1641_vm12, %v1982_v53, %v9922_v55 }
 0x13f   :  { %13719 = vst [vmem:[#allocation48_spill] sm:$0xff] %v9945_v11  ;;  %7798 = vrot.lane.b32.xlu0 %v13694_v23, %s8397_s25  ;;  %v2005_v57 = vsel %vm1641_vm12, %v1983_v25, %v9925_v54  ;;  %vm13720_vm7 = vmmov %vm13718_vm0  ;;  %vm2149_vm9 = vcmask 547840   ;;  %v2026_v38 = vsel %vm1664_vm13, %v2004_v8, %v9942_v14  ;;  %v9972_v25 = vsel %vm1664_vm13, %v2007_v9, %v9937_v60  ;;  %v13725_v8 = vld [vmem:[#allocation37_spill] sm:$0xff] }
 0x140   :  { %v9958_v20 = vsel %vm13720_vm7, %v7331_v3, %v7335_v16  ;;  %7803 = vrot.lane.b32.xlu1 %v13689_v13, %s8398_s26  ;;  %v2027_v53 = vsel %vm1664_vm13, %v2005_v57, %v9945_v11  ;;  %v7475_v3 = vunpack.i.l.bf16 %v9762_v29  ;;  %vm13723_vm0 = vcmask 859136  }
 0x141   :  { %13721 = vst [vmem:[#allocation16_spill] sm:$0xff] %v9958_v20  ;;  %v9962_v61 = vpop.permute.xlu1 %7523  ;;  %v9964_v30 = vpop.permute.xlu0 %7518  ;;  %v9981_v24 = vsel %vm13723_vm0, %v7345_v46, %v13453_v42  ;;  %v13726_v62 = vunpack.i.h.bf16 %v13725_v8  ;;  %vm13727_vm7 = vmmov %vm13723_vm0  ;;  %v9995_v19 = vsel %vm1664_vm13, %v2006_v5, %v9958_v20  ;;  %v7471_v42 = vunpack.i.h.bf16 %v9764_v44 }
 0x142   :  { %13722 = vst [vmem:[#allocation42_spill] sm:$0xff] %v9962_v61  ;;  %v13458_v2 = vunpack.i.h.bf16 %v9962_v61  ;;  %v13459_v35 = vunpack.i.l.bf16 %v9962_v61  ;;  %13724 = vst [vmem:[#allocation39_spill] sm:$0xff] %v9981_v24  ;;  %v7470_v8 = vunpack.i.l.bf16 %v9764_v44  ;;  %v7832_v60 = vpack.i.bf16 %v2027_v53, %v2026_v38  ;;  %v13731_v44 = vld [vmem:[#allocation44_spill] sm:$0xff] }
 0x143   :  { %v9986_v57 = vsel %vm13727_vm7, %v13726_v62, %v7340_v45  ;;  %vm13728_vm5 = vmmov %vm13723_vm0  ;;  %7808 = vrot.lane.b32.xlu0 %v13694_v23, %s8398_s26  ;;  %v13732_v22 = vunpack.i.h.bf16 %v13731_v44  ;;  %v13737_v44 = vld [vmem:[#allocation12_spill] sm:$0xff]  ;;  %v13739_v38 = vunpack.i.h.bf16 %v9481_v18  ;;  %v7496_v20 = vunpack.i.h.bf16 %v9853_v49 }
 0x144   :  { %v9989_v9 = vsel %vm13728_vm5, %v7340_v45, %v7341_v7  ;;  %vm13729_vm4 = vmmov %vm13723_vm0  ;;  %vm13730_vm5 = vcmask 711680   ;;  %7813 = vrot.lane.b32.xlu1 %v13689_v13, %s8399_s27  ;;  %v7485_v45 = vunpack.i.l.bf16 %v9802_v58  ;;  %v7490_v14 = vunpack.i.l.bf16 %v9855_v1 }
 0x145   :  { %v9998_v16 = vsel %vm13729_vm4, %v7341_v7, %v7345_v46  ;;  %v1139_v62 = vsel %vm13730_vm5, %v13459_v35, %v13458_v2  ;;  %v10013_v46 = vpop.permute.xlu0 %7528  ;;  %v10015_v7 = vpop.permute.xlu1 %7533  ;;  %vm13733_vm4 = vcmask 1039360   ;;  %v7837_v11 = vpack.i.bf16 %v9989_v9, %v9986_v57 }
 0x146   :  { %v10011_v5 = vsel %vm1572_vm6, %v1717_v36, %v1139_v62  ;;  %v264_v15 = vsel %vm13733_vm4, %v13732_v22, %v7475_v3  ;;  %vm13735_vm0 = vmmov %vm13733_vm4  ;;  %v7842_v36 = vpack.i.bf16 %v9972_v25, %v9995_v19  ;;  %v13736_v22 = vunpack.i.h.bf16 %v9442_v34  ;;  %v13738_v19 = vld [vmem:[#allocation18_spill] sm:$0xff] }
 0x147   :  { %v265_v2 = vsel %vm13735_vm0, %v7475_v3, %v13734_v59  ;;  %7818 = vrot.lane.b32.xlu0 %v13694_v23, %s8399_s27  ;;  %v961_v59 = vsel %vm954_vm15, %v7470_v8, %v7471_v42  ;;  %v1540_v35 = vsel %vm1526_vm2, %v13737_v44, %v264_v15  ;;  %v1048_v34 = vsel %vm13474_vm10, %v13739_v38, %v7485_v45  ;;  %v13741_v44 = vld [vmem:[#allocation62_spill] sm:$0xff]  ;;  %v13742_v38 = vld [vmem:[#allocation63_spill] sm:$0xff] }
 0x148   :  { %v960_v53 = vsel %vm954_vm15, %v13736_v22, %v7470_v8  ;;  %7823 = vrot.lane.b32.xlu1 %v13689_v13, %s8400_s30  ;;  %v1541_v25 = vsel %vm1526_vm2, %v13738_v19, %v265_v2  ;;  %v7495_v22 = vunpack.i.l.bf16 %v9853_v49  ;;  %v13740_v62 = vunpack.i.h.bf16 %v9802_v58 }
 0x149   :  { %v10048_v8 = vpop.permute.xlu0 %7538  ;;  %v10050_v3 = vpop.permute.xlu1 %7543  ;;  %v1692_v18 = vsel %vm1526_vm2, %v13741_v44, %v960_v53  ;;  %v1693_v19 = vsel %vm1526_vm2, %v13742_v38, %v961_v59  ;;  %v13743_v49 = vunpack.i.l.bf16 %v9804_v31  ;;  %v13744_v2 = vunpack.i.h.bf16 %v10015_v7 }
 0x14a   :  { %v1049_v13 = vsel %vm13474_vm10, %v7485_v45, %v13740_v62  ;;  %v13464_v15 = vunpack.i.h.bf16 %v10048_v8  ;;  %v1714_v45 = vsel %vm13538_vm3, %v1692_v18, %v1048_v34  ;;  %v13745_v53 = vunpack.i.l.bf16 %v10015_v7  ;;  %v13749_v34 = vld [vmem:[#allocation45_spill] sm:$0xff] }
 0x14b   :  { %7828 = vrot.lane.b32.xlu0 %v13694_v23, %s8400_s30  ;;  %v962_v62 = vsel %vm954_vm15, %v7471_v42, %v13743_v49  ;;  %v13746_v59 = vunpack.i.l.bf16 %v10048_v8  ;;  %vm13467_vm7 = vmmov 1   ;;  %v1715_v42 = vsel %vm13538_vm3, %v1693_v19, %v1049_v13 }
 0x14c   :  { %v2151_v44 = vsel %vm2149_vm9, %v13745_v53, %v13744_v2  ;;  %7833 = vrot.lane.b32.xlu1 %v7832_v60, %s8401_s0  ;;  %vm10083_vm5 = vmpackc.low %vm1526_vm2, %vm13467_vm7  ;;  %v13750_v18 = vunpack.i.h.bf16 %v13749_v34  ;;  %vm13751_vm4 = vcmask 1031168   ;;  %v7505_v49 = vunpack.i.l.bf16 %v9891_v37 }
 0x14d   :  { %v2172_v38 = vsel %vm2149_vm9, %v13746_v59, %v13464_v15  ;;  %v10092_v53 = vpop.permute.xlu0 %7548  ;;  %v10094_v59 = vpop.permute.xlu1 %7553  ;;  %vm13753_vm0 = vmmov %vm13751_vm4  ;;  %v7506_v26 = vunpack.i.h.bf16 %v9891_v37  ;;  %v13754_v13 = vunpack.i.h.bf16 %v9762_v29  ;;  %vm13755_vm7 = vcmask 1039360  }
 0x14e   :  { %v352_v2 = vsel %vm13751_vm4, %v13750_v18, %v7495_v22  ;;  %13752 = vst [vmem:[#allocation34_spill] sm:$0xff] %v10094_v59  ;;  %v6429_v60 = vpack.c.bf16 %v2172_v38, %v2151_v44  ;;  %v353_v15 = vsel %vm13753_vm0, %v7495_v22, %v7496_v20  ;;  %v13471_v0 = vunpack.i.h.bf16 %v10094_v59  ;;  %vm13757_vm4 = vmmov %vm13755_vm7  ;;  %v13758_v38 = vld [vmem:[#allocation64_spill] sm:$0xff] }
 0x14f   :  { %v13472_v54 = vunpack.i.l.bf16 %v10094_v59  ;;  %v266_v19 = vsel %vm13755_vm7, %v13754_v13, %v7490_v14  ;;  %v13756_v34 = vunpack.i.h.bf16 %v9855_v1  ;;  %v7520_v44 = vunpack.i.l.bf16 %v9964_v30  ;;  %7838 = vrot.lane.b32.xlu0 %v7837_v11, %s8401_s0  ;;  %v13759_v13 = vld [vmem:[#allocation17_spill] sm:$0xff] }
 0x150   :  { %6431 = vmatprep.subr.msk.bf16.mxu0 %vm10083_vm5, %v6429_v60  ;;  %v7515_v22 = vunpack.i.l.bf16 %v9928_v28  ;;  %v7510_v29 = vunpack.i.l.bf16 %v9930_v32  ;;  %7843 = vrot.lane.b32.xlu1 %v7842_v36, %s8401_s0  ;;  %v1694_v11 = vsel %vm1526_vm2, %v13758_v38, %v962_v62  ;;  %vm13761_vm7 = vcmask 711680  }
 0x151   :  { %v267_v18 = vsel %vm13757_vm4, %v7490_v14, %v13756_v34  ;;  %v1227_v14 = vsel %vm13483_vm1, %v13472_v54, %v13471_v0  ;;  %v13760_v34 = vunpack.i.h.bf16 %v13759_v13  ;;  %v10130_v39 = vpop.permute.xlu0 %7558  ;;  %v10132_v56 = vpop.permute.xlu1 %7563  ;;  %v1563_v0 = vsel %vm13538_vm3, %v1540_v35, %v352_v2  ;;  %vm13762_vm0 = vmmov %vm13761_vm7  ;;  %v13765_v54 = vld [vmem:[#allocation7_spill] sm:$0xff] }
 0x152   :  { %v10128_v55 = vsel %vm13537_vm8, %v10011_v5, %v1227_v14  ;;  %v1564_v36 = vsel %vm13538_vm3, %v1541_v25, %v353_v15  ;;  %v1137_v62 = vsel %vm13762_vm0, %v7505_v49, %v7506_v26  ;;  %v13763_v38 = vunpack.i.l.bf16 %v9893_v10  ;;  %v13766_v14 = vld [vmem:[#allocation19_spill] sm:$0xff] }
 0x153   :  { %v1136_v60 = vsel %vm13761_vm7, %v13760_v34, %v7505_v49  ;;  %v13764_v13 = vunpack.i.h.bf16 %v9802_v58  ;;  %v1542_v5 = vsel %vm1526_vm2, %v13765_v54, %v266_v19  ;;  %v1543_v37 = vsel %vm1526_vm2, %v13766_v14, %v267_v18  ;;  %v13769_v58 = vld [vmem:[#allocation46_spill] sm:$0xff] }
 0x154   :  { %v13767_v43 = vunpack.i.h.bf16 %v9964_v30  ;;  %v13768_v25 = vpack.i.bf16 %v9981_v24, %v9998_v16  ;;  %v10154_v15 = vsel %vm1572_vm6, %v1714_v45, %v1136_v60  ;;  %v13770_v2 = vunpack.i.h.bf16 %v13769_v58 }
 0x155   :  { %v1050_v34 = vsel %vm13474_vm10, %v13764_v13, %v13763_v38  ;;  %vm13771_vm4 = vcmask 1022976   ;;  %v13772_v54 = vunpack.i.h.bf16 %v9928_v28  ;;  %vm13774_vm0 = vcmask 1031168   ;;  %v10177_v58 = vpop.permute.xlu1 %7573 }
 0x156   :  { %v521_v35 = vsel %vm13489_vm14, %v7520_v44, %v13767_v43  ;;  %7848 = vrot.lane.b32.xlu0 %v13768_v25, %s8401_s0  ;;  %v440_v49 = vsel %vm13771_vm4, %v13770_v2, %v7515_v22  ;;  %vm13773_vm7 = vmmov %vm13771_vm4  ;;  %v354_v18 = vsel %vm13774_vm0, %v7496_v20, %v7510_v29  ;;  %v13775_v43 = vld [vmem:[#allocation8_spill] sm:$0xff]  ;;  %v10166_v38 = vsel %vm1572_vm6, %v1715_v42, %v1137_v62  ;;  %v13779_v2 = vld [vmem:[#allocation10_spill] sm:$0xff] }
 0x157   :  { %v441_v19 = vsel %vm13773_vm7, %v7515_v22, %v13772_v54  ;;  %1889 = vrot.lane.b32.xlu1 %v13775_v43, %s8388_s14  ;;  %v10169_v13 = vsel %vm13538_vm3, %v1694_v11, %v1050_v34  ;;  %v13776_v45 = vunpack.i.h.bf16 %v9930_v32  ;;  %vm13777_vm10 = vmmov %vm13774_vm0  ;;  %v13778_v14 = vunpack.i.h.bf16 %v9617_v51  ;;  %v7569_v22 = vpop.permute.xlu0 %7568 }
 0x158   :  { %v8404_v20 = vmov 0   ;;  %v1602_v42 = vsel %vm13537_vm8, %v13779_v2, %v521_v35  ;;  %v13476_v62 = vunpack.i.h.bf16 %v10092_v53  ;;  %v7550_v11 = vunpack.i.l.bf16 %v10092_v53  ;;  %v13782_v35 = vld [vmem:[#allocation9_spill] sm:$0xff] }
 0x159   :  { %v355_v60 = vsel %vm13777_vm10, %v7510_v29, %v13776_v45  ;;  %v520_v25 = vsel %vm13489_vm14, %v13778_v14, %v7520_v44  ;;  %8017 = vset.pattern.permute.xlu1 %v8404_v20  ;;  %v7570_v34 = vunpack.i.l.bf16 %v7569_v22  ;;  %vm13501_vm4 = vcmask 203776   ;;  %8343 = vset.pattern.permute.xlu0 %v8404_v20 }
 0x15a   :  { %v10184_v29 = vsel %vm1572_vm6, %v1563_v0, %v440_v49  ;;  %v10187_v51 = vsel %vm1572_vm6, %v1564_v36, %v441_v19  ;;  %v10190_v44 = vsel %vm13538_vm3, %v1542_v5, %v354_v18  ;;  %v7576_v54 = vunpack.i.h.bf16 %v10177_v58  ;;  %1936 = vrot.lane.b32.xlu0 %v13775_v43, %s8389_s15  ;;  %v13786_v18 = vld [vmem:[#allocation51_spill] sm:$0xff] }
 0x15b   :  { %13780 = vst [vmem:[#allocation40_spill] sm:$0xff] %v10184_v29  ;;  %13781 = vst [vmem:[#allocation15_spill] sm:$0xff] %v10187_v51  ;;  %v1601_v45 = vsel %vm13537_vm8, %v13782_v35, %v520_v25  ;;  %v7571_v14 = vunpack.i.h.bf16 %v7569_v22  ;;  %v13783_v20 = vunpack.i.l.bf16 %v10015_v7  ;;  %1940 = vrot.lane.b32.xlu1 %v13775_v43, %s8390_s18  ;;  %v10204_v36 = vsel %vm13538_vm3, %v1543_v37, %v355_v60  ;;  %v10216_v35 = vpop.permute.xlu1 %7583 }
 0x15c   :  { %v13784_v5 = vunpack.i.l.bf16 %v9962_v61  ;;  %vm13785_vm10 = vcmask 711680   ;;  %v1625_v25 = vsel %vm1618_vm11, %v1602_v42, %v13786_v18  ;;  %v13787_v22 = vunpack.i.l.bf16 %v10048_v8 }
 0x15d   :  { %v2150_v0 = vsel %vm2149_vm9, %v7570_v34, %v13783_v20  ;;  %v10214_v34 = vpop.permute.xlu0 %7578  ;;  %v7530_v20 = vunpack.i.l.bf16 %v10013_v46  ;;  %v523_v37 = vsel %vm13489_vm14, %v7550_v11, %v13476_v62  ;;  %v7531_v42 = vunpack.i.h.bf16 %v10013_v46 }
 0x15e   :  { %v1138_v19 = vsel %vm13785_vm10, %v7506_v26, %v13784_v5  ;;  %v2171_v2 = vsel %vm2149_vm9, %v7576_v54, %v13787_v22  ;;  %v7580_v26 = vunpack.i.l.bf16 %v10214_v34  ;;  %v13788_v5 = vunpack.i.h.bf16 %v9964_v30  ;;  %1944 = vrot.lane.b32.xlu0 %v13775_v43, %s8391_s19  ;;  %v13789_v22 = vld [vmem:[#allocation50_spill] sm:$0xff]  ;;  %s8413_s19 = smov 16  }
 0x15f   :  { %v6432_v18 = vpack.c.bf16 %v2171_v2, %v2150_v0  ;;  %v1624_v49 = vsel %vm1618_vm11, %v1601_v45, %v13789_v22  ;;  %v13790_v24 = vunpack.i.h.bf16 %v10015_v7  ;;  %v13791_v60 = vunpack.i.l.bf16 %v10177_v58  ;;  %1948 = vrot.lane.b32.xlu1 %v13775_v43, %s8392_s20  ;;  %v13794_v7 = vld [vmem:[#allocation28_spill] sm:$0xff]  ;;  %s8414_s20 = smov 72  }
 0x160   :  { %v522_v54 = vsel %vm13489_vm14, %v13788_v5, %v7550_v11  ;;  %v13792_v46 = vunpack.i.h.bf16 %v10048_v8  ;;  %v13793_v11 = vunpack.i.h.bf16 %v10214_v34  ;;  %v7545_v45 = vunpack.i.l.bf16 %v10050_v3  ;;  %v10253_v8 = vpop.permute.xlu1 %7593 }
 0x161   :  { %v2152_v62 = vsel %vm2149_vm9, %v13790_v24, %v7571_v14  ;;  %v2153_v61 = vsel %vm2149_vm9, %v7571_v14, %v13791_v60  ;;  %v1604_v24 = vsel %vm13537_vm8, %v13794_v7, %v523_v37  ;;  %6434 = vmatpush1.bf16.msk.msra.mxu0 %vm10083_vm5, %v6432_v18  ;;  %v10251_v14 = vpop.permute.xlu0 %7588  ;;  %v13795_v60 = vunpack.i.h.bf16 %v9642_v4  ;;  %v13796_v37 = vld [vmem:[#allocation55_spill] sm:$0xff]  ;;  %v13798_v4 = vld [vmem:[#allocation21_spill] sm:$0xff] }
 0x162   :  { %v2173_v30 = vsel %vm2149_vm9, %v13792_v46, %v7580_v26  ;;  %v2174_v5 = vsel %vm2149_vm9, %v7580_v26, %v13793_v11  ;;  %v13479_v43 = vunpack.i.h.bf16 %v10251_v14  ;;  %v13480_v22 = vunpack.i.l.bf16 %v10251_v14  ;;  %v10260_v46 = vld [vmem:[#allocation2] sm:$0xff]  ;;  %7853 = vrot.lane.b32.xlu0 %v13798_v4, %s8393_s21 }
 0x163   :  { %v6439_v0 = vpack.c.bf16 %v2174_v5, %v2153_v61  ;;  %v6442_v2 = vpack.c.bf16 %v2173_v30, %v2152_v62  ;;  %v1224_v26 = vsel %vm13483_vm1, %v13795_v60, %v7530_v20  ;;  %v1648_v11 = vsel %vm1641_vm12, %v1625_v25, %v13796_v37  ;;  %v13799_v62 = vld [vmem:[#allocation54_spill] sm:$0xff]  ;;  %v13800_v5 = vld [vmem:[#allocation53_spill] sm:$0xff] }
 0x164   :  { %v1225_v18 = vsel %vm13483_vm1, %v7530_v20, %v7531_v42  ;;  %v13481_v7 = vunpack.i.h.bf16 %v10050_v3  ;;  %v1603_v61 = vsel %vm13537_vm8, %v13797_v21, %v522_v54  ;;  %v1647_v30 = vsel %vm1641_vm12, %v1624_v49, %v13799_v62  ;;  %v13802_v54 = vld [vmem:[#allocation22_spill] sm:$0xff]  ;;  %5915 = vmatmul.mubr.msk.f32.vlgmr.msra.gmra.mrb[0].mxu0 %vm13501_vm4, %v10260_v46 }
 0x165   :  { %6441 = vmatprep.subr.msk.bf16.mxu1 %vm10083_vm5, %v6439_v0  ;;  %v1627_v60 = vsel %vm1618_vm11, %v1604_v24, %v13800_v5  ;;  %v7560_v20 = vunpack.i.l.bf16 %v10130_v39  ;;  %vm13801_vm7 = vcmask 695296   ;;  %7858 = vrot.lane.b32.xlu1 %v13802_v54, %s8393_s21  ;;  %v1738_v0 = vsel %vm1572_vm6, %v10169_v13, %v1138_v19  ;;  %v10295_v5 = vpop.permute.xlu0 %7598  ;;  %v13805_v19 = vld [vmem:[#allocation56_spill] sm:$0xff] }
 0x166   :  { %v1315_v21 = vsel %vm13801_vm7, %v13480_v22, %v13479_v43  ;;  %v13803_v49 = vunpack.i.h.bf16 %v9928_v28  ;;  %vm13804_vm0 = vcmask 1022976   ;;  %v7565_v37 = vunpack.i.l.bf16 %v10132_v56  ;;  %6444 = vmatpush1.bf16.msk.msra.mxu1 %vm10083_vm5, %v6442_v2  ;;  %v10297_v43 = vpop.permute.xlu1 %7603  ;;  %7863 = vrot.lane.b32.xlu0 %v13798_v4, %s8394_s22 }
 0x167   :  { %v1783_v62 = vsel %vm1618_vm11, %v10128_v55, %v1315_v21  ;;  %v1758_v28 = vsel %vm13537_vm8, %v10154_v15, %v1224_v26  ;;  %v1759_v13 = vsel %vm13537_vm8, %v10166_v38, %v1225_v18  ;;  %v13806_v55 = vld [vmem:[#allocation57_spill] sm:$0xff]  ;;  %v13807_v21 = vmov 0.0   ;;  %vm13808_vm10 = vmmov %vm13804_vm0  ;;  %v13810_v38 = vld [vmem:[#allocation52_spill] sm:$0xff] }
 0x168   :  { %v442_v24 = vsel %vm13804_vm0, %v13803_v49, %v7545_v45  ;;  %v10307_v49 = vsel %vm1664_vm13, %v1647_v30, %v13805_v19  ;;  %v10311_v2 = vsel %vm1664_vm13, %v1648_v11, %v13806_v55  ;;  %2473 = vmatprep.mubr.f32.mxu0 %v13807_v21  ;;  %v443_v22 = vsel %vm13808_vm10, %v7545_v45, %v13481_v7  ;;  %v13811_v18 = vld [vmem:[#allocation58_spill] sm:$0xff]  ;;  %vm13814_vm0 = vmmov %vm13801_vm7 }
 0x169   :  { %v13809_v25 = vunpack.i.l.bf16 %v10094_v59  ;;  %v1626_v26 = vsel %vm1618_vm11, %v1603_v61, %v13810_v38  ;;  %v1650_v11 = vsel %vm1641_vm12, %v1627_v60, %v13811_v18  ;;  %v10328_v30 = vsel %vm1572_vm6, %v10190_v44, %v442_v24  ;;  %7868 = vrot.lane.b32.xlu1 %v13802_v54, %s8394_s22  ;;  %v10345_v18 = vpop.permute.xlu0 %7608  ;;  %5918 = vmatmul.mubr.msk.f32.vlgmr.msra.gmra.mrb[0].mxu1 %vm13501_vm4, %v10260_v46 }
 0x16a   :  { %v13812_v19 = vunpack.i.h.bf16 %v10130_v39  ;;  %v7566_v55 = vunpack.i.h.bf16 %v10132_v56  ;;  %v13813_v61 = vunpack.i.h.bf16 %v9672_v40  ;;  %v13815_v60 = vunpack.i.h.bf16 %v9266_v48  ;;  %v10347_v56 = vpop.permute.xlu1 %7613  ;;  %v13818_v48 = vld [vmem:[#allocation59_spill] sm:$0xff]  ;;  %2544 = vmatprep.mubr.f32.mxu1 %v13807_v21  ;;  %7873 = vrot.lane.b32.xlu0 %v13798_v4, %s8396_s24 }
 0x16b   :  { %v1226_v15 = vsel %vm13483_vm1, %v7531_v42, %v13809_v25  ;;  %v7585_v42 = vunpack.i.l.bf16 %v10216_v35  ;;  %vm13816_vm10 = vcmask 891904   ;;  %v7586_v24 = vunpack.i.h.bf16 %v10216_v35  ;;  %v13819_v35 = vld [vmem:[#allocation60_spill] sm:$0xff] }
 0x16c   :  { %v1313_v45 = vsel %vm13801_vm7, %v7560_v20, %v13812_v19  ;;  %v1312_v25 = vsel %vm13814_vm0, %v13813_v61, %v7560_v20  ;;  %v1905_v44 = vsel %vm13816_vm10, %v13815_v60, %v7565_v37  ;;  %v7595_v38 = vunpack.i.l.bf16 %v10253_v8  ;;  %vm13820_vm7 = vmmov %vm13816_vm10 }
 0x16d   :  { %v10353_v40 = vsel %vm1572_vm6, %v10204_v36, %v443_v22  ;;  %v1760_v20 = vsel %vm13537_vm8, %v1738_v0, %v1226_v15  ;;  %v1649_v19 = vsel %vm1641_vm12, %v1626_v26, %v13818_v48  ;;  %v10361_v61 = vsel %vm1664_vm13, %v1650_v11, %v13819_v35  ;;  %7878 = vrot.lane.b32.xlu1 %v13798_v4, %s8395_s23 }
 0x16e   :  { %13817 = vst [vmem:[#allocation43_spill] sm:$0xff] %v10353_v40  ;;  %v1781_v60 = vsel %vm1618_vm11, %v1759_v13, %v1313_v45  ;;  %v7596_v7 = vunpack.i.h.bf16 %v10253_v8  ;;  %v13484_v59 = vunpack.i.h.bf16 %v10347_v56  ;;  %v7615_v36 = vunpack.i.l.bf16 %v10347_v56  ;;  %v10390_v48 = vpop.permute.xlu1 %7623  ;;  %7883 = vrot.lane.b32.xlu0 %v13802_v54, %s8396_s24 }
 0x16f   :  { %v1906_v22 = vsel %vm13820_vm7, %v7565_v37, %v7566_v55  ;;  %v1964_v0 = vsel %vm13537_vm8, %v10184_v29, %v1905_v44  ;;  %v13821_v15 = vunpack.i.h.bf16 %v9264_v41  ;;  %vm13822_vm0 = vcmask 883712   ;;  %v7619_v44 = vpop.permute.xlu0 %7618 }
 0x170   :  { %v1780_v8 = vsel %vm1618_vm11, %v1758_v28, %v1312_v25  ;;  %vm13824_vm10 = vmmov %vm13822_vm0  ;;  %v13826_v11 = vunpack.i.h.bf16 %v9719_v12  ;;  %vm13827_vm1 = vcmask 687104   ;;  %v7600_v45 = vunpack.i.l.bf16 %v10295_v5 }
 0x171   :  { %v10375_v26 = vsel %vm13822_vm0, %v13821_v15, %v7585_v42  ;;  %v10381_v13 = vsel %vm13824_vm10, %v7585_v42, %v7586_v24  ;;  %vm13828_vm7 = vmmov %vm13827_vm1  ;;  %v7605_v28 = vunpack.i.l.bf16 %v10297_v43  ;;  %v7620_v25 = vunpack.i.l.bf16 %v7619_v44  ;;  %7888 = vrot.lane.b32.xlu1 %v13798_v4, %s8397_s25 }
 0x172   :  { %13823 = vst [vmem:[#allocation47_spill] sm:$0xff] %v10375_v26  ;;  %13825 = vst [vmem:[#allocation37_spill] sm:$0xff] %v10381_v13  ;;  %v1400_v37 = vsel %vm13827_vm1, %v13826_v11, %v7595_v38  ;;  %v1403_v41 = vsel %vm13828_vm7, %v7615_v36, %v13484_v59  ;;  %v1965_v12 = vsel %vm13537_vm8, %v10187_v51, %v1906_v22  ;;  %v7621_v11 = vunpack.i.h.bf16 %v7619_v44  ;;  %v13829_v59 = vld [vmem:[#allocation61_spill] sm:$0xff] }
 0x173   :  { %v1805_v42 = vsel %vm1641_vm12, %v1783_v62, %v1403_v41  ;;  %v1401_v15 = vsel %vm13827_vm1, %v7595_v38, %v7596_v7  ;;  %v1672_v29 = vsel %vm1664_vm13, %v1649_v19, %v13829_v59  ;;  %v10404_v35 = vsel %vm1618_vm11, %v1964_v0, %v10375_v26  ;;  %v7629_v26 = vpop.permute.xlu0 %7628  ;;  %7893 = vrot.lane.b32.xlu0 %v13802_v54, %s8395_s23 }
 0x174   :  { %v10408_v62 = vsel %vm1618_vm11, %v1965_v12, %v10381_v13  ;;  %v13830_v38 = vunpack.i.h.bf16 %v9741_v33  ;;  %vm13831_vm0 = vcmask 556032   ;;  %v1802_v41 = vsel %vm1641_vm12, %v1780_v8, %v1400_v37  ;;  %v10423_v13 = vpop.permute.xlu1 %7633 }
 0x175   :  { %v13832_v44 = vunpack.i.l.bf16 %v10251_v14  ;;  %v13833_v59 = vunpack.i.h.bf16 %v10130_v39  ;;  %vm13834_vm10 = vcmask 695296   ;;  %vm13835_vm7 = vcmask 891904   ;;  %7898 = vrot.lane.b32.xlu1 %v13802_v54, %s8397_s25 }
 0x176   :  { %v1488_v22 = vsel %vm13831_vm0, %v13830_v38, %v7620_v25  ;;  %v1907_v0 = vsel %vm13835_vm7, %v7566_v55, %v7600_v45  ;;  %v13490_v12 = vunpack.i.h.bf16 %v10297_v43  ;;  %v1803_v33 = vsel %vm1641_vm12, %v1781_v60, %v1401_v15  ;;  %vm13837_vm1 = vmmov %vm13835_vm7 }
 0x177   :  { %v1314_v19 = vsel %vm13834_vm10, %v13833_v59, %v13832_v44  ;;  %v1824_v51 = vsel %vm1664_vm13, %v1802_v41, %v1488_v22  ;;  %v13836_v38 = vunpack.i.h.bf16 %v10295_v5  ;;  %vm13838_vm0 = vcmask 883712   ;;  %7903 = vrot.lane.b32.xlu0 %v13798_v4, %s8398_s26 }
 0x178   :  { %v10431_v37 = vsel %vm13838_vm0, %v7586_v24, %v7605_v28  ;;  %vm13839_vm14 = vcmask 687104   ;;  %vm13840_vm10 = vcmask 556032   ;;  %v13491_v44 = vunpack.i.h.bf16 %v10423_v13 }
 0x179   :  { %v1908_v8 = vsel %vm13837_vm1, %v7600_v45, %v13836_v38  ;;  %v1402_v39 = vsel %vm13839_vm14, %v7596_v7, %v7615_v36  ;;  %v1489_v55 = vsel %vm13840_vm10, %v7620_v25, %v7621_v11  ;;  %v7635_v59 = vunpack.i.l.bf16 %v10423_v13  ;;  %vm13841_vm14 = vmmov %vm13838_vm0  ;;  %v10457_v25 = vpop.permute.xlu1 %7643  ;;  %7908 = vrot.lane.b32.xlu1 %v13802_v54, %s8398_s26 }
 0x17a   :  { %v6445_v60 = vpack.c.bf16 %v1824_v51, %v10307_v49  ;;  %v1966_v15 = vsel %vm13537_vm8, %v10328_v30, %v1907_v0  ;;  %v7611_v45 = vunpack.i.h.bf16 %v10345_v18  ;;  %v7610_v24 = vunpack.i.l.bf16 %v10345_v18  ;;  %vm13843_vm7 = vmmov %vm13840_vm10  ;;  %v10455_v49 = vpop.permute.xlu0 %7638 }
 0x17b   :  { %v7625_v7 = vunpack.i.l.bf16 %v10390_v48  ;;  %v10450_v36 = vsel %vm13841_vm14, %v7605_v28, %v13490_v12  ;;  %v1491_v51 = vsel %vm13843_vm7, %v7635_v59, %v13491_v44  ;;  %vm13844_vm1 = vmmov %vm13843_vm7  ;;  %v1782_v22 = vsel %vm1618_vm11, %v1760_v20, %v1314_v19  ;;  %7913 = vrot.lane.b32.xlu0 %v13798_v4, %s8399_s27 }
 0x17c   :  { %13842 = vst [vmem:[#allocation44_spill] sm:$0xff] %v10450_v36  ;;  %6446 = vmatprep.subr.bf16.mxu0 %v6445_v60  ;;  %v1490_v18 = vsel %vm13844_vm1, %v7621_v11, %v7635_v59  ;;  %v7631_v41 = vunpack.i.h.bf16 %v7629_v26  ;;  %v7630_v0 = vunpack.i.l.bf16 %v7629_v26  ;;  %v13845_v38 = vpack.c.bf16 %v9770_v52, %v9824_v50 }
 0x17d   :  { %v1804_v28 = vsel %vm1641_vm12, %v1782_v22, %v1402_v39  ;;  %v1825_v12 = vsel %vm1664_vm13, %v1803_v33, %v1489_v55  ;;  %v1967_v60 = vsel %vm13537_vm8, %v10353_v40, %v1908_v8  ;;  %v1988_v44 = vsel %vm1618_vm11, %v1966_v15, %v10431_v37  ;;  %v7654_v55 = vpop.permute.xlu1 %7653  ;;  %7918 = vrot.lane.b32.xlu1 %v13802_v54, %s8399_s27 }
 0x17e   :  { %6448 = vmatpush1.bf16.msra.mxu0 %v13845_v38  ;;  %v1826_v20 = vsel %vm1664_vm13, %v1804_v28, %v1490_v18  ;;  %v10474_v26 = vsel %vm1664_vm13, %v1805_v42, %v1491_v51  ;;  %v13846_v52 = vunpack.i.h.bf16 %v9289_v17  ;;  %vm13847_vm0 = vcmask 875520   ;;  %v10492_v17 = vpop.permute.xlu0 %7648 }
 0x17f   :  { %vm13848_vm10 = vmmov %vm13847_vm0  ;;  %v13493_v19 = vunpack.i.h.bf16 %v10390_v48  ;;  %v13492_v8 = vunpack.i.h.bf16 %v10455_v49  ;;  %v7640_v42 = vunpack.i.l.bf16 %v10455_v49  ;;  %v6455_v39 = vpack.c.bf16 %v1826_v20, %v1672_v29  ;;  %7923 = vrot.lane.b32.xlu0 %v13798_v4, %s8400_s30 }
 0x180   :  { %v10479_v50 = vsel %vm13847_vm0, %v13846_v52, %v7610_v24  ;;  %v10482_v11 = vsel %vm13848_vm10, %v7610_v24, %v7611_v45  ;;  %vm13849_vm14 = vmmov %vm13847_vm0  ;;  %v6457_v59 = vpack.c.bf16 %v1825_v12, %v10311_v2  ;;  %v13851_v15 = vunpack.i.h.bf16 %v9329_v6 }
 0x181   :  { %v10486_v33 = vsel %vm13849_vm14, %v7611_v45, %v7625_v7  ;;  %vm13852_vm7 = vcmask 867328   ;;  %v7646_v51 = vunpack.i.h.bf16 %v10457_v25  ;;  %v7645_v18 = vunpack.i.l.bf16 %v10457_v25  ;;  %6456 = vmatprep.subr.bf16.mxu1 %v6455_v39  ;;  %7928 = vrot.lane.b32.xlu1 %v13802_v54, %s8400_s30 }
 0x182   :  { %13850 = vst [vmem:[#allocation12_spill] sm:$0xff] %v10486_v33  ;;  %v10498_v24 = vsel %vm13852_vm7, %v13851_v15, %v7630_v0  ;;  %vm13853_vm1 = vmmov %vm13852_vm7  ;;  %v1989_v29 = vsel %vm1618_vm11, %v1967_v60, %v10450_v36  ;;  %v7656_v22 = vunpack.i.h.bf16 %v7654_v55  ;;  %v7655_v38 = vunpack.i.l.bf16 %v7654_v55  ;;  %6458 = vmatpush1.bf16.msra.mxu1 %v6457_v59  ;;  %v10534_v60 = vpop.permute.xlu1 %7663 }
 0x183   :  { %v10501_v45 = vsel %vm13853_vm1, %v7630_v0, %v7631_v41  ;;  %v2008_v2 = vsel %vm1641_vm12, %v10404_v35, %v10479_v50  ;;  %v2009_v12 = vsel %vm1641_vm12, %v10408_v62, %v10482_v11  ;;  %v10520_v25 = vsel %vm13847_vm0, %v7625_v7, %v13493_v19  ;;  %vm13856_vm10 = vmmov %vm13853_vm1  ;;  %v7659_v62 = vpop.permute.xlu0 %7658 }
 0x184   :  { %13854 = vst [vmem:[#allocation18_spill] sm:$0xff] %v10501_v45  ;;  %13855 = vst [vmem:[#allocation62_spill] sm:$0xff] %v10520_v25  ;;  %v2010_v0 = vsel %vm1641_vm12, %v1988_v44, %v10486_v33  ;;  %v10525_v28 = vsel %vm13856_vm10, %v7631_v41, %v7640_v42  ;;  %v2030_v7 = vsel %vm1664_vm13, %v2008_v2, %v10498_v24  ;;  %v13860_v41 = vunpack.i.h.bf16 %v9365_v47 }
 0x185   :  { %13857 = vst [vmem:[#allocation63_spill] sm:$0xff] %v10525_v28  ;;  %vm13858_vm14 = vmmov %vm13853_vm1  ;;  %v2031_v44 = vsel %vm1664_vm13, %v2009_v12, %v10501_v45  ;;  %vm13861_vm7 = vcmask 859136   ;;  %v7660_v39 = vunpack.i.l.bf16 %v7659_v62  ;;  %v13495_v55 = vunpack.i.h.bf16 %v10492_v17 }
 0x186   :  { %v10530_v35 = vsel %vm13858_vm14, %v7640_v42, %v13492_v8  ;;  %v10543_v20 = vsel %vm13861_vm7, %v13860_v41, %v7645_v18  ;;  %vm13862_vm1 = vmmov %vm13861_vm7  ;;  %v7661_v42 = vunpack.i.h.bf16 %v7659_v62  ;;  %v7650_v59 = vunpack.i.l.bf16 %v10492_v17  ;;  %v7674_v4 = vpop.permute.xlu1 %7673 }
 0x187   :  { %13859 = vst [vmem:[#allocation45_spill] sm:$0xff] %v10530_v35  ;;  %v10546_v52 = vsel %vm13862_vm1, %v7645_v18, %v7646_v51  ;;  %v13863_v15 = vunpack.i.l.bf16 %v10177_v58  ;;  %v2155_v12 = vsel %vm2149_vm9, %v7655_v38, %v7656_v22  ;;  %v13864_v47 = vunpack.i.h.bf16 %v10214_v34  ;;  %vm13865_vm0 = vmmov %vm13862_vm1 }
 0x188   :  { %v2176_v41 = vsel %vm2149_vm9, %v7660_v39, %v7661_v42  ;;  %v7665_v6 = vunpack.i.l.bf16 %v10534_v60  ;;  %v2011_v58 = vsel %vm1641_vm12, %v1989_v29, %v10520_v25  ;;  %v2032_v19 = vsel %vm1664_vm13, %v2010_v0, %v10525_v28  ;;  %vm13866_vm10 = vmmov %vm13865_vm0 }
 0x189   :  { %v2154_v2 = vsel %vm2149_vm9, %v13863_v15, %v7655_v38  ;;  %v2175_v18 = vsel %vm2149_vm9, %v13864_v47, %v7660_v39  ;;  %v10566_v38 = vpop.permute.xlu0 %7668  ;;  %v7932_v15 = vpack.i.bf16 %v2031_v44, %v2030_v7  ;;  %v6449_v34 = vpack.c.bf16 %v2176_v41, %v2155_v12 }
 0x18a   :  { %v6452_v8 = vpack.c.bf16 %v2175_v18, %v2154_v2  ;;  %v13494_v47 = vunpack.i.h.bf16 %v10566_v38  ;;  %v7670_v39 = vunpack.i.l.bf16 %v10566_v38  ;;  %v2033_v62 = vsel %vm1664_vm13, %v2011_v58, %v10530_v35 }
 0x18b   :  { %v10575_v29 = vsel %vm13865_vm0, %v7646_v51, %v7650_v59  ;;  %v7937_v54 = vpack.i.bf16 %v10546_v52, %v10543_v20  ;;  %7933 = vrot.lane.b32.xlu0 %v7932_v15, %s8401_s0  ;;  %6451 = vmatprep.subr.msk.bf16.mxu0 %vm10083_vm5, %v6449_v34  ;;  %v10585_v7 = vsel %vm13866_vm10, %v7650_v59, %v13495_v55  ;;  %v13868_v0 = vunpack.i.h.bf16 %v10534_v60  ;;  %v7684_v59 = vpop.permute.xlu1 %7683 }
 0x18c   :  { %13867 = vst [vmem:[#allocation64_spill] sm:$0xff] %v10585_v7  ;;  %v2177_v51 = vsel %vm2149_vm9, %v7661_v42, %v7670_v39  ;;  %v2178_v2 = vsel %vm2149_vm9, %v7670_v39, %v13494_v47  ;;  %6454 = vmatpush1.bf16.msk.msra.mxu0 %vm10083_vm5, %v6452_v8  ;;  %v2156_v12 = vsel %vm2149_vm9, %v7656_v22, %v7665_v6  ;;  %v7676_v34 = vunpack.i.h.bf16 %v7674_v4 }
 0x18d   :  { %v2157_v44 = vsel %vm2149_vm9, %v7665_v6, %v13868_v0  ;;  %7938 = vrot.lane.b32.xlu1 %v7937_v54, %s8401_s0  ;;  %v10598_v18 = vpop.permute.xlu0 %7678  ;;  %v7942_v41 = vpack.i.bf16 %v2033_v62, %v2032_v19  ;;  %v6462_v15 = vpack.c.bf16 %v2177_v51, %v2156_v12  ;;  %v7947_v42 = vpack.i.bf16 %v10585_v7, %v10575_v29  ;;  %v13869_v19 = vld [vmem:[#allocation26_spill] sm:$0xff] }
 0x18e   :  { %v6459_v58 = vpack.c.bf16 %v2178_v2, %v2157_v44  ;;  %v7675_v39 = vunpack.i.l.bf16 %v7674_v4  ;;  %v13870_v44 = vunpack.i.h.bf16 %v9855_v1  ;;  %vm13871_vm14 = vcmask 1039360  }
 0x18f   :  { %7943 = vrot.lane.b32.xlu0 %v7942_v41, %s8401_s0  ;;  %5921 = vmatmul.mubr.msk.f32.vlgmr.msra.gmra.mrb[2].mxu0 %vm13501_vm4, %v10260_v46  ;;  %v7694_v22 = vpop.permute.xlu1 %7693  ;;  %vm13872_vm7 = vmmov %vm13871_vm14  ;;  %v7680_v12 = vunpack.i.l.bf16 %v10598_v18  ;;  %v7686_v41 = vunpack.i.h.bf16 %v7684_v59  ;;  %vm13879_vm10 = vcmask 1031168  }
 0x190   :  { %6461 = vmatprep.subr.msk.bf16.mxu1 %vm10083_vm5, %v6459_v58  ;;  %2615 = vmatprep.mubr.f32.mxu0 %v13807_v21  ;;  %v268_v51 = vsel %vm13871_vm14, %v13870_v44, %v7675_v39  ;;  %v269_v4 = vsel %vm13872_vm7, %v7675_v39, %v7676_v34  ;;  %v7685_v58 = vunpack.i.l.bf16 %v7684_v59  ;;  %v7696_v47 = vunpack.i.h.bf16 %v7694_v22  ;;  %v13873_v44 = vld [vmem:[#allocation20_spill] sm:$0xff]  ;;  %v13874_v59 = vld [vmem:[#allocation23_spill] sm:$0xff]  ;;  %vm13875_vm1 = vmmov %vm13872_vm7 }
 0x191   :  { %7948 = vrot.lane.b32.xlu1 %v7947_v42, %s8401_s0  ;;  %v10608_v8 = vpop.permute.xlu0 %7688  ;;  %6464 = vmatpush1.bf16.msk.msra.mxu1 %vm10083_vm5, %v6462_v15  ;;  %v7695_v55 = vunpack.i.l.bf16 %v7694_v22  ;;  %v1544_v2 = vsel %vm1526_vm2, %v13873_v44, %v268_v51  ;;  %v1545_v35 = vsel %vm1526_vm2, %v13874_v59, %v269_v4  ;;  %v270_v25 = vsel %vm13875_vm1, %v7676_v34, %v7680_v12  ;;  %vm13877_vm0 = vmmov %vm13875_vm1 }
 0x192   :  { %v7690_v42 = vunpack.i.l.bf16 %v10608_v8  ;;  %v13876_v15 = vunpack.i.h.bf16 %v10598_v18  ;;  %v13878_v22 = vunpack.i.h.bf16 %v9930_v32  ;;  %vm13880_vm14 = vmmov %vm13879_vm10  ;;  %v13882_v44 = vunpack.i.h.bf16 %v10608_v8 }
 0x193   :  { %7953 = vrot.lane.b32.xlu0 %v13669_v27, %s8393_s21  ;;  %v10619_v62 = vpop.permute.xlu1 %7703  ;;  %v357_v40 = vsel %vm13880_vm14, %v7685_v58, %v7686_v41  ;;  %vm13881_vm7 = vmmov %vm13879_vm10  ;;  %vm13885_vm1 = vcmask 1022976   ;;  %vm13892_vm14 = vcmask 891904  }
 0x194   :  { %5924 = vmatmul.mubr.msk.f32.vlgmr.msra.gmra.mrb[2].mxu1 %vm13501_vm4, %v10260_v46  ;;  %v271_v36 = vsel %vm13877_vm0, %v7680_v12, %v13876_v15  ;;  %v356_v7 = vsel %vm13879_vm10, %v13878_v22, %v7685_v58  ;;  %v358_v51 = vsel %vm13881_vm7, %v7686_v41, %v7690_v42  ;;  %vm13883_vm4 = vmmov %vm13881_vm7  ;;  %v13884_v12 = vunpack.i.h.bf16 %v10050_v3 }
 0x195   :  { %950 = vrot.lane.b32.xlu1 %v13869_v19, %s8393_s21  ;;  %v10617_v6 = vpop.permute.xlu0 %7698  ;;  %2686 = vmatprep.mubr.f32.mxu1 %v13807_v21  ;;  %v359_v4 = vsel %vm13883_vm4, %v7690_v42, %v13882_v44  ;;  %vm13886_vm0 = vmmov %vm13885_vm1  ;;  %v7706_v58 = vunpack.i.h.bf16 %v10619_v62  ;;  %v7705_v22 = vunpack.i.l.bf16 %v10619_v62  ;;  %v13887_v44 = vld [vmem:[#allocation24_spill] sm:$0xff]  ;;  %v1547_v3 = vsel %vm1526_vm2, %v13869_v19, %v271_v36 }
 0x196   :  { %v7700_v59 = vunpack.i.l.bf16 %v10617_v6  ;;  %v444_v32 = vsel %vm13885_vm1, %v13884_v12, %v7695_v55  ;;  %v445_v15 = vsel %vm13886_vm0, %v7695_v55, %v7696_v47  ;;  %v1546_v34 = vsel %vm1526_vm2, %v13887_v44, %v270_v25  ;;  %vm13888_vm4 = vmmov %vm13886_vm0 }
 0x197   :  { %7958 = vrot.lane.b32.xlu0 %v13669_v27, %s8394_s22  ;;  %v10630_v0 = vpop.permute.xlu1 %7713  ;;  %v1567_v28 = vsel %vm13538_vm3, %v1544_v2, %v356_v7  ;;  %v1568_v62 = vsel %vm13538_vm3, %v1545_v35, %v357_v40  ;;  %v1569_v45 = vsel %vm13538_vm3, %v1546_v34, %v358_v51  ;;  %v1570_v33 = vsel %vm13538_vm3, %v1547_v3, %v359_v4  ;;  %vm13890_vm10 = vmmov %vm13886_vm0 }
 0x198   :  { %v10693_v25 = vsel %vm1572_vm6, %v1567_v28, %v444_v32  ;;  %v10696_v36 = vsel %vm1572_vm6, %v1568_v62, %v445_v15  ;;  %v446_v44 = vsel %vm13888_vm4, %v7696_v47, %v7700_v59  ;;  %v13891_v40 = vunpack.i.h.bf16 %v10295_v5  ;;  %vm13893_vm7 = vmmov %vm13892_vm14 }
 0x199   :  { %1038 = vrot.lane.b32.xlu1 %v13869_v19, %s8394_s22  ;;  %v10628_v54 = vpop.permute.xlu0 %7708  ;;  %v1910_v2 = vsel %vm13893_vm7, %v7705_v22, %v7706_v58  ;;  %v13505_v51 = vunpack.i.h.bf16 %v10630_v0  ;;  %v7715_v28 = vunpack.i.l.bf16 %v10630_v0  ;;  %v13894_v47 = vunpack.i.h.bf16 %v10297_v43  ;;  %vm13901_vm4 = vmmov %vm13893_vm7 }
 0x19a   :  { %v7711_v12 = vunpack.i.h.bf16 %v10628_v54  ;;  %v7710_v55 = vunpack.i.l.bf16 %v10628_v54  ;;  %v13889_v54 = vunpack.i.h.bf16 %v10617_v6  ;;  %v1909_v35 = vsel %vm13892_vm14, %v13891_v40, %v7705_v22 }
 0x19b   :  { %7963 = vrot.lane.b32.xlu0 %v13669_v27, %s8396_s24  ;;  %v10646_v39 = vpop.permute.xlu1 %7723  ;;  %vm13895_vm1 = vcmask 883712   ;;  %v10723_v22 = vsel %vm1572_vm6, %v1569_v45, %v446_v44  ;;  %v1911_v44 = vsel %vm13901_vm4, %v7706_v58, %v7715_v28  ;;  %vm13904_vm14 = vcmask 875520  }
 0x19c   :  { %v447_v7 = vsel %vm13890_vm10, %v7700_v59, %v13889_v54  ;;  %v10715_v59 = vsel %vm13895_vm1, %v13894_v47, %v7710_v55  ;;  %vm13897_vm0 = vmmov %vm13895_vm1  ;;  %v7726_v32 = vunpack.i.h.bf16 %v10646_v39  ;;  %v7725_v15 = vunpack.i.l.bf16 %v10646_v39  ;;  %13899 = vst [vmem:[#allocation19_spill] sm:$0xff] %v10723_v22 }
 0x19d   :  { %7968 = vrot.lane.b32.xlu1 %v13669_v27, %s8395_s23  ;;  %v10644_v1 = vpop.permute.xlu0 %7718  ;;  %13896 = vst [vmem:[#allocation17_spill] sm:$0xff] %v10715_v59  ;;  %v10718_v5 = vsel %vm13897_vm0, %v7710_v55, %v7711_v12  ;;  %v10726_v3 = vsel %vm1572_vm6, %v1570_v33, %v447_v7  ;;  %v1968_v55 = vsel %vm13537_vm8, %v10693_v25, %v1909_v35  ;;  %vm13902_vm10 = vmmov %vm13901_vm4  ;;  %vm13909_vm1 = vcmask 867328  }
 0x19e   :  { %13898 = vst [vmem:[#allocation7_spill] sm:$0xff] %v10718_v5  ;;  %13900 = vst [vmem:[#allocation46_spill] sm:$0xff] %v10726_v3  ;;  %v1969_v54 = vsel %vm13537_vm8, %v10696_v36, %v1910_v2  ;;  %v10737_v39 = vunpack.i.h.bf16 %v10644_v1  ;;  %v7720_v45 = vunpack.i.l.bf16 %v10644_v1  ;;  %v1990_v33 = vsel %vm1618_vm11, %v1968_v55, %v10715_v59 }
 0x19f   :  { %1126 = vrot.lane.b32.xlu0 %v13869_v19, %s8396_s24  ;;  %v10678_v42 = vpop.permute.xlu1 %7733  ;;  %v1912_v7 = vsel %vm13902_vm10, %v7715_v28, %v13505_v51  ;;  %v13903_v1 = vunpack.i.h.bf16 %v10390_v48  ;;  %vm13906_vm7 = vmmov %vm13904_vm14  ;;  %v13908_v28 = vunpack.i.h.bf16 %v10455_v49  ;;  %vm13913_vm4 = vcmask 883712  }
 0x1a0   :  { %v7736_v62 = vunpack.i.h.bf16 %v10678_v42  ;;  %v7735_v43 = vunpack.i.l.bf16 %v10678_v42  ;;  %v1991_v42 = vsel %vm1618_vm11, %v1969_v54, %v10718_v5  ;;  %v10758_v47 = vsel %vm13906_vm7, %v7725_v15, %v7726_v32  ;;  %vm13911_vm0 = vmmov %vm13909_vm1 }
 0x1a1   :  { %7973 = vrot.lane.b32.xlu1 %v13669_v27, %s8397_s25  ;;  %v10676_v41 = vpop.permute.xlu0 %7728  ;;  %v10755_v2 = vsel %vm13904_vm14, %v13903_v1, %v7725_v15  ;;  %13907 = vst [vmem:[#allocation10_spill] sm:$0xff] %v10758_v47  ;;  %v10777_v15 = vsel %vm13913_vm4, %v7711_v12, %v7720_v45  ;;  %vm13915_vm10 = vmmov %vm13913_vm4  ;;  %v2013_v12 = vsel %vm1641_vm12, %v1991_v42, %v10758_v47  ;;  %vm13924_vm4 = vcmask 859136  }
 0x1a2   :  { %13905 = vst [vmem:[#allocation8_spill] sm:$0xff] %v10755_v2  ;;  %v10761_v58 = vunpack.i.h.bf16 %v10676_v41  ;;  %v7730_v55 = vunpack.i.l.bf16 %v10676_v41  ;;  %v10767_v54 = vsel %vm13909_vm1, %v13908_v28, %v7735_v43  ;;  %v10770_v51 = vsel %vm13911_vm0, %v7735_v43, %v7736_v62  ;;  %13914 = vst [vmem:[#allocation50_spill] sm:$0xff] %v10777_v15 }
 0x1a3   :  { %510 = vrot.lane.b32.xlu0 %v13869_v19, %s8395_s23  ;;  %v10710_v34 = vpop.permute.xlu1 %7743  ;;  %13910 = vst [vmem:[#allocation9_spill] sm:$0xff] %v10767_v54  ;;  %13912 = vst [vmem:[#allocation51_spill] sm:$0xff] %v10770_v51  ;;  %v10781_v41 = vsel %vm13915_vm10, %v7720_v45, %v10737_v39  ;;  %v1970_v43 = vsel %vm13537_vm8, %v10723_v22, %v1911_v44  ;;  %v2012_v5 = vsel %vm1641_vm12, %v1990_v33, %v10755_v2 }
 0x1a4   :  { %13916 = vst [vmem:[#allocation28_spill] sm:$0xff] %v10781_v41  ;;  %v7746_v49 = vunpack.i.h.bf16 %v10710_v34  ;;  %v7745_v28 = vunpack.i.l.bf16 %v10710_v34  ;;  %vm13917_vm14 = vmmov %vm13906_vm7  ;;  %v10802_v44 = vsel %vm13906_vm7, %v7730_v55, %v10761_v58  ;;  %v2035_v33 = vsel %vm1664_vm13, %v2013_v12, %v10770_v51 }
 0x1a5   :  { %1214 = vrot.lane.b32.xlu1 %v13869_v19, %s8397_s25  ;;  %v7739_v4 = vpop.permute.xlu0 %7738  ;;  %v10798_v34 = vsel %vm13917_vm14, %v7726_v32, %v7730_v55  ;;  %13919 = vst [vmem:[#allocation49_spill] sm:$0xff] %v10802_v44  ;;  %v1992_v42 = vsel %vm1618_vm11, %v1970_v43, %v10777_v15  ;;  %vm13920_vm1 = vmmov %vm13911_vm0 }
 0x1a6   :  { %v10772_v48 = vunpack.i.h.bf16 %v7739_v4  ;;  %v7740_v1 = vunpack.i.l.bf16 %v7739_v4  ;;  %v1971_v4 = vsel %vm13537_vm8, %v10726_v3, %v1912_v7  ;;  %13918 = vst [vmem:[#allocation55_spill] sm:$0xff] %v10798_v34  ;;  %v2034_v7 = vsel %vm1664_vm13, %v2012_v5, %v10767_v54  ;;  %vm13925_vm10 = vmmov %vm13924_vm4 }
 0x1a7   :  { %7978 = vrot.lane.b32.xlu0 %v13669_v27, %s8398_s26  ;;  %v10750_v35 = vpop.permute.xlu1 %7753  ;;  %v1993_v3 = vsel %vm1618_vm11, %v1971_v4, %v10781_v41  ;;  %v13923_v5 = vunpack.i.h.bf16 %v10492_v17  ;;  %v10827_v43 = vsel %vm13925_vm10, %v7745_v28, %v7746_v49  ;;  %v7992_v17 = vpack.i.bf16 %v2035_v33, %v2034_v7  ;;  %vm13926_vm14 = vmmov %vm13924_vm4 }
 0x1a8   :  { %v10813_v47 = vsel %vm13920_vm1, %v7736_v62, %v7740_v1  ;;  %v10817_v32 = vsel %vm13911_vm0, %v7740_v1, %v10772_v48  ;;  %v2014_v62 = vsel %vm1641_vm12, %v1992_v42, %v10798_v34  ;;  %v2015_v1 = vsel %vm1641_vm12, %v1993_v3, %v10802_v44  ;;  %vm13927_vm7 = vmmov %vm13924_vm4 }
 0x1a9   :  { %1302 = vrot.lane.b32.xlu1 %v13869_v19, %s8398_s26  ;;  %v7749_v40 = vpop.permute.xlu0 %7748  ;;  %13921 = vst [vmem:[#allocation21_spill] sm:$0xff] %v10813_v47  ;;  %13922 = vst [vmem:[#allocation54_spill] sm:$0xff] %v10817_v32  ;;  %v10824_v55 = vsel %vm13924_vm4, %v13923_v5, %v7745_v28  ;;  %v2036_v28 = vsel %vm1664_vm13, %v2014_v62, %v10813_v47  ;;  %v2037_v41 = vsel %vm1664_vm13, %v2015_v1, %v10817_v32  ;;  %vm13931_vm1 = vcmask 1014784  }
 0x1aa   :  { %v10829_v12 = vunpack.i.h.bf16 %v7749_v40  ;;  %v7750_v4 = vunpack.i.l.bf16 %v7749_v40  ;;  %v7997_v40 = vpack.i.bf16 %v10827_v43, %v10824_v55  ;;  %v7755_v7 = vunpack.i.l.bf16 %v10750_v35  ;;  %vm13933_vm0 = vmmov %vm13931_vm1 }
 0x1ab   :  { %7983 = vrot.lane.b32.xlu0 %v13669_v27, %s8399_s27  ;;  %v7764_v59 = vpop.permute.xlu1 %7763  ;;  %v8002_v42 = vpack.i.bf16 %v2037_v41, %v2036_v28  ;;  %v7756_v62 = vunpack.i.h.bf16 %v10750_v35  ;;  %v13929_v47 = vunpack.i.h.bf16 %v9804_v31  ;;  %vm13936_vm4 = vcmask 719872  }
 0x1ac   :  { %v10847_v3 = vsel %vm13926_vm14, %v7746_v49, %v7750_v4  ;;  %v7766_v51 = vunpack.i.h.bf16 %v7764_v59  ;;  %vm13937_vm10 = vmmov %vm13936_vm4 }
 0x1ad   :  { %1390 = vrot.lane.b32.xlu1 %v13869_v19, %s8399_s27  ;;  %v10795_v45 = vpop.permute.xlu0 %7758  ;;  %v965_v28 = vsel %vm954_vm15, %v7755_v7, %v7756_v62  ;;  %vm13939_vm14 = vmmov %vm13936_vm4 }
 0x1af   :  { %7988 = vrot.lane.b32.xlu0 %v13669_v27, %s8400_s30  ;;  %v7774_v5 = vpop.permute.xlu1 %7773 }
 0x1b0   :  { %v7775_v34 = vunpack.i.l.bf16 %v7774_v5  ;;  %v7776_v41 = vunpack.i.h.bf16 %v7774_v5 }
 0x1b1   :  { %1478 = vrot.lane.b32.xlu1 %v13869_v19, %s8400_s30  ;;  %v10837_v27 = vpop.permute.xlu0 %7768  ;;  %v10851_v19 = vsel %vm13927_vm7, %v7750_v4, %v10829_v12  ;;  %v7765_v4 = vunpack.i.l.bf16 %v7764_v59  ;;  %vm13943_vm7 = vcmask 711680  }
 0x1b2   :  { %13928 = vst [vmem:[#allocation53_spill] sm:$0xff] %v10851_v19  ;;  %v8007_v49 = vpack.i.bf16 %v10851_v19, %v10847_v3 }
 0x1b3   :  { %7993 = vrot.lane.b32.xlu0 %v7992_v17, %s8401_s0  ;;  %v10856_v32 = vpop.permute.xlu1 %7783  ;;  %v1053_v54 = vsel %vm13937_vm10, %v7765_v4, %v7766_v51  ;;  %vm13953_vm10 = vcmask 703488  }
 0x1b5   :  { %7998 = vrot.lane.b32.xlu1 %v7997_v40, %s8401_s0  ;;  %v7779_v33 = vpop.permute.xlu0 %7778  ;;  %v964_v40 = vsel %vm954_vm15, %v13929_v47, %v7755_v7 }
 0x1b6   :  { %v7780_v1 = vunpack.i.l.bf16 %v7779_v33  ;;  %v7781_v44 = vunpack.i.h.bf16 %v7779_v33  ;;  %v13930_v33 = vunpack.i.h.bf16 %v10092_v53  ;;  %v1696_v7 = vsel %vm1526_vm2, %v9986_v57, %v964_v40 }
 0x1b7   :  { %8003 = vrot.lane.b32.xlu0 %v8002_v42, %s8401_s0  ;;  %v10871_v19 = vpop.permute.xlu1 %7793  ;;  %v13932_v42 = vunpack.i.l.bf16 %v10795_v45  ;;  %v13935_v53 = vunpack.i.h.bf16 %v9893_v10  ;;  %v1697_v10 = vsel %vm1526_vm2, %v9989_v9, %v965_v28 }
 0x1b8   :  { %v524_v17 = vsel %vm13931_vm1, %v13930_v33, %v7780_v1  ;;  %v525_v59 = vsel %vm13933_vm0, %v7780_v1, %v7781_v44  ;;  %v13944_v2 = vunpack.i.l.bf16 %v10871_v19  ;;  %vm13945_vm1 = vmmov %vm13933_vm0 }
 0x1b9   :  { %8008 = vrot.lane.b32.xlu1 %v8007_v49, %s8401_s0  ;;  %v7789_v35 = vpop.permute.xlu0 %7788  ;;  %v966_v31 = vsel %vm954_vm15, %v7756_v62, %v13932_v42  ;;  %v13934_v49 = vld [vmem:[#allocation27_spill] sm:$0xff]  ;;  %v1052_v33 = vsel %vm13936_vm4, %v13935_v53, %v7765_v4  ;;  %v13938_v62 = vunpack.i.l.bf16 %v10837_v27  ;;  %v1605_v1 = vsel %vm13537_vm8, %v13703_v63, %v524_v17  ;;  %v13940_v4 = vld [vmem:[#allocation14_spill] sm:$0xff]  ;;  %vm13946_vm0 = vmmov %vm13943_vm7 }
 0x1ba   :  { %v1698_v5 = vsel %vm1526_vm2, %v9998_v16, %v966_v31  ;;  %v1606_v40 = vsel %vm13537_vm8, %v13940_v4, %v525_v59  ;;  %v1718_v63 = vsel %vm13538_vm3, %v1696_v7, %v1052_v33  ;;  %v13941_v17 = vld [vmem:[#allocation42_spill] sm:$0xff]  ;;  %v7791_v15 = vunpack.i.h.bf16 %v7789_v35  ;;  %v13947_v31 = vld [vmem:[#allocation13_spill] sm:$0xff]  ;;  %vm13950_vm4 = vmmov %vm13946_vm0 }
 0x1bb   :  { %952 = vrot.lane.b32.xlu0 %v13934_v49, %s8393_s21  ;;  %v1054_v42 = vsel %vm13939_vm14, %v7766_v51, %v13938_v62  ;;  %v7790_v51 = vunpack.i.l.bf16 %v7789_v35  ;;  %v7804_v53 = vpop.permute.xlu1 %7803  ;;  %v13942_v62 = vunpack.i.h.bf16 %v13941_v17  ;;  %v526_v22 = vsel %vm13945_vm1, %v7781_v44, %v13944_v2  ;;  %v13948_v7 = vld [vmem:[#allocation29_spill] sm:$0xff]  ;;  %vm13955_vm14 = vmmov %vm13953_vm10 }
 0x1bc   :  { %v1719_v16 = vsel %vm13538_vm3, %v1697_v10, %v1053_v54  ;;  %v1720_v9 = vsel %vm13538_vm3, %v1698_v5, %v1054_v42  ;;  %v1141_v28 = vsel %vm13946_vm0, %v7775_v34, %v7776_v41  ;;  %v1628_v59 = vsel %vm1618_vm11, %v1605_v1, %v13947_v31  ;;  %v13954_v5 = vld [vmem:[#allocation25_spill] sm:$0xff]  ;;  %vm13962_vm0 = vmmov %vm13953_vm10 }
 0x1bd   :  { %1040 = vrot.lane.b32.xlu1 %v13934_v49, %s8394_s22  ;;  %v10894_v57 = vpop.permute.xlu0 %7798  ;;  %v1140_v47 = vsel %vm13943_vm7, %v13942_v62, %v7775_v34  ;;  %v1629_v33 = vsel %vm1618_vm11, %v1606_v40, %v13948_v7  ;;  %v13949_v35 = vunpack.i.l.bf16 %v10856_v32  ;;  %v7806_v2 = vunpack.i.h.bf16 %v7804_v53  ;;  %v13951_v34 = vld [vmem:[#allocation34_spill] sm:$0xff]  ;;  %v13956_v7 = vld [vmem:[#allocation41_spill] sm:$0xff]  ;;  %s8415_s22 = smov 117  }
 0x1be   :  { %v7805_v44 = vunpack.i.l.bf16 %v7804_v53  ;;  %v1740_v42 = vsel %vm1572_vm6, %v1718_v63, %v1140_v47  ;;  %v13952_v10 = vunpack.i.h.bf16 %v13951_v34  ;;  %v1607_v40 = vsel %vm13537_vm8, %v13954_v5, %v526_v22  ;;  %v13957_v22 = vld [vmem:[#allocation38_spill] sm:$0xff] }
 0x1bf   :  { %1128 = vrot.lane.b32.xlu0 %v13934_v49, %s8396_s24  ;;  %v1142_v4 = vsel %vm13950_vm4, %v7776_v41, %v13949_v35  ;;  %v13522_v17 = vunpack.i.l.bf16 %v10894_v57  ;;  %v7814_v62 = vpop.permute.xlu1 %7813  ;;  %v1741_v41 = vsel %vm1572_vm6, %v1719_v16, %v1141_v28  ;;  %v1229_v53 = vsel %vm13955_vm14, %v7790_v51, %v7791_v15  ;;  %s8416_s24 = smov 116  }
 0x1c0   :  { %v1228_v1 = vsel %vm13953_vm10, %v13952_v10, %v7790_v51  ;;  %v7816_v31 = vunpack.i.h.bf16 %v7814_v62  ;;  %v1651_v47 = vsel %vm1641_vm12, %v1628_v59, %v13956_v7  ;;  %v1742_v63 = vsel %vm1572_vm6, %v1720_v9, %v1142_v4  ;;  %v13961_v9 = vld [vmem:[#allocation33_spill] sm:$0xff] }
 0x1c1   :  { %512 = vrot.lane.b32.xlu1 %v13934_v49, %s8395_s23  ;;  %v10923_v54 = vpop.permute.xlu0 %7808  ;;  %v7815_v34 = vunpack.i.l.bf16 %v7814_v62  ;;  %v1652_v10 = vsel %vm1641_vm12, %v1629_v33, %v13957_v22  ;;  %v1762_v5 = vsel %vm13537_vm8, %v1740_v42, %v1228_v1  ;;  %v13958_v16 = vunpack.i.h.bf16 %v10251_v14 }
 0x1c2   :  { %vm13959_vm7 = vcmask 695296   ;;  %v1630_v4 = vsel %vm1618_vm11, %v1607_v40, %v13961_v9  ;;  %v1763_v62 = vsel %vm13537_vm8, %v1741_v41, %v1229_v53  ;;  %v1230_v33 = vsel %vm13962_vm0, %v7791_v15, %v13522_v17  ;;  %v13969_v9 = vld [vmem:[#allocation35_spill] sm:$0xff] }
 0x1c3   :  { %1216 = vrot.lane.b32.xlu0 %v13934_v49, %s8397_s25  ;;  %v1316_v51 = vsel %vm13959_vm7, %v13958_v16, %v7805_v44  ;;  %vm13960_vm1 = vmmov %vm13959_vm7  ;;  %v13963_v14 = vunpack.i.h.bf16 %v10347_v56  ;;  %vm13964_vm4 = vcmask 687104   ;;  %v7824_v1 = vpop.permute.xlu1 %7823  ;;  %v13967_v15 = vunpack.i.l.bf16 %v10923_v54  ;;  %s8417_s25 = smov 111  }
 0x1c4   :  { %v1317_v28 = vsel %vm13960_vm1, %v7805_v44, %v7806_v2  ;;  %v13965_v44 = vld [vmem:[#allocation32_spill] sm:$0xff]  ;;  %vm13966_vm10 = vmmov %vm13964_vm4  ;;  %v7826_v35 = vunpack.i.h.bf16 %v7824_v1  ;;  %v7825_v40 = vunpack.i.l.bf16 %v7824_v1  ;;  %v1784_v53 = vsel %vm1618_vm11, %v1762_v5, %v1316_v51 }
 0x1c5   :  { %1304 = vrot.lane.b32.xlu1 %v13934_v49, %s8398_s26  ;;  %v10949_v59 = vpop.permute.xlu0 %7818  ;;  %v1404_v42 = vsel %vm13964_vm4, %v13963_v14, %v7815_v34  ;;  %v1674_v7 = vsel %vm1664_vm13, %v1651_v47, %v13965_v44  ;;  %v1405_v22 = vsel %vm13966_vm10, %v7815_v34, %v7816_v31  ;;  %v1785_v41 = vsel %vm1618_vm11, %v1763_v62, %v1317_v28  ;;  %vm13968_vm14 = vmmov %vm13960_vm1  ;;  %s8418_s26 = smov 120  }
 0x1c6   :  { %v13521_v16 = vunpack.i.l.bf16 %v10949_v59  ;;  %v1318_v56 = vsel %vm13968_vm14, %v7806_v2, %v13967_v15  ;;  %v1653_v47 = vsel %vm1641_vm12, %v1630_v4, %v13969_v9  ;;  %vm13970_vm7 = vmmov %vm13964_vm4  ;;  %vm13971_vm1 = vcmask 556032  }
 0x1c7   :  { %1392 = vrot.lane.b32.xlu0 %v13934_v49, %s8399_s27  ;;  %v1493_v14 = vsel %vm13971_vm1, %v7825_v40, %v7826_v35  ;;  %v13972_v28 = vunpack.i.h.bf16 %v10423_v13  ;;  %vm13973_vm0 = vmmov %vm13971_vm1  ;;  %v1806_v5 = vsel %vm1641_vm12, %v1784_v53, %v1404_v42  ;;  %v1764_v51 = vsel %vm13537_vm8, %v1742_v63, %v1230_v33  ;;  %v54_v13 = vld [vmem:[%s13335_s2] sm:$0xff]  ;;  %s8412_s2 = smov 44  }
 0x1c8   :  { %v1406_v34 = vsel %vm13970_vm7, %v7816_v31, %v13521_v16  ;;  %v1807_v4 = vsel %vm1641_vm12, %v1785_v41, %v1405_v22  ;;  %v7834_v31 = vpop.permute.xlu1 %7833  ;;  %v1786_v17 = vsel %vm1618_vm11, %v1764_v51, %v1318_v56  ;;  %vm13974_vm4 = vmmov %vm13973_vm0  ;;  %v13979_v51 = vunpack.i.h.bf16 %v10566_v38 }
 0x1c9   :  { %1480 = vrot.lane.b32.xlu1 %v13934_v49, %s8400_s30  ;;  %v10979_v1 = vpop.permute.xlu0 %7828  ;;  %v1492_v2 = vsel %vm13973_vm0, %v13972_v28, %v7825_v40  ;;  %v7836_v15 = vunpack.i.h.bf16 %v7834_v31  ;;  %v7835_v9 = vunpack.i.l.bf16 %v7834_v31  ;;  %v1808_v33 = vsel %vm1641_vm12, %v1786_v17, %v1406_v34  ;;  %v13975_v40 = vld [vmem:[#allocation16_spill] sm:$0xff]  ;;  %s8421_s30 = smov 118  }
 0x1ca   :  { %v7830_v62 = vunpack.i.l.bf16 %v10979_v1  ;;  %v1828_v44 = vsel %vm1664_vm13, %v1806_v5, %v1492_v2  ;;  %v1829_v42 = vsel %vm1664_vm13, %v1807_v4, %v1493_v14  ;;  %v1676_v41 = vsel %vm1664_vm13, %v1653_v47, %v13975_v40  ;;  %v13977_v5 = vld [vmem:[#allocation48_spill] sm:$0xff] }
 0x1cb   :  { %v6465_v16 = vpack.c.bf16 %v1828_v44, %v1674_v7  ;;  %v13976_v2 = vpack.c.bf16 %v10474_v26, %v10361_v61  ;;  %v1675_v17 = vsel %vm1664_vm13, %v1652_v10, %v13977_v5  ;;  %v2159_v47 = vsel %vm2149_vm9, %v7835_v9, %v7836_v15 }
 0x1cc   :  { %v1494_v63 = vsel %vm13974_vm4, %v7826_v35, %v7830_v62  ;;  %v11001_v28 = vpop.permute.xlu1 %7843  ;;  %v6477_v14 = vpack.c.bf16 %v1829_v42, %v1675_v17  ;;  %v13981_v42 = vunpack.i.h.bf16 %v10608_v8  ;;  %v13982_v40 = vunpack.i.h.bf16 %v10630_v0 }
 0x1cd   :  { %6466 = vmatprep.subr.bf16.mxu0 %v6465_v16  ;;  %v7839_v22 = vpop.permute.xlu0 %7838  ;;  %v1830_v7 = vsel %vm1664_vm13, %v1808_v33, %v1494_v63  ;;  %2216 = vperm.xlu1 %8017, %v54_v13   ;;  %v13978_v16 = vunpack.i.h.bf16 %v10534_v60  ;;  %v7846_v61 = vunpack.i.h.bf16 %v11001_v28  ;;  %v7845_v26 = vunpack.i.l.bf16 %v11001_v28 }
 0x1ce   :  { %v7841_v56 = vunpack.i.h.bf16 %v7839_v22  ;;  %v7840_v53 = vunpack.i.l.bf16 %v7839_v22  ;;  %6468 = vmatpush1.bf16.msra.mxu0 %v13976_v2  ;;  %v6475_v35 = vpack.c.bf16 %v1830_v7, %v1676_v41  ;;  %v13980_v13 = vunpack.i.h.bf16 %v10598_v18 }
 0x1cf   :  { %v2158_v34 = vsel %vm2149_vm9, %v13978_v16, %v7835_v9  ;;  %vm13983_vm10 = vcmask 891904   ;;  %v2160_v18 = vsel %vm2149_vm9, %v7836_v15, %v7845_v26  ;;  %vm13985_vm14 = vcmask 883712  }
 0x1d0   :  { %v2179_v4 = vsel %vm2149_vm9, %v13979_v51, %v7840_v53  ;;  %v2180_v31 = vsel %vm2149_vm9, %v7840_v53, %v7841_v56  ;;  %6476 = vmatprep.subr.bf16.mxu1 %v6475_v35  ;;  %v1548_v9 = vsel %vm1526_vm2, %v13934_v49, %v13980_v13  ;;  %v1890_v33 = vpop.permute.xlu1 %1889  ;;  %v2161_v49 = vsel %vm2149_vm9, %v7845_v26, %v7846_v61 }
 0x1d1   :  { %v6472_v10 = vpack.c.bf16 %v2179_v4, %v2158_v34  ;;  %v11018_v44 = vpop.permute.xlu0 %7848  ;;  %6478 = vmatpush1.bf16.msra.mxu1 %v6477_v14  ;;  %v6469_v60 = vpack.c.bf16 %v2180_v31, %v2159_v47  ;;  %v1571_v22 = vsel %vm13538_vm3, %v1548_v9, %v13981_v42  ;;  %v1913_v41 = vsel %vm13983_vm10, %v13982_v40, %v1890_v33 }
 0x1d2   :  { %v13524_v38 = vunpack.i.h.bf16 %v11018_v44  ;;  %v7850_v63 = vunpack.i.l.bf16 %v11018_v44  ;;  %v13984_v53 = vunpack.i.h.bf16 %v10617_v6  ;;  %vm13986_vm7 = vcmask 875520  }
 0x1d3   :  { %6471 = vmatprep.subr.msk.bf16.mxu0 %vm10083_vm5, %v6469_v60  ;;  %vm13987_vm1 = vcmask 203776   ;;  %vm13988_vm0 = vcmask 867328   ;;  %vm13989_vm4 = vcmask 859136   ;;  %v7761_v13 = vunpack.i.h.bf16 %v10795_v45 }
 0x1d4   :  { %v2181_v7 = vsel %vm2149_vm9, %v7841_v56, %v7850_v63  ;;  %v2182_v8 = vsel %vm2149_vm9, %v7850_v63, %v13524_v38  ;;  %6474 = vmatpush1.bf16.msk.msra.mxu0 %vm10083_vm5, %v6472_v10  ;;  %v11047_v2 = vsel %vm1572_vm6, %v1571_v22, %v13984_v53  ;;  %v1941_v17 = vpop.permute.xlu1 %1940  ;;  %vm13990_vm10 = vmmov %vm13987_vm1  ;;  %v7796_v10 = vunpack.i.h.bf16 %v10871_v19 }
 0x1d5   :  { %v6482_v0 = vpack.c.bf16 %v2181_v7, %v2160_v18  ;;  %v1937_v15 = vpop.permute.xlu0 %1936  ;;  %v6479_v35 = vpack.c.bf16 %v2182_v8, %v2161_v49  ;;  %v1972_v5 = vsel %vm13537_vm8, %v11047_v2, %v1913_v41  ;;  %v1942_v34 = vsel %vm13986_vm7, %v10761_v58, %v1941_v17 }
 0x1d6   :  { %v1938_v56 = vsel %vm13985_vm14, %v10737_v39, %v1937_v15  ;;  %v7771_v63 = vunpack.i.h.bf16 %v10837_v27  ;;  %v7786_v33 = vunpack.i.h.bf16 %v10856_v32  ;;  %v13991_v42 = vunpack.i.l.bf16 %v10871_v19  ;;  %v13998_v19 = vld [vmem:[#allocation11_spill] sm:$0xff] }
 0x1d7   :  { %v1994_v16 = vsel %vm1618_vm11, %v1972_v5, %v1938_v56  ;;  %5927 = vmatmul.mubr.msk.f32.vlgmr.msra.gmra.mrb[4].mxu0 %vm13987_vm1, %v10260_v46  ;;  %6481 = vmatprep.subr.msk.bf16.mxu1 %vm10083_vm5, %v6479_v35  ;;  %vm13992_vm14 = vcmask 1014784   ;;  %v13993_v40 = vunpack.i.l.bf16 %v10795_v45  ;;  %v13994_v49 = vunpack.i.l.bf16 %v10837_v27  ;;  %v13999_v5 = vld [vmem:[#allocation39_spill] sm:$0xff] }
 0x1d8   :  { %6484 = vmatpush1.bf16.msk.msra.mxu1 %vm10083_vm5, %v6482_v0  ;;  %2757 = vmatprep.mubr.f32.mxu0 %v13807_v21  ;;  %v2016_v47 = vsel %vm1641_vm12, %v1994_v16, %v1942_v34  ;;  %v1949_v51 = vpop.permute.xlu1 %1948  ;;  %vm13995_vm7 = vcmask 719872   ;;  %v7801_v8 = vunpack.i.h.bf16 %v10894_v57  ;;  %v13996_v0 = vunpack.i.l.bf16 %v10856_v32 }
 0x1d9   :  { %v1945_v6 = vpop.permute.xlu0 %1944  ;;  %v1950_v4 = vsel %vm13989_vm4, %v10829_v12, %v1949_v51  ;;  %v967_v41 = vsel %vm954_vm15, %v13993_v40, %v7761_v13  ;;  %v1055_v7 = vsel %vm13995_vm7, %v13994_v49, %v7771_v63  ;;  %vm13997_vm1 = vcmask 711680  }
 0x1da   :  { %v1946_v14 = vsel %vm13988_vm0, %v10772_v48, %v1945_v6  ;;  %v1143_v53 = vsel %vm13997_vm1, %v13996_v0, %v7786_v33  ;;  %v7811_v35 = vunpack.i.h.bf16 %v10923_v54  ;;  %v7821_v45 = vunpack.i.h.bf16 %v10949_v59  ;;  %v14000_v6 = vld [vmem:[#allocation31_spill] sm:$0xff] }
 0x1db   :  { %v2038_v31 = vsel %vm1664_vm13, %v2016_v47, %v1946_v14  ;;  %5930 = vmatmul.mubr.msk.f32.vlgmr.msra.gmra.mrb[4].mxu1 %vm13990_vm10, %v10260_v46  ;;  %v527_v46 = vsel %vm13992_vm14, %v13991_v42, %v7796_v10  ;;  %v1699_v56 = vsel %vm1526_vm2, %v13999_v5, %v967_v41  ;;  %v14001_v47 = vunpack.i.l.bf16 %v10894_v57 }
 0x1dc   :  { %v8012_v26 = vpack.i.bf16 %v1950_v4, %v2038_v31  ;;  %2828 = vmatprep.mubr.f32.mxu1 %v13807_v21  ;;  %v11074_v9 = vpop.permute.xlu1 %7858  ;;  %v1608_v15 = vsel %vm13537_vm8, %v13998_v19, %v527_v46  ;;  %v1721_v27 = vsel %vm13538_vm3, %v1699_v56, %v1055_v7  ;;  %vm14002_vm0 = vcmask 703488   ;;  %v14007_v56 = vld [vmem:[#allocation30_spill] sm:$0xff] }
 0x1dd   :  { %v7854_v60 = vpop.permute.xlu0 %7853  ;;  %v1743_v34 = vsel %vm1572_vm6, %v1721_v27, %v1143_v53  ;;  %v1631_v32 = vsel %vm1618_vm11, %v1608_v15, %v14000_v6  ;;  %v1231_v14 = vsel %vm14002_vm0, %v14001_v47, %v7801_v8  ;;  %v14003_v51 = vunpack.i.l.bf16 %v10923_v54 }
 0x1de   :  { %8013 = vrot.lane.b32.xlu0 %v8012_v26, %s8401_s0  ;;  %vm14004_vm4 = vcmask 695296   ;;  %v14005_v31 = vunpack.i.l.bf16 %v10949_v59  ;;  %vm14006_vm10 = vcmask 687104   ;;  %v7831_v42 = vunpack.i.h.bf16 %v10979_v1  ;;  %s8422_s0 = smov 110  }
 0x1df   :  { %v1319_v4 = vsel %vm14004_vm4, %v14003_v51, %v7811_v35  ;;  %v7855_v46 = vunpack.i.l.bf16 %v7854_v60  ;;  %v7856_v40 = vunpack.i.h.bf16 %v7854_v60  ;;  %v13523_v41 = vunpack.i.l.bf16 %v11074_v9 }
 0x1e0   :  { %v11085_v18 = vpop.permute.xlu1 %7868  ;;  %v1407_v26 = vsel %vm14006_vm10, %v14005_v31, %v7821_v45  ;;  %v1765_v53 = vsel %vm13537_vm8, %v1743_v34, %v1231_v14  ;;  %v1654_v27 = vsel %vm1641_vm12, %v1631_v32, %v14007_v56  ;;  %vm14008_vm14 = vcmask 556032  }
 0x1e1   :  { %v7864_v22 = vpop.permute.xlu0 %7863  ;;  %v1787_v5 = vsel %vm1618_vm11, %v1765_v53, %v1319_v4  ;;  %v1495_v60 = vsel %vm14008_vm14, %v7830_v62, %v7831_v42  ;;  %v969_v34 = vsel %vm954_vm15, %v7855_v46, %v7856_v40  ;;  %v970_v14 = vsel %vm954_vm15, %v7856_v40, %v13523_v41  ;;  %v14012_v40 = vld [vmem:[#allocation36_spill] sm:$0xff] }
 0x1e2   :  { %v7865_v19 = vunpack.i.l.bf16 %v7864_v22  ;;  %v1809_v6 = vsel %vm1641_vm12, %v1787_v5, %v1407_v26  ;;  %v7866_v47 = vunpack.i.h.bf16 %v7864_v22  ;;  %vm14009_vm7 = vcmask 1014784   ;;  %v14014_v5 = vld [vmem:[#allocation40_spill] sm:$0xff] }
 0x1e3   :  { %vm14010_vm1 = vmmov %vm14009_vm7  ;;  %vm14011_vm0 = vcmask 719872   ;;  %v7870_v26 = vunpack.i.l.bf16 %v11085_v18  ;;  %vm14017_vm14 = vcmask 711680  }
 0x1e4   :  { %v7879_v16 = vpop.permute.xlu1 %7878  ;;  %v1056_v31 = vsel %vm14011_vm0, %v7771_v63, %v7865_v19  ;;  %vm14013_vm4 = vmmov %vm14011_vm0 }
 0x1e5   :  { %v7874_v17 = vpop.permute.xlu0 %7873  ;;  %v7881_v49 = vunpack.i.h.bf16 %v7879_v16  ;;  %v7880_v7 = vunpack.i.l.bf16 %v7879_v16  ;;  %v968_v16 = vsel %vm954_vm15, %v7761_v13, %v7855_v46  ;;  %v1057_v63 = vsel %vm14013_vm4, %v7865_v19, %v7866_v47  ;;  %vm14016_vm10 = vmmov %vm14011_vm0 }
 0x1e6   :  { %v7876_v62 = vunpack.i.h.bf16 %v7874_v17  ;;  %v7875_v53 = vunpack.i.l.bf16 %v7874_v17  ;;  %v1700_v22 = vsel %vm1526_vm2, %v10543_v20, %v968_v16  ;;  %v14015_v17 = vld [vmem:[#allocation15_spill] sm:$0xff]  ;;  %v1701_v20 = vsel %vm1526_vm2, %v10546_v52, %v969_v34  ;;  %v14019_v34 = vld [vmem:[#allocation37_spill] sm:$0xff] }
 0x1e7   :  { %v528_v51 = vsel %vm14009_vm7, %v7796_v10, %v7880_v7  ;;  %v529_v32 = vsel %vm14010_vm1, %v7880_v7, %v7881_v49  ;;  %v11151_v10 = vsel %vm1664_vm13, %v1654_v27, %v14012_v40  ;;  %v11154_v7 = vsel %vm1664_vm13, %v1809_v6, %v1495_v60  ;;  %vm14018_vm7 = vmmov %vm14017_vm14 }
 0x1e8   :  { %v7889_v15 = vpop.permute.xlu1 %7888  ;;  %v1609_v56 = vsel %vm13537_vm8, %v14014_v5, %v528_v51  ;;  %v1610_v41 = vsel %vm13537_vm8, %v14015_v17, %v529_v32  ;;  %v1702_v27 = vsel %vm1526_vm2, %v10575_v29, %v970_v14  ;;  %v1722_v16 = vsel %vm13538_vm3, %v1700_v22, %v1056_v31  ;;  %vm14020_vm1 = vmmov %vm14018_vm7  ;;  %v14021_v31 = vld [vmem:[#allocation47_spill] sm:$0xff] }
 0x1e9   :  { %v11121_v0 = vpop.permute.xlu0 %7883  ;;  %v7890_v6 = vunpack.i.l.bf16 %v7889_v15  ;;  %v1058_v19 = vsel %vm14016_vm10, %v7866_v47, %v7870_v26  ;;  %v1144_v51 = vsel %vm14017_vm14, %v7786_v33, %v7875_v53  ;;  %v1145_v32 = vsel %vm14018_vm7, %v7875_v53, %v7876_v62 }
 0x1ea   :  { %v7885_v46 = vunpack.i.l.bf16 %v11121_v0  ;;  %v7891_v40 = vunpack.i.h.bf16 %v7889_v15  ;;  %v1723_v52 = vsel %vm13538_vm3, %v1701_v20, %v1057_v63  ;;  %v1633_v29 = vsel %vm1618_vm11, %v1610_v41, %v14019_v34 }
 0x1eb   :  { %v1632_v22 = vsel %vm1618_vm11, %v1609_v56, %v14021_v31  ;;  %vm14022_vm0 = vcmask 1014784   ;;  %v1724_v63 = vsel %vm13538_vm3, %v1702_v27, %v1058_v19  ;;  %v1744_v17 = vsel %vm1572_vm6, %v1722_v16, %v1144_v51 }
 0x1ec   :  { %v11144_v13 = vpop.permute.xlu1 %7898  ;;  %v1146_v14 = vsel %vm14020_vm1, %v7876_v62, %v7885_v46  ;;  %v1745_v41 = vsel %vm1572_vm6, %v1723_v52, %v1145_v32  ;;  %vm14023_vm4 = vcmask 703488   ;;  %v1656_v57 = vsel %vm1641_vm12, %v1633_v29, %v10482_v11 }
 0x1ed   :  { %v11140_v4 = vpop.permute.xlu0 %7893  ;;  %v7900_v15 = vunpack.i.l.bf16 %v11144_v13  ;;  %v1232_v62 = vsel %vm14023_vm4, %v7801_v8, %v7890_v6  ;;  %vm14024_vm10 = vmmov %vm14023_vm4  ;;  %vm14026_vm7 = vcmask 695296  }
 0x1ee   :  { %v7895_v38 = vunpack.i.l.bf16 %v11140_v4  ;;  %v1233_v56 = vsel %vm14024_vm10, %v7890_v6, %v7891_v40  ;;  %v1766_v8 = vsel %vm13537_vm8, %v1744_v17, %v1232_v62  ;;  %vm14025_vm14 = vmmov %vm14023_vm4 }
 0x1ef   :  { %v1234_v6 = vsel %vm14025_vm14, %v7891_v40, %v7900_v15  ;;  %vm14027_vm1 = vmmov %vm14026_vm7  ;;  %vm14031_vm14 = vcmask 556032  }
 0x1f0   :  { %v11172_v5 = vpop.permute.xlu1 %7908  ;;  %v530_v33 = vsel %vm14022_vm0, %v7881_v49, %v7895_v38  ;;  %v1655_v49 = vsel %vm1641_vm12, %v1632_v22, %v10479_v50  ;;  %vm14028_vm0 = vcmask 687104   ;;  %vm14030_vm10 = vmmov %vm14027_vm1 }
 0x1f1   :  { %v7904_v60 = vpop.permute.xlu0 %7903  ;;  %v1611_v27 = vsel %vm13537_vm8, %v10328_v30, %v530_v33  ;;  %v7910_v16 = vunpack.i.l.bf16 %v11172_v5  ;;  %v1767_v30 = vsel %vm13537_vm8, %v1745_v41, %v1233_v56  ;;  %v1678_v29 = vsel %vm1664_vm13, %v1655_v49, %v10498_v24  ;;  %vm14029_vm4 = vmmov %vm14028_vm0  ;;  %v14034_v56 = vld [vmem:[#allocation12_spill] sm:$0xff] }
 0x1f2   :  { %v7906_v47 = vunpack.i.h.bf16 %v7904_v60  ;;  %v7905_v53 = vunpack.i.l.bf16 %v7904_v60  ;;  %v1746_v60 = vsel %vm1572_vm6, %v1724_v63, %v1146_v14 }
 0x1f3   :  { %v1768_v22 = vsel %vm13537_vm8, %v1746_v60, %v1234_v6 }
 0x1f4   :  { %v11199_v19 = vpop.permute.xlu1 %7918  ;;  %v1320_v50 = vsel %vm14026_vm7, %v7811_v35, %v7905_v53  ;;  %v1321_v51 = vsel %vm14027_vm1, %v7905_v53, %v7906_v47  ;;  %v1634_v35 = vsel %vm1618_vm11, %v1611_v27, %v10431_v37  ;;  %v1322_v59 = vsel %vm14030_vm10, %v7906_v47, %v7910_v16  ;;  %vm14032_vm7 = vmmov %vm14031_vm14 }
 0x1f5   :  { %v7914_v20 = vpop.permute.xlu0 %7913  ;;  %v7920_v11 = vunpack.i.l.bf16 %v11199_v19  ;;  %v1789_v33 = vsel %vm1618_vm11, %v1767_v30, %v1321_v51  ;;  %v1788_v53 = vsel %vm1618_vm11, %v1766_v8, %v1320_v50  ;;  %vm14033_vm1 = vmmov %vm14028_vm0  ;;  %v1790_v6 = vsel %vm1618_vm11, %v1768_v22, %v1322_v59  ;;  %v14036_v50 = vld [vmem:[#allocation18_spill] sm:$0xff] }
 0x1f6   :  { %v7916_v34 = vunpack.i.h.bf16 %v7914_v20  ;;  %v7915_v31 = vunpack.i.l.bf16 %v7914_v20  ;;  %v1679_v51 = vsel %vm1664_vm13, %v1656_v57, %v14036_v50  ;;  %v14038_v57 = vunpack.i.h.bf16 %v11018_v44 }
 0x1f7   :  { %v7896_v44 = vunpack.i.h.bf16 %v11140_v4  ;;  %vm14040_vm10 = vcmask 203776   ;;  %v7886_v50 = vunpack.i.h.bf16 %v11121_v0  ;;  %v14041_v4 = vunpack.i.l.bf16 %v11074_v9 }
 0x1f8   :  { %v1408_v32 = vsel %vm14028_vm0, %v7821_v45, %v7915_v31  ;;  %v1409_v40 = vsel %vm14029_vm4, %v7915_v31, %v7916_v34  ;;  %v11226_v45 = vpop.permute.xlu1 %7928  ;;  %v1410_v47 = vsel %vm14033_vm1, %v7916_v34, %v7920_v11  ;;  %v1657_v31 = vsel %vm1641_vm12, %v1634_v35, %v14034_v56  ;;  %vm14035_vm0 = vmmov %vm14032_vm7 }
 0x1f9   :  { %v7924_v52 = vpop.permute.xlu0 %7923  ;;  %v7930_v63 = vunpack.i.l.bf16 %v11226_v45  ;;  %v1810_v17 = vsel %vm1641_vm12, %v1788_v53, %v1408_v32  ;;  %v1811_v41 = vsel %vm1641_vm12, %v1789_v33, %v1409_v40  ;;  %v6487_v34 = vpack.c.bf16 %v11154_v7, %v11151_v10 }
 0x1fa   :  { %v7926_v14 = vunpack.i.h.bf16 %v7924_v52  ;;  %v7925_v54 = vunpack.i.l.bf16 %v7924_v52  ;;  %vm14039_vm4 = vcmask 1014784   ;;  %vm14046_vm1 = vcmask 711680  }
 0x1fc   :  { %v1497_v24 = vsel %vm14031_vm14, %v7925_v54, %v7926_v14  ;;  %v1496_v37 = vsel %vm14032_vm7, %v7831_v42, %v7925_v54  ;;  %v1498_v8 = vsel %vm14035_vm0, %v7926_v14, %v7930_v63  ;;  %v14037_v14 = vld [vmem:[#allocation63_spill] sm:$0xff]  ;;  %vm14042_vm14 = vcmask 719872   ;;  %vm14044_vm7 = vmmov %vm14040_vm10 }
 0x1fd   :  { %v7934_v62 = vpop.permute.xlu0 %7933  ;;  %v1832_v20 = vsel %vm1664_vm13, %v1810_v17, %v1496_v37  ;;  %v1833_v1 = vsel %vm1664_vm13, %v1811_v41, %v1497_v24  ;;  %v1680_v54 = vsel %vm1664_vm13, %v1657_v31, %v14037_v14  ;;  %vm14048_vm0 = vcmask 703488  }
 0x1fe   :  { %v7936_v49 = vunpack.i.h.bf16 %v7934_v62  ;;  %v7935_v60 = vunpack.i.l.bf16 %v7934_v62  ;;  %v6485_v27 = vpack.c.bf16 %v1832_v20, %v1678_v29  ;;  %v1812_v29 = vsel %vm1641_vm12, %v1790_v6, %v1410_v47  ;;  %v11293_v6 = vld [vmem:[#allocation2] sm:$0xff] }
 0x1ff   :  { %v7939_v42 = vpop.permute.xlu1 %7938  ;;  %v1834_v35 = vsel %vm1664_vm13, %v1812_v29, %v1498_v8  ;;  %v6497_v7 = vpack.c.bf16 %v1833_v1, %v1679_v51  ;;  %v531_v8 = vsel %vm14039_vm4, %v7895_v38, %v7896_v44  ;;  %v7901_v51 = vunpack.i.h.bf16 %v11144_v13 }
 0x200   :  { %v7941_v30 = vunpack.i.h.bf16 %v7939_v42  ;;  %v7940_v32 = vunpack.i.l.bf16 %v7939_v42  ;;  %v2163_v52 = vsel %vm2149_vm9, %v7935_v60, %v7936_v49  ;;  %6486 = vmatprep.subr.bf16.mxu0 %v6485_v27  ;;  %v2162_v40 = vsel %vm2149_vm9, %v7846_v61, %v7935_v60 }
 0x201   :  { %v11259_v10 = vpop.permute.xlu0 %7943  ;;  %6488 = vmatpush1.bf16.msra.mxu0 %v6487_v34  ;;  %v6495_v59 = vpack.c.bf16 %v1834_v35, %v1680_v54  ;;  %v7871_v42 = vunpack.i.h.bf16 %v11085_v18  ;;  %v1147_v35 = vsel %vm14046_vm1, %v7885_v46, %v7886_v50  ;;  %v7921_v18 = vunpack.i.h.bf16 %v11199_v19 }
 0x202   :  { %v2183_v22 = vsel %vm2149_vm9, %v14038_v57, %v7940_v32  ;;  %v2184_v33 = vsel %vm2149_vm9, %v7940_v32, %v7941_v30  ;;  %v7946_v28 = vunpack.i.h.bf16 %v11259_v10  ;;  %v7945_v61 = vunpack.i.l.bf16 %v11259_v10 }
 0x203   :  { %v11266_v53 = vpop.permute.xlu1 %7948  ;;  %v6489_v24 = vpack.c.bf16 %v2184_v33, %v2163_v52  ;;  %v6492_v37 = vpack.c.bf16 %v2183_v22, %v2162_v40  ;;  %6496 = vmatprep.subr.bf16.mxu1 %v6495_v59  ;;  %v1059_v32 = vsel %vm14042_vm14, %v7870_v26, %v7871_v42  ;;  %v14043_v52 = vld [vmem:[#allocation43_spill] sm:$0xff]  ;;  %v7911_v40 = vunpack.i.h.bf16 %v11172_v5 }
 0x204   :  { %v7951_v17 = vunpack.i.h.bf16 %v11266_v53  ;;  %v7950_v41 = vunpack.i.l.bf16 %v11266_v53  ;;  %v2164_v47 = vsel %vm2149_vm9, %v7936_v49, %v7945_v61  ;;  %v2165_v62 = vsel %vm2149_vm9, %v7945_v61, %v7946_v28  ;;  %6498 = vmatpush1.bf16.msra.mxu1 %v6497_v7  ;;  %v14047_v7 = vld [vmem:[#allocation44_spill] sm:$0xff] }
 0x205   :  { %6491 = vmatprep.subr.msk.bf16.mxu0 %vm10083_vm5, %v6489_v24  ;;  %v7954_v20 = vpop.permute.xlu0 %7953  ;;  %v7861_v49 = vunpack.i.h.bf16 %v11074_v9  ;;  %v1612_v29 = vsel %vm13537_vm8, %v14043_v52, %v531_v8  ;;  %v14045_v9 = vld [vmem:[#allocation64_spill] sm:$0xff]  ;;  %v1235_v22 = vsel %vm14048_vm0, %v7900_v15, %v7901_v51  ;;  %v7931_v33 = vunpack.i.h.bf16 %v11226_v45 }
 0x206   :  { %v2185_v56 = vsel %vm2149_vm9, %v7941_v30, %v7950_v41  ;;  %v2186_v31 = vsel %vm2149_vm9, %v7950_v41, %v7951_v17  ;;  %6494 = vmatpush1.bf16.msk.msra.mxu0 %vm10083_vm5, %v6492_v37  ;;  %v1635_v57 = vsel %vm1618_vm11, %v1612_v29, %v14047_v7  ;;  %vm14049_vm4 = vcmask 695296  }
 0x207   :  { %v6502_v60 = vpack.c.bf16 %v2185_v56, %v2164_v47  ;;  %v11285_v27 = vpop.permute.xlu1 %950  ;;  %v6499_v1 = vpack.c.bf16 %v2186_v31, %v2165_v62  ;;  %v971_v38 = vsel %vm954_vm15, %v14041_v4, %v7861_v49  ;;  %v1323_v46 = vsel %vm14049_vm4, %v7910_v16, %v7911_v40  ;;  %v14051_v56 = vld [vmem:[#allocation62_spill] sm:$0xff] }
 0x208   :  { %v1703_v54 = vsel %vm1526_vm2, %v14045_v9, %v971_v38  ;;  %v7956_v59 = vunpack.i.h.bf16 %v7954_v20  ;;  %v7955_v61 = vunpack.i.l.bf16 %v7954_v20  ;;  %v1658_v31 = vsel %vm1641_vm12, %v1635_v57, %v14051_v56  ;;  %v14054_v9 = vld [vmem:[#allocation45_spill] sm:$0xff]  ;;  %v14064_v56 = vld [vmem:[#allocation19_spill] sm:$0xff] }
 0x209   :  { %6501 = vmatprep.subr.msk.bf16.mxu1 %vm10083_vm5, %v6499_v1  ;;  %5933 = vmatmul.mubr.msk.f32.vlgmr.msra.gmra.mrb[6].mxu0 %vm14040_vm10, %v11293_v6  ;;  %v7959_v34 = vpop.permute.xlu0 %7958  ;;  %v1725_v26 = vsel %vm13538_vm3, %v1703_v54, %v1059_v32  ;;  %vm14050_vm10 = vcmask 687104   ;;  %vm14052_vm14 = vcmask 556032   ;;  %v11361_v54 = vsel %vm1664_vm13, %v1658_v31, %v14054_v9 }
 0x20a   :  { %6504 = vmatpush1.bf16.msk.msra.mxu1 %vm10083_vm5, %v6502_v60  ;;  %2899 = vmatprep.mubr.f32.mxu0 %v13807_v21  ;;  %v1747_v37 = vsel %vm1572_vm6, %v1725_v26, %v1147_v35  ;;  %v1411_v15 = vsel %vm14050_vm10, %v7920_v11, %v7921_v18  ;;  %v1499_v20 = vsel %vm14052_vm14, %v7930_v63, %v7931_v33  ;;  %v7960_v60 = vunpack.i.l.bf16 %v7959_v34 }
 0x20b   :  { %v11305_v30 = vpop.permute.xlu1 %1038  ;;  %v1769_v47 = vsel %vm13537_vm8, %v1747_v37, %v1235_v22  ;;  %v972_v4 = vsel %vm954_vm15, %v7861_v49, %v7955_v61  ;;  %v973_v11 = vsel %vm954_vm15, %v7955_v61, %v7956_v59  ;;  %v7961_v38 = vunpack.i.h.bf16 %v7959_v34 }
 0x20c   :  { %v1791_v16 = vsel %vm1618_vm11, %v1769_v47, %v1323_v46  ;;  %v974_v34 = vsel %vm954_vm15, %v7956_v59, %v11285_v27  ;;  %v1704_v26 = vsel %vm1526_vm2, %v10824_v55, %v972_v4  ;;  %v1705_v7 = vsel %vm1526_vm2, %v10827_v43, %v973_v11  ;;  %v14066_v11 = vld [vmem:[#allocation8_spill] sm:$0xff] }
 0x20d   :  { %5936 = vmatmul.mubr.msk.f32.vlgmr.msra.gmra.mrb[6].mxu1 %vm14044_vm7, %v11293_v6  ;;  %v7964_v14 = vpop.permute.xlu0 %7963  ;;  %vm14053_vm7 = vcmask 1014784   ;;  %v1813_v52 = vsel %vm1641_vm12, %v1791_v16, %v1411_v15  ;;  %vm14056_vm0 = vcmask 719872   ;;  %vm14059_vm14 = vcmask 711680  }
 0x20e   :  { %2970 = vmatprep.mubr.f32.mxu1 %v13807_v21  ;;  %v7965_v32 = vunpack.i.l.bf16 %v7964_v14  ;;  %vm14055_vm1 = vmmov %vm14053_vm7  ;;  %v7966_v35 = vunpack.i.h.bf16 %v7964_v14  ;;  %v11367_v49 = vsel %vm1664_vm13, %v1813_v52, %v1499_v20  ;;  %v1060_v57 = vsel %vm14056_vm0, %v7871_v42, %v7960_v60 }
 0x20f   :  { %v7969_v0 = vpop.permute.xlu1 %7968  ;;  %vm14057_vm4 = vmmov %vm14056_vm0  ;;  %v1726_v37 = vsel %vm13538_vm3, %v1704_v26, %v1060_v57 }
 0x210   :  { %v7970_v24 = vunpack.i.l.bf16 %v7969_v0  ;;  %v7971_v62 = vunpack.i.h.bf16 %v7969_v0  ;;  %vm14058_vm10 = vmmov %vm14056_vm0  ;;  %v1148_v0 = vsel %vm14059_vm14, %v7886_v50, %v7965_v32  ;;  %v1706_v50 = vsel %vm1526_vm2, %v10847_v3, %v974_v34 }
 0x211   :  { %v11337_v41 = vpop.permute.xlu0 %1126  ;;  %v1061_v14 = vsel %vm14058_vm10, %v7960_v60, %v7961_v38  ;;  %v14065_v60 = vld [vmem:[#allocation7_spill] sm:$0xff] }
 0x212   :  { %v532_v1 = vsel %vm14053_vm7, %v7896_v44, %v7970_v24  ;;  %v533_v63 = vsel %vm14055_vm1, %v7970_v24, %v7971_v62  ;;  %vm14060_vm7 = vmmov %vm14055_vm1  ;;  %v14061_v24 = vld [vmem:[#allocation17_spill] sm:$0xff] }
 0x213   :  { %v7974_v8 = vpop.permute.xlu1 %7973  ;;  %v1613_v44 = vsel %vm13537_vm8, %v10693_v25, %v532_v1  ;;  %v1062_v25 = vsel %vm14057_vm4, %v7961_v38, %v11305_v30  ;;  %v1614_v55 = vsel %vm13537_vm8, %v10696_v36, %v533_v63  ;;  %vm14062_vm1 = vmmov %vm14059_vm14  ;;  %vm14067_vm4 = vcmask 703488  }
 0x214   :  { %v7976_v59 = vunpack.i.h.bf16 %v7974_v8  ;;  %v7975_v61 = vunpack.i.l.bf16 %v7974_v8  ;;  %v1636_v42 = vsel %vm1618_vm11, %v1613_v44, %v14061_v24  ;;  %v1149_v47 = vsel %vm14062_vm1, %v7965_v32, %v7966_v35  ;;  %vm14063_vm0 = vmmov %vm14062_vm1 }
 0x215   :  { %v11357_v29 = vpop.permute.xlu0 %510  ;;  %v1150_v15 = vsel %vm14063_vm0, %v7966_v35, %v11337_v41  ;;  %v1637_v1 = vsel %vm1618_vm11, %v1614_v55, %v14065_v60  ;;  %v1748_v8 = vsel %vm1572_vm6, %v1726_v37, %v1148_v0  ;;  %v1728_v4 = vsel %vm13538_vm3, %v1706_v50, %v1062_v25  ;;  %vm14068_vm10 = vmmov %vm14067_vm4  ;;  %v14070_v35 = vld [vmem:[#allocation50_spill] sm:$0xff]  ;;  %v14073_v25 = vld [vmem:[#allocation9_spill] sm:$0xff] }
 0x216   :  { %v534_v46 = vsel %vm14060_vm7, %v7971_v62, %v11357_v29  ;;  %v1727_v62 = vsel %vm13538_vm3, %v1705_v7, %v1061_v14  ;;  %v1659_v38 = vsel %vm1641_vm12, %v1636_v42, %v14066_v11  ;;  %v1236_v32 = vsel %vm14067_vm4, %v7901_v51, %v7975_v61  ;;  %vm14069_vm14 = vmmov %vm14067_vm4  ;;  %v14074_v0 = vld [vmem:[#allocation10_spill] sm:$0xff]  ;;  %v14079_v37 = vld [vmem:[#allocation55_spill] sm:$0xff] }
 0x217   :  { %v11376_v22 = vpop.permute.xlu1 %1214  ;;  %v1615_v36 = vsel %vm13537_vm8, %v14064_v56, %v534_v46  ;;  %v1749_v3 = vsel %vm1572_vm6, %v1727_v62, %v1149_v47  ;;  %v1237_v52 = vsel %vm14068_vm10, %v7975_v61, %v7976_v59  ;;  %v1750_v9 = vsel %vm1572_vm6, %v1728_v4, %v1150_v15 }
 0x218   :  { %v1238_v44 = vsel %vm14069_vm14, %v7976_v59, %v11376_v22  ;;  %v1638_v34 = vsel %vm1618_vm11, %v1615_v36, %v14070_v35  ;;  %vm14071_vm7 = vcmask 695296   ;;  %v1682_v14 = vsel %vm1664_vm13, %v1659_v38, %v14073_v25 }
 0x219   :  { %v7979_v43 = vpop.permute.xlu0 %7978  ;;  %vm14072_vm1 = vmmov %vm14071_vm7  ;;  %v1660_v46 = vsel %vm1641_vm12, %v1637_v1, %v14074_v0  ;;  %v1770_v55 = vsel %vm13537_vm8, %v1748_v8, %v1236_v32  ;;  %vm14076_vm4 = vcmask 687104   ;;  %v1771_v61 = vsel %vm13537_vm8, %v1749_v3, %v1237_v52  ;;  %v14084_v32 = vld [vmem:[#allocation21_spill] sm:$0xff] }
 0x21a   :  { %v7981_v16 = vunpack.i.h.bf16 %v7979_v43  ;;  %v7980_v20 = vunpack.i.l.bf16 %v7979_v43  ;;  %vm14075_vm0 = vmmov %vm14072_vm1  ;;  %v1772_v43 = vsel %vm13537_vm8, %v1750_v9, %v1238_v44  ;;  %v1661_v47 = vsel %vm1641_vm12, %v1638_v34, %v14079_v37 }
 0x21b   :  { %v11397_v31 = vpop.permute.xlu1 %1302  ;;  %vm14077_vm10 = vmmov %vm14076_vm4  ;;  %v1684_v52 = vsel %vm1664_vm13, %v1661_v47, %v14084_v32 }
 0x21c   :  { %v1324_v57 = vsel %vm14071_vm7, %v7911_v40, %v7980_v20  ;;  %v1325_v13 = vsel %vm14072_vm1, %v7980_v20, %v7981_v16  ;;  %v1326_v59 = vsel %vm14075_vm0, %v7981_v16, %v11397_v31  ;;  %vm14078_vm14 = vmmov %vm14076_vm4  ;;  %v14080_v20 = vld [vmem:[#allocation51_spill] sm:$0xff]  ;;  %vm14081_vm7 = vcmask 556032  }
 0x21d   :  { %v7984_v63 = vpop.permute.xlu0 %7983  ;;  %v1793_v15 = vsel %vm1618_vm11, %v1771_v61, %v1325_v13  ;;  %v1792_v19 = vsel %vm1618_vm11, %v1770_v55, %v1324_v57  ;;  %v1794_v16 = vsel %vm1618_vm11, %v1772_v43, %v1326_v59  ;;  %v1683_v60 = vsel %vm1664_vm13, %v1660_v46, %v14080_v20  ;;  %vm14082_vm1 = vmmov %vm14081_vm7 }
 0x21e   :  { %v7986_v26 = vunpack.i.h.bf16 %v7984_v63  ;;  %v7985_v7 = vunpack.i.l.bf16 %v7984_v63  ;;  %vm14083_vm0 = vmmov %vm14082_vm1 }
 0x21f   :  { %v11419_v51 = vpop.permute.xlu1 %1390 }
 0x220   :  { %v1412_v5 = vsel %vm14076_vm4, %v7921_v18, %v7985_v7  ;;  %v1413_v40 = vsel %vm14077_vm10, %v7985_v7, %v7986_v26  ;;  %v1414_v24 = vsel %vm14078_vm14, %v7986_v26, %v11419_v51  ;;  %v6507_v26 = vpack.c.bf16 %v11367_v49, %v11361_v54 }
 0x221   :  { %v7989_v42 = vpop.permute.xlu0 %7988  ;;  %v1815_v18 = vsel %vm1641_vm12, %v1793_v15, %v1413_v40  ;;  %v1814_v36 = vsel %vm1641_vm12, %v1792_v19, %v1412_v5  ;;  %v1816_v11 = vsel %vm1641_vm12, %v1794_v16, %v1414_v24  ;;  %vm14085_vm4 = vcmask 203776  }
 0x222   :  { %v7991_v50 = vunpack.i.h.bf16 %v7989_v42  ;;  %v7990_v62 = vunpack.i.l.bf16 %v7989_v42  ;;  %vm14086_vm10 = vcmask 719872   ;;  %vm14088_vm14 = vcmask 711680  }
 0x223   :  { %v11441_v56 = vpop.permute.xlu1 %1478 }
 0x224   :  { %v1501_v1 = vsel %vm14081_vm7, %v7990_v62, %v7991_v50  ;;  %v1500_v8 = vsel %vm14082_vm1, %v7931_v33, %v7990_v62  ;;  %v1502_v4 = vsel %vm14083_vm0, %v7991_v50, %v11441_v56  ;;  %vm14089_vm7 = vcmask 1014784  }
 0x225   :  { %v7994_v38 = vpop.permute.xlu0 %7993  ;;  %v1836_v3 = vsel %vm1664_vm13, %v1814_v36, %v1500_v8  ;;  %v1838_v9 = vsel %vm1664_vm13, %v1816_v11, %v1502_v4  ;;  %v1837_v63 = vsel %vm1664_vm13, %v1815_v18, %v1501_v1  ;;  %v14087_v18 = vld [vmem:[#allocation53_spill] sm:$0xff]  ;;  %vm14092_vm1 = vcmask 703488  }
 0x226   :  { %v7996_v44 = vunpack.i.h.bf16 %v7994_v38  ;;  %v7995_v35 = vunpack.i.l.bf16 %v7994_v38  ;;  %v6505_v45 = vpack.c.bf16 %v1836_v3, %v1682_v14  ;;  %v6515_v34 = vpack.c.bf16 %v1838_v9, %v1684_v52  ;;  %v14093_v3 = vld [vmem:[#allocation28_spill] sm:$0xff] }
 0x227   :  { %v7999_v33 = vpop.permute.xlu1 %7998  ;;  %v6517_v7 = vpack.c.bf16 %v1837_v63, %v1683_v60  ;;  %v14090_v60 = vld [vmem:[#allocation46_spill] sm:$0xff]  ;;  %vm14094_vm0 = vcmask 695296  }
 0x228   :  { %v8001_v57 = vunpack.i.h.bf16 %v7999_v33  ;;  %v8000_v13 = vunpack.i.l.bf16 %v7999_v33  ;;  %v2166_v25 = vsel %vm2149_vm9, %v7946_v28, %v7995_v35  ;;  %v2167_v0 = vsel %vm2149_vm9, %v7995_v35, %v7996_v44  ;;  %6506 = vmatprep.subr.bf16.mxu0 %v6505_v45  ;;  %6516 = vmatprep.subr.bf16.mxu1 %v6515_v34  ;;  %v14095_v45 = vld [vmem:[#allocation49_spill] sm:$0xff] }
 0x229   :  { %v11465_v46 = vpop.permute.xlu0 %8003  ;;  %6508 = vmatpush1.bf16.msra.mxu0 %v6507_v26  ;;  %6518 = vmatpush1.bf16.msra.mxu1 %v6517_v7 }
 0x22a   :  { %v2187_v14 = vsel %vm2149_vm9, %v7951_v17, %v8000_v13  ;;  %v2188_v54 = vsel %vm2149_vm9, %v8000_v13, %v8001_v57  ;;  %v8006_v49 = vunpack.i.h.bf16 %v11465_v46  ;;  %v8005_v10 = vunpack.i.l.bf16 %v11465_v46 }
 0x22b   :  { %v6512_v55 = vpack.c.bf16 %v2187_v14, %v2166_v25  ;;  %v11473_v28 = vpop.permute.xlu1 %8008  ;;  %v6509_v59 = vpack.c.bf16 %v2188_v54, %v2167_v0  ;;  %v14098_v14 = vld [vmem:[#allocation54_spill] sm:$0xff] }
 0x22c   :  { %v8011_v5 = vunpack.i.h.bf16 %v11473_v28  ;;  %v8010_v40 = vunpack.i.l.bf16 %v11473_v28  ;;  %v2168_v61 = vsel %vm2149_vm9, %v7996_v44, %v8005_v10  ;;  %v2169_v53 = vsel %vm2149_vm9, %v8005_v10, %v8006_v49 }
 0x22d   :  { %6511 = vmatprep.subr.msk.bf16.mxu0 %vm10083_vm5, %v6509_v59  ;;  %v953_v17 = vpop.permute.xlu0 %952 }
 0x22e   :  { %v2189_v43 = vsel %vm2149_vm9, %v8001_v57, %v8010_v40  ;;  %v2190_v24 = vsel %vm2149_vm9, %v8010_v40, %v8011_v5  ;;  %6514 = vmatpush1.bf16.msk.msra.mxu0 %vm10083_vm5, %v6512_v55  ;;  %v975_v47 = vsel %vm954_vm15, %v11285_v27, %v953_v17  ;;  %v1708_v50 = vsel %vm1526_vm2, %v10829_v12, %v953_v17 }
 0x22f   :  { %v6522_v42 = vpack.c.bf16 %v2189_v43, %v2168_v61  ;;  %v1041_v37 = vpop.permute.xlu1 %1040  ;;  %v6519_v15 = vpack.c.bf16 %v2190_v24, %v2169_v53  ;;  %v1707_v36 = vsel %vm1526_vm2, %v14087_v18, %v975_v47  ;;  %vm14091_vm2 = vmmov %vm14085_vm4 }
 0x230   :  { %v1063_v19 = vsel %vm14086_vm10, %v11305_v30, %v1041_v37  ;;  %v1730_v30 = vsel %vm13538_vm3, %v1708_v50, %v1041_v37  ;;  %vm14097_vm10 = vcmask 556032  }
 0x231   :  { %6521 = vmatprep.subr.msk.bf16.mxu1 %vm10083_vm5, %v6519_v15  ;;  %5939 = vmatmul.mubr.msk.f32.vlgmr.msra.gmra.mrb[8].mxu0 %vm14085_vm4, %v11293_v6  ;;  %v1129_v62 = vpop.permute.xlu0 %1128  ;;  %v1729_v8 = vsel %vm13538_vm3, %v1707_v36, %v1063_v19  ;;  %vm14096_vm4 = vcmask 687104   ;;  %v88_v19 = vld [vmem:[%s13336_s3 + $0x108] sm:$0xff]  ;;  %v13525_v36 = vmov 0.0|0.0  }
 0x232   :  { %6524 = vmatpush1.bf16.msk.msra.mxu1 %vm10083_vm5, %v6522_v42  ;;  %3041 = vmatprep.mubr.f32.mxu0 %v13807_v21  ;;  %v1151_v12 = vsel %vm14088_vm14, %v11337_v41, %v1129_v62  ;;  %v1752_v4 = vsel %vm1572_vm6, %v1730_v30, %v1129_v62  ;;  %v87_v62 = vld [vmem:[%s13336_s3 + $0x100] sm:$0xff]  ;;  %vm14106_vm14 = vcmask 883712  }
 0x233   :  { %v513_v27 = vpop.permute.xlu1 %512 }
 0x234   :  { %v535_v16 = vsel %vm14089_vm7, %v11357_v29, %v513_v27  ;;  %v1617_v20 = vsel %vm13537_vm8, %v11047_v2, %v513_v27  ;;  %v1751_v29 = vsel %vm1572_vm6, %v1729_v8, %v1151_v12  ;;  %v11623_v27 = vpack.c.bf16 %v88_v19, %v87_v62  ;;  %v61_v62 = vld [vmem:[%s13336_s3 + $0x30] sm:$0xff]  ;;  %v62_v19 = vld [vmem:[%s13336_s3 + $0x38] sm:$0xff]  ;;  %vm14107_vm7 = vmmov %vm14106_vm14 }
 0x235   :  { %v1616_v1 = vsel %vm13537_vm8, %v14090_v60, %v535_v16  ;;  %5942 = vmatmul.mubr.msk.f32.vlgmr.msra.gmra.mrb[8].mxu1 %vm14091_vm2, %v11293_v6  ;;  %v1217_v11 = vpop.permute.xlu0 %1216  ;;  %v1640_v41 = vsel %vm1618_vm11, %v1617_v20, %v10737_v39  ;;  %v89_v60 = vld [vmem:[%s13336_s3 + $0x110] sm:$0xff] }
 0x236   :  { %v1239_v2 = vsel %vm14092_vm1, %v11376_v22, %v1217_v11  ;;  %v1774_v38 = vsel %vm13537_vm8, %v1752_v4, %v1217_v11  ;;  %v1639_v32 = vsel %vm1618_vm11, %v1616_v1, %v14093_v3  ;;  %v1663_v39 = vsel %vm1641_vm12, %v1640_v41, %v10761_v58  ;;  %v90_v1 = vld [vmem:[%s13336_s3 + $0x118] sm:$0xff]  ;;  %v91_v11 = vld [vmem:[%s13336_s3 + $0x120] sm:$0xff]  ;;  %v92_v41 = vld [vmem:[%s13336_s3 + $0x128] sm:$0x7] }
 0x237   :  { %v1305_v52 = vpop.permute.xlu1 %1304  ;;  %v1773_v9 = vsel %vm13537_vm8, %v1751_v29, %v1239_v2  ;;  %v1662_v22 = vsel %vm1641_vm12, %v1639_v32, %v14095_v45  ;;  %v1686_v13 = vsel %vm1664_vm13, %v1663_v39, %v10772_v48  ;;  %v11546_v10 = vpop.f32.mrb[0].mxu0  ;;  %v11634_v8 = vpack.c.bf16 %v90_v1, %v89_v60  ;;  %v63_v1 = vld [vmem:[%s13336_s3 + $0x40] sm:$0xff] }
 0x238   :  { %v1327_v63 = vsel %vm14094_vm0, %v11397_v31, %v1305_v52  ;;  %v1796_v44 = vsel %vm1618_vm11, %v1774_v38, %v1305_v52  ;;  %v1685_v54 = vsel %vm1664_vm13, %v1662_v22, %v14098_v14  ;;  %v11548_v55 = vpop.f32.mrb[1].mxu0  ;;  %v14101_v29 = vmov 0  ;;  %v74_v14 = vld [vmem:[%s13336_s3 + $0x98] sm:$0xff] }
 0x239   :  { %v1393_v35 = vpop.permute.xlu0 %1392  ;;  %v1795_v34 = vsel %vm1618_vm11, %v1773_v9, %v1327_v63  ;;  %vm14099_vm11 = vmmov %vm14091_vm2  ;;  %v11655_v2 = vpack.c.bf16 %v92_v41, %v91_v11  ;;  %v64_v11 = vld [vmem:[%s13336_s3 + $0x48] sm:$0xff]  ;;  %vm14108_vm2 = vcmask 875520  }
 0x23a   :  { %v1415_v33 = vsel %vm14096_vm4, %v11419_v51, %v1393_v35  ;;  %v1818_v26 = vsel %vm1641_vm12, %v1796_v44, %v1393_v35  ;;  %vm14109_vm1 = vmmov %vm14108_vm2 }
 0x23b   :  { %v1481_v7 = vpop.permute.xlu1 %1480  ;;  %v1817_v57 = vsel %vm1641_vm12, %v1795_v34, %v1415_v33  ;;  %vm14100_vm12 = vmmov 1   ;;  %vm14112_vm4 = vmmov %vm14107_vm7 }
 0x23c   :  { %v1503_v31 = vsel %vm14097_vm10, %v11441_v56, %v1481_v7  ;;  %v1840_v58 = vsel %vm1664_vm13, %v1818_v26, %v1481_v7  ;;  %v2404_v59 = vpop.f32.mrb[0].mxu1  ;;  %v71_v7 = vld [vmem:[%s13336_s3 + $0x80] sm:$0xff]  ;;  %vm14113_vm10 = vmmov %vm14109_vm1 }
 0x23d   :  { %v1839_v25 = vsel %vm1664_vm13, %v1817_v57, %v1503_v31  ;;  %v6525_v0 = vpack.c.bf16 %v1840_v58, %v1686_v13  ;;  %v2406_v56 = vpop.f32.mrb[1].mxu1  ;;  %vm11651_vm13 = vmpackc.low %vm1572_vm6, %vm14100_vm12  ;;  %v72_v57 = vld [vmem:[%s13336_s3 + $0x88] sm:$0xff]  ;;  %v55_v13 = vld [vmem:[%s13336_s3] sm:$0xff]  ;;  %vm14104_vm6 = vcmask 1039360  }
 0x23e   :  { %v6527_v51 = vpack.c.bf16 %v1839_v25, %v1685_v54  ;;  %v14102_v29 = vsel %vm11651_vm13, 4294967295, %v14101_v29  ;;  %v11713_v31 = vpack.c.bf16 %v72_v57, %v71_v7  ;;  %v56_v58 = vld [vmem:[%s13336_s3 + $0x8] sm:$0xff]  ;;  %vm14115_vm12 = vmmov %vm14112_vm4 }
 0x23f   :  { %6526 = vmatprep.subr.bf16.mxu0 %v6525_v0  ;;  %14103 = vst [vmem:[#allocation22_spill] sm:$0xff] %v14102_v29  ;;  %v11724_v25 = vpack.c.bf16 %v56_v58, %v55_v13  ;;  %v73_v0 = vld [vmem:[%s13336_s3 + $0x90] sm:$0xff] }
 0x240   :  { %6528 = vmatpush1.bf16.msra.mxu0 %v6527_v51  ;;  %v11735_v51 = vpack.c.bf16 %v74_v14, %v73_v0  ;;  %6536 = vmatprep.subr.bf16.mxu1 %v11713_v31  ;;  %v83_v14 = vld [vmem:[%s13336_s3 + $0xe0] sm:$0xff] }
 0x241   :  { %6538 = vmatpush3.bf16.msra.mxu1 %v11724_v25 }
 0x242   :  { %6540 = vmatprep.subr.bf16.mxu1 %v11735_v51 }
 0x24c   :  { %v11550_v40 = vpop.permute.xlu1 %2216 }
 0x24d   :  { %v11553_v48 = vadd.f32 %v2406_v56, %v11550_v40  ;;  %v11595_v15 = vadd.f32 %v2404_v59, %v11550_v40  ;;  %v11674_v3 = vadd.f32 %v11548_v55, %v11550_v40  ;;  %v57_v55 = vld [vmem:[%s13336_s3 + $0x10] sm:$0xff]  ;;  %v58_v59 = vld [vmem:[%s13336_s3 + $0x18] sm:$0xff] }
 0x24f   :  { %3076 = vrot.lane.b32.xlu1 %v11553_v48, %s8385_s1 }
 0x250   :  { %v8014_v61 = vpop.permute.xlu0 %8013 }
 0x251   :  { %v8016_v53 = vunpack.i.h.bf16 %v8014_v61  ;;  %v8015_v17 = vunpack.i.l.bf16 %v8014_v61  ;;  %v11751_v61 = vpack.c.bf16 %v58_v59, %v57_v55  ;;  %v84_v55 = vld [vmem:[%s13336_s3 + $0xe8] sm:$0xff]  ;;  %v67_v59 = vld [vmem:[%s13336_s3 + $0x60] sm:$0xff] }
 0x253   :  { %v2191_v43 = vsel %vm2149_vm9, %v8011_v5, %v8016_v53  ;;  %v2170_v24 = vsel %vm2149_vm9, %v8006_v49, %v8015_v17  ;;  %v6529_v42 = vpack.c.bf16 %v8016_v53, %v8015_v17  ;;  %3179 = vrot.lane.b32.xlu1 %v11553_v48, %s8389_s15  ;;  %vm8406_vm9 = vmmov 0   ;;  %v75_v53 = vld [vmem:[%s13336_s3 + $0xa0] sm:$0xff]  ;;  %v76_v17 = vld [vmem:[%s13336_s3 + $0xa8] sm:$0xff]  ;;  %6542 = vmatpush3.bf16.msra.mxu1 %v11751_v61 }
 0x254   :  { %v6532_v37 = vpack.c.bf16 %v2191_v43, %v2170_v24  ;;  %v11759_v43 = vpack.c.bf16 %v76_v17, %v75_v53  ;;  %v59_v24 = vld [vmem:[%s13336_s3 + $0x20] sm:$0xff]  ;;  %v11844_v53 = vpack.c.bf16 %v84_v55, %v83_v14 }
 0x255   :  { %6531 = vmatprep.subr.msk.bf16.mxu0 %vm10083_vm5, %v6529_v42  ;;  %v60_v42 = vld [vmem:[%s13336_s3 + $0x28] sm:$0xff] }
 0x256   :  { %6534 = vmatpush1.bf16.msk.msra.mxu0 %vm10083_vm5, %v6532_v37  ;;  %v77_v37 = vld [vmem:[%s13336_s3 + $0xb0] sm:$0xff]  ;;  %6544 = vmatprep.subr.bf16.mxu1 %v11759_v43  ;;  %vm14105_vm5 = vmmov %vm14104_vm6 }
 0x257   :  { %6567 = vmatprep.subr.bf16.mxu0 %v13525_v36  ;;  %vm14111_vm0 = vmmov %vm14105_vm5 }
 0x259   :  { %5945 = vmatmul.mubr.msk.f32.vlgmr.msra.gmra.mrb[10].mxu0 %vm14099_vm11, %v11293_v6  ;;  %vm14114_vm11 = vmmov %vm14111_vm0 }
 0x25a   :  { %6569 = vmatpush3.bf16.msra.mxu0 %v11623_v27  ;;  %6340 = vmatprep.mubr.msk.f32.mxu0 %vm8406_vm9, %v13807_v21 }
 0x25b   :  { %6570 = vmatprep.subr.bf16.mxu0 %v13525_v36 }
 0x25e   :  { %6572 = vmatpush3.bf16.msra.mxu0 %v11634_v8 }
 0x25f   :  { %6573 = vmatprep.subr.bf16.mxu0 %v13525_v36 }
 0x262   :  { %v2475_v28 = vpop.f32.mrb[2].mxu0  ;;  %6576 = vmatpush3.bf16.msk.msra.mxu0 %vm11651_vm13, %v11655_v2 }
 0x263   :  { %v11572_v5 = vadd.f32 %v2475_v28, %v11550_v40  ;;  %v2477_v46 = vpop.f32.mrb[3].mxu0  ;;  %6578 = vmatprep.subr.bf16.mxu0 %v11713_v31  ;;  %v78_v28 = vld [vmem:[%s13336_s3 + $0xb8] sm:$0xff] }
 0x264   :  { %v11575_v49 = vadd.f32 %v2477_v46, %v11550_v40 }
 0x265   :  { %3078 = vrot.lane.b32.xlu0 %v11572_v5, %s8385_s1 }
 0x266   :  { %3080 = vrot.lane.b32.xlu1 %v11575_v49, %s8385_s1 }
 0x267   :  { %v2546_v47 = vpop.f32.mrb[2].mxu1 }
 0x268   :  { %v11582_v23 = vadd.f32 %v2546_v47, %v11550_v40  ;;  %v2548_v6 = vpop.f32.mrb[3].mxu1  ;;  %v11777_v47 = vpack.c.bf16 %v60_v42, %v59_v24 }
 0x269   :  { %v11604_v50 = vadd.f32 %v2548_v6, %v11550_v40  ;;  %v11779_v6 = vpack.c.bf16 %v78_v28, %v77_v37 }
 0x26a   :  { %3183 = vrot.lane.b32.xlu1 %v11575_v49, %s8389_s15  ;;  %3082 = vrot.lane.b32.xlu0 %v11582_v23, %s8385_s1 }
 0x26b   :  { %6546 = vmatpush3.bf16.msra.mxu1 %v11777_v47 }
 0x26c   :  { %6548 = vmatprep.subr.bf16.mxu1 %v11779_v6 }
 0x26e   :  { %3286 = vrot.lane.b32.xlu1 %v11575_v49, %s8390_s18  ;;  %3181 = vrot.lane.b32.xlu0 %v11572_v5, %s8389_s15 }
 0x272   :  { %3282 = vrot.lane.b32.xlu1 %v11553_v48, %s8390_s18  ;;  %3185 = vrot.lane.b32.xlu0 %v11582_v23, %s8389_s15 }
 0x276   :  { %3074 = vrot.lane.b32.xlu1 %v11595_v15, %s8385_s1  ;;  %3284 = vrot.lane.b32.xlu0 %v11572_v5, %s8390_s18 }
 0x27a   :  { %3187 = vrot.lane.b32.xlu1 %v11604_v50, %s8389_s15  ;;  %3288 = vrot.lane.b32.xlu0 %v11582_v23, %s8390_s18 }
 0x27e   :  { %3084 = vrot.lane.b32.xlu0 %v11604_v50, %s8385_s1 }
 0x282   :  { %3290 = vrot.lane.b32.xlu0 %v11604_v50, %s8390_s18 }
 0x286   :  { %3177 = vrot.lane.b32.xlu0 %v11595_v15, %s8389_s15 }
 0x2aa   :  { %v2617_v18 = vpop.f32.mrb[4].mxu0 }
 0x2ab   :  { %v2619_v12 = vpop.f32.mrb[5].mxu0  ;;  %v11686_v9 = vadd.f32 %v2617_v18, %v11550_v40 }
 0x2ac   :  { %v11640_v4 = vadd.f32 %v2619_v12, %v11550_v40  ;;  %v79_v12 = vld [vmem:[%s13336_s3 + $0xc0] sm:$0xff] }
 0x2ae   :  { %v2688_v16 = vpop.f32.mrb[4].mxu1 }
 0x2af   :  { %v2689_v20 = vadd.f32 %v2688_v16, %v11550_v40  ;;  %v2690_v30 = vpop.f32.mrb[5].mxu1  ;;  %v80_v16 = vld [vmem:[%s13336_s3 + $0xc8] sm:$0xff] }
 0x2b0   :  { %v11670_v38 = vadd.f32 %v2690_v30, %v11550_v40  ;;  %v11797_v60 = vpack.c.bf16 %v80_v16, %v79_v12  ;;  %v85_v16 = vld [vmem:[%s13336_s3 + $0xf0] sm:$0xff] }
 0x2b1   :  { %3090 = vrot.lane.b32.xlu0 %v2689_v20, %s8385_s1  ;;  %3193 = vrot.lane.b32.xlu1 %v2689_v20, %s8389_s15 }
 0x2b2   :  { %v8018_v32 = vpack.i.bf16 %v11674_v3, %v11670_v38 }
 0x2b5   :  { %3191 = vrot.lane.b32.xlu0 %v11640_v4, %s8389_s15  ;;  %3088 = vrot.lane.b32.xlu1 %v11640_v4, %s8385_s1 }
 0x2b9   :  { %3296 = vrot.lane.b32.xlu0 %v2689_v20, %s8390_s18  ;;  %3294 = vrot.lane.b32.xlu1 %v11640_v4, %s8390_s18  ;;  %v11795_v20 = vpack.c.bf16 %v62_v19, %v61_v62 }
 0x2bb   :  { %6550 = vmatpush3.bf16.msra.mxu1 %v11795_v20 }
 0x2bc   :  { %6552 = vmatprep.subr.bf16.mxu1 %v11797_v60 }
 0x2bd   :  { %3195 = vrot.lane.b32.xlu0 %v11670_v38, %s8389_s15  ;;  %3280 = vrot.lane.b32.xlu1 %v11595_v15, %s8390_s18 }
 0x2c1   :  { %8019 = vrot.lane.b32.xlu1 %v8018_v32, %s8385_s1  ;;  %v11698_v34 = vpop.permute.xlu1 %3076  ;;  %v11809_v32 = vpack.c.bf16 %v64_v11, %v63_v1 }
 0x2c3   :  { %6554 = vmatpush3.bf16.msra.mxu1 %v11809_v32 }
 0x2c5   :  { %3298 = vrot.lane.b32.xlu1 %v11670_v38, %s8390_s18  ;;  %v11732_v54 = vpop.permute.xlu1 %3179 }
 0x2d7   :  { %v11702_v33 = vpop.permute.xlu0 %3078 }
 0x2d8   :  { %v3081_v46 = vpop.permute.xlu1 %3080  ;;  %v3117_v13 = vsel %vm14104_vm6, %v11698_v34, %v11702_v33  ;;  %vm14116_vm6 = vmmov %vm14109_vm1 }
 0x2d9   :  { %v3118_v58 = vsel %vm14105_vm5, %v11702_v33, %v3081_v46  ;;  %v68_v33 = vld [vmem:[%s13336_s3 + $0x68] sm:$0xff]  ;;  %v3156_v37 = vmax.f32 %v11553_v48, %v3117_v13  ;;  %v69_v48 = vld [vmem:[%s13336_s3 + $0x70] sm:$0xff]  ;;  %vm14117_vm5 = vmmov %vm14111_vm0 }
 0x2da   :  { %v11852_v42 = vpack.c.bf16 %v68_v33, %v67_v59  ;;  %v3157_v28 = vmax.f32 %v11572_v5, %v3118_v58 }
 0x2dc   :  { %v2759_v52 = vpop.f32.mrb[6].mxu0  ;;  %v11746_v56 = vpop.permute.xlu0 %3082 }
 0x2dd   :  { %v11689_v63 = vadd.f32 %v2759_v52, %v11550_v40  ;;  %v2761_v44 = vpop.f32.mrb[7].mxu0  ;;  %v3184_v30 = vpop.permute.xlu1 %3183  ;;  %v81_v52 = vld [vmem:[%s13336_s3 + $0xd0] sm:$0xff]  ;;  %v3119_v58 = vsel %vm14111_vm0, %v3081_v46, %v11746_v56 }
 0x2de   :  { %v11705_v26 = vadd.f32 %v2761_v44, %v11550_v40  ;;  %v82_v44 = vld [vmem:[%s13336_s3 + $0xd8] sm:$0xff]  ;;  %v3158_v46 = vmax.f32 %v11575_v49, %v3119_v58 }
 0x2df   :  { %v8023_v35 = vpack.i.bf16 %v11689_v63, %v11686_v9 }
 0x2e0   :  { %v2830_v39 = vpop.f32.mrb[6].mxu1  ;;  %v3182_v18 = vpop.permute.xlu0 %3181 }
 0x2e1   :  { %v11693_v45 = vpop.f32.mrb[7].mxu1  ;;  %8024 = vrot.lane.b32.xlu0 %v8023_v35, %s8385_s1  ;;  %8029 = vrot.lane.b32.xlu1 %v8023_v35, %s8389_s15  ;;  %v2831_v22 = vadd.f32 %v2830_v39, %v11550_v40  ;;  %v11820_v39 = vpack.c.bf16 %v82_v44, %v81_v52  ;;  %v3287_v7 = vpop.permute.xlu1 %3286  ;;  %v3220_v17 = vsel %vm14106_vm14, %v11732_v54, %v3182_v18  ;;  %v70_v44 = vld [vmem:[%s13336_s3 + $0x78] sm:$0xff]  ;;  %vm14118_vm14 = vmmov %vm14111_vm0 }
 0x2e2   :  { %v3221_v24 = vsel %vm14107_vm7, %v3182_v18, %v3184_v30  ;;  %v86_v18 = vld [vmem:[%s13336_s3 + $0xf8] sm:$0xff]  ;;  %v3259_v5 = vmax.f32 %v3156_v37, %v3220_v17  ;;  %v11877_v13 = vpack.c.bf16 %v70_v44, %v69_v48  ;;  %vm14119_vm7 = vmmov %vm14112_vm4 }
 0x2e3   :  { %6556 = vmatprep.subr.bf16.mxu1 %v11820_v39  ;;  %v3260_v1 = vmax.f32 %v3157_v28, %v3221_v24  ;;  %v11872_v52 = vpack.c.bf16 %v86_v18, %v85_v16  ;;  %vm14121_vm0 = vmmov %vm14109_vm1 }
 0x2e4   :  { %v11807_v41 = vpop.permute.xlu0 %3185  ;;  %14110 = vst [vmem:[#allocation56_spill] sm:$0xff] %v11877_v13 }
 0x2e5   :  { %8034 = vrot.lane.b32.xlu0 %v8023_v35, %s8390_s18  ;;  %3201 = vrot.lane.b32.xlu1 %v2831_v22, %s8389_s15  ;;  %v65_v35 = vld [vmem:[%s13336_s3 + $0x50] sm:$0xff]  ;;  %v11856_v62 = vpop.permute.xlu1 %3282  ;;  %v3222_v59 = vsel %vm14112_vm4, %v3184_v30, %v11807_v41 }
 0x2e8   :  { %v3285_v0 = vpop.permute.xlu0 %3284 }
 0x2e9   :  { %3098 = vrot.lane.b32.xlu0 %v2831_v22, %s8385_s1  ;;  %3096 = vrot.lane.b32.xlu1 %v11705_v26, %s8385_s1  ;;  %v3323_v19 = vsel %vm14108_vm2, %v11856_v62, %v3285_v0  ;;  %v3324_v12 = vsel %vm14109_vm1, %v3285_v0, %v3287_v7  ;;  %v11896_v16 = vpop.permute.xlu1 %3074  ;;  %vm14120_vm2 = vmmov %vm14112_vm4  ;;  %vm3399_vm4 = vcmask 351232  }
 0x2ea   :  { %v3362_v0 = vmax.f32 %v3259_v5, %v3323_v19  ;;  %v3363_v14 = vmax.f32 %v3260_v1, %v3324_v12  ;;  %v3261_v12 = vmax.f32 %v3158_v46, %v3222_v59 }
 0x2ec   :  { %v3382_v37 = vmax.f32 %v3362_v0, 0.0  ;;  %v3383_v28 = vmax.f32 %v3363_v14, 0.0 }
 0x2ed   :  { %3304 = vrot.lane.b32.xlu0 %v2831_v22, %s8390_s18  ;;  %3302 = vrot.lane.b32.xlu1 %v11705_v26, %s8390_s18  ;;  %v66_v22 = vld [vmem:[%s13336_s3 + $0x58] sm:$0xff]  ;;  %v11907_v5 = vpop.permute.xlu1 %3187  ;;  %s8407_s3 = smov 28  }
 0x2ee   :  { %v11826_v57 = vpack.c.bf16 %v66_v22, %v65_v35  ;;  %v3289_v35 = vpop.permute.xlu0 %3288  ;;  %v8038_v18 = vpack.i.bf16 %v3382_v37, %v3383_v28  ;;  %v3223_v44 = vsel %vm14115_vm12, %v11807_v41, %v11907_v5  ;;  %vm14124_vm12 = vmmov %vm14120_vm2 }
 0x2ef   :  { %v3325_v19 = vsel %vm14113_vm10, %v3287_v7, %v3289_v35  ;;  %vm14122_vm10 = vmmov %vm14117_vm5 }
 0x2f0   :  { %6558 = vmatpush3.bf16.msra.mxu1 %v11826_v57  ;;  %v3364_v49 = vmax.f32 %v3261_v12, %v3325_v19 }
 0x2f1   :  { %3199 = vrot.lane.b32.xlu0 %v11705_v26, %s8389_s15  ;;  %6560 = vmatprep.subr.bf16.mxu1 %v11844_v53 }
 0x2f2   :  { %v11898_v30 = vpop.permute.xlu0 %3084  ;;  %v3384_v7 = vmax.f32 %v3364_v49, 0.0 }
 0x2f3   :  { %v3120_v48 = vsel %vm14114_vm11, %v11746_v56, %v11898_v30  ;;  %v11922_v56 = vadd.f32 %v11546_v10, %v11550_v40  ;;  %vm14123_vm11 = vmmov %vm14117_vm5 }
 0x2f4   :  { %6562 = vmatpush3.bf16.msra.mxu1 %v11852_v42  ;;  %v3159_v1 = vmax.f32 %v11582_v23, %v3120_v48 }
 0x2f5   :  { %6564 = vmatprep.subr.bf16.mxu1 %v11872_v52  ;;  %v8048_v10 = vpack.i.bf16 %v11922_v56, %v11674_v3 }
 0x2f6   :  { %v11918_v58 = vpop.permute.xlu0 %3290  ;;  %v3262_v0 = vmax.f32 %v3159_v1, %v3223_v44 }
 0x2f7   :  { %v3326_v23 = vsel %vm14116_vm6, %v3289_v35, %v11918_v58  ;;  %v11941_v35 = vadd.f32 %v11693_v45, %v11550_v40  ;;  %vm14125_vm6 = vmmov %vm14120_vm2 }
 0x2f8   :  { %6566 = vmatpush3.bf16.msra.mxu1 %v11877_v13 }
 0x2f9   :  { %6620 = vmatprep.subr.bf16.mxu1 %v11713_v31 }
 0x2fa   :  { %v11946_v46 = vpop.permute.xlu0 %3177 }
 0x304   :  { %v2901_v11 = vpop.f32.mrb[8].mxu0 }
 0x305   :  { %v2903_v22 = vpop.f32.mrb[9].mxu0 }
 0x306   :  { %v11882_v55 = vadd.f32 %v2903_v22, %v11550_v40  ;;  %v11916_v22 = vadd.f32 %v2901_v11, %v11550_v40  ;;  %v3365_v11 = vmax.f32 %v3262_v0, %v3326_v23  ;;  %v3219_v0 = vsel %vm14120_vm2, %v11946_v46, %v11732_v54 }
 0x308   :  { %v2972_v33 = vpop.f32.mrb[8].mxu1  ;;  %3104 = vrot.lane.b32.xlu0 %v11882_v55, %s8385_s1  ;;  %v8043_v41 = vpack.i.bf16 %v11916_v22, %v11922_v56  ;;  %v3385_v59 = vmax.f32 %v3365_v11, 0.0 }
 0x309   :  { %v11893_v17 = vadd.f32 %v2972_v33, %v11550_v40  ;;  %v2974_v24 = vpop.f32.mrb[9].mxu1 }
 0x30a   :  { %v11936_v14 = vadd.f32 %v2974_v24, %v11550_v40  ;;  %v8063_v24 = vpack.i.bf16 %v11941_v35, %v11916_v22 }
 0x30b   :  { %3106 = vrot.lane.b32.xlu1 %v11893_v17, %s8385_s1 }
 0x30c   :  { %3207 = vrot.lane.b32.xlu0 %v11882_v55, %s8389_s15  ;;  %v8058_v33 = vpack.i.bf16 %v11936_v14, %v11941_v35 }
 0x30f   :  { %3209 = vrot.lane.b32.xlu1 %v11893_v17, %s8389_s15 }
 0x310   :  { %8039 = vrot.lane.b32.xlu0 %v8038_v18, %s8407_s3  ;;  %v3116_v18 = vsel %vm14118_vm14, %v11896_v16, %v11698_v34  ;;  %vm14126_vm14 = vmmov %vm14121_vm0 }
 0x313   :  { %3554 = vrot.lane.b32.xlu1 %v3384_v7, %s8407_s3 }
 0x314   :  { %3310 = vrot.lane.b32.xlu0 %v11882_v55, %s8390_s18 }
 0x317   :  { %3312 = vrot.lane.b32.xlu1 %v11893_v17, %s8390_s18 }
 0x318   :  { %8044 = vrot.lane.b32.xlu0 %v8043_v41, %s8385_s1 }
 0x31b   :  { %8049 = vrot.lane.b32.xlu1 %v8048_v10, %s8389_s15 }
 0x31c   :  { %8054 = vrot.lane.b32.xlu0 %v8048_v10, %s8390_s18 }
 0x31f   :  { %3556 = vrot.lane.b32.xlu1 %v3385_v59, %s8407_s3 }
 0x320   :  { %8059 = vrot.lane.b32.xlu0 %v8058_v33, %s8385_s1 }
 0x323   :  { %8064 = vrot.lane.b32.xlu1 %v8063_v24, %s8389_s15  ;;  %v3091_v37 = vpop.permute.xlu0 %3090  ;;  %v3194_v28 = vpop.permute.xlu1 %3193 }
 0x327   :  { %8069 = vrot.lane.b32.xlu1 %v8063_v24, %s8390_s18  ;;  %v11953_v45 = vpop.permute.xlu0 %3191  ;;  %v3089_v19 = vpop.permute.xlu1 %3088 }
 0x328   :  { %v3123_v12 = vsel %vm14117_vm5, %v3089_v19, %v3091_v37  ;;  %v3226_v48 = vsel %vm14119_vm7, %v11953_v45, %v3194_v28  ;;  %vm14127_vm7 = vmmov %vm14121_vm0 }
 0x329   :  { %v3162_v49 = vmax.f32 %v11640_v4, %v3123_v12  ;;  %v3155_v4 = vmax.f32 %v11595_v15, %v3116_v18 }
 0x32b   :  { %v3297_v7 = vpop.permute.xlu0 %3296  ;;  %v3265_v1 = vmax.f32 %v3162_v49, %v3226_v48  ;;  %v11962_v44 = vpop.permute.xlu1 %3294  ;;  %v3258_v33 = vmax.f32 %v3155_v4, %v3219_v0 }
 0x32c   :  { %v3329_v23 = vsel %vm14109_vm1, %v11962_v44, %v3297_v7  ;;  %v3043_v41 = vpop.f32.mrb[10].mxu0  ;;  %vm14128_vm1 = vmmov %vm14117_vm5 }
 0x32d   :  { %v3368_v11 = vmax.f32 %v3265_v1, %v3329_v23  ;;  %v11971_v34 = vadd.f32 %v3043_v41, %v11550_v40  ;;  %v3045_v10 = vpop.f32.mrb[11].mxu0 }
 0x32e   :  { %v11974_v59 = vadd.f32 %v3045_v10, %v11550_v40 }
 0x32f   :  { %3110 = vrot.lane.b32.xlu0 %v11971_v34, %s8385_s1  ;;  %v11978_v24 = vpop.permute.xlu1 %3280  ;;  %v3388_v15 = vmax.f32 %v3368_v11, 0.0 }
 0x330   :  { %v3322_v54 = vsel %vm14121_vm0, %v11978_v24, %v11856_v62  ;;  %3112 = vrot.lane.b32.xlu1 %v11974_v59, %s8385_s1  ;;  %v3196_v62 = vpop.permute.xlu0 %3195  ;;  %vm14129_vm0 = vmmov %vm14128_vm1 }
 0x331   :  { %v3361_v37 = vmax.f32 %v3258_v33, %v3322_v54 }
 0x333   :  { %v3381_v28 = vmax.f32 %v3361_v37, 0.0  ;;  %3713 = vrot.lane.b32.xlu0 %v3388_v15, %s8408_s16  ;;  %v12009_v40 = vpop.permute.xlu1 %8019 }
 0x334   :  { %3213 = vrot.lane.b32.xlu1 %v11971_v34, %s8389_s15  ;;  %v8021_v33 = vunpack.i.l.bf16 %v12009_v40 }
 0x335   :  { %6341 = vmatmul.mubr.msk.f32.vlgmr.msra.gmra.mrb[12].mxu0 %vm3399_vm4, %v3381_v28 }
 0x336   :  { %6580 = vmatpush3.bf16.msra.mxu0 %v11724_v25 }
 0x337   :  { %3211 = vrot.lane.b32.xlu0 %v11936_v14, %s8389_s15  ;;  %6582 = vmatprep.subr.bf16.mxu0 %v11735_v51  ;;  %v3299_v12 = vpop.permute.xlu1 %3298 }
 0x338   :  { %3314 = vrot.lane.b32.xlu1 %v11936_v14, %s8390_s18 }
 0x33a   :  { %6584 = vmatpush3.bf16.msra.mxu0 %v11751_v61 }
 0x33b   :  { %3215 = vrot.lane.b32.xlu0 %v11974_v59, %s8389_s15  ;;  %6586 = vmatprep.subr.bf16.mxu0 %v11759_v43 }
 0x33c   :  { %3318 = vrot.lane.b32.xlu1 %v11974_v59, %s8390_s18 }
 0x33e   :  { %6588 = vmatpush3.bf16.msra.mxu0 %v11777_v47 }
 0x33f   :  { %3316 = vrot.lane.b32.xlu0 %v11971_v34, %s8390_s18  ;;  %6590 = vmatprep.subr.bf16.mxu0 %v11779_v6  ;;  %s8409_s18 = smov 112  }
 0x342   :  { %6592 = vmatpush3.bf16.msra.mxu0 %v11795_v20 }
 0x343   :  { %6594 = vmatprep.subr.bf16.mxu0 %v11797_v60 }
 0x346   :  { %6596 = vmatpush3.bf16.msra.mxu0 %v11809_v32 }
 0x347   :  { %6598 = vmatprep.subr.bf16.mxu0 %v11820_v39 }
 0x34a   :  { %6600 = vmatpush3.bf16.msra.mxu0 %v11826_v57 }
 0x34b   :  { %6602 = vmatprep.subr.bf16.mxu0 %v11844_v53 }
 0x34e   :  { %6604 = vmatpush3.bf16.msra.mxu0 %v11852_v42 }
 0x34f   :  { %6606 = vmatprep.subr.bf16.mxu0 %v11872_v52 }
 0x352   :  { %6608 = vmatpush3.bf16.msra.mxu0 %v11877_v13 }
 0x353   :  { %v8025_v49 = vpop.permute.xlu0 %8024  ;;  %v8030_v18 = vpop.permute.xlu1 %8029  ;;  %6609 = vmatprep.subr.bf16.mxu0 %v13525_v36 }
 0x354   :  { %v8026_v48 = vunpack.i.l.bf16 %v8025_v49  ;;  %v8031_v7 = vunpack.i.l.bf16 %v8030_v18  ;;  %v8027_v1 = vunpack.i.h.bf16 %v8025_v49 }
 0x356   :  { %v3121_v0 = vsel %vm14122_vm10, %v11898_v30, %v8026_v48  ;;  %v3122_v23 = vsel %vm14123_vm11, %v8026_v48, %v3089_v19  ;;  %v3224_v54 = vsel %vm14124_vm12, %v11907_v5, %v8031_v7  ;;  %v3225_v15 = vsel %vm14125_vm6, %v8031_v7, %v11953_v45  ;;  %vm14130_vm10 = vmmov %vm14127_vm7 }
 0x357   :  { %v3160_v41 = vmax.f32 %v11604_v50, %v3121_v0  ;;  %v3161_v4 = vmax.f32 %v11686_v9, %v3122_v23  ;;  %v8035_v11 = vpop.permute.xlu0 %8034  ;;  %v3202_v10 = vpop.permute.xlu1 %3201  ;;  %v3124_v30 = vsel %vm14117_vm5, %v8021_v33, %v8027_v1  ;;  %v8032_v23 = vunpack.i.h.bf16 %v8030_v18  ;;  %vm14131_vm11 = vmmov %vm14120_vm2 }
 0x358   :  { %v8036_v37 = vunpack.i.l.bf16 %v8035_v11  ;;  %v3163_v5 = vmax.f32 %v11670_v38, %v3124_v30  ;;  %v8037_v7 = vunpack.i.h.bf16 %v8035_v11  ;;  %vm14132_vm12 = vmmov %vm14120_vm2 }
 0x359   :  { %v3263_v28 = vmax.f32 %v3160_v41, %v3224_v54  ;;  %v3264_v49 = vmax.f32 %v3161_v4, %v3225_v15  ;;  %v3227_v33 = vsel %vm14120_vm2, %v3196_v62, %v8032_v23  ;;  %vm14133_vm6 = vmmov %vm14127_vm7 }
 0x35a   :  { %v3327_v50 = vsel %vm14126_vm14, %v11918_v58, %v8036_v37  ;;  %v3328_v9 = vsel %vm14127_vm7, %v8036_v37, %v11962_v44  ;;  %v3266_v15 = vmax.f32 %v3163_v5, %v3227_v33  ;;  %v3330_v44 = vsel %vm14130_vm10, %v3299_v12, %v8037_v7  ;;  %vm14134_vm5 = vmmov %vm14133_vm6 }
 0x35b   :  { %v3366_v19 = vmax.f32 %v3263_v28, %v3327_v50  ;;  %v3367_v48 = vmax.f32 %v3264_v49, %v3328_v9  ;;  %v3099_v0 = vpop.permute.xlu0 %3098  ;;  %v3097_v36 = vpop.permute.xlu1 %3096  ;;  %vm3558_vm14 = vcmask 228352   ;;  %vm14135_vm7 = vmmov %vm14129_vm0 }
 0x35c   :  { %v3125_v54 = vsel %vm14128_vm1, %v8027_v1, %v3097_v36  ;;  %v3126_v58 = vsel %vm14129_vm0, %v3097_v36, %v3099_v0  ;;  %v3369_v62 = vmax.f32 %v3266_v15, %v3330_v44  ;;  %vm14136_vm1 = vmmov %vm14134_vm5 }
 0x35d   :  { %v3386_v13 = vmax.f32 %v3366_v19, 0.0  ;;  %v3387_v45 = vmax.f32 %v3367_v48, 0.0  ;;  %v3164_v18 = vmax.f32 %v11689_v63, %v3125_v54  ;;  %v3165_v38 = vmax.f32 %v11705_v26, %v3126_v58  ;;  %vm14138_vm10 = vmmov %vm14129_vm0 }
 0x35e   :  { %v3389_v63 = vmax.f32 %v3369_v62, 0.0 }
 0x35f   :  { %v3305_v41 = vpop.permute.xlu0 %3304  ;;  %v8073_v4 = vpack.i.bf16 %v3386_v13, %v3387_v45  ;;  %v3303_v37 = vpop.permute.xlu1 %3302 }
 0x360   :  { %v3331_v36 = vsel %vm14133_vm6, %v8037_v7, %v3303_v37  ;;  %v3332_v30 = vsel %vm14134_vm5, %v3303_v37, %v3305_v41  ;;  %vm14141_vm6 = vmmov %vm14136_vm1 }
 0x361   :  { %8074 = vrot.lane.b32.xlu0 %v8073_v4, %s8408_s16  ;;  %vm14142_vm5 = vmmov %vm14136_vm1 }
 0x363   :  { %v3200_v28 = vpop.permute.xlu0 %3199 }
 0x364   :  { %v3228_v11 = vsel %vm14131_vm11, %v8032_v23, %v3200_v28  ;;  %v3229_v13 = vsel %vm14132_vm12, %v3200_v28, %v3202_v10  ;;  %vm14139_vm11 = vmmov %vm14120_vm2 }
 0x365   :  { %v3267_v49 = vmax.f32 %v3164_v18, %v3228_v11  ;;  %v3268_v1 = vmax.f32 %v3165_v38, %v3229_v13  ;;  %v8022_v18 = vunpack.i.h.bf16 %v12009_v40  ;;  %v14137_v13 = vmov 0.0|0.0   ;;  %vm14140_vm12 = vmmov %vm14120_vm2 }
 0x367   :  { %v3370_v50 = vmax.f32 %v3267_v49, %v3331_v36  ;;  %v3371_v9 = vmax.f32 %v3268_v1, %v3332_v30  ;;  %v3115_v40 = vsel %vm14129_vm0, %v8022_v18, %v11896_v16 }
 0x368   :  { %v3154_v16 = vmax.f32 %v11674_v3, %v3115_v40 }
 0x369   :  { %v3390_v12 = vmax.f32 %v3370_v50, 0.0  ;;  %v3391_v19 = vmax.f32 %v3371_v9, 0.0 }
 0x36b   :  { %3869 = vrot.lane.b32.xlu0 %v3391_v19, %s8399_s27  ;;  %v8078_v26 = vpack.i.bf16 %v3389_v63, %v3390_v12 }
 0x36d   :  { %8079 = vrot.lane.b32.xlu1 %v8078_v26, %s8399_s27  ;;  %s8410_s27 = smov 12  }
 0x37a   :  { %v12046_v48 = vpop.permute.xlu0 %3104 }
 0x37d   :  { %v12048_v10 = vpop.permute.xlu1 %3106 }
 0x37e   :  { %v12050_v0 = vpop.permute.xlu0 %3207  ;;  %v3129_v41 = vsel %vm14135_vm7, %v12046_v48, %v12048_v10  ;;  %vm14143_vm7 = vmmov %vm14129_vm0 }
 0x37f   :  { %v3168_v44 = vmax.f32 %v11882_v55, %v3129_v41 }
 0x381   :  { %v12052_v23 = vpop.permute.xlu1 %3209 }
 0x382   :  { %v8040_v5 = vpop.permute.xlu0 %8039  ;;  %v3232_v54 = vsel %vm14120_vm2, %v12050_v0, %v12052_v23 }
 0x383   :  { %v8042_v45 = vunpack.i.h.bf16 %v8040_v5  ;;  %v8041_v7 = vunpack.i.l.bf16 %v8040_v5  ;;  %v3271_v38 = vmax.f32 %v3168_v44, %v3232_v54 }
 0x385   :  { %v3555_v4 = vpop.permute.xlu1 %3554  ;;  %v3559_v33 = vsel %vm3558_vm14, %v8042_v45, %v8041_v7 }
 0x386   :  { %v12061_v58 = vpop.permute.xlu0 %3310  ;;  %v3560_v15 = vsel %vm3558_vm14, %v8041_v7, %v3555_v4 }
 0x387   :  { %3630 = vmatprep.mubr.f32.mxu0 %v3560_v15 }
 0x388   :  { %3631 = vmatmul.mubr.f32.vlgmr.msra.gmra.mrb[14].mxu0 %v3559_v33 }
 0x389   :  { %6611 = vmatpush3.bf16.msra.mxu0 %v11623_v27  ;;  %v12067_v37 = vpop.permute.xlu1 %3312  ;;  %6355 = vmatprep.mubr.msk.f32.mxu0 %vm8406_vm9, %v13807_v21 }
 0x38a   :  { %v3335_v28 = vsel %vm14136_vm1, %v12061_v58, %v12067_v37  ;;  %v8045_v11 = vpop.permute.xlu0 %8044  ;;  %6612 = vmatprep.subr.bf16.mxu0 %v14137_v13  ;;  %vm14145_vm1 = vmmov %vm14120_vm2 }
 0x38b   :  { %v3374_v55 = vmax.f32 %v3271_v38, %v3335_v28  ;;  %v8046_v62 = vunpack.i.l.bf16 %v8045_v11  ;;  %v8047_v54 = vunpack.i.h.bf16 %v8045_v11 }
 0x38d   :  { %v3394_v49 = vmax.f32 %v3374_v55, 0.0  ;;  %v3114_v1 = vsel %vm14138_vm10, %v8046_v62, %v8022_v18  ;;  %6614 = vmatpush3.bf16.msra.mxu0 %v11634_v8  ;;  %v8050_v36 = vpop.permute.xlu1 %8049 }
 0x38e   :  { %v3153_v30 = vmax.f32 %v11922_v56, %v3114_v1  ;;  %v8052_v50 = vunpack.i.h.bf16 %v8050_v36  ;;  %v8051_v9 = vunpack.i.l.bf16 %v8050_v36  ;;  %v8055_v12 = vpop.permute.xlu0 %8054  ;;  %6615 = vmatprep.subr.bf16.mxu0 %v14137_v13 }
 0x38f   :  { %v8057_v19 = vunpack.i.h.bf16 %v8055_v12  ;;  %v8056_v63 = vunpack.i.l.bf16 %v8055_v12  ;;  %4024 = vrot.lane.b32.xlu1 %v3394_v49, %s8409_s18 }
 0x390   :  { %v3217_v26 = vsel %vm14139_vm11, %v8052_v50, %v8051_v9  ;;  %v3218_v5 = vsel %vm14140_vm12, %v8051_v9, %v11946_v46  ;;  %vm14148_vm11 = vmmov %vm14143_vm7 }
 0x391   :  { %v3256_v45 = vmax.f32 %v3153_v30, %v3217_v26  ;;  %v3320_v56 = vsel %vm14141_vm6, %v8057_v19, %v8056_v63  ;;  %6618 = vmatpush3.bf16.msk.msra.mxu0 %vm11651_vm13, %v11655_v2  ;;  %v3557_v7 = vpop.permute.xlu1 %3556  ;;  %v3257_v41 = vmax.f32 %v3154_v16, %v3218_v5  ;;  %v3321_v33 = vsel %vm14142_vm5, %v8056_v63, %v11978_v24  ;;  %vm14149_vm12 = vmmov %vm14145_vm1 }
 0x392   :  { %v3561_v3 = vsel %vm3558_vm14, %v3555_v4, %v3557_v7  ;;  %v12093_v15 = vpop.permute.xlu0 %8059  ;;  %6651 = vmatprep.subr.bf16.mxu0 %v14137_v13  ;;  %vm14144_vm14 = vmmov %vm14129_vm0 }
 0x393   :  { %v8061_v46 = vunpack.i.l.bf16 %v12093_v15  ;;  %v3360_v44 = vmax.f32 %v3257_v41, %v3321_v33  ;;  %v3359_v18 = vmax.f32 %v3256_v45, %v3320_v56  ;;  %v3128_v24 = vsel %vm14144_vm14, %v8047_v54, %v12046_v48  ;;  %vm14146_vm0 = vmmov %vm14142_vm5 }
 0x394   :  { %6356 = vmatmul.mubr.msk.f32.vlgmr.msra.gmra.mrb[16].mxu0 %vm3399_vm4, %v3561_v3  ;;  %v3167_v36 = vmax.f32 %v11916_v22, %v3128_v24  ;;  %vm14147_vm10 = vmmov %vm14146_vm0 }
 0x395   :  { %v3127_v38 = vsel %vm14143_vm7, %v8061_v46, %v8047_v54  ;;  %v8065_v28 = vpop.permute.xlu1 %8064  ;;  %v3380_v55 = vmax.f32 %v3360_v44, 0.0  ;;  %v3379_v62 = vmax.f32 %v3359_v18, 0.0  ;;  %6653 = vmatpush3.bf16.msra.mxu0 %v11623_v27  ;;  %6370 = vmatprep.mubr.msk.f32.mxu0 %vm8406_vm9, %v13807_v21  ;;  %vm14150_vm6 = vmmov %vm14143_vm7 }
 0x396   :  { %v8067_v4 = vunpack.i.h.bf16 %v8065_v28  ;;  %v8066_v11 = vunpack.i.l.bf16 %v8065_v28  ;;  %6654 = vmatprep.subr.bf16.mxu0 %v14137_v13  ;;  %v3166_v40 = vmax.f32 %v11941_v35, %v3127_v38  ;;  %vm14151_vm5 = vmmov %vm14150_vm6 }
 0x397   :  { %3470 = vmatprep.mubr.f32.mxu1 %v3380_v55  ;;  %vm14152_vm7 = vmmov %vm14145_vm1 }
 0x398   :  { %v3230_v49 = vsel %vm14120_vm2, %v8067_v4, %v8066_v11  ;;  %v3231_v1 = vsel %vm14145_vm1, %v8066_v11, %v12050_v0  ;;  %3471 = vmatmul.mubr.f32.vlgmr.msra.gmra.mrb[10].mxu1 %v3379_v62  ;;  %vm14153_vm14 = vmmov %vm14146_vm0 }
 0x399   :  { %v8070_v30 = vpop.permute.xlu1 %8069  ;;  %6656 = vmatpush3.bf16.msra.mxu0 %v11634_v8  ;;  %6622 = vmatpush3.bf16.msra.mxu1 %v11724_v25  ;;  %v3269_v35 = vmax.f32 %v3166_v40, %v3230_v49  ;;  %v3270_v9 = vmax.f32 %v3167_v36, %v3231_v1  ;;  %vm14154_vm2 = vmmov %vm14145_vm1 }
 0x39a   :  { %v8072_v48 = vunpack.i.h.bf16 %v8070_v30  ;;  %v8071_v50 = vunpack.i.l.bf16 %v8070_v30  ;;  %6657 = vmatprep.subr.bf16.mxu0 %v14137_v13  ;;  %6624 = vmatprep.subr.bf16.mxu1 %v11735_v51  ;;  %vm14155_vm1 = vmmov %vm14146_vm0 }
 0x39c   :  { %v3333_v12 = vsel %vm14146_vm0, %v8072_v48, %v8071_v50  ;;  %v3334_v0 = vsel %vm14147_vm10, %v8071_v50, %v12061_v58  ;;  %v8062_v58 = vunpack.i.h.bf16 %v12093_v15  ;;  %v14156_v50 = vld [vmem:[#allocation56_spill] sm:$0xff]  ;;  %vm3715_vm10 = vcmask 457728  }
 0x39d   :  { %v3372_v19 = vmax.f32 %v3269_v35, %v3333_v12  ;;  %v3373_v22 = vmax.f32 %v3270_v9, %v3334_v0  ;;  %6660 = vmatpush3.bf16.msk.msra.mxu0 %vm11651_vm13, %v11655_v2  ;;  %6626 = vmatpush3.bf16.msra.mxu1 %v11751_v61 }
 0x39e   :  { %6628 = vmatprep.subr.bf16.mxu1 %v11759_v43  ;;  %6662 = vmatprep.subr.bf16.mxu0 %v11713_v31  ;;  %v3130_v41 = vsel %vm14148_vm11, %v12048_v10, %v8062_v58  ;;  %vm14157_vm11 = vcmask 687104  }
 0x39f   :  { %v3392_v63 = vmax.f32 %v3372_v19, 0.0  ;;  %v3393_v16 = vmax.f32 %v3373_v22, 0.0  ;;  %v3169_v3 = vmax.f32 %v11893_v17, %v3130_v41 }
 0x3a1   :  { %v3111_v26 = vpop.permute.xlu0 %3110  ;;  %v8083_v5 = vpack.i.bf16 %v3392_v63, %v3393_v16  ;;  %6630 = vmatpush3.bf16.msra.mxu1 %v11777_v47 }
 0x3a2   :  { %v3113_v45 = vpop.permute.xlu1 %3112  ;;  %6632 = vmatprep.subr.bf16.mxu1 %v11779_v6  ;;  %v3131_v46 = vsel %vm14150_vm6, %v8062_v58, %v3111_v26  ;;  %vm4026_vm6 = vcmask 916480  }
 0x3a3   :  { %8084 = vrot.lane.b32.xlu0 %v8083_v5, %s8409_s18  ;;  %v3132_v44 = vsel %vm14151_vm5, %v3111_v26, %v3113_v45  ;;  %v3170_v28 = vmax.f32 %v11936_v14, %v3131_v46  ;;  %v3172_v62 = vmax.f32 %v11974_v59, %v3113_v45  ;;  %vm4185_vm5 = vcmask 97280  }
 0x3a4   :  { %v3171_v55 = vmax.f32 %v11971_v34, %v3132_v44 }
 0x3a5   :  { %v12127_v56 = vpop.permute.xlu0 %3713  ;;  %6634 = vmatpush3.bf16.msra.mxu1 %v11795_v20 }
 0x3a6   :  { %6371 = vmatmul.mubr.msk.f32.vlgmr.msra.gmra.mrb[18].mxu0 %vm3399_vm4, %v12127_v56  ;;  %v3214_v7 = vpop.permute.xlu1 %3213  ;;  %6636 = vmatprep.subr.bf16.mxu1 %v11797_v60 }
 0x3a7   :  { %6664 = vmatpush3.bf16.msra.mxu0 %v11724_v25 }
 0x3a8   :  { %6666 = vmatprep.subr.bf16.mxu0 %v11735_v51 }
 0x3a9   :  { %v3212_v33 = vpop.permute.xlu0 %3211  ;;  %6638 = vmatpush3.bf16.msra.mxu1 %v11809_v32 }
 0x3aa   :  { %v3233_v54 = vsel %vm14149_vm12, %v12052_v23, %v3212_v33  ;;  %6640 = vmatprep.subr.bf16.mxu1 %v11820_v39  ;;  %v3315_v15 = vpop.permute.xlu1 %3314  ;;  %v3234_v38 = vsel %vm14152_vm7, %v3212_v33, %v3214_v7  ;;  %vm14158_vm12 = vmmov %vm14157_vm11  ;;  %vm4355_vm7 = vcmask 588800  }
 0x3ab   :  { %6668 = vmatpush3.bf16.msra.mxu0 %v11751_v61  ;;  %v3272_v10 = vmax.f32 %v3169_v3, %v3233_v54  ;;  %v3336_v23 = vsel %vm14153_vm14, %v12067_v37, %v3315_v15  ;;  %v3273_v24 = vmax.f32 %v3170_v28, %v3234_v38  ;;  %vm4357_vm14 = vcmask 359424  }
 0x3ac   :  { %6670 = vmatprep.subr.bf16.mxu0 %v11759_v43 }
 0x3ad   :  { %v3216_v18 = vpop.permute.xlu0 %3215  ;;  %6642 = vmatpush3.bf16.msra.mxu1 %v11826_v57  ;;  %v3375_v4 = vmax.f32 %v3272_v10, %v3336_v23 }
 0x3ae   :  { %v3235_v17 = vsel %vm14154_vm2, %v3214_v7, %v3216_v18  ;;  %6644 = vmatprep.subr.bf16.mxu1 %v11844_v53  ;;  %v3319_v40 = vpop.permute.xlu1 %3318  ;;  %v3275_v14 = vmax.f32 %v3172_v62, %v3216_v18  ;;  %vm4359_vm2 = vcmask 130048  }
 0x3af   :  { %6672 = vmatpush3.bf16.msra.mxu0 %v11777_v47  ;;  %v3274_v11 = vmax.f32 %v3171_v55, %v3235_v17  ;;  %v3395_v59 = vmax.f32 %v3375_v4, 0.0 }
 0x3b0   :  { %6674 = vmatprep.subr.bf16.mxu0 %v11779_v6  ;;  %v3378_v35 = vmax.f32 %v3275_v14, %v3319_v40 }
 0x3b1   :  { %v3317_v49 = vpop.permute.xlu0 %3316  ;;  %6646 = vmatpush3.bf16.msra.mxu1 %v11852_v42 }
 0x3b2   :  { %v3337_v37 = vsel %vm14155_vm1, %v3315_v15, %v3317_v49  ;;  %v3338_v1 = vsel %vm14146_vm0, %v3317_v49, %v3319_v40  ;;  %6648 = vmatprep.subr.bf16.mxu1 %v11872_v52  ;;  %v3398_v12 = vmax.f32 %v3378_v35, 0.0  ;;  %vm4361_vm1 = vcmask 949248  }
 0x3b3   :  { %v3376_v34 = vmax.f32 %v3273_v24, %v3337_v37  ;;  %v3377_v36 = vmax.f32 %v3274_v11, %v3338_v1  ;;  %6676 = vmatpush3.bf16.msra.mxu0 %v11795_v20  ;;  %vm4582_vm0 = vcmask 957440  }
 0x3b4   :  { %6678 = vmatprep.subr.bf16.mxu0 %v11797_v60 }
 0x3b5   :  { %v3396_v30 = vmax.f32 %v3376_v34, 0.0  ;;  %v3397_v48 = vmax.f32 %v3377_v36, 0.0  ;;  %6650 = vmatpush3.bf16.msra.mxu1 %v14156_v50 }
 0x3b6   :  { %6693 = vmatprep.subr.bf16.mxu1 %v14137_v13 }
 0x3b7   :  { %v8088_v9 = vpack.i.bf16 %v3395_v59, %v3396_v30  ;;  %4181 = vrot.lane.b32.xlu0 %v3397_v48, %s8410_s27  ;;  %6680 = vmatpush3.bf16.msra.mxu0 %v11809_v32 }
 0x3b8   :  { %6682 = vmatprep.subr.bf16.mxu0 %v11820_v39 }
 0x3b9   :  { %8089 = vrot.lane.b32.xlu1 %v8088_v9, %s8410_s27 }
 0x3bb   :  { %6684 = vmatpush3.bf16.msra.mxu0 %v11826_v57 }
 0x3bc   :  { %6686 = vmatprep.subr.bf16.mxu0 %v11844_v53 }
 0x3bd   :  { %4183 = vrot.lane.b32.xlu1 %v3398_v12, %s8410_s27 }
 0x3bf   :  { %6688 = vmatpush3.bf16.msra.mxu0 %v11852_v42 }
 0x3c0   :  { %6690 = vmatprep.subr.bf16.mxu0 %v11872_v52 }
 0x3c3   :  { %6692 = vmatpush3.bf16.msra.mxu0 %v14156_v50 }
 0x3c4   :  { %6735 = vmatprep.subr.bf16.mxu0 %v14137_v13 }
 0x3d3   :  { %v8075_v0 = vpop.permute.xlu0 %8074 }
 0x3d4   :  { %v8077_v19 = vunpack.i.h.bf16 %v8075_v0  ;;  %v8076_v22 = vunpack.i.l.bf16 %v8075_v0 }
 0x3d6   :  { %v3717_v63 = vsel %vm3715_vm10, %v8076_v22, %v12127_v56  ;;  %v3716_v16 = vsel %vm3715_vm10, %v8077_v19, %v8076_v22  ;;  %vm14159_vm10 = vcmask 1039360  }
 0x3d7   :  { %3786 = vmatprep.mubr.f32.mxu1 %v3717_v63 }
 0x3d8   :  { %3787 = vmatmul.mubr.f32.vlgmr.msra.gmra.mrb[12].mxu1 %v3716_v16 }
 0x3d9   :  { %6695 = vmatpush3.bf16.msra.mxu1 %v11623_v27  ;;  %6385 = vmatprep.mubr.msk.f32.mxu1 %vm8406_vm9, %v13807_v21 }
 0x3da   :  { %6696 = vmatprep.subr.bf16.mxu1 %v14137_v13 }
 0x3dd   :  { %6698 = vmatpush3.bf16.msra.mxu1 %v11634_v8  ;;  %v3870_v58 = vpop.permute.xlu0 %3869 }
 0x3de   :  { %6699 = vmatprep.subr.bf16.mxu1 %v14137_v13 }
 0x3df   :  { %v8080_v26 = vpop.permute.xlu1 %8079 }
 0x3e0   :  { %v8082_v5 = vunpack.i.h.bf16 %v8080_v26  ;;  %v8081_v45 = vunpack.i.l.bf16 %v8080_v26 }
 0x3e1   :  { %6702 = vmatpush3.bf16.msk.msra.mxu1 %vm11651_vm13, %v11655_v2 }
 0x3e2   :  { %v3872_v56 = vsel %vm14157_vm11, %v8081_v45, %v3870_v58  ;;  %v3871_v7 = vsel %vm14158_vm12, %v8082_v5, %v8081_v45  ;;  %6704 = vmatprep.subr.bf16.mxu1 %v11713_v31  ;;  %vm14160_vm11 = vcmask 1022976   ;;  %vm14161_vm12 = vmmov %vm14159_vm10 }
 0x3e3   :  { %3941 = vmatprep.mubr.f32.mxu0 %v3872_v56 }
 0x3e4   :  { %6386 = vmatmul.mubr.msk.f32.vlgmr.msra.gmra.mrb[14].mxu1 %vm3399_vm4, %v3870_v58  ;;  %3942 = vmatmul.mubr.f32.vlgmr.msra.gmra.mrb[20].mxu0 %v3871_v7 }
 0x3e5   :  { %6737 = vmatpush3.bf16.msra.mxu0 %v11623_v27  ;;  %6706 = vmatpush3.bf16.msra.mxu1 %v11724_v25 }
 0x3e6   :  { %6738 = vmatprep.subr.bf16.mxu0 %v14137_v13  ;;  %6708 = vmatprep.subr.bf16.mxu1 %v11735_v51 }
 0x3e7   :  { %6400 = vmatprep.mubr.msk.f32.mxu0 %vm8406_vm9, %v13807_v21 }
 0x3e9   :  { %6740 = vmatpush3.bf16.msra.mxu0 %v11634_v8  ;;  %6710 = vmatpush3.bf16.msra.mxu1 %v11751_v61 }
 0x3ea   :  { %6741 = vmatprep.subr.bf16.mxu0 %v14137_v13  ;;  %6712 = vmatprep.subr.bf16.mxu1 %v11759_v43 }
 0x3ed   :  { %6744 = vmatpush3.bf16.msk.msra.mxu0 %vm11651_vm13, %v11655_v2  ;;  %6714 = vmatpush3.bf16.msra.mxu1 %v11777_v47 }
 0x3ee   :  { %6716 = vmatprep.subr.bf16.mxu1 %v11779_v6  ;;  %6746 = vmatprep.subr.bf16.mxu0 %v11713_v31 }
 0x3f1   :  { %6718 = vmatpush3.bf16.msra.mxu1 %v11795_v20 }
 0x3f2   :  { %6720 = vmatprep.subr.bf16.mxu1 %v11797_v60 }
 0x3f5   :  { %6722 = vmatpush3.bf16.msra.mxu1 %v11809_v32 }
 0x3f6   :  { %6724 = vmatprep.subr.bf16.mxu1 %v11820_v39 }
 0x3f9   :  { %6726 = vmatpush3.bf16.msra.mxu1 %v11826_v57 }
 0x3fa   :  { %6728 = vmatprep.subr.bf16.mxu1 %v11844_v53 }
 0x3fd   :  { %6730 = vmatpush3.bf16.msra.mxu1 %v11852_v42 }
 0x3fe   :  { %6732 = vmatprep.subr.bf16.mxu1 %v11872_v52 }
 0x401   :  { %v4025_v41 = vpop.permute.xlu1 %4024  ;;  %6734 = vmatpush3.bf16.msra.mxu1 %v14156_v50 }
 0x402   :  { %6401 = vmatmul.mubr.msk.f32.vlgmr.msra.gmra.mrb[22].mxu0 %vm3399_vm4, %v4025_v41  ;;  %6777 = vmatprep.subr.bf16.mxu1 %v14137_v13 }
 0x403   :  { %6748 = vmatpush3.bf16.msra.mxu0 %v11724_v25 }
 0x404   :  { %6750 = vmatprep.subr.bf16.mxu0 %v11735_v51 }
 0x407   :  { %6752 = vmatpush3.bf16.msra.mxu0 %v11751_v61 }
 0x408   :  { %v3542_v31 = vpop.f32.mrb[12].mxu0  ;;  %6754 = vmatprep.subr.bf16.mxu0 %v11759_v43 }
 0x409   :  { %v6342_v33 = vpop.f32.mrb[13].mxu0 }
 0x40b   :  { %6756 = vmatpush3.bf16.msra.mxu0 %v11777_v47 }
 0x40c   :  { %6758 = vmatprep.subr.bf16.mxu0 %v11779_v6 }
 0x40f   :  { %6760 = vmatpush3.bf16.msra.mxu0 %v11795_v20 }
 0x410   :  { %6762 = vmatprep.subr.bf16.mxu0 %v11797_v60 }
 0x413   :  { %6764 = vmatpush3.bf16.msra.mxu0 %v11809_v32 }
 0x414   :  { %6766 = vmatprep.subr.bf16.mxu0 %v11820_v39 }
 0x415   :  { %v8085_v25 = vpop.permute.xlu0 %8084 }
 0x416   :  { %v8087_v51 = vunpack.i.h.bf16 %v8085_v25  ;;  %v8086_v61 = vunpack.i.l.bf16 %v8085_v25 }
 0x417   :  { %6768 = vmatpush3.bf16.msra.mxu0 %v11826_v57 }
 0x418   :  { %v4028_v43 = vsel %vm4026_vm6, %v8086_v61, %v4025_v41  ;;  %v4027_v47 = vsel %vm4026_vm6, %v8087_v51, %v8086_v61  ;;  %6770 = vmatprep.subr.bf16.mxu0 %v11844_v53 }
 0x419   :  { %4097 = vmatprep.mubr.f32.mxu1 %v4028_v43 }
 0x41a   :  { %4098 = vmatmul.mubr.f32.vlgmr.msra.gmra.mrb[16].mxu1 %v4027_v47 }
 0x41b   :  { %6779 = vmatpush3.bf16.msra.mxu1 %v11623_v27  ;;  %6772 = vmatpush3.bf16.msra.mxu0 %v11852_v42 }
 0x41c   :  { %6780 = vmatprep.subr.bf16.mxu1 %v14137_v13  ;;  %6774 = vmatprep.subr.bf16.mxu0 %v11872_v52 }
 0x41d   :  { %6415 = vmatprep.mubr.msk.f32.mxu1 %vm8406_vm9, %v13807_v21 }
 0x41f   :  { %6782 = vmatpush3.bf16.msra.mxu1 %v11634_v8  ;;  %6776 = vmatpush3.bf16.msra.mxu0 %v14156_v50 }
 0x420   :  { %6783 = vmatprep.subr.bf16.mxu1 %v14137_v13 }
 0x423   :  { %6786 = vmatpush3.bf16.msk.msra.mxu1 %vm11651_vm13, %v11655_v2 }
 0x429   :  { %v4182_v60 = vpop.permute.xlu0 %4181 }
 0x42b   :  { %v8090_v27 = vpop.permute.xlu1 %8089 }
 0x42c   :  { %v8092_v6 = vunpack.i.h.bf16 %v8090_v27  ;;  %v8091_v20 = vunpack.i.l.bf16 %v8090_v27 }
 0x42e   :  { %v4187_v32 = vsel %vm4185_vm5, %v8091_v20, %v4182_v60  ;;  %v4186_v39 = vsel %vm4185_vm5, %v8092_v6, %v8091_v20 }
 0x42f   :  { %v4184_v57 = vpop.permute.xlu1 %4183  ;;  %4257 = vmatprep.mubr.f32.mxu0 %v4187_v32 }
 0x430   :  { %v4188_v53 = vsel %vm4185_vm5, %v4182_v60, %v4184_v57  ;;  %4258 = vmatmul.mubr.f32.vlgmr.msra.gmra.mrb[24].mxu0 %v4186_v39  ;;  %vm14162_vm5 = vmmov %vm14159_vm10 }
 0x431   :  { %6416 = vmatmul.mubr.msk.f32.vlgmr.msra.gmra.mrb[18].mxu1 %vm3399_vm4, %v4188_v53  ;;  %vm4353_vm4 = vcmask 818176  }
 0x45b   :  { %v6042_v8 = vpop.f32.mrb[14].mxu0 }
 0x45c   :  { %v6043_v42 = vpop.f32.mrb[15].mxu0 }
 0x45d   :  { %v6044_v52 = vadd.f32 %v6043_v42, %v6042_v8 }
 0x467   :  { %v3702_v54 = vpop.f32.mrb[16].mxu0 }
 0x468   :  { %v3703_v3 = vadd.f32 %v6044_v52, %v3702_v54  ;;  %v6357_v15 = vpop.f32.mrb[17].mxu0 }
 0x46a   :  { %4334 = vrot.lane.b32.xlu0 %v3703_v3, %s8411_s17 }
 0x46b   :  { %v6000_v2 = vpop.f32.mrb[10].mxu1 }
 0x46c   :  { %v6001_v46 = vpop.f32.mrb[11].mxu1 }
 0x46d   :  { %v6002_v44 = vadd.f32 %v6001_v46, %v6000_v2 }
 0x46f   :  { %v3543_v10 = vadd.f32 %v6002_v44, %v3542_v31 }
 0x479   :  { %v3858_v18 = vpop.f32.mrb[18].mxu0 }
 0x47a   :  { %v6372_v38 = vpop.f32.mrb[19].mxu0 }
 0x4ab   :  { %v6084_v23 = vpop.f32.mrb[12].mxu1 }
 0x4ac   :  { %v6085_v17 = vpop.f32.mrb[13].mxu1 }
 0x4ad   :  { %v6086_v28 = vadd.f32 %v6085_v17, %v6084_v23 }
 0x4af   :  { %v3859_v55 = vadd.f32 %v6086_v28, %v3858_v18 }
 0x4b7   :  { %v4013_v62 = vpop.f32.mrb[14].mxu1  ;;  %v6126_v24 = vpop.f32.mrb[20].mxu0 }
 0x4b8   :  { %v6387_v4 = vpop.f32.mrb[15].mxu1  ;;  %v6127_v11 = vpop.f32.mrb[21].mxu0 }
 0x4b9   :  { %v6128_v40 = vadd.f32 %v6127_v11, %v6126_v24 }
 0x4bb   :  { %v4014_v49 = vadd.f32 %v6128_v40, %v4013_v62 }
 0x4bd   :  { %4342 = vrot.lane.b32.xlu0 %v4014_v49, %s8412_s2 }
 0x4d5   :  { %v4169_v37 = vpop.f32.mrb[22].mxu0 }
 0x4d6   :  { %v6402_v1 = vpop.f32.mrb[23].mxu0 }
 0x4dc   :  { %v4335_v30 = vpop.permute.xlu0 %4334 }
 0x4dd   :  { %v12241_v48 = vsel %vm4353_vm4, %v3543_v10, %v4335_v30  ;;  %vm14163_vm4 = vmmov %vm14162_vm5 }
 0x4ed   :  { %v6168_v14 = vpop.f32.mrb[16].mxu1 }
 0x4ee   :  { %v6169_v34 = vpop.f32.mrb[17].mxu1 }
 0x4ef   :  { %v6170_v36 = vadd.f32 %v6169_v34, %v6168_v14 }
 0x4f1   :  { %v4170_v59 = vadd.f32 %v6170_v36, %v4169_v37 }
 0x4f3   :  { %4346 = vrot.lane.b32.xlu1 %v4170_v59, %s8413_s19 }
 0x4f7   :  { %4338 = vrot.lane.b32.xlu1 %v3859_v55, %s8414_s20 }
 0x4fb   :  { %4572 = vrot.lane.b32.xlu1 %v12241_v48, %s8415_s22 }
 0x503   :  { %v6210_v50 = vpop.f32.mrb[24].mxu0 }
 0x504   :  { %v6211_v35 = vpop.f32.mrb[25].mxu0  ;;  %v4329_v9 = vpop.f32.mrb[18].mxu1 }
 0x505   :  { %v6212_v12 = vadd.f32 %v6211_v35, %v6210_v50  ;;  %v6417_v0 = vpop.f32.mrb[19].mxu1 }
 0x507   :  { %v4330_v19 = vadd.f32 %v6212_v12, %v4329_v9 }
 0x509   :  { %4350 = vrot.lane.b32.xlu0 %v4330_v19, %s8416_s24 }
 0x52f   :  { %v4343_v63 = vpop.permute.xlu0 %4342 }
 0x565   :  { %v4347_v22 = vpop.permute.xlu1 %4346 }
 0x566   :  { %v4360_v56 = vsel %vm4359_vm2, %v4343_v63, %v4347_v22  ;;  %vm4522_vm2 = vcmask 982016  }
 0x569   :  { %v4339_v16 = vpop.permute.xlu1 %4338 }
 0x56a   :  { %v12247_v26 = vsel %vm4355_vm7, %v4335_v30, %v4339_v16  ;;  %v12249_v5 = vsel %vm4357_vm14, %v4339_v16, %v4343_v63  ;;  %vm14164_vm14 = vcmask 1031168  }
 0x56b   :  { %4574 = vrot.lane.b32.xlu1 %v12247_v26, %s8415_s22  ;;  %4576 = vrot.lane.b32.xlu0 %v12249_v5, %s8415_s22  ;;  %v8128_v45 = vpack.i.bf16 %v12249_v5, %v12247_v26 }
 0x56d   :  { %v4573_v33 = vpop.permute.xlu1 %4572 }
 0x56f   :  { %8129 = vrot.lane.b32.xlu0 %v8128_v45, %s8395_s23  ;;  %8094 = vrot.lane.b32.xlu1 %v8128_v45, %s8385_s1 }
 0x573   :  { %8144 = vrot.lane.b32.xlu0 %v8128_v45, %s8417_s25  ;;  %8099 = vrot.lane.b32.xlu1 %v8128_v45, %s8386_s12 }
 0x577   :  { %8154 = vrot.lane.b32.xlu0 %v8128_v45, %s8388_s14  ;;  %8104 = vrot.lane.b32.xlu1 %v8128_v45, %s8387_s13 }
 0x57b   :  { %8109 = vrot.lane.b32.xlu1 %v8128_v45, %s8418_s26  ;;  %v12264_v58 = vpop.permute.xlu0 %4350 }
 0x57c   :  { %4444 = vrot.lane.b32.xlu0 %v12264_v58, %s8385_s1  ;;  %v12278_v7 = vsel %vm4361_vm1, %v4360_v56, %v12264_v58 }
 0x57d   :  { %v8158_v41 = vpack.i.bf16 %v12241_v48, %v12278_v7  ;;  %v8208_v31 = vpack.i.bf16 %v12278_v7, %v12241_v48 }
 0x57f   :  { %8114 = vrot.lane.b32.xlu1 %v8128_v45, %s8419_s28 }
 0x580   :  { %4463 = vrot.lane.b32.xlu0 %v12264_v58, %s8386_s12 }
 0x583   :  { %8119 = vrot.lane.b32.xlu1 %v8128_v45, %s8420_s29 }
 0x584   :  { %4520 = vrot.lane.b32.xlu0 %v12264_v58, %s8418_s26 }
 0x587   :  { %8124 = vrot.lane.b32.xlu1 %v8128_v45, %s8421_s30 }
 0x588   :  { %4540 = vrot.lane.b32.xlu0 %v12264_v58, %s8420_s29 }
 0x58b   :  { %8134 = vrot.lane.b32.xlu1 %v8128_v45, %s8416_s24 }
 0x58c   :  { %4580 = vrot.lane.b32.xlu0 %v12264_v58, %s8415_s22 }
 0x58f   :  { %8139 = vrot.lane.b32.xlu1 %v8128_v45, %s8409_s18 }
 0x590   :  { %8159 = vrot.lane.b32.xlu0 %v8158_v41, %s8385_s1 }
 0x593   :  { %8149 = vrot.lane.b32.xlu1 %v8128_v45, %s8422_s0 }
 0x594   :  { %8164 = vrot.lane.b32.xlu0 %v8158_v41, %s8386_s12  ;;  %s8423_s12 = smov 103  }
 0x597   :  { %4482 = vrot.lane.b32.xlu1 %v12264_v58, %s8387_s13 }
 0x598   :  { %8169 = vrot.lane.b32.xlu0 %v8158_v41, %s8387_s13 }
 0x59b   :  { %4735 = vrot.lane.b32.xlu1 %v12264_v58, %s8419_s28 }
 0x59c   :  { %8174 = vrot.lane.b32.xlu0 %v8158_v41, %s8418_s26 }
 0x59f   :  { %4560 = vrot.lane.b32.xlu1 %v12264_v58, %s8421_s30 }
 0x5a0   :  { %8179 = vrot.lane.b32.xlu0 %v8158_v41, %s8419_s28 }
 0x5a3   :  { %4501 = vrot.lane.b32.xlu1 %v12264_v58, %s8395_s23 }
 0x5a4   :  { %8184 = vrot.lane.b32.xlu0 %v8158_v41, %s8420_s29 }
 0x5a7   :  { %8199 = vrot.lane.b32.xlu1 %v8128_v45, %s8393_s21 }
 0x5a8   :  { %8189 = vrot.lane.b32.xlu0 %v8158_v41, %s8421_s30 }
 0x5ab   :  { %4600 = vrot.lane.b32.xlu1 %v12264_v58, %s8416_s24 }
 0x5ac   :  { %8194 = vrot.lane.b32.xlu0 %v8128_v45, %s8389_s15 }
 0x5af   :  { %4578 = vrot.lane.b32.xlu1 %v12278_v7, %s8415_s22 }
 0x5b0   :  { %8204 = vrot.lane.b32.xlu0 %v8128_v45, %s8423_s12 }
 0x5b3   :  { %4619 = vrot.lane.b32.xlu1 %v12264_v58, %s8409_s18 }
 0x5b4   :  { %4638 = vrot.lane.b32.xlu0 %v12264_v58, %s8417_s25 }
 0x5b7   :  { %4678 = vrot.lane.b32.xlu1 %v12264_v58, %s8388_s14 }
 0x5b8   :  { %4658 = vrot.lane.b32.xlu0 %v12264_v58, %s8422_s0 }
 0x5bb   :  { %4697 = vrot.lane.b32.xlu1 %v12264_v58, %s8389_s15 }
 0x5bc   :  { %4716 = vrot.lane.b32.xlu0 %v12264_v58, %s8393_s21 }
 0x5bf   :  { %8209 = vrot.lane.b32.xlu1 %v8208_v31, %s8395_s23 }
 0x5c0   :  { %8214 = vrot.lane.b32.xlu0 %v8208_v31, %s8416_s24 }
 0x5c3   :  { %8219 = vrot.lane.b32.xlu1 %v8208_v31, %s8409_s18 }
 0x5c4   :  { %8224 = vrot.lane.b32.xlu0 %v8208_v31, %s8417_s25 }
 0x5c7   :  { %8229 = vrot.lane.b32.xlu1 %v8208_v31, %s8422_s0 }
 0x5c8   :  { %8234 = vrot.lane.b32.xlu0 %v8208_v31, %s8388_s14 }
 0x5cb   :  { %8244 = vrot.lane.b32.xlu1 %v8208_v31, %s8393_s21 }
 0x5cc   :  { %8239 = vrot.lane.b32.xlu0 %v8208_v31, %s8389_s15 }
 0x5dd   :  { %v12323_v25 = vpop.permute.xlu1 %4574  ;;  %v12325_v51 = vpop.permute.xlu0 %4576 }
 0x5de   :  { %v12329_v61 = vsel %vm4582_vm0, %v4573_v33, %v12323_v25 }
 0x5e1   :  { %v8095_v43 = vpop.permute.xlu1 %8094  ;;  %v12331_v47 = vpop.permute.xlu0 %8129 }
 0x5e2   :  { %v8097_v27 = vunpack.i.h.bf16 %v8095_v43  ;;  %v8096_v6 = vunpack.i.l.bf16 %v8095_v43  ;;  %v13533_v59 = vunpack.i.h.bf16 %v12331_v47  ;;  %v13534_v30 = vunpack.i.l.bf16 %v12331_v47 }
 0x5e4   :  { %v12334_v20 = vsel %vm14159_vm10, %v8096_v6, %v8097_v27  ;;  %vm14165_vm10 = vmmov %vm14164_vm14 }
 0x5e5   :  { %v8100_v60 = vpop.permute.xlu1 %8099  ;;  %v12336_v32 = vpop.permute.xlu0 %8144  ;;  %v6787_v39 = vpack.c.bf16 %v12334_v20, %v12247_v26 }
 0x5e6   :  { %v8102_v17 = vunpack.i.h.bf16 %v8100_v60  ;;  %v8101_v28 = vunpack.i.l.bf16 %v8100_v60 }
 0x5e7   :  { %6788 = vmatprep.subr.bf16.mxu1 %v6787_v39 }
 0x5e8   :  { %v12380_v36 = vsel %vm14164_vm14, %v8101_v28, %v8102_v17 }
 0x5e9   :  { %v8105_v57 = vpop.permute.xlu1 %8104  ;;  %v12340_v53 = vpop.permute.xlu0 %8154 }
 0x5ea   :  { %v8107_v18 = vunpack.i.h.bf16 %v8105_v57  ;;  %v8106_v38 = vunpack.i.l.bf16 %v8105_v57 }
 0x5ec   :  { %v12365_v4 = vsel %vm14160_vm11, %v8106_v38, %v8107_v18  ;;  %vm14166_vm11 = vcmask 1014784  }
 0x5ed   :  { %v12342_v8 = vpop.permute.xlu1 %8109  ;;  %v6791_v35 = vpack.c.bf16 %v12365_v4, %v12380_v36  ;;  %v4504_v41 = vsel %vm14166_vm11, %v13534_v30, %v13533_v59  ;;  %vm4737_vm11 = vcmask 990208  }
 0x5ee   :  { %v12344_v42 = vpop.permute.xlu0 %4444  ;;  %v8112_v9 = vunpack.i.h.bf16 %v12342_v8  ;;  %v8111_v12 = vunpack.i.l.bf16 %v12342_v8 }
 0x5f0   :  { %v12401_v56 = vsel %vm4522_vm2, %v8111_v12, %v8112_v9 }
 0x5f1   :  { %v12346_v52 = vpop.permute.xlu1 %8114 }
 0x5f2   :  { %v12348_v54 = vpop.permute.xlu0 %4463 }
 0x5f5   :  { %v12350_v3 = vpop.permute.xlu1 %8119 }
 0x5f6   :  { %v12352_v15 = vpop.permute.xlu0 %4520 }
 0x5f9   :  { %v12354_v2 = vpop.permute.xlu1 %8124 }
 0x5fa   :  { %v12356_v46 = vpop.permute.xlu0 %4540  ;;  %v8127_v8 = vunpack.i.h.bf16 %v12354_v2 }
 0x5fd   :  { %v12358_v44 = vpop.permute.xlu1 %8134 }
 0x5fe   :  { %v12360_v10 = vpop.permute.xlu0 %4580 }
 0x601   :  { %v12362_v23 = vpop.permute.xlu1 %8139 }
 0x602   :  { %v8160_v55 = vpop.permute.xlu0 %8159 }
 0x603   :  { %v8162_v62 = vunpack.i.h.bf16 %v8160_v55  ;;  %v8161_v24 = vunpack.i.l.bf16 %v8160_v55 }
 0x605   :  { %v4446_v11 = vsel %vm14161_vm12, %v8162_v62, %v8096_v6  ;;  %v12369_v40 = vsel %vm14162_vm5, %v8097_v27, %v8161_v24  ;;  %v12371_v49 = vpop.permute.xlu1 %8149  ;;  %v12375_v37 = vsel %vm14163_vm4, %v8161_v24, %v12344_v42  ;;  %vm14167_vm12 = vmmov %vm14165_vm10  ;;  %vm14168_vm5 = vcmask 1022976  }
 0x606   :  { %v8248_v1 = vpack.i.bf16 %v4446_v11, %v12241_v48  ;;  %v6789_v14 = vpack.c.bf16 %v4446_v11, %v12241_v48  ;;  %v8165_v34 = vpop.permute.xlu0 %8164  ;;  %v6837_v50 = vpack.c.bf16 %v12369_v40, %v12249_v5  ;;  %v6835_v48 = vpack.c.bf16 %v12375_v37, %v12278_v7  ;;  %vm14169_vm4 = vmmov %vm14168_vm5 }
 0x607   :  { %v8167_v0 = vunpack.i.h.bf16 %v8165_v34  ;;  %v8166_v19 = vunpack.i.l.bf16 %v8165_v34  ;;  %vm14170_vm14 = vmmov %vm14169_vm4 }
 0x608   :  { %8249 = vrot.lane.b32.xlu0 %v8248_v1, %s8423_s12  ;;  %6790 = vmatpush1.bf16.msra.mxu1 %v6789_v14  ;;  %v8116_v1 = vunpack.i.l.bf16 %v12346_v52 }
 0x609   :  { %v12393_v22 = vpop.permute.xlu1 %4482  ;;  %6792 = vmatprep.subr.bf16.mxu1 %v6791_v35  ;;  %6836 = vmatprep.subr.bf16.mxu0 %v6835_v48  ;;  %v4465_v45 = vsel %vm14165_vm10, %v8167_v0, %v8101_v28  ;;  %v4467_v31 = vsel %vm14167_vm12, %v8102_v17, %v8166_v19  ;;  %v12421_v55 = vsel %vm14165_vm10, %v8166_v19, %v12348_v54  ;;  %vm4542_vm12 = vcmask 973824  }
 0x60a   :  { %v8170_v16 = vpop.permute.xlu0 %8169  ;;  %6838 = vmatpush1.bf16.msra.mxu0 %v6837_v50  ;;  %v8303_v48 = vpack.i.bf16 %v12264_v58, %v12278_v7  ;;  %vm14173_vm10 = vcmask 1014784  }
 0x60b   :  { %v8172_v26 = vunpack.i.h.bf16 %v8170_v16  ;;  %v8171_v5 = vunpack.i.l.bf16 %v8170_v16  ;;  %vm14175_vm8 = vmmov %vm14173_vm10 }
 0x60c   :  { %vm14176_vm3 = vmmov %vm14175_vm8 }
 0x60d   :  { %v4484_v33 = vsel %vm14168_vm5, %v8172_v26, %v8106_v38  ;;  %v4486_v43 = vsel %vm14169_vm4, %v8107_v18, %v8171_v5  ;;  %v12411_v27 = vpop.permute.xlu1 %4735  ;;  %v12415_v6 = vsel %vm14170_vm14, %v8171_v5, %v12393_v22  ;;  %v6795_v18 = vpack.c.bf16 %v12401_v56, %v4504_v41 }
 0x60e   :  { %v8253_v60 = vpack.i.bf16 %v4484_v33, %v4465_v45  ;;  %v6793_v39 = vpack.c.bf16 %v4484_v33, %v4465_v45  ;;  %v6841_v57 = vpack.c.bf16 %v4486_v43, %v4467_v31  ;;  %v12417_v28 = vpop.permute.xlu0 %8174  ;;  %v6839_v38 = vpack.c.bf16 %v12415_v6, %v12421_v55 }
 0x60f   :  { %v8177_v17 = vunpack.i.h.bf16 %v12417_v28  ;;  %v8121_v45 = vunpack.i.l.bf16 %v12350_v3  ;;  %v8126_v41 = vunpack.i.l.bf16 %v12354_v2  ;;  %vm4562_vm5 = vcmask 965632  }
 0x610   :  { %8254 = vrot.lane.b32.xlu0 %v8253_v60, %s8423_s12  ;;  %6794 = vmatpush1.bf16.msra.mxu1 %v6793_v39  ;;  %vm4640_vm4 = vcmask 908288   ;;  %vm4660_vm14 = vcmask 900096  }
 0x611   :  { %v12428_v62 = vpop.permute.xlu1 %4560  ;;  %6840 = vmatprep.subr.bf16.mxu0 %v6839_v38  ;;  %6796 = vmatprep.subr.bf16.mxu1 %v6795_v18  ;;  %v12437_v34 = vsel %vm4522_vm2, %v8177_v17, %v8111_v12  ;;  %v12456_v12 = vsel %vm4582_vm0, %v12323_v25, %v12325_v51  ;;  %v8268_v25 = vpack.i.bf16 %v12369_v40, %v12334_v20  ;;  %v13531_v17 = vunpack.i.l.bf16 %v12417_v28 }
 0x612   :  { %6842 = vmatpush1.bf16.msra.mxu0 %v6841_v57  ;;  %v12432_v11 = vpop.permute.xlu0 %8179  ;;  %v8278_v20 = vpack.i.bf16 %v4486_v43, %v12365_v4 }
 0x613   :  { %v8182_v14 = vunpack.i.h.bf16 %v12432_v11 }
 0x615   :  { %v4738_v50 = vsel %vm4737_vm11, %v8182_v14, %v8116_v1  ;;  %v12440_v35 = vpop.permute.xlu1 %4501  ;;  %v13532_v14 = vunpack.i.l.bf16 %v12432_v11 }
 0x616   :  { %v8258_v0 = vpack.i.bf16 %v12437_v34, %v4738_v50  ;;  %v12445_v19 = vpop.permute.xlu0 %8184  ;;  %v8117_v50 = vunpack.i.h.bf16 %v12346_v52 }
 0x617   :  { %v8187_v16 = vunpack.i.h.bf16 %v12445_v19  ;;  %v13529_v52 = vunpack.i.l.bf16 %v12445_v19 }
 0x618   :  { %8259 = vrot.lane.b32.xlu1 %v8258_v0, %s8423_s12  ;;  %v4739_v4 = vsel %vm4737_vm11, %v8116_v1, %v8117_v50 }
 0x619   :  { %v12449_v26 = vpop.permute.xlu1 %8199  ;;  %v12464_v60 = vsel %vm4542_vm12, %v8187_v16, %v8121_v45  ;;  %v8273_v16 = vpack.i.bf16 %v4467_v31, %v12380_v36  ;;  %v8122_v36 = vunpack.i.h.bf16 %v12350_v3  ;;  %v12536_v3 = vld [vmem:[%s13337_s4 + $0x8] sm:$0xff] }
 0x61a   :  { %v12451_v5 = vpop.permute.xlu0 %8189  ;;  %5958 = vmatprep.mubr.msk.f32.mxu1 %vm4355_vm7, %v12536_v3  ;;  %5959 = vmatprep.mubr.msk.f32.mxu0 %vm4355_vm7, %v12536_v3 }
 0x61b   :  { %v8192_v33 = vunpack.i.h.bf16 %v12451_v5  ;;  %v4544_v2 = vsel %vm4542_vm12, %v8121_v45, %v8122_v36  ;;  %v13535_v45 = vunpack.i.h.bf16 %v12336_v32 }
 0x61c   :  { %4824 = vrot.lane.b32.xlu1 %v12456_v12, %s8423_s12 }
 0x61d   :  { %v12467_v39 = vsel %vm4562_vm5, %v8192_v33, %v8126_v41  ;;  %v12469_v57 = vpop.permute.xlu1 %4600  ;;  %v12493_v33 = vsel %vm4522_vm2, %v8112_v9, %v13531_v17 }
 0x61e   :  { %v8263_v38 = vpack.i.bf16 %v12467_v39, %v12464_v60  ;;  %v12475_v18 = vpop.permute.xlu0 %8194  ;;  %v8288_v31 = vpack.i.bf16 %v12493_v33, %v12401_v56  ;;  %v4564_v56 = vsel %vm4562_vm5, %v8126_v41, %v8127_v8  ;;  %v13536_v41 = vunpack.i.l.bf16 %v12336_v32 }
 0x61f   :  { %v6799_v7 = vpack.c.bf16 %v4564_v56, %v4544_v2 }
 0x620   :  { %8264 = vrot.lane.b32.xlu0 %v8263_v38, %s8423_s12  ;;  %8269 = vrot.lane.b32.xlu1 %v8268_v25, %s8423_s12  ;;  %v4740_v25 = vsel %vm4737_vm11, %v8117_v50, %v13532_v14  ;;  %v13530_v38 = vunpack.i.l.bf16 %v12451_v5  ;;  %v12574_v17 = vsel %vm4640_vm4, %v13536_v41, %v13535_v45  ;;  %v14171_v45 = vunpack.i.l.bf16 %v12362_v23 }
 0x621   :  { %v12482_v0 = vpop.permute.xlu1 %4578  ;;  %v8283_v43 = vpack.i.bf16 %v4740_v25, %v4739_v4 }
 0x622   :  { %v12486_v40 = vpop.permute.xlu0 %8204  ;;  %v12519_v1 = vsel %vm4562_vm5, %v8127_v8, %v13530_v38  ;;  %v13540_v8 = vunpack.i.h.bf16 %v12358_v44  ;;  %v12561_v63 = vsel %vm4582_vm0, %v12325_v51, %v12482_v0 }
 0x623   :  { %v8298_v25 = vpack.i.bf16 %v12519_v1, %v4564_v56 }
 0x624   :  { %8274 = vrot.lane.b32.xlu0 %v8273_v16, %s8423_s12  ;;  %8279 = vrot.lane.b32.xlu1 %v8278_v20, %s8423_s12  ;;  %v12514_v16 = vsel %vm4542_vm12, %v8122_v36, %v13529_v52  ;;  %v8308_v52 = vpack.i.bf16 %v12344_v42, %v12375_v37  ;;  %v14172_v37 = vunpack.i.l.bf16 %v12331_v47 }
 0x625   :  { %v12505_v9 = vpop.permute.xlu1 %4619  ;;  %v8293_v20 = vpack.i.bf16 %v12514_v16, %v4544_v2 }
 0x626   :  { %v12509_v24 = vpop.permute.xlu0 %4638 }
 0x628   :  { %8289 = vrot.lane.b32.xlu0 %v8288_v31, %s8423_s12  ;;  %8284 = vrot.lane.b32.xlu1 %v8283_v43, %s8423_s12  ;;  %v8136_v43 = vunpack.i.l.bf16 %v12358_v44 }
 0x629   :  { %v12527_v50 = vpop.permute.xlu1 %4678 }
 0x62a   :  { %v12531_v4 = vpop.permute.xlu0 %4658 }
 0x62c   :  { %8294 = vrot.lane.b32.xlu0 %v8293_v20, %s8423_s12  ;;  %8299 = vrot.lane.b32.xlu1 %v8298_v25, %s8423_s12  ;;  %v13539_v20 = vunpack.i.h.bf16 %v12362_v23  ;;  %v4603_v25 = vsel %vm4361_vm1, %v8136_v43, %v13540_v8 }
 0x62d   :  { %v12548_v36 = vpop.permute.xlu1 %4697 }
 0x62e   :  { %v12552_v31 = vpop.permute.xlu0 %4716  ;;  %v12588_v41 = vsel %vm4026_vm6, %v14171_v45, %v13539_v20  ;;  %v8313_v45 = vpack.i.bf16 %v12348_v54, %v12421_v55  ;;  %v14177_v20 = vunpack.i.l.bf16 %v12432_v11  ;;  %v14179_v55 = vunpack.i.l.bf16 %v12451_v5 }
 0x62f   :  { %v14183_v5 = vunpack.i.l.bf16 %v12445_v19 }
 0x630   :  { %4826 = vrot.lane.b32.xlu0 %v12561_v63, %s8423_s12  ;;  %8304 = vrot.lane.b32.xlu1 %v8303_v48, %s8423_s12  ;;  %v14174_v48 = vunpack.i.h.bf16 %v12331_v47  ;;  %v12620_v11 = vsel %vm4562_vm5, %v14179_v55, %v12428_v62 }
 0x631   :  { %v8210_v38 = vpop.permute.xlu1 %8209 }
 0x632   :  { %v8212_v14 = vunpack.i.h.bf16 %v8210_v38  ;;  %v8211_v59 = vunpack.i.l.bf16 %v8210_v38  ;;  %v8215_v30 = vpop.permute.xlu0 %8214 }
 0x633   :  { %v8216_v51 = vunpack.i.l.bf16 %v8215_v30 }
 0x634   :  { %v4503_v38 = vsel %vm14173_vm10, %v8211_v59, %v14172_v37  ;;  %v4505_v2 = vsel %vm14175_vm8, %v14174_v48, %v8212_v14  ;;  %8309 = vrot.lane.b32.xlu0 %v8308_v52, %s8423_s12  ;;  %4822 = vrot.lane.b32.xlu1 %v12329_v61, %s8423_s12  ;;  %v4506_v56 = vsel %vm14176_vm3, %v8212_v14, %v12440_v35  ;;  %v14178_v52 = vunpack.i.l.bf16 %v12417_v28 }
 0x635   :  { %v4741_v59 = vsel %vm4737_vm11, %v14177_v20, %v12411_v27  ;;  %v6797_v47 = vpack.c.bf16 %v12437_v34, %v4503_v38  ;;  %v12609_v37 = vpop.permute.xlu1 %8219  ;;  %v6845_v8 = vpack.c.bf16 %v12493_v33, %v4505_v2  ;;  %v8217_v14 = vunpack.i.h.bf16 %v8215_v30 }
 0x636   :  { %v4526_v48 = vsel %vm4522_vm2, %v14178_v52, %v12352_v15  ;;  %v8225_v29 = vpop.permute.xlu0 %8224  ;;  %v8318_v34 = vpack.i.bf16 %v12393_v22, %v12415_v6  ;;  %v6803_v28 = vpack.c.bf16 %v4603_v25, %v12456_v12  ;;  %v14180_v38 = vunpack.i.h.bf16 %v12340_v53 }
 0x637   :  { %6798 = vmatpush1.bf16.msra.mxu1 %v6797_v47  ;;  %v6843_v20 = vpack.c.bf16 %v4526_v48, %v4506_v56  ;;  %v14181_v33 = vunpack.i.l.bf16 %v12340_v53  ;;  %vm14182_vm3 = vcmask 891904   ;;  %v4546_v2 = vsel %vm4542_vm12, %v14183_v5, %v12356_v46 }
 0x638   :  { %6800 = vmatprep.subr.bf16.mxu1 %v6799_v7  ;;  %8314 = vrot.lane.b32.xlu0 %v8313_v45, %s8423_s12  ;;  %v6807_v6 = vpack.c.bf16 %v12574_v17, %v12588_v41  ;;  %v14184_v12 = vunpack.i.h.bf16 %v12371_v49  ;;  %v14185_v25 = vunpack.i.l.bf16 %v12371_v49  ;;  %v8323_v47 = vpack.i.bf16 %v12411_v27, %v4741_v59  ;;  %vm14192_vm8 = vmmov %vm14182_vm3 }
 0x639   :  { %v12630_v30 = vsel %vm14182_vm3, %v14181_v33, %v14180_v38  ;;  %v6801_v7 = vpack.c.bf16 %v12467_v39, %v12464_v60  ;;  %6844 = vmatprep.subr.bf16.mxu0 %v6843_v20  ;;  %v6847_v19 = vpack.c.bf16 %v12620_v11, %v4546_v2  ;;  %8319 = vrot.lane.b32.xlu1 %v8318_v34, %s8423_s12  ;;  %v8227_v17 = vunpack.i.h.bf16 %v8225_v29  ;;  %v12657_v39 = vpop.permute.xlu1 %8229 }
 0x63a   :  { %v12644_v56 = vsel %vm4660_vm14, %v14185_v25, %v14184_v12  ;;  %v4602_v45 = vsel %vm4361_vm1, %v8216_v51, %v8136_v43  ;;  %v8226_v41 = vunpack.i.l.bf16 %v8225_v29  ;;  %6846 = vmatpush1.bf16.msra.mxu0 %v6845_v8  ;;  %v8235_v52 = vpop.permute.xlu0 %8234  ;;  %v4605_v55 = vsel %vm4361_vm1, %v8217_v14, %v12469_v57 }
 0x63b   :  { %v8202_v38 = vunpack.i.h.bf16 %v12449_v26  ;;  %v8221_v27 = vunpack.i.l.bf16 %v12609_v37  ;;  %v8328_v60 = vpack.i.bf16 %v12352_v15, %v4526_v48  ;;  %6848 = vmatprep.subr.bf16.mxu0 %v6847_v19  ;;  %6802 = vmatpush1.bf16.msra.mxu1 %v6801_v7  ;;  %v6811_v43 = vpack.c.bf16 %v12630_v30, %v12644_v56 }
 0x63c   :  { %v6849_v29 = vpack.c.bf16 %v12519_v1, %v12514_v16  ;;  %v4586_v8 = vsel %vm4582_vm0, %v12482_v0, %v12360_v10  ;;  %v14186_v51 = vunpack.i.h.bf16 %v12358_v44  ;;  %v8222_v48 = vunpack.i.h.bf16 %v12609_v37  ;;  %6804 = vmatprep.subr.bf16.mxu1 %v6803_v28  ;;  %8324 = vrot.lane.b32.xlu0 %v8323_v47, %s8423_s12 }
 0x63d   :  { %v8197_v34 = vunpack.i.h.bf16 %v12475_v18  ;;  %v6805_v20 = vpack.c.bf16 %v4602_v45, %v12329_v61  ;;  %v8333_v33 = vpack.i.bf16 %v12356_v46, %v4546_v2  ;;  %v6851_v16 = vpack.c.bf16 %v4605_v55, %v4586_v8  ;;  %8329 = vrot.lane.b32.xlu1 %v8328_v60, %s8423_s12 }
 0x63e   :  { %v4604_v59 = vsel %vm4361_vm1, %v14186_v51, %v8217_v14  ;;  %v14187_v0 = vunpack.i.l.bf16 %v12336_v32  ;;  %v8237_v1 = vunpack.i.h.bf16 %v8235_v52  ;;  %v8236_v14 = vunpack.i.l.bf16 %v8235_v52  ;;  %6850 = vmatpush1.bf16.msra.mxu0 %v6849_v29  ;;  %v8240_v12 = vpop.permute.xlu0 %8239  ;;  %vm14193_vm1 = vmmov %vm14182_vm3 }
 0x63f   :  { %v4644_v37 = vsel %vm4640_vm4, %v8227_v17, %v12509_v24  ;;  %v8196_v28 = vunpack.i.l.bf16 %v12475_v18  ;;  %v6853_v30 = vpack.c.bf16 %v4604_v59, %v12561_v63  ;;  %v14188_v61 = vunpack.i.l.bf16 %v12362_v23  ;;  %6852 = vmatprep.subr.bf16.mxu0 %v6851_v16  ;;  %6806 = vmatpush1.bf16.msra.mxu1 %v6805_v20 }
 0x640   :  { %v4641_v44 = vsel %vm4640_vm4, %v8226_v41, %v14187_v0  ;;  %v8338_v2 = vpack.i.bf16 %v12428_v62, %v12620_v11  ;;  %v14189_v25 = vunpack.i.h.bf16 %v12336_v32  ;;  %v8232_v47 = vunpack.i.h.bf16 %v12657_v39  ;;  %6808 = vmatprep.subr.bf16.mxu1 %v6807_v6  ;;  %8334 = vrot.lane.b32.xlu0 %v8333_v33, %s8423_s12  ;;  %v8245_v32 = vpop.permute.xlu1 %8244 }
 0x641   :  { %v4621_v5 = vsel %vm4026_vm6, %v8221_v27, %v14188_v61  ;;  %v8231_v18 = vunpack.i.l.bf16 %v12657_v39  ;;  %v4624_v63 = vsel %vm4026_vm6, %v8222_v48, %v12505_v9  ;;  %v8201_v7 = vunpack.i.l.bf16 %v12449_v26 }
 0x642   :  { %v4643_v56 = vsel %vm4640_vm4, %v14189_v25, %v8227_v17  ;;  %v14190_v11 = vunpack.i.h.bf16 %v12362_v23  ;;  %v6809_v45 = vpack.c.bf16 %v4641_v44, %v4621_v5  ;;  %v6855_v41 = vpack.c.bf16 %v4644_v37, %v4624_v63  ;;  %8339 = vrot.lane.b32.xlu1 %v8338_v2, %s8423_s12  ;;  %6854 = vmatpush1.bf16.msra.mxu0 %v6853_v30  ;;  %v4365_v25 = vld [vmem:[%s13338_s5] sm:$0xff] }
 0x643   :  { %v14191_v17 = vunpack.i.l.bf16 %v12340_v53  ;;  %v8242_v52 = vunpack.i.h.bf16 %v8240_v12  ;;  %v8241_v55 = vunpack.i.l.bf16 %v8240_v12  ;;  %v4683_v27 = vsel %vm14193_vm1, %v8237_v1, %v12527_v50 }
 0x644   :  { %v4623_v19 = vsel %vm4026_vm6, %v14190_v11, %v8222_v48  ;;  %6856 = vmatprep.subr.bf16.mxu0 %v6855_v41  ;;  %6810 = vmatpush1.bf16.msra.mxu1 %v6809_v45  ;;  %vm14194_vm0 = vcmask 883712   ;;  %v14195_v39 = vunpack.i.l.bf16 %v12371_v49  ;;  %v8247_v51 = vunpack.i.h.bf16 %v8245_v32  ;;  %vm14197_vm6 = vmmov %vm14193_vm1 }
 0x645   :  { %v4680_v6 = vsel %vm14192_vm8, %v8236_v14, %v14191_v17  ;;  %v6857_v60 = vpack.c.bf16 %v4643_v56, %v4623_v19  ;;  %v4700_v23 = vsel %vm14194_vm0, %v8196_v28, %v8197_v34  ;;  %v8246_v59 = vunpack.i.l.bf16 %v8245_v32  ;;  %6812 = vmatprep.subr.bf16.mxu1 %v6811_v43  ;;  %4828 = vrot.lane.b32.xlu0 %v4586_v8, %s8423_s12  ;;  %vm14198_vm11 = vmmov %vm14194_vm0 }
 0x646   :  { %v4661_v29 = vsel %vm4660_vm14, %v8231_v18, %v14195_v39  ;;  %v4664_v48 = vsel %vm4660_vm14, %v8232_v47, %v12531_v4  ;;  %v14196_v20 = vunpack.i.h.bf16 %v12340_v53  ;;  %4830 = vrot.lane.b32.xlu1 %v12360_v10, %s8423_s12  ;;  %v4719_v44 = vsel %vm954_vm15, %v8201_v7, %v8202_v38  ;;  %vm14199_vm5 = vmmov %vm14194_vm0 }
 0x647   :  { %v6813_v16 = vpack.c.bf16 %v4680_v6, %v4661_v29  ;;  %v6859_v0 = vpack.c.bf16 %v4683_v27, %v4664_v48  ;;  %v4699_v43 = vsel %vm14198_vm11, %v8241_v55, %v8196_v28  ;;  %6858 = vmatpush1.bf16.msra.mxu0 %v6857_v60  ;;  %v6815_v14 = vpack.c.bf16 %v4719_v44, %v4700_v23  ;;  %vm14201_vm4 = vmmov %vm14194_vm0 }
 0x648   :  { %v4682_v33 = vsel %vm14197_vm6, %v14196_v20, %v8237_v1  ;;  %v4702_v8 = vsel %vm14199_vm5, %v8242_v52, %v12548_v36  ;;  %v14200_v53 = vunpack.i.h.bf16 %v12371_v49  ;;  %v4718_v30 = vsel %vm954_vm15, %v8246_v59, %v8201_v7 }
 0x649   :  { %6860 = vmatprep.subr.bf16.mxu0 %v6859_v0  ;;  %6814 = vmatpush1.bf16.msra.mxu1 %v6813_v16  ;;  %v4721_v61 = vsel %vm954_vm15, %v8247_v51, %v12552_v31  ;;  %v4701_v28 = vsel %vm14201_vm4, %v8197_v34, %v8242_v52  ;;  %v6817_v5 = vpack.c.bf16 %v4718_v30, %v4699_v43  ;;  %v8207_v63 = vunpack.i.h.bf16 %v12486_v40 }
 0x64a   :  { %v4663_v1 = vsel %vm4660_vm14, %v14200_v53, %v8232_v47  ;;  %6816 = vmatprep.subr.bf16.mxu1 %v6815_v14  ;;  %v6863_v2 = vpack.c.bf16 %v4721_v61, %v4702_v8  ;;  %v4720_v49 = vsel %vm954_vm15, %v8202_v38, %v8247_v51  ;;  %4916 = vperm.xlu0 %8343, %v4365_v25   ;;  %v8206_v26 = vunpack.i.l.bf16 %v12486_v40 }
 0x64b   :  { %v6861_v37 = vpack.c.bf16 %v4682_v33, %v4663_v1  ;;  %v6865_v12 = vpack.c.bf16 %v4720_v49, %v4701_v28  ;;  %vm4832_vm15 = vcmask 842752  }
 0x64c   :  { %v4834_v6 = vsel %vm4832_vm15, %v8206_v26, %v8207_v63 }
 0x64d   :  { %6862 = vmatpush1.bf16.msra.mxu0 %v6861_v37  ;;  %6818 = vmatpush1.bf16.msra.mxu1 %v6817_v5 }
 0x64e   :  { %6864 = vmatprep.subr.bf16.mxu0 %v6863_v2 }
 0x651   :  { %6866 = vmatpush1.bf16.msra.mxu0 %v6865_v12 }
 0x67a   :  { %v8250_v56 = vpop.permute.xlu0 %8249 }
 0x67b   :  { %v8251_v7 = vunpack.i.l.bf16 %v8250_v56  ;;  %v8252_v19 = vunpack.i.h.bf16 %v8250_v56 }
 0x67d   :  { %v4833_v41 = vsel %vm4832_vm15, %v8251_v7, %v8206_v26 }
 0x682   :  { %v8255_v18 = vpop.permute.xlu0 %8254 }
 0x683   :  { %v8257_v55 = vunpack.i.h.bf16 %v8255_v18  ;;  %v8256_v27 = vunpack.i.l.bf16 %v8255_v18 }
 0x68a   :  { %v8260_v47 = vpop.permute.xlu1 %8259 }
 0x68b   :  { %v8262_v43 = vunpack.i.h.bf16 %v8260_v47  ;;  %v8261_v14 = vunpack.i.l.bf16 %v8260_v47 }
 0x68e   :  { %v12736_v34 = vpop.permute.xlu1 %4824 }
 0x692   :  { %v8265_v38 = vpop.permute.xlu0 %8264  ;;  %v12740_v11 = vpop.permute.xlu1 %8269 }
 0x693   :  { %v8272_v45 = vunpack.i.h.bf16 %v12740_v11  ;;  %v8271_v32 = vunpack.i.l.bf16 %v12740_v11  ;;  %v8267_v56 = vunpack.i.h.bf16 %v8265_v38  ;;  %v8266_v47 = vunpack.i.l.bf16 %v8265_v38 }
 0x695   :  { %v4837_v17 = vsel %vm4832_vm15, %v8252_v19, %v8271_v32  ;;  %v4838_v52 = vsel %vm4832_vm15, %v8271_v32, %v8272_v45 }
 0x696   :  { %v6821_v60 = vpack.c.bf16 %v4837_v17, %v4833_v41  ;;  %v12752_v23 = vpop.permute.xlu0 %8274  ;;  %v12754_v39 = vpop.permute.xlu1 %8279  ;;  %v6819_v29 = vpack.c.bf16 %v4838_v52, %v4834_v6 }
 0x697   :  { %v8277_v51 = vunpack.i.h.bf16 %v12752_v23  ;;  %v8276_v59 = vunpack.i.l.bf16 %v12752_v23  ;;  %v8282_v48 = vunpack.i.h.bf16 %v12754_v39  ;;  %v8281_v20 = vunpack.i.l.bf16 %v12754_v39 }
 0x698   :  { %6820 = vmatprep.subr.bf16.mxu1 %v6819_v29 }
 0x699   :  { %v4841_v33 = vsel %vm4832_vm15, %v8256_v27, %v8276_v59  ;;  %v4845_v16 = vsel %vm4832_vm15, %v8257_v55, %v8281_v20  ;;  %6822 = vmatpush1.bf16.msra.mxu1 %v6821_v60  ;;  %v4842_v0 = vsel %vm4832_vm15, %v8276_v59, %v8277_v51  ;;  %v4846_v44 = vsel %vm4832_vm15, %v8281_v20, %v8282_v48 }
 0x69a   :  { %v6825_v8 = vpack.c.bf16 %v4845_v16, %v4841_v33  ;;  %v12768_v53 = vpop.permute.xlu0 %8289  ;;  %v12770_v1 = vpop.permute.xlu1 %8284  ;;  %v6823_v37 = vpack.c.bf16 %v4846_v44, %v4842_v0 }
 0x69b   :  { %v8292_v30 = vunpack.i.h.bf16 %v12768_v53  ;;  %v8291_v61 = vunpack.i.l.bf16 %v12768_v53  ;;  %v8287_v28 = vunpack.i.h.bf16 %v12770_v1  ;;  %v8286_v5 = vunpack.i.l.bf16 %v12770_v1 }
 0x69c   :  { %6824 = vmatprep.subr.bf16.mxu1 %v6823_v37  ;;  %v14203_v1 = vpack.c.bf16 %v12352_v15, %v12440_v35 }
 0x69d   :  { %v4853_v2 = vsel %vm4832_vm15, %v8262_v43, %v8291_v61  ;;  %v4849_v49 = vsel %vm4832_vm15, %v8261_v14, %v8286_v5  ;;  %6826 = vmatpush1.bf16.msra.mxu1 %v6825_v8  ;;  %v4850_v12 = vsel %vm4832_vm15, %v8286_v5, %v8287_v28  ;;  %v4854_v25 = vsel %vm4832_vm15, %v8291_v61, %v8292_v30  ;;  %v12818_v61 = vld [vmem:[%s13337_s4] sm:$0xff] }
 0x69e   :  { %v6829_v18 = vpack.c.bf16 %v4853_v2, %v4849_v49  ;;  %v12784_v26 = vpop.permute.xlu0 %8294  ;;  %v12786_v7 = vpop.permute.xlu1 %8299  ;;  %v6827_v19 = vpack.c.bf16 %v4854_v25, %v4850_v12  ;;  %v6884_v5 = vpack.c.bf16 %v12344_v42, %v12264_v58 }
 0x69f   :  { %v8297_v32 = vunpack.i.h.bf16 %v12784_v26  ;;  %v8296_v41 = vunpack.i.l.bf16 %v12784_v26  ;;  %v8302_v17 = vunpack.i.h.bf16 %v12786_v7  ;;  %v8301_v6 = vunpack.i.l.bf16 %v12786_v7 }
 0x6a0   :  { %6828 = vmatprep.subr.bf16.mxu1 %v6827_v19 }
 0x6a1   :  { %v4857_v52 = vsel %vm4832_vm15, %v8266_v47, %v8296_v41  ;;  %v4861_v55 = vsel %vm4832_vm15, %v8267_v56, %v8301_v6  ;;  %6830 = vmatpush1.bf16.msra.mxu1 %v6829_v18  ;;  %v4858_v38 = vsel %vm4832_vm15, %v8296_v41, %v8297_v32  ;;  %v4862_v27 = vsel %vm4832_vm15, %v8301_v6, %v8302_v17 }
 0x6a2   :  { %v6833_v60 = vpack.c.bf16 %v4861_v55, %v4857_v52  ;;  %v12800_v29 = vpop.permute.xlu0 %4826  ;;  %v12802_v59 = vpop.permute.xlu1 %8304  ;;  %v6831_v20 = vpack.c.bf16 %v4862_v27, %v4858_v38 }
 0x6a3   :  { %v8307_v33 = vunpack.i.h.bf16 %v12802_v59  ;;  %v8306_v16 = vunpack.i.l.bf16 %v12802_v59  ;;  %v4866_v0 = vsel %vm4832_vm15, %v12736_v34, %v12800_v29  ;;  %v4367_v59 = vld [vmem:[%s13339_s6 + $0x8] sm:$0xff] }
 0x6a4   :  { %6832 = vmatprep.subr.bf16.mxu1 %v6831_v20 }
 0x6a5   :  { %6834 = vmatpush1.bf16.msra.mxu1 %v6833_v60  ;;  %v4835_v2 = vsel %vm4832_vm15, %v8207_v63, %v8306_v16 }
 0x6a6   :  { %v12809_v44 = vpop.permute.xlu0 %8309  ;;  %v4823_v43 = vpop.permute.xlu1 %4822  ;;  %4970 = vmatprep.subr.mxu1 %v4866_v0 }
 0x6a7   :  { %v8312_v14 = vunpack.i.h.bf16 %v12809_v44  ;;  %v8311_v8 = vunpack.i.l.bf16 %v12809_v44  ;;  %v4865_v37 = vsel %vm4832_vm15, %v4823_v43, %v12736_v34  ;;  %v4836_v34 = vsel %vm4832_vm15, %v8306_v16, %v8307_v33 }
 0x6a9   :  { %v4839_v49 = vsel %vm4832_vm15, %v8272_v45, %v8311_v8  ;;  %4971 = vmatpush1.msra.mxu1 %v4865_v37  ;;  %v4840_v12 = vsel %vm4832_vm15, %v8311_v8, %v8312_v14 }
 0x6aa   :  { %v6869_v25 = vpack.c.bf16 %v4839_v49, %v4835_v2  ;;  %v12834_v56 = vpop.permute.xlu0 %8314  ;;  %6883 = vmatprep.subr.bf16.mxu1 %v14137_v13  ;;  %4987 = vmatmul.mubr.f32.vlgmr.msra.gmra.mrb[20].mxu1 %v12818_v61  ;;  %v6867_v58 = vpack.c.bf16 %v4840_v12, %v4836_v34  ;;  %v14204_v12 = vpack.c.bf16 %v12428_v62, %v12356_v46 }
 0x6ab   :  { %v8317_v42 = vunpack.i.h.bf16 %v12834_v56  ;;  %v8316_v40 = vunpack.i.l.bf16 %v12834_v56  ;;  %v12840_v63 = vpop.permute.xlu1 %8319  ;;  %6885 = vmatpush1.bf16.msra.mxu1 %v6884_v5  ;;  %5960 = vmatprep.mubr.msk.f32.mxu1 %vm4355_vm7, %v12536_v3  ;;  %v14205_v46 = vpack.c.bf16 %v12509_v24, %v12505_v9  ;;  %v14207_v62 = vpack.c.bf16 %v12552_v31, %v12548_v36  ;;  %v4383_v31 = vld [vmem:[%s13339_s6 + $0x88] sm:$0xff] }
 0x6ac   :  { %v8322_v11 = vunpack.i.h.bf16 %v12840_v63  ;;  %v8321_v45 = vunpack.i.l.bf16 %v12840_v63  ;;  %6868 = vmatprep.subr.bf16.mxu0 %v6867_v58  ;;  %6886 = vmatprep.subr.bf16.mxu1 %v14137_v13  ;;  %v6908_v24 = vpack.c.bf16 %v8312_v14, %v8307_v33  ;;  %v4384_v33 = vld [vmem:[%s13339_s6 + $0x90] sm:$0xff]  ;;  %v4385_v14 = vld [vmem:[%s13339_s6 + $0x98] sm:$0xff]  ;;  %v4386_v58 = vld [vmem:[%s13339_s6 + $0xa0] sm:$0xff]  ;;  %vm14208_vm7 = vcmask 1039360  }
 0x6ad   :  { %v4843_v47 = vsel %vm4832_vm15, %v8277_v51, %v8316_v40  ;;  %6870 = vmatpush1.bf16.msra.mxu0 %v6869_v25  ;;  %v4844_v18 = vsel %vm4832_vm15, %v8316_v40, %v8317_v42  ;;  %v14202_v51 = vpack.c.bf16 %v12393_v22, %v12348_v54  ;;  %v4369_v25 = vld [vmem:[%s13339_s6 + $0x18] sm:$0xff]  ;;  %v6923_v56 = vpack.c.bf16 %v4385_v14, %v4384_v33  ;;  %vm14209_vm14 = vmmov %vm14208_vm7 }
 0x6ae   :  { %v4847_v3 = vsel %vm4832_vm15, %v8282_v48, %v8321_v45  ;;  %v8325_v19 = vpop.permute.xlu0 %8324  ;;  %v4848_v41 = vsel %vm4832_vm15, %v8321_v45, %v8322_v11  ;;  %v4371_v45 = vld [vmem:[%s13339_s6 + $0x28] sm:$0xff]  ;;  %vm14210_vm10 = vmmov %vm14208_vm7 }
 0x6af   :  { %v6873_v6 = vpack.c.bf16 %v4847_v3, %v4843_v47  ;;  %v8327_v52 = vunpack.i.h.bf16 %v8325_v19  ;;  %v8326_v55 = vunpack.i.l.bf16 %v8325_v19  ;;  %v8330_v23 = vpop.permute.xlu1 %8329  ;;  %6888 = vmatpush1.bf16.msra.mxu1 %v14202_v51  ;;  %v6871_v38 = vpack.c.bf16 %v4848_v41, %v4844_v18  ;;  %v4388_v47 = vld [vmem:[%s13339_s6 + $0xb0] sm:$0xff]  ;;  %v4389_v18 = vld [vmem:[%s13339_s6 + $0xb8] sm:$0xff]  ;;  %vm14211_vm3 = vmmov %vm14208_vm7 }
 0x6b0   :  { %v8332_v27 = vunpack.i.h.bf16 %v8330_v23  ;;  %v8331_v60 = vunpack.i.l.bf16 %v8330_v23  ;;  %6889 = vmatprep.subr.bf16.mxu1 %v14137_v13  ;;  %v6931_v19 = vpack.c.bf16 %v4389_v18, %v4388_v47  ;;  %v4372_v41 = vld [vmem:[%s13339_s6 + $0x30] sm:$0xff]  ;;  %v4391_v23 = vld [vmem:[%s13339_s6 + $0xc8] sm:$0xff] }
 0x6b1   :  { %v4851_v39 = vsel %vm4832_vm15, %v8287_v28, %v8326_v55  ;;  %6872 = vmatprep.subr.bf16.mxu0 %v6871_v38  ;;  %v4852_v48 = vsel %vm4832_vm15, %v8326_v55, %v8327_v52  ;;  %v4390_v55 = vld [vmem:[%s13339_s6 + $0xc0] sm:$0xff] }
 0x6b2   :  { %v4855_v20 = vsel %vm4832_vm15, %v8292_v30, %v8331_v60  ;;  %6874 = vmatpush1.bf16.msra.mxu0 %v6873_v6  ;;  %v8335_v16 = vpop.permute.xlu0 %8334  ;;  %v4856_v54 = vsel %vm4832_vm15, %v8331_v60, %v8332_v27  ;;  %v6914_v9 = vpack.c.bf16 %v8332_v27, %v8327_v52  ;;  %v4373_v6 = vld [vmem:[%s13339_s6 + $0x38] sm:$0xff] }
 0x6b3   :  { %v6877_v22 = vpack.c.bf16 %v4855_v20, %v4851_v39  ;;  %v8337_v0 = vunpack.i.h.bf16 %v8335_v16  ;;  %v8336_v43 = vunpack.i.l.bf16 %v8335_v16  ;;  %6891 = vmatpush1.bf16.msra.mxu1 %v14203_v1  ;;  %v6875_v28 = vpack.c.bf16 %v4856_v54, %v4852_v48  ;;  %v4374_v48 = vld [vmem:[%s13339_s6 + $0x40] sm:$0xff]  ;;  %v4375_v20 = vld [vmem:[%s13339_s6 + $0x48] sm:$0xff]  ;;  %v4392_v54 = vld [vmem:[%s13339_s6 + $0xd0] sm:$0xff] }
 0x6b4   :  { %v8340_v8 = vpop.permute.xlu1 %8339  ;;  %6892 = vmatprep.subr.bf16.mxu1 %v14137_v13  ;;  %v6933_v38 = vpack.c.bf16 %v4373_v6, %v4372_v41  ;;  %v6935_v39 = vpack.c.bf16 %v4391_v23, %v4390_v55  ;;  %v6937_v16 = vpack.c.bf16 %v4375_v20, %v4374_v48  ;;  %v4398_v55 = vld [vmem:[%s13339_s6 + $0x100] sm:$0xff]  ;;  %v4399_v23 = vld [vmem:[%s13339_s6 + $0x108] sm:$0xff] }
 0x6b5   :  { %v8342_v37 = vunpack.i.h.bf16 %v8340_v8  ;;  %v8341_v5 = vunpack.i.l.bf16 %v8340_v8  ;;  %v4859_v53 = vsel %vm4832_vm15, %v8297_v32, %v8336_v43  ;;  %6876 = vmatprep.subr.bf16.mxu0 %v6875_v28  ;;  %v4860_v30 = vsel %vm4832_vm15, %v8336_v43, %v8337_v0  ;;  %v4376_v43 = vld [vmem:[%s13339_s6 + $0x50] sm:$0xff]  ;;  %v4377_v8 = vld [vmem:[%s13339_s6 + $0x58] sm:$0xff]  ;;  %v4394_v28 = vld [vmem:[%s13339_s6 + $0xe0] sm:$0xff] }
 0x6b6   :  { %6878 = vmatpush1.bf16.msra.mxu0 %v6877_v22  ;;  %v6896_v32 = vpack.c.bf16 %v12469_v57, %v12360_v10  ;;  %v14206_v10 = vpack.c.bf16 %v12527_v50, %v12531_v4  ;;  %v6911_v57 = vpack.c.bf16 %v8322_v11, %v8317_v42  ;;  %v4382_v4 = vld [vmem:[%s13339_s6 + $0x80] sm:$0xff]  ;;  %v4387_v42 = vld [vmem:[%s13339_s6 + $0xa8] sm:$0xff]  ;;  %v4393_v22 = vld [vmem:[%s13339_s6 + $0xd8] sm:$0xff]  ;;  %v6941_v1 = vpack.c.bf16 %v4377_v8, %v4376_v43 }
 0x6b7   :  { %v4863_v2 = vsel %vm4832_vm15, %v8302_v17, %v8341_v5  ;;  %v4864_v15 = vsel %vm4832_vm15, %v8341_v5, %v8342_v37  ;;  %v4829_v49 = vpop.permute.xlu0 %4828  ;;  %6894 = vmatpush1.bf16.msra.mxu1 %v14204_v12  ;;  %v6917_v50 = vpack.c.bf16 %v8342_v37, %v8337_v0  ;;  %v6919_v36 = vpack.c.bf16 %v4383_v31, %v4382_v4  ;;  %v4370_v11 = vld [vmem:[%s13339_s6 + $0x20] sm:$0xff]  ;;  %v4395_v37 = vld [vmem:[%s13339_s6 + $0xe8] sm:$0xff]  ;;  %v4396_v12 = vld [vmem:[%s13339_s6 + $0xf0] sm:$0xff] }
 0x6b8   :  { %v6881_v35 = vpack.c.bf16 %v4863_v2, %v4859_v53  ;;  %v4831_v34 = vpop.permute.xlu1 %4830  ;;  %v6879_v26 = vpack.c.bf16 %v4864_v15, %v4860_v30  ;;  %6895 = vmatprep.subr.bf16.mxu1 %v14137_v13  ;;  %v4867_v17 = vsel %vm4832_vm15, %v12800_v29, %v4829_v49  ;;  %v4366_v29 = vld [vmem:[%s13339_s6] sm:$0xff]  ;;  %v6927_v63 = vpack.c.bf16 %v4387_v42, %v4386_v58  ;;  %v4379_v30 = vld [vmem:[%s13339_s6 + $0x68] sm:$0xff] }
 0x6b9   :  { %v4868_v7 = vsel %vm4832_vm15, %v4829_v49, %v4831_v34  ;;  %v6921_v44 = vpack.c.bf16 %v4367_v59, %v4366_v29  ;;  %v6929_v3 = vpack.c.bf16 %v4371_v45, %v4370_v11  ;;  %v6939_v0 = vpack.c.bf16 %v4393_v22, %v4392_v54  ;;  %v4378_v5 = vld [vmem:[%s13339_s6 + $0x60] sm:$0xff]  ;;  %v4400_v54 = vld [vmem:[%s13339_s6 + $0x110] sm:$0xff]  ;;  %v4401_v22 = vld [vmem:[%s13339_s6 + $0x118] sm:$0xff] }
 0x6ba   :  { %6880 = vmatprep.subr.bf16.mxu0 %v6879_v26  ;;  %v6943_v53 = vpack.c.bf16 %v4395_v37, %v4394_v28  ;;  %v6945_v2 = vpack.c.bf16 %v4379_v30, %v4378_v5  ;;  %v4397_v26 = vld [vmem:[%s13339_s6 + $0xf8] sm:$0xff]  ;;  %v6953_v48 = vpack.c.bf16 %v4399_v23, %v4398_v55  ;;  %v4419_v43 = vld [vmem:[%s13339_s6 + $0x1a8] sm:$0xff]  ;;  %v6957_v8 = vpack.c.bf16 %v4401_v22, %v4400_v54  ;;  %v4402_v28 = vld [vmem:[%s13339_s6 + $0x120] sm:$0xff] }
 0x6bb   :  { %6882 = vmatpush1.bf16.msra.mxu0 %v6881_v35  ;;  %6897 = vmatpush1.bf16.msra.mxu1 %v6896_v32  ;;  %v4403_v37 = vld [vmem:[%s13339_s6 + $0x128] sm:$0xff]  ;;  %v4420_v5 = vld [vmem:[%s13339_s6 + $0x1b0] sm:$0xff]  ;;  %v4430_v54 = vld [vmem:[%s13339_s6 + $0x200] sm:$0xff] }
 0x6bc   :  { %5041 = vmatprep.subr.mxu0 %v4868_v7  ;;  %6898 = vmatprep.subr.bf16.mxu1 %v14137_v13  ;;  %v6947_v7 = vpack.c.bf16 %v4397_v26, %v4396_v12  ;;  %v6961_v30 = vpack.c.bf16 %v4403_v37, %v4402_v28  ;;  %v4423_v12 = vld [vmem:[%s13339_s6 + $0x1c8] sm:$0xff]  ;;  %v5465_v28 = vld [vmem:[%s13340_s7] sm:$0xff] }
 0x6bd   :  { %v4431_v22 = vld [vmem:[%s13339_s6 + $0x208] sm:$0x7] }
 0x6bf   :  { %5042 = vmatpush1.msra.mxu0 %v4867_v17  ;;  %6900 = vmatpush1.bf16.msra.mxu1 %v14205_v46  ;;  %v4380_v17 = vld [vmem:[%s13339_s6 + $0x70] sm:$0xff]  ;;  %v4381_v46 = vld [vmem:[%s13339_s6 + $0x78] sm:$0xff] }
 0x6c0   :  { %5058 = vmatmul.mubr.f32.vlgmr.msra.gmra.mrb[26].mxu0 %v12818_v61  ;;  %6901 = vmatprep.subr.bf16.mxu1 %v14137_v13 }
 0x6c1   :  { %6920 = vmatprep.subr.bf16.mxu0 %v6919_v36 }
 0x6c2   :  { %6922 = vmatpush3.bf16.msra.mxu0 %v6921_v44 }
 0x6c3   :  { %6903 = vmatpush1.bf16.msra.mxu1 %v14206_v10  ;;  %6924 = vmatprep.subr.bf16.mxu0 %v6923_v56  ;;  %v6949_v10 = vpack.c.bf16 %v4381_v46, %v4380_v17  ;;  %v4406_v17 = vld [vmem:[%s13339_s6 + $0x140] sm:$0xff]  ;;  %v4407_v46 = vld [vmem:[%s13339_s6 + $0x148] sm:$0xff] }
 0x6c4   :  { %6904 = vmatprep.subr.bf16.mxu1 %v14137_v13 }
 0x6c7   :  { %6906 = vmatpush1.bf16.msra.mxu1 %v14207_v62  ;;  %v4414_v62 = vld [vmem:[%s13339_s6 + $0x180] sm:$0xff] }
 0x6c8   :  { %6907 = vmatprep.subr.bf16.mxu1 %v14137_v13 }
 0x6c9   :  { %v4917_v52 = vpop.permute.xlu0 %4916 }
 0x6cb   :  { %6909 = vmatpush1.bf16.msra.mxu1 %v6908_v24  ;;  %v4415_v24 = vld [vmem:[%s13339_s6 + $0x188] sm:$0xff] }
 0x6cc   :  { %6910 = vmatprep.subr.bf16.mxu1 %v14137_v13 }
 0x6cf   :  { %6912 = vmatpush1.bf16.msra.mxu1 %v6911_v57  ;;  %v6951_v57 = vpack.c.bf16 %v4415_v24, %v4414_v62  ;;  %v4425_v62 = vld [vmem:[%s13339_s6 + $0x1d8] sm:$0xff] }
 0x6d0   :  { %6913 = vmatprep.subr.bf16.mxu1 %v14137_v13 }
 0x6d3   :  { %6915 = vmatpush1.bf16.msra.mxu1 %v6914_v9 }
 0x6d4   :  { %6916 = vmatprep.subr.bf16.mxu1 %v14137_v13 }
 0x6d7   :  { %6918 = vmatpush1.bf16.msra.mxu1 %v6917_v50 }
 0x6d8   :  { %5112 = vmatprep.subr.mxu1 %v13807_v21 }
 0x6db   :  { %5113 = vmatpush1.msra.mxu1 %v4831_v34 }
 0x6dc   :  { %5129 = vmatmul.mubr.f32.vlgmr.msra.gmra.mrb[22].mxu1 %v12818_v61  ;;  %v4368_v61 = vld [vmem:[%s13339_s6 + $0x10] sm:$0xff] }
 0x6dd   :  { %5553 = vmatprep.mubr.f32.mxu1 %v13807_v21  ;;  %v6925_v40 = vpack.c.bf16 %v4369_v25, %v4368_v61 }
 0x6df   :  { %6926 = vmatpush3.bf16.msra.mxu0 %v6925_v40 }
 0x6e0   :  { %6928 = vmatprep.subr.bf16.mxu0 %v6927_v63 }
 0x6e3   :  { %6930 = vmatpush3.bf16.msra.mxu0 %v6929_v3 }
 0x6e4   :  { %6932 = vmatprep.subr.bf16.mxu0 %v6931_v19 }
 0x6e7   :  { %6934 = vmatpush3.bf16.msra.mxu0 %v6933_v38  ;;  %v4416_v38 = vld [vmem:[%s13339_s6 + $0x190] sm:$0xff] }
 0x6e8   :  { %6936 = vmatprep.subr.bf16.mxu0 %v6935_v39 }
 0x6eb   :  { %6938 = vmatpush3.bf16.msra.mxu0 %v6937_v16 }
 0x6ec   :  { %6940 = vmatprep.subr.bf16.mxu0 %v6939_v0  ;;  %v4418_v0 = vld [vmem:[%s13339_s6 + $0x1a0] sm:$0xff] }
 0x6ef   :  { %6942 = vmatpush3.bf16.msra.mxu0 %v6941_v1  ;;  %v6959_v1 = vpack.c.bf16 %v4419_v43, %v4418_v0 }
 0x6f0   :  { %6944 = vmatprep.subr.bf16.mxu0 %v6943_v53  ;;  %v4421_v53 = vld [vmem:[%s13339_s6 + $0x1b8] sm:$0xff] }
 0x6f3   :  { %6946 = vmatpush3.bf16.msra.mxu0 %v6945_v2  ;;  %v6963_v2 = vpack.c.bf16 %v4421_v53, %v4420_v5 }
 0x6f4   :  { %6948 = vmatprep.subr.bf16.mxu0 %v6947_v7 }
 0x6f7   :  { %6950 = vmatpush3.bf16.msra.mxu0 %v6949_v10  ;;  %v4424_v10 = vld [vmem:[%s13339_s6 + $0x1d0] sm:$0xff] }
 0x6f8   :  { %6952 = vmatprep.subr.bf16.mxu0 %v6951_v57  ;;  %v6969_v57 = vpack.c.bf16 %v4407_v46, %v4406_v17  ;;  %v5470_v17 = vld [vmem:[%s13340_s7 + $0x28] sm:$0xff] }
 0x77d   :  { %v4988_v51 = vpop.f32.mrb[20].mxu1 }
 0x77e   :  { %v4990_v27 = vpop.f32.mrb[21].mxu1  ;;  %v12974_v60 = vadd.f32 %v4988_v51, %v4917_v52 }
 0x77f   :  { %v4991_v35 = vadd.f32 %v4990_v27, %v4917_v52  ;;  %v4417_v27 = vld [vmem:[%s13339_s6 + $0x198] sm:$0xff] }
 0x780   :  { %5139 = vrot.lane.b32.xlu1 %v12974_v60, %s8385_s1  ;;  %v6955_v16 = vpack.c.bf16 %v4417_v27, %v4416_v38  ;;  %v4412_v27 = vld [vmem:[%s13339_s6 + $0x170] sm:$0xff] }
 0x793   :  { %v5059_v15 = vpop.f32.mrb[26].mxu0 }
 0x794   :  { %v13008_v49 = vadd.f32 %v5059_v15, %v4917_v52  ;;  %v5061_v34 = vpop.f32.mrb[27].mxu0  ;;  %v4404_v15 = vld [vmem:[%s13339_s6 + $0x130] sm:$0xff] }
 0x795   :  { %v13034_v9 = vadd.f32 %v5061_v34, %v4917_v52  ;;  %v4422_v34 = vld [vmem:[%s13339_s6 + $0x1c0] sm:$0xff] }
 0x796   :  { %v8349_v32 = vpack.i.bf16 %v13008_v49, %v4991_v35  ;;  %v6967_v7 = vpack.c.bf16 %v4423_v12, %v4422_v34 }
 0x798   :  { %8350 = vrot.lane.b32.xlu0 %v8349_v32, %s8418_s26  ;;  %8345 = vrot.lane.b32.xlu1 %v8349_v32, %s8385_s1 }
 0x79c   :  { %8355 = vrot.lane.b32.xlu0 %v8349_v32, %s8420_s29  ;;  %5163 = vrot.lane.b32.xlu1 %v12974_v60, %s8418_s26 }
 0x7a0   :  { %5145 = vrot.lane.b32.xlu0 %v13034_v9, %s8385_s1  ;;  %5187 = vrot.lane.b32.xlu1 %v12974_v60, %s8420_s29 }
 0x7a4   :  { %5169 = vrot.lane.b32.xlu0 %v13034_v9, %s8418_s26 }
 0x7a8   :  { %5193 = vrot.lane.b32.xlu0 %v13034_v9, %s8420_s29 }
 0x7af   :  { %v5130_v50 = vpop.f32.mrb[22].mxu1 }
 0x7b0   :  { %v13044_v4 = vadd.f32 %v5130_v50, %v4917_v52  ;;  %v5132_v31 = vpop.f32.mrb[23].mxu1 }
 0x7b1   :  { %v6971_v31 = vpack.c.bf16 %v4425_v62, %v4424_v10 }
 0x7b2   :  { %5147 = vrot.lane.b32.xlu1 %v13044_v4, %s8385_s1 }
 0x7b6   :  { %5171 = vrot.lane.b32.xlu1 %v13044_v4, %s8418_s26 }
 0x7ba   :  { %5195 = vrot.lane.b32.xlu1 %v13044_v4, %s8420_s29 }
 0x7f2   :  { %v5140_v36 = vpop.permute.xlu1 %5139 }
 0x80a   :  { %v13052_v29 = vpop.permute.xlu0 %8350  ;;  %v13054_v59 = vpop.permute.xlu1 %8345 }
 0x80b   :  { %v8353_v33 = vunpack.i.h.bf16 %v13052_v29  ;;  %v8352_v44 = vunpack.i.l.bf16 %v13052_v29  ;;  %v8348_v14 = vunpack.i.h.bf16 %v13054_v59  ;;  %v8347_v61 = vunpack.i.l.bf16 %v13054_v59  ;;  %v4413_v29 = vld [vmem:[%s13339_s6 + $0x178] sm:$0xff] }
 0x80d   :  { %v5150_v25 = vsel %vm14208_vm7, %v8347_v61, %v8348_v14  ;;  %v5149_v56 = vsel %vm14209_vm14, %v5140_v36, %v8347_v61  ;;  %v5174_v11 = vsel %vm4522_vm2, %v8352_v44, %v8353_v33  ;;  %v4408_v36 = vld [vmem:[%s13339_s6 + $0x150] sm:$0xff]  ;;  %v4426_v61 = vld [vmem:[%s13339_s6 + $0x1e0] sm:$0xff] }
 0x80e   :  { %v5159_v58 = vmax.f32 %v4991_v35, %v5150_v25  ;;  %v13064_v42 = vpop.permute.xlu0 %8355  ;;  %v5164_v40 = vpop.permute.xlu1 %5163  ;;  %v5158_v63 = vmax.f32 %v12974_v60, %v5149_v56  ;;  %v4405_v35 = vld [vmem:[%s13339_s6 + $0x138] sm:$0xff]  ;;  %v4427_v25 = vld [vmem:[%s13339_s6 + $0x1e8] sm:$0xff] }
 0x80f   :  { %v8358_v45 = vunpack.i.h.bf16 %v13064_v42  ;;  %v8357_v47 = vunpack.i.l.bf16 %v13064_v42  ;;  %v5173_v18 = vsel %vm4522_vm2, %v5164_v40, %v8352_v44  ;;  %v6965_v32 = vpack.c.bf16 %v4405_v35, %v4404_v15  ;;  %v4409_v44 = vld [vmem:[%s13339_s6 + $0x158] sm:$0xff] }
 0x810   :  { %v5183_v3 = vmax.f32 %v5159_v58, %v5174_v11  ;;  %v5182_v41 = vmax.f32 %v5158_v63, %v5173_v18  ;;  %v6973_v40 = vpack.c.bf16 %v4409_v44, %v4408_v36  ;;  %v6975_v11 = vpack.c.bf16 %v4427_v25, %v4426_v61  ;;  %v4411_v18 = vld [vmem:[%s13339_s6 + $0x168] sm:$0xff]  ;;  %v5814_v44 = vld [vmem:[%s13342_s9 + $0x80] sm:$0xff] }
 0x811   :  { %v5198_v19 = vsel %vm4542_vm12, %v8357_v47, %v8358_v45  ;;  %v5815_v61 = vld [vmem:[%s13342_s9 + $0x88] sm:$0xff] }
 0x812   :  { %v5188_v6 = vpop.permute.xlu1 %5187  ;;  %v5207_v52 = vmax.f32 %v5183_v3, %v5198_v19  ;;  %v5146_v26 = vpop.permute.xlu0 %5145 }
 0x813   :  { %v5197_v51 = vsel %vm4542_vm12, %v5188_v6, %v8357_v47  ;;  %v4410_v47 = vld [vmem:[%s13339_s6 + $0x160] sm:$0xff]  ;;  %v5151_v3 = vsel %vm14211_vm3, %v8348_v14, %v5146_v26  ;;  %v4429_v6 = vld [vmem:[%s13339_s6 + $0x1f8] sm:$0xff] }
 0x814   :  { %v5206_v60 = vmax.f32 %v5182_v41, %v5197_v51  ;;  %v5212_v39 = vmax.f32 %v5207_v52, 0.0  ;;  %v4428_v41 = vld [vmem:[%s13339_s6 + $0x1f0] sm:$0xff]  ;;  %v6977_v51 = vpack.c.bf16 %v4411_v18, %v4410_v47  ;;  %v5160_v14 = vmax.f32 %v13008_v49, %v5151_v3  ;;  %v5817_v18 = vld [vmem:[%s13342_s9 + $0x98] sm:$0xff] }
 0x815   :  { %v6979_v38 = vpack.c.bf16 %v4429_v6, %v4428_v41  ;;  %v6981_v49 = vpack.c.bf16 %v4413_v29, %v4412_v27  ;;  %v5816_v47 = vld [vmem:[%s13342_s9 + $0x90] sm:$0xff]  ;;  %v5801_v6 = vld [vmem:[%s13342_s9 + $0x18] sm:$0xff] }
 0x816   :  { %v5211_v20 = vmax.f32 %v5206_v60, 0.0  ;;  %5287 = vmatprep.mubr.f32.mxu0 %v5212_v39  ;;  %v5170_v50 = vpop.permute.xlu0 %5169  ;;  %v5800_v41 = vld [vmem:[%s13342_s9 + $0x10] sm:$0xff] }
 0x817   :  { %v5175_v55 = vsel %vm4522_vm2, %v8353_v33, %v5170_v50 }
 0x818   :  { %5288 = vmatmul.mubr.f32.vlgmr.msra.gmra.mrb[28].mxu0 %v5211_v20  ;;  %v5184_v39 = vmax.f32 %v5160_v14, %v5175_v55  ;;  %v5819_v55 = vld [vmem:[%s13342_s9 + $0xa8] sm:$0xff] }
 0x819   :  { %6954 = vmatpush3.bf16.msra.mxu0 %v6953_v48  ;;  %v5803_v14 = vld [vmem:[%s13342_s9 + $0x28] sm:$0xff] }
 0x81a   :  { %6956 = vmatprep.subr.bf16.mxu0 %v6955_v16  ;;  %v5194_v52 = vpop.permute.xlu0 %5193 }
 0x81b   :  { %v5199_v33 = vsel %vm4542_vm12, %v8358_v45, %v5194_v52  ;;  %v6984_v45 = vpack.c.bf16 %v4431_v22, %v4430_v54  ;;  %v5807_v54 = vld [vmem:[%s13342_s9 + $0x48] sm:$0xff]  ;;  %v5824_v22 = vld [vmem:[%s13342_s9 + $0xd0] sm:$0xff] }
 0x81c   :  { %v5208_v20 = vmax.f32 %v5184_v39, %v5199_v33  ;;  %v5804_v33 = vld [vmem:[%s13342_s9 + $0x30] sm:$0xff]  ;;  %v5822_v39 = vld [vmem:[%s13342_s9 + $0xc0] sm:$0xff] }
 0x81d   :  { %6958 = vmatpush3.bf16.msra.mxu0 %v6957_v8  ;;  %v5809_v8 = vld [vmem:[%s13342_s9 + $0x58] sm:$0xff] }
 0x81e   :  { %6960 = vmatprep.subr.bf16.mxu0 %v6959_v1  ;;  %v5213_v0 = vmax.f32 %v5208_v20, 0.0  ;;  %v5466_v1 = vld [vmem:[%s13340_s7 + $0x8] sm:$0xff] }
 0x81f   :  { %5489 = vmatprep.subr.mxu1 %v5466_v1  ;;  %v5827_v1 = vld [vmem:[%s13342_s9 + $0xe8] sm:$0xff] }
 0x820   :  { %5490 = vmatpush1.msra.mxu1 %v5465_v28 }
 0x821   :  { %6962 = vmatpush3.bf16.msra.mxu0 %v6961_v30 }
 0x822   :  { %6964 = vmatprep.subr.bf16.mxu0 %v6963_v2 }
 0x824   :  { %v5148_v24 = vpop.permute.xlu1 %5147 }
 0x825   :  { %6966 = vmatpush3.bf16.msra.mxu0 %v6965_v32  ;;  %v5152_v56 = vsel %vm14210_vm10, %v5146_v26, %v5148_v24  ;;  %v5162_v16 = vmax.f32 %v13044_v4, %v5148_v24  ;;  %v5467_v32 = vld [vmem:[%s13340_s7 + $0x10] sm:$0xff] }
 0x826   :  { %6968 = vmatprep.subr.bf16.mxu0 %v6967_v7  ;;  %v5161_v19 = vmax.f32 %v13034_v9, %v5152_v56  ;;  %v5471_v56 = vld [vmem:[%s13340_s7 + $0x30] sm:$0xff] }
 0x828   :  { %v5172_v58 = vpop.permute.xlu1 %5171 }
 0x829   :  { %6970 = vmatpush3.bf16.msra.mxu0 %v6969_v57  ;;  %v5176_v63 = vsel %vm4522_vm2, %v5170_v50, %v5172_v58  ;;  %v5186_v42 = vmax.f32 %v5162_v16, %v5172_v58  ;;  %vm5216_vm2 = vcmask 89088   ;;  %v5469_v57 = vld [vmem:[%s13340_s7 + $0x20] sm:$0xff]  ;;  %v5472_v50 = vld [vmem:[%s13340_s7 + $0x38] sm:$0xff]  ;;  %v6987_v58 = vpack.c.bf16 %v5815_v61, %v5814_v44 }
 0x82a   :  { %6972 = vmatprep.subr.bf16.mxu0 %v6971_v31  ;;  %v5185_v23 = vmax.f32 %v5161_v19, %v5176_v63  ;;  %v5798_v63 = vld [vmem:[%s13342_s9] sm:$0xff] }
 0x82b   :  { %v5806_v16 = vld [vmem:[%s13342_s9 + $0x40] sm:$0xff] }
 0x82c   :  { %v5196_v59 = vpop.permute.xlu1 %5195  ;;  %v5967_v44 = vld [vmem:[%s13343_s10] ss:$0 sm:$0xff] }
 0x82d   :  { %6974 = vmatpush3.bf16.msra.mxu0 %v6973_v40  ;;  %v5200_v9 = vsel %vm4542_vm12, %v5194_v52, %v5196_v59  ;;  %v5210_v43 = vmax.f32 %v5186_v42, %v5196_v59  ;;  %vm14214_vm12 = vcmask 1043456   ;;  %v5818_v52 = vld [vmem:[%s13342_s9 + $0xa0] sm:$0xff]  ;;  %v5825_v42 = vld [vmem:[%s13342_s9 + $0xd8] sm:$0xff] }
 0x82e   :  { %6976 = vmatprep.subr.bf16.mxu0 %v6975_v11  ;;  %v5209_v60 = vmax.f32 %v5185_v23, %v5200_v9  ;;  %v5799_v11 = vld [vmem:[%s13342_s9 + $0x8] sm:$0xff]  ;;  %v6993_v23 = vpack.c.bf16 %v5801_v6, %v5800_v41  ;;  %v6995_v59 = vpack.c.bf16 %v5819_v55, %v5818_v52  ;;  %v5820_v9 = vld [vmem:[%s13342_s9 + $0xb0] sm:$0xff] }
 0x82f   :  { %v5215_v4 = vmax.f32 %v5210_v43, 0.0  ;;  %v6989_v3 = vpack.c.bf16 %v5799_v11, %v5798_v63  ;;  %v5808_v43 = vld [vmem:[%s13342_s9 + $0x50] sm:$0xff] }
 0x830   :  { %v5214_v48 = vmax.f32 %v5209_v60, 0.0  ;;  %v5805_v60 = vld [vmem:[%s13342_s9 + $0x38] sm:$0xff]  ;;  %v7009_v28 = vpack.c.bf16 %v5809_v8, %v5808_v43 }
 0x831   :  { %6978 = vmatpush3.bf16.msra.mxu0 %v6977_v51  ;;  %v5802_v51 = vld [vmem:[%s13342_s9 + $0x20] sm:$0xff] }
 0x832   :  { %6980 = vmatprep.subr.bf16.mxu0 %v6979_v38  ;;  %5357 = vmatprep.mubr.f32.mxu0 %v5214_v48  ;;  %v5821_v38 = vld [vmem:[%s13342_s9 + $0xb8] sm:$0xff]  ;;  %v6997_v27 = vpack.c.bf16 %v5803_v14, %v5802_v51  ;;  %v5823_v48 = vld [vmem:[%s13342_s9 + $0xc8] sm:$0xff] }
 0x833   :  { %v6999_v29 = vpack.c.bf16 %v5821_v38, %v5820_v9  ;;  %v7003_v20 = vpack.c.bf16 %v5823_v48, %v5822_v39 }
 0x835   :  { %6982 = vmatpush3.bf16.msra.mxu0 %v6981_v49  ;;  %v7001_v49 = vpack.c.bf16 %v5805_v60, %v5804_v33 }
 0x836   :  { %6983 = vmatprep.subr.bf16.mxu0 %v14137_v13  ;;  %v5468_v13 = vld [vmem:[%s13340_s7 + $0x18] sm:$0xff] }
 0x837   :  { %5568 = vmatprep.subr.mxu1 %v5468_v13 }
 0x838   :  { %5358 = vmatmul.mubr.f32.vlgmr.msra.gmra.mrb[30].mxu0 %v5213_v0  ;;  %v7007_v0 = vpack.c.bf16 %v5825_v42, %v5824_v22 }
 0x839   :  { %6986 = vmatpush3.bf16.msk.msra.mxu0 %vm11651_vm13, %v6984_v45  ;;  %6422 = vmatprep.mubr.msk.f32.mxu0 %vm8406_vm9, %v13807_v21  ;;  %vm5485_vm13 = vcmask 64512   ;;  %vm14213_vm9 = vcmask 1041408   ;;  %v7005_v45 = vpack.c.bf16 %v5807_v54, %v5806_v16 }
 0x83c   :  { %6423 = vmatmul.mubr.msk.f32.vlgmr.msra.gmra.mrb[32].mxu0 %vm5216_vm2, %v5215_v4  ;;  %v5826_v4 = vld [vmem:[%s13342_s9 + $0xe0] sm:$0xff] }
 0x83d   :  { %v7011_v13 = vpack.c.bf16 %v5827_v1, %v5826_v4 }
 0x8eb   :  { %v6252_v37 = vpop.f32.mrb[28].mxu0 }
 0x8ec   :  { %v6253_v5 = vpop.f32.mrb[29].mxu0 }
 0x8ed   :  { %v6254_v53 = vadd.f32 %v6253_v5, %v6252_v37  ;;  %v5810_v37 = vld [vmem:[%s13342_s9 + $0x60] sm:$0xff]  ;;  %v5811_v5 = vld [vmem:[%s13342_s9 + $0x68] sm:$0xff] }
 0x90b   :  { %v6287_v30 = vpop.f32.mrb[30].mxu0 }
 0x90c   :  { %v6288_v2 = vpop.f32.mrb[31].mxu0 }
 0x90d   :  { %v6289_v15 = vadd.f32 %v6288_v2, %v6287_v30  ;;  %v5828_v30 = vld [vmem:[%s13342_s9 + $0xf0] sm:$0xff]  ;;  %v5829_v2 = vld [vmem:[%s13342_s9 + $0xf8] sm:$0xff] }
 0x90f   :  { %v5360_v35 = vadd.f32 %v6289_v15, %v6254_v53  ;;  %v5429_v34 = vpop.f32.mrb[32].mxu0  ;;  %v7013_v53 = vpack.c.bf16 %v5811_v5, %v5810_v37  ;;  %v5812_v15 = vld [vmem:[%s13342_s9 + $0x70] sm:$0xff] }
 0x910   :  { %v6424_v12 = vpop.f32.mrb[33].mxu0 }
 0x911   :  { %v5430_v26 = vadd.f32 %v5429_v34, %v5360_v35  ;;  %v7015_v35 = vpack.c.bf16 %v5829_v2, %v5828_v30  ;;  %v5813_v34 = vld [vmem:[%s13342_s9 + $0x78] sm:$0xff] }
 0x912   :  { %v7017_v12 = vpack.c.bf16 %v5813_v34, %v5812_v15 }
 0x913   :  { %5433 = vxpose.xlu0.b32.start.end [1/1] (short) (narrow) %v5430_v26, 24  ;;  %v5473_v26 = vld [vmem:[%s13341_s8] sm:$0x3] }
 0x993   :  { %v5449_v7 = vpop.trf.xlu0 }
 0x994   :  { %5963 = vmatmul.mubr.msk.f32.vlgmr.msra.gmra.mrb[24].mxu1 %vm5485_vm13, %v5449_v7  ;;  %v5563_v10 = vrot.slane %v5449_v7, 6 }
 0x995   :  { %5569 = vmatpush1.msra.mxu1 %v5467_v32  ;;  %5632 = vmatprep.mubr.f32.mxu1 %v13807_v21  ;;  %v14215_v32 = vld [vmem:[#allocation6_spill] sm:$0xff] }
 0x996   :  { %5647 = vmatprep.subr.mxu1 %v5470_v17  ;;  %v5478_v7 = vrot.slane %v5473_v26, %v14215_v32  ;;  %v14216_v17 = vld [vmem:[#allocation5_spill] sm:$0xff] }
 0x997   :  { %v5450_v46 = vpop.trf.xlu0 }
 0x998   :  { %v5564_v62 = vrot.slane %v5450_v46, 6  ;;  %v5642_v25 = vrot.slane %v5450_v46, 4  ;;  %v5482_v46 = vrot.slane %v5473_v26, %v14216_v17 }
 0x99a   :  { %v5565_v24 = vsel %vm14213_vm9, %v5563_v10, %v5564_v62 }
 0x99b   :  { %v5451_v31 = vpop.trf.xlu0 }
 0x99c   :  { %5964 = vmatmul.mubr.msk.f32.vlgmr.msra.gmra.mrb[24].mxu1 %vm5485_vm13, %v5565_v24  ;;  %v5643_v36 = vrot.slane %v5451_v31, 4  ;;  %v5720_v19 = vrot.slane %v5451_v31, 2 }
 0x99d   :  { %5648 = vmatpush1.msra.mxu1 %v5469_v57  ;;  %5711 = vmatprep.mubr.f32.mxu1 %v13807_v21 }
 0x99e   :  { %5723 = vmatprep.subr.mxu1 %v5472_v50  ;;  %v5644_v40 = vsel %vm14214_vm12, %v5642_v25, %v5643_v36 }
 0x9a4   :  { %5965 = vmatmul.mubr.msk.f32.vlgmr.msra.gmra.mrb[24].mxu1 %vm5485_vm13, %v5644_v40 }
 0x9a5   :  { %5724 = vmatpush1.msra.mxu1 %v5471_v56  ;;  %5787 = vmatprep.mubr.f32.mxu1 %v13807_v21  ;;  %v6991_v21 = vpack.c.bf16 %v5817_v18, %v5816_v47 }
 0x9a6   :  { %6988 = vmatprep.subr.bf16.mxu1 %v6987_v58 }
 0x9ac   :  { %5966 = vmatmul.mubr.msk.f32.vlgmr.msra.gmra.mrb[24].mxu1 %vm5485_vm13, %v5720_v19 }
 0x9ad   :  { %6990 = vmatpush3.bf16.msra.mxu1 %v6989_v3 }
 0x9ae   :  { %6992 = vmatprep.subr.bf16.mxu1 %v6991_v21 }
 0x9b1   :  { %6994 = vmatpush3.bf16.msra.mxu1 %v6993_v23 }
 0x9b2   :  { %6996 = vmatprep.subr.bf16.mxu1 %v6995_v59 }
 0x9b5   :  { %6998 = vmatpush3.bf16.msra.mxu1 %v6997_v27 }
 0x9b6   :  { %7000 = vmatprep.subr.bf16.mxu1 %v6999_v29 }
 0x9b9   :  { %7002 = vmatpush3.bf16.msra.mxu1 %v7001_v49 }
 0x9ba   :  { %7004 = vmatprep.subr.bf16.mxu1 %v7003_v20 }
 0x9bd   :  { %7006 = vmatpush3.bf16.msra.mxu1 %v7005_v45 }
 0x9be   :  { %7008 = vmatprep.subr.bf16.mxu1 %v7007_v0 }
 0x9c1   :  { %7010 = vmatpush3.bf16.msra.mxu1 %v7009_v28 }
 0x9c2   :  { %7012 = vmatprep.subr.bf16.mxu1 %v7011_v13 }
 0x9c5   :  { %7014 = vmatpush3.bf16.msra.mxu1 %v7013_v53 }
 0x9c6   :  { %7016 = vmatprep.subr.bf16.mxu1 %v7015_v35 }
 0x9c9   :  { %7018 = vmatpush3.bf16.msra.mxu1 %v7017_v12 }
 0xa7f   :  { %v5789_v10 = vpop.f32.mrb[24].mxu1 }
 0xa80   :  { %v7019_v62 = vadd.f32 %v5789_v10, %v5478_v7  ;;  %v5791_v24 = vpop.f32.mrb[25].mxu1 }
 0xa81   :  { %v7020_v57 = vadd.f32 %v5791_v24, %v5482_v46 }
 0xa82   :  { %v5796_v31 = vmax.f32 %v7019_v62, 0.0 }
 0xa83   :  { %v5797_v50 = vmax.f32 %v7020_v57, 0.0 }
 0xa85   :  { %5901 = vmatprep.mubr.f32.mxu1 %v5797_v50 }
 0xa86   :  { %5902 = vmatmul.mubr.f32.vlgmr.msra.gmra.mrb[26].mxu1 %v5796_v31 }
 0xb59   :  { %v6325_v36 = vpop.f32.mrb[26].mxu1 }
 0xb5a   :  { %v6326_v61 = vpop.f32.mrb[27].mxu1 }
 0xb5b   :  { %v6327_v25 = vadd.f32 %v6326_v61, %v6325_v36 }
 0xb5d   :  { %v5904_v56 = vadd.f32 %v6327_v25, %v5967_v44 }
 0xb5f   :  { %5907 = vst [vmem:[%s13344_s11] sm:$0x3f] %v5904_v56 }
 0xb60   :  { %5912 = vsyncpa [#allocation3], 1 }

</bundles_post_ra>
